<compile_context>
chip_gen: v7x
topology: tpu7x:2x2x1
jax: 0.10.0
libtpu: 0.0.40
codegen_flags: <defaults>
</compile_context>

<pallas_src>
import jax
import jax.numpy as jnp
from jax.experimental import pallas as pl
from jax.experimental.pallas import tpu as pltpu

PAD = 8      # spatial halo of the x scratch (covers the dilation-8 branch)
WHALO = 8    # W halo of the plat scratch (8 keeps its interior write aligned)
LANES = 128  # TPU lane width; final-stage weights are padded to this width


def _sksak_kernel(x_ref, e_ref,
                  wcomb_ref, bd_ref, alpha_ref,
                  wplat_ref, bplat_ref,
                  wx_ref, we_ref, wp_ref, bout_ref,
                  out_ref,
                  xpad_ref, dpad_ref):
    H, W, C = x_ref.shape
    F = out_ref.shape[0]          # out block is (F, H*W)  (lane-dense)
    HW = H * W
    f32 = jnp.float32

    # ---- zero only the halo rings of the padded scratch buffers ----------
    # Interiors are fully overwritten below.  The rings are re-zeroed every
    # grid step (perimeter only, cheap) so the kernel stays correct when the
    # "parallel" batch axis is split across TensorCores (per-core scratch).
    Wx = W + 2 * PAD
    xpad_ref[0:PAD, :, :] = jnp.zeros((PAD, Wx, C), f32)
    xpad_ref[PAD + H:, :, :] = jnp.zeros((PAD, Wx, C), f32)
    xpad_ref[PAD:PAD + H, 0:PAD, :] = jnp.zeros((H, PAD, C), f32)
    xpad_ref[PAD:PAD + H, PAD + W:, :] = jnp.zeros((H, PAD, C), f32)
    Wd = W + 2 * WHALO
    dpad_ref[0:1, :, :] = jnp.zeros((1, Wd, F), f32)
    dpad_ref[1 + H:, :, :] = jnp.zeros((1, Wd, F), f32)
    dpad_ref[1:1 + H, 0:WHALO, :] = jnp.zeros((H, WHALO, F), f32)
    dpad_ref[1:1 + H, WHALO + W:, :] = jnp.zeros((H, WHALO, F), f32)

    def accum_3x3(acc, src_ref, wsel, r, h0, w0):
        """Accumulate the 9 shifted-tap matmuls of one (dilated) 3x3 conv."""
        cin = src_ref.shape[-1]
        for kx in range(3):
            dx = (kx - 1) * r
            if dx % 8 == 0:
                # sublane-aligned W shift: read each tap directly.
                for ky in range(3):
                    dy = (ky - 1) * r
                    tap = src_ref[h0 + dy:h0 + dy + H,
                                  w0 + dx:w0 + dx + W, :].reshape(HW, cin)
                    acc = acc + jnp.dot(tap, wsel(ky, kx),
                                        preferred_element_type=f32)
            else:
                # misaligned W shift: realign once per (branch, kx) and only
                # slice the leading (untiled) H axis inside the ky loop.
                slab = src_ref[h0 - r:h0 + r + H, w0 + dx:w0 + dx + W, :]
                for ky in range(3):
                    tap = slab[ky * r:ky * r + H].reshape(HW, cin)
                    acc = acc + jnp.dot(tap, wsel(ky, kx),
                                        preferred_element_type=f32)
        return acc

    # ---- stage 1: four dilated 3x3 convs with feat2feat folded in --------
    xpad_ref[PAD:PAD + H, PAD:PAD + W, :] = x_ref[...]
    dcat = jnp.broadcast_to(bd_ref[...], (HW, F)).astype(f32)
    for bidx, r in enumerate((1, 2, 4, 8)):
        dcat = accum_3x3(dcat, xpad_ref,
                         lambda ky, kx, b=bidx: wcomb_ref[b, ky, kx],
                         r, PAD, PAD)

    # ---- stage 2: platlayer = PReLU then 3x3 conv (padding=1) ------------
    alpha = jnp.broadcast_to(alpha_ref[...], (HW, F))
    pre = jnp.where(dcat > 0, dcat, alpha * dcat)

    dpad_ref[1:1 + H, WHALO:WHALO + W, :] = pre.reshape(H, W, F)
    plat = jnp.broadcast_to(bplat_ref[...], (HW, F)).astype(f32)
    plat = accum_3x3(plat, dpad_ref, lambda ky, kx: wplat_ref[ky, kx],
                     1, 1, WHALO)

    # ---- stage 3: fused (feat2ch @ ch4feat) 1x1 on [x, edge, plat] --------
    # Weights are zero-padded to 128 output columns in the wrapper so the
    # accumulator is a full lane tile: tile-aligned transpose, then an
    # unmasked lane-dense (F, HW) store.
    xf = x_ref[...].reshape(HW, C)
    ef = e_ref[...].reshape(HW, C)
    out = jnp.broadcast_to(bout_ref[...], (HW, LANES)).astype(f32)
    out = out + jnp.dot(xf, wx_ref[...], preferred_element_type=f32)
    out = out + jnp.dot(ef, we_ref[...], preferred_element_type=f32)
    out = out + jnp.dot(plat, wp_ref[...], preferred_element_type=f32)

    out_ref[...] = jnp.transpose(out)[:F, :].astype(out_ref.dtype)


def fold_params(p):
    """Offline algebraic folding of the three 1x1 convs into their neighbours."""
    F = p['w1'].shape[3]
    ws = (p['w1'], p['w2'], p['w4'], p['w8'])
    bs = (p['b1'], p['b2'], p['b4'], p['b8'])
    # feat2feat (4F->F) folded into the four dilated 3x3 conv weights/biases.
    wcomb = jnp.stack([jnp.einsum('klcf,fg->klcg', w, p['wff'][i])
                       for i, w in enumerate(ws)], axis=0)          # (4,3,3,C,F)
    bd = p['bff'] + sum(b @ p['wff'][i] for i, b in enumerate(bs))  # (1,F)
    # feat2ch (F->C) folded through ch4feat's dout block; x+edge block merged.
    wp = p['wfc'] @ p['wc4'][3]                                     # (F,F)
    bout = p['bc4'] + p['bfc'] @ p['wc4'][3]                        # (1,F)
    wx = p['wc4'][0] + p['wc4'][2]                                  # (C,F)
    we = p['wc4'][1] + p['wc4'][2]                                  # (C,F)
    # Lane-pad the final-stage weights/bias to 128 output columns.
    pad = ((0, 0), (0, LANES - F))
    return dict(wcomb=wcomb, bd=bd, alpha=p['alpha'],
                wplat=p['wplat'], bplat=p['bplat'],
                wx=jnp.pad(wx, pad), we=jnp.pad(we, pad),
                wp=jnp.pad(wp, pad), bout=jnp.pad(bout, pad))


def sksak_feat_forward(x_nchw, edge_nchw, params):
    N, C, H, W = x_nchw.shape
    F = params['b1'].shape[-1]
    assert W % 8 == 0 and (H * W) % 128 == 0 and F % 8 == 0

    fp = fold_params(params)
    x = jnp.transpose(x_nchw, (0, 2, 3, 1))        # NHWC for the conv taps
    edge = jnp.transpose(edge_nchw, (0, 2, 3, 1))  # NHWC

    weight_args = (fp['wcomb'], fp['bd'], fp['alpha'],
                   fp['wplat'], fp['bplat'],
                   fp['wx'], fp['we'], fp['wp'], fp['bout'])

    def full_spec(a):
        nd = a.ndim
        return pl.BlockSpec(a.shape, lambda n, _nd=nd: (0,) * _nd)

    in_specs = [pl.BlockSpec((None, H, W, C), lambda n: (n, 0, 0, 0)),
                pl.BlockSpec((None, H, W, C), lambda n: (n, 0, 0, 0))]
    in_specs += [full_spec(a) for a in weight_args]

    out = pl.pallas_call(
        _sksak_kernel,
        out_shape=jax.ShapeDtypeStruct((N, F, H * W), jnp.float32),
        grid=(N,),
        in_specs=in_specs,
        out_specs=pl.BlockSpec((None, F, H * W), lambda n: (n, 0, 0)),
        scratch_shapes=[
            pltpu.VMEM((H + 2 * PAD, W + 2 * PAD, C), jnp.float32),
            pltpu.VMEM((H + 2, W + 2 * WHALO, F), jnp.float32),
        ],
        compiler_params=pltpu.CompilerParams(
            dimension_semantics=("parallel",),       # images are independent
            vmem_limit_bytes=32 * 1024 * 1024),
    )(x, edge, *weight_args)

    return out.reshape(N, F, H, W)                   # pure reshape, no transpose


def init_params(key, channels, features):
    C, F = channels, features
    keys = jax.random.split(key, 16)

    def conv_w(k, kh, kw, cin, cout):
        return 0.1 * jax.random.normal(k, (kh, kw, cin, cout), jnp.float32)

    def bias(k, cout):
        return 0.1 * jax.random.normal(k, (1, cout), jnp.float32)

    p = {}
    p['w1'] = conv_w(keys[0], 3, 3, C, F); p['b1'] = bias(keys[1], F)
    p['w2'] = conv_w(keys[2], 3, 3, C, F); p['b2'] = bias(keys[3], F)
    p['w4'] = conv_w(keys[4], 3, 3, C, F); p['b4'] = bias(keys[5], F)
    p['w8'] = conv_w(keys[6], 3, 3, C, F); p['b8'] = bias(keys[7], F)
    # feat2feat: 1x1 conv (4F -> F), stored per-branch (4, F, F)
    p['wff'] = 0.1 * jax.random.normal(keys[8], (4, F, F), jnp.float32)
    p['bff'] = bias(keys[9], F)
    # PReLU (num_parameters=1, torch default init 0.25), broadcast to (1, F)
    p['alpha'] = jnp.full((1, F), 0.25, jnp.float32)
    p['wplat'] = conv_w(keys[10], 3, 3, F, F); p['bplat'] = bias(keys[11], F)
    # feat2ch: 1x1 conv (F -> C)
    p['wfc'] = 0.1 * jax.random.normal(keys[12], (F, C), jnp.float32)
    p['bfc'] = bias(keys[13], C)
    # ch4feat: 1x1 conv (4C -> F), stored per input block (4, C, F)
    p['wc4'] = 0.1 * jax.random.normal(keys[14], (4, C, F), jnp.float32)
    p['bc4'] = bias(keys[15], F)
    return p
    # NOTE: self.prelu in the torch module is unused in forward() -> omitted.


# ---------------- pure-JAX reference (unfused; validates the folding) -------
def _conv2d_ref(x, w, b, dilation=1):
    pad = dilation
    out = jax.lax.conv_general_dilated(
        x, w, window_strides=(1, 1),
        padding=[(pad, pad), (pad, pad)],
        rhs_dilation=(dilation, dilation),
        dimension_numbers=('NHWC', 'HWIO', 'NHWC'))
    return out + b.reshape(1, 1, 1, -1)


def sksak_feat_ref(x_nchw, edge_nchw, p):
    x = jnp.transpose(x_nchw, (0, 2, 3, 1))
    e = jnp.transpose(edge_nchw, (0, 2, 3, 1))
    d1 = _conv2d_ref(x, p['w1'], p['b1'], 1)
    d2 = _conv2d_ref(x, p['w2'], p['b2'], 2)
    d4 = _conv2d_ref(x, p['w4'], p['b4'], 4)
    d8 = _conv2d_ref(x, p['w8'], p['b8'], 8)
    F = p['b1'].shape[-1]
    wff = p['wff'].reshape(4 * F, F)
    dcat = jnp.concatenate([d1, d2, d4, d8], -1) @ wff \
        + p['bff'].reshape(1, 1, 1, -1)
    pre = jnp.where(dcat > 0, dcat, p['alpha'].reshape(1, 1, 1, -1) * dcat)
    plat = _conv2d_ref(pre, p['wplat'], p['bplat'], 1)
    dout = plat @ p['wfc'] + p['bfc'].reshape(1, 1, 1, -1)
    C = x.shape[-1]
    wc4 = p['wc4'].reshape(4 * C, -1)
    cat = jnp.concatenate([x, e, x + e, dout], -1)
    out = cat @ wc4 + p['bc4'].reshape(1, 1, 1, -1)
    return jnp.transpose(out, (0, 3, 1, 2))


if __name__ == "__main__":
    key = jax.random.PRNGKey(0)
    k1, k2, k3 = jax.random.split(key, 3)
    N, C, H, W = 2, 4, 16, 16   # batch, channels, spatial
    F = 8                       # features

    x = jax.random.normal(k1, (N, C, H, W), jnp.float32)
    edge = jax.random.normal(k2, (N, C, H, W), jnp.float32)
    params = init_params(k3, C, F)

    out = sksak_feat_forward(x, edge, params)
    out = jax.block_until_ready(out)

    ref = sksak_feat_ref(x, edge, params)
    assert out.shape == (N, F, H, W), out.shape
    err = float(jnp.max(jnp.abs(out - ref)))
    assert err < 1e-3, f"max abs error vs reference: {err}"
    print("KERNEL_OK")
</pallas_src>

<mosaic_0001>
module attributes {stable_mosaic.version = 11 : i64} {
  func.func @_sksak_kernel(%arg0: i32, %arg1: memref<1x16x16x4xf32, #tpu.memory_space<vmem>>, %arg2: memref<1x16x16x4xf32, #tpu.memory_space<vmem>>, %arg3: memref<4x3x3x4x8xf32, #tpu.memory_space<vmem>>, %arg4: memref<1x8xf32, #tpu.memory_space<vmem>>, %arg5: memref<1x8xf32, #tpu.memory_space<vmem>>, %arg6: memref<3x3x8x8xf32, #tpu.memory_space<vmem>>, %arg7: memref<1x8xf32, #tpu.memory_space<vmem>>, %arg8: memref<4x128xf32, #tpu.memory_space<vmem>>, %arg9: memref<4x128xf32, #tpu.memory_space<vmem>>, %arg10: memref<8x128xf32, #tpu.memory_space<vmem>>, %arg11: memref<1x128xf32, #tpu.memory_space<vmem>>, %arg12: memref<1x8x256xf32, #tpu.memory_space<vmem>>, %arg13: memref<32x32x4xf32, #tpu.memory_space<vmem>>, %arg14: memref<18x32x8xf32, #tpu.memory_space<vmem>>) attributes {dimension_semantics = [#tpu.dimension_semantics<parallel>], iteration_bounds = array<i64: 2>, scalar_prefetch = 0 : i64, scratch_operands = 2 : i64, tpu.core_type = #tpu.core_type<tc>, window_params = [{transform_indices = @transform_0, window_bounds = array<i64: 1, 16, 16, 4>}, {transform_indices = @transform_1, window_bounds = array<i64: 1, 16, 16, 4>}, {pipeline_mode = #tpu.pipeline_mode<synchronous>, transform_indices = @transform_2, window_bounds = array<i64: 4, 3, 3, 4, 8>}, {pipeline_mode = #tpu.pipeline_mode<synchronous>, transform_indices = @transform_3, window_bounds = array<i64: 1, 8>}, {pipeline_mode = #tpu.pipeline_mode<synchronous>, transform_indices = @transform_4, window_bounds = array<i64: 1, 8>}, {pipeline_mode = #tpu.pipeline_mode<synchronous>, transform_indices = @transform_5, window_bounds = array<i64: 3, 3, 8, 8>}, {pipeline_mode = #tpu.pipeline_mode<synchronous>, transform_indices = @transform_6, window_bounds = array<i64: 1, 8>}, {pipeline_mode = #tpu.pipeline_mode<synchronous>, transform_indices = @transform_7, window_bounds = array<i64: 4, 128>}, {pipeline_mode = #tpu.pipeline_mode<synchronous>, transform_indices = @transform_8, window_bounds = array<i64: 4, 128>}, {pipeline_mode = #tpu.pipeline_mode<synchronous>, transform_indices = @transform_9, window_bounds = array<i64: 8, 128>}, {pipeline_mode = #tpu.pipeline_mode<synchronous>, transform_indices = @transform_10, window_bounds = array<i64: 1, 128>}, {transform_indices = @transform_11, window_bounds = array<i64: 1, 8, 256>}]} {
    %cst = arith.constant 0.000000e+00 : f32
    %0 = vector.broadcast %cst : f32 to vector<8x32x4xf32>
    %c0 = arith.constant 0 : index
    %c0_0 = arith.constant 0 : index
    %c0_1 = arith.constant 0 : index
    %1 = vector.load %arg13[%c0, %c0_0, %c0_1] : memref<32x32x4xf32, #tpu.memory_space<vmem>>, vector<8x32x4xf32>
    tpu.vector_store %arg13[%c0, %c0_0, %c0_1], %0 {strides = array<i32>} : memref<32x32x4xf32, #tpu.memory_space<vmem>>, vector<8x32x4xf32>,
    %cst_2 = arith.constant 0.000000e+00 : f32
    %2 = vector.broadcast %cst_2 : f32 to vector<8x32x4xf32>
    %c24 = arith.constant 24 : index
    %c0_3 = arith.constant 0 : index
    %c0_4 = arith.constant 0 : index
    %3 = vector.load %arg13[%c24, %c0_3, %c0_4] : memref<32x32x4xf32, #tpu.memory_space<vmem>>, vector<8x32x4xf32>
    tpu.vector_store %arg13[%c24, %c0_3, %c0_4], %2 {strides = array<i32>} : memref<32x32x4xf32, #tpu.memory_space<vmem>>, vector<8x32x4xf32>,
    %cst_5 = arith.constant 0.000000e+00 : f32
    %4 = vector.broadcast %cst_5 : f32 to vector<16x8x4xf32>
    %c8 = arith.constant 8 : index
    %c0_6 = arith.constant 0 : index
    %c0_7 = arith.constant 0 : index
    %5 = vector.load %arg13[%c8, %c0_6, %c0_7] : memref<32x32x4xf32, #tpu.memory_space<vmem>>, vector<16x8x4xf32>
    tpu.vector_store %arg13[%c8, %c0_6, %c0_7], %4 {strides = array<i32>} : memref<32x32x4xf32, #tpu.memory_space<vmem>>, vector<16x8x4xf32>,
    %cst_8 = arith.constant 0.000000e+00 : f32
    %6 = vector.broadcast %cst_8 : f32 to vector<16x8x4xf32>
    %c8_9 = arith.constant 8 : index
    %c24_10 = arith.constant 24 : index
    %c0_11 = arith.constant 0 : index
    %7 = vector.load %arg13[%c8_9, %c24_10, %c0_11] : memref<32x32x4xf32, #tpu.memory_space<vmem>>, vector<16x8x4xf32>
    tpu.vector_store %arg13[%c8_9, %c24_10, %c0_11], %6 {strides = array<i32>} : memref<32x32x4xf32, #tpu.memory_space<vmem>>, vector<16x8x4xf32>,
    %cst_12 = arith.constant 0.000000e+00 : f32
    %8 = vector.broadcast %cst_12 : f32 to vector<1x32x8xf32>
    %c0_13 = arith.constant 0 : index
    %c0_14 = arith.constant 0 : index
    %c0_15 = arith.constant 0 : index
    %9 = vector.load %arg14[%c0_13, %c0_14, %c0_15] : memref<18x32x8xf32, #tpu.memory_space<vmem>>, vector<1x32x8xf32>
    tpu.vector_store %arg14[%c0_13, %c0_14, %c0_15], %8 {strides = array<i32>} : memref<18x32x8xf32, #tpu.memory_space<vmem>>, vector<1x32x8xf32>,
    %cst_16 = arith.constant 0.000000e+00 : f32
    %10 = vector.broadcast %cst_16 : f32 to vector<1x32x8xf32>
    %c17 = arith.constant 17 : index
    %c0_17 = arith.constant 0 : index
    %c0_18 = arith.constant 0 : index
    %11 = vector.load %arg14[%c17, %c0_17, %c0_18] : memref<18x32x8xf32, #tpu.memory_space<vmem>>, vector<1x32x8xf32>
    tpu.vector_store %arg14[%c17, %c0_17, %c0_18], %10 {strides = array<i32>} : memref<18x32x8xf32, #tpu.memory_space<vmem>>, vector<1x32x8xf32>,
    %cst_19 = arith.constant 0.000000e+00 : f32
    %12 = vector.broadcast %cst_19 : f32 to vector<16x8x8xf32>
    %c1 = arith.constant 1 : index
    %c0_20 = arith.constant 0 : index
    %c0_21 = arith.constant 0 : index
    %13 = vector.load %arg14[%c1, %c0_20, %c0_21] : memref<18x32x8xf32, #tpu.memory_space<vmem>>, vector<16x8x8xf32>
    tpu.vector_store %arg14[%c1, %c0_20, %c0_21], %12 {strides = array<i32>} : memref<18x32x8xf32, #tpu.memory_space<vmem>>, vector<16x8x8xf32>,
    %cst_22 = arith.constant 0.000000e+00 : f32
    %14 = vector.broadcast %cst_22 : f32 to vector<16x8x8xf32>
    %c1_23 = arith.constant 1 : index
    %c24_24 = arith.constant 24 : index
    %c0_25 = arith.constant 0 : index
    %15 = vector.load %arg14[%c1_23, %c24_24, %c0_25] : memref<18x32x8xf32, #tpu.memory_space<vmem>>, vector<16x8x8xf32>
    tpu.vector_store %arg14[%c1_23, %c24_24, %c0_25], %14 {strides = array<i32>} : memref<18x32x8xf32, #tpu.memory_space<vmem>>, vector<16x8x8xf32>,
    %c0_26 = arith.constant 0 : index
    %c0_27 = arith.constant 0 : index
    %c0_28 = arith.constant 0 : index
    %c0_29 = arith.constant 0 : index
    %16 = vector.load %arg1[%c0_26, %c0_27, %c0_28, %c0_29] : memref<1x16x16x4xf32, #tpu.memory_space<vmem>>, vector<1x16x16x4xf32>
    %17 = vector.shape_cast %16 : vector<1x16x16x4xf32> to vector<16x16x4xf32>
    %c8_30 = arith.constant 8 : index
    %c8_31 = arith.constant 8 : index
    %c0_32 = arith.constant 0 : index
    %18 = vector.load %arg13[%c8_30, %c8_31, %c0_32] : memref<32x32x4xf32, #tpu.memory_space<vmem>>, vector<16x16x4xf32>
    tpu.vector_store %arg13[%c8_30, %c8_31, %c0_32], %17 {strides = array<i32>} : memref<32x32x4xf32, #tpu.memory_space<vmem>>, vector<16x16x4xf32>,
    %c0_33 = arith.constant 0 : index
    %c0_34 = arith.constant 0 : index
    %19 = vector.load %arg4[%c0_33, %c0_34] : memref<1x8xf32, #tpu.memory_space<vmem>>, vector<1x8xf32>
    %20 = vector.shape_cast %19 : vector<1x8xf32> to vector<1x8xf32>
    %21 = vector.broadcast %20 : vector<1x8xf32> to vector<256x8xf32>
    %c7 = arith.constant 7 : index
    %c7_35 = arith.constant 7 : index
    %c0_36 = arith.constant 0 : index
    %22 = vector.load %arg13[%c7, %c7_35, %c0_36] : memref<32x32x4xf32, #tpu.memory_space<vmem>>, vector<18x16x4xf32>
    %23 = vector.extract_strided_slice %22 {offsets = [0, 0, 0], sizes = [16, 16, 4], strides = [1, 1, 1]} : vector<18x16x4xf32> to vector<16x16x4xf32>
    %24 = vector.shape_cast %23 : vector<16x16x4xf32> to vector<256x4xf32>
    %c0_37 = arith.constant 0 : index
    %c0_38 = arith.constant 0 : index
    %c0_39 = arith.constant 0 : index
    %c0_40 = arith.constant 0 : index
    %c0_41 = arith.constant 0 : index
    %25 = vector.load %arg3[%c0_37, %c0_38, %c0_39, %c0_40, %c0_41] : memref<4x3x3x4x8xf32, #tpu.memory_space<vmem>>, vector<1x1x1x4x8xf32>
    %26 = vector.shape_cast %25 : vector<1x1x1x4x8xf32> to vector<4x8xf32>
    %cst_42 = arith.constant dense<0.000000e+00> : vector<256x8xf32>
    %27 = tpu.matmul %24, %26, %cst_42 {dimension_numbers = #tpu.dot_dimension_numbers<[1], [0], [0], [1], [0, 0, 1, 1], [], []>} : vector<256x4xf32>, vector<4x8xf32>, vector<256x8xf32> -> vector<256x8xf32>
    %28 = arith.addf %21, %27 : vector<256x8xf32>
    %29 = vector.extract_strided_slice %22 {offsets = [1, 0, 0], sizes = [16, 16, 4], strides = [1, 1, 1]} : vector<18x16x4xf32> to vector<16x16x4xf32>
    %30 = vector.shape_cast %29 : vector<16x16x4xf32> to vector<256x4xf32>
    %c0_43 = arith.constant 0 : index
    %c1_44 = arith.constant 1 : index
    %c0_45 = arith.constant 0 : index
    %c0_46 = arith.constant 0 : index
    %c0_47 = arith.constant 0 : index
    %31 = vector.load %arg3[%c0_43, %c1_44, %c0_45, %c0_46, %c0_47] : memref<4x3x3x4x8xf32, #tpu.memory_space<vmem>>, vector<1x1x1x4x8xf32>
    %32 = vector.shape_cast %31 : vector<1x1x1x4x8xf32> to vector<4x8xf32>
    %cst_48 = arith.constant dense<0.000000e+00> : vector<256x8xf32>
    %33 = tpu.matmul %30, %32, %cst_48 {dimension_numbers = #tpu.dot_dimension_numbers<[1], [0], [0], [1], [0, 0, 1, 1], [], []>} : vector<256x4xf32>, vector<4x8xf32>, vector<256x8xf32> -> vector<256x8xf32>
    %34 = arith.addf %28, %33 : vector<256x8xf32>
    %35 = vector.extract_strided_slice %22 {offsets = [2, 0, 0], sizes = [16, 16, 4], strides = [1, 1, 1]} : vector<18x16x4xf32> to vector<16x16x4xf32>
    %36 = vector.shape_cast %35 : vector<16x16x4xf32> to vector<256x4xf32>
    %c0_49 = arith.constant 0 : index
    %c2 = arith.constant 2 : index
    %c0_50 = arith.constant 0 : index
    %c0_51 = arith.constant 0 : index
    %c0_52 = arith.constant 0 : index
    %37 = vector.load %arg3[%c0_49, %c2, %c0_50, %c0_51, %c0_52] : memref<4x3x3x4x8xf32, #tpu.memory_space<vmem>>, vector<1x1x1x4x8xf32>
    %38 = vector.shape_cast %37 : vector<1x1x1x4x8xf32> to vector<4x8xf32>
    %cst_53 = arith.constant dense<0.000000e+00> : vector<256x8xf32>
    %39 = tpu.matmul %36, %38, %cst_53 {dimension_numbers = #tpu.dot_dimension_numbers<[1], [0], [0], [1], [0, 0, 1, 1], [], []>} : vector<256x4xf32>, vector<4x8xf32>, vector<256x8xf32> -> vector<256x8xf32>
    %40 = arith.addf %34, %39 : vector<256x8xf32>
    %c7_54 = arith.constant 7 : index
    %c8_55 = arith.constant 8 : index
    %c0_56 = arith.constant 0 : index
    %41 = vector.load %arg13[%c7_54, %c8_55, %c0_56] : memref<32x32x4xf32, #tpu.memory_space<vmem>>, vector<16x16x4xf32>
    %42 = vector.shape_cast %41 : vector<16x16x4xf32> to vector<256x4xf32>
    %c0_57 = arith.constant 0 : index
    %c0_58 = arith.constant 0 : index
    %c1_59 = arith.constant 1 : index
    %c0_60 = arith.constant 0 : index
    %c0_61 = arith.constant 0 : index
    %43 = vector.load %arg3[%c0_57, %c0_58, %c1_59, %c0_60, %c0_61] : memref<4x3x3x4x8xf32, #tpu.memory_space<vmem>>, vector<1x1x1x4x8xf32>
    %44 = vector.shape_cast %43 : vector<1x1x1x4x8xf32> to vector<4x8xf32>
    %cst_62 = arith.constant dense<0.000000e+00> : vector<256x8xf32>
    %45 = tpu.matmul %42, %44, %cst_62 {dimension_numbers = #tpu.dot_dimension_numbers<[1], [0], [0], [1], [0, 0, 1, 1], [], []>} : vector<256x4xf32>, vector<4x8xf32>, vector<256x8xf32> -> vector<256x8xf32>
    %46 = arith.addf %40, %45 : vector<256x8xf32>
    %c8_63 = arith.constant 8 : index
    %c8_64 = arith.constant 8 : index
    %c0_65 = arith.constant 0 : index
    %47 = vector.load %arg13[%c8_63, %c8_64, %c0_65] : memref<32x32x4xf32, #tpu.memory_space<vmem>>, vector<16x16x4xf32>
    %48 = vector.shape_cast %47 : vector<16x16x4xf32> to vector<256x4xf32>
    %c0_66 = arith.constant 0 : index
    %c1_67 = arith.constant 1 : index
    %c1_68 = arith.constant 1 : index
    %c0_69 = arith.constant 0 : index
    %c0_70 = arith.constant 0 : index
    %49 = vector.load %arg3[%c0_66, %c1_67, %c1_68, %c0_69, %c0_70] : memref<4x3x3x4x8xf32, #tpu.memory_space<vmem>>, vector<1x1x1x4x8xf32>
    %50 = vector.shape_cast %49 : vector<1x1x1x4x8xf32> to vector<4x8xf32>
    %cst_71 = arith.constant dense<0.000000e+00> : vector<256x8xf32>
    %51 = tpu.matmul %48, %50, %cst_71 {dimension_numbers = #tpu.dot_dimension_numbers<[1], [0], [0], [1], [0, 0, 1, 1], [], []>} : vector<256x4xf32>, vector<4x8xf32>, vector<256x8xf32> -> vector<256x8xf32>
    %52 = arith.addf %46, %51 : vector<256x8xf32>
    %c9 = arith.constant 9 : index
    %c8_72 = arith.constant 8 : index
    %c0_73 = arith.constant 0 : index
    %53 = vector.load %arg13[%c9, %c8_72, %c0_73] : memref<32x32x4xf32, #tpu.memory_space<vmem>>, vector<16x16x4xf32>
    %54 = vector.shape_cast %53 : vector<16x16x4xf32> to vector<256x4xf32>
    %c0_74 = arith.constant 0 : index
    %c2_75 = arith.constant 2 : index
    %c1_76 = arith.constant 1 : index
    %c0_77 = arith.constant 0 : index
    %c0_78 = arith.constant 0 : index
    %55 = vector.load %arg3[%c0_74, %c2_75, %c1_76, %c0_77, %c0_78] : memref<4x3x3x4x8xf32, #tpu.memory_space<vmem>>, vector<1x1x1x4x8xf32>
    %56 = vector.shape_cast %55 : vector<1x1x1x4x8xf32> to vector<4x8xf32>
    %cst_79 = arith.constant dense<0.000000e+00> : vector<256x8xf32>
    %57 = tpu.matmul %54, %56, %cst_79 {dimension_numbers = #tpu.dot_dimension_numbers<[1], [0], [0], [1], [0, 0, 1, 1], [], []>} : vector<256x4xf32>, vector<4x8xf32>, vector<256x8xf32> -> vector<256x8xf32>
    %58 = arith.addf %52, %57 : vector<256x8xf32>
    %c7_80 = arith.constant 7 : index
    %c9_81 = arith.constant 9 : index
    %c0_82 = arith.constant 0 : index
    %59 = vector.load %arg13[%c7_80, %c9_81, %c0_82] : memref<32x32x4xf32, #tpu.memory_space<vmem>>, vector<18x16x4xf32>
    %60 = vector.extract_strided_slice %59 {offsets = [0, 0, 0], sizes = [16, 16, 4], strides = [1, 1, 1]} : vector<18x16x4xf32> to vector<16x16x4xf32>
    %61 = vector.shape_cast %60 : vector<16x16x4xf32> to vector<256x4xf32>
    %c0_83 = arith.constant 0 : index
    %c0_84 = arith.constant 0 : index
    %c2_85 = arith.constant 2 : index
    %c0_86 = arith.constant 0 : index
    %c0_87 = arith.constant 0 : index
    %62 = vector.load %arg3[%c0_83, %c0_84, %c2_85, %c0_86, %c0_87] : memref<4x3x3x4x8xf32, #tpu.memory_space<vmem>>, vector<1x1x1x4x8xf32>
    %63 = vector.shape_cast %62 : vector<1x1x1x4x8xf32> to vector<4x8xf32>
    %cst_88 = arith.constant dense<0.000000e+00> : vector<256x8xf32>
    %64 = tpu.matmul %61, %63, %cst_88 {dimension_numbers = #tpu.dot_dimension_numbers<[1], [0], [0], [1], [0, 0, 1, 1], [], []>} : vector<256x4xf32>, vector<4x8xf32>, vector<256x8xf32> -> vector<256x8xf32>
    %65 = arith.addf %58, %64 : vector<256x8xf32>
    %66 = vector.extract_strided_slice %59 {offsets = [1, 0, 0], sizes = [16, 16, 4], strides = [1, 1, 1]} : vector<18x16x4xf32> to vector<16x16x4xf32>
    %67 = vector.shape_cast %66 : vector<16x16x4xf32> to vector<256x4xf32>
    %c0_89 = arith.constant 0 : index
    %c1_90 = arith.constant 1 : index
    %c2_91 = arith.constant 2 : index
    %c0_92 = arith.constant 0 : index
    %c0_93 = arith.constant 0 : index
    %68 = vector.load %arg3[%c0_89, %c1_90, %c2_91, %c0_92, %c0_93] : memref<4x3x3x4x8xf32, #tpu.memory_space<vmem>>, vector<1x1x1x4x8xf32>
    %69 = vector.shape_cast %68 : vector<1x1x1x4x8xf32> to vector<4x8xf32>
    %cst_94 = arith.constant dense<0.000000e+00> : vector<256x8xf32>
    %70 = tpu.matmul %67, %69, %cst_94 {dimension_numbers = #tpu.dot_dimension_numbers<[1], [0], [0], [1], [0, 0, 1, 1], [], []>} : vector<256x4xf32>, vector<4x8xf32>, vector<256x8xf32> -> vector<256x8xf32>
    %71 = arith.addf %65, %70 : vector<256x8xf32>
    %72 = vector.extract_strided_slice %59 {offsets = [2, 0, 0], sizes = [16, 16, 4], strides = [1, 1, 1]} : vector<18x16x4xf32> to vector<16x16x4xf32>
    %73 = vector.shape_cast %72 : vector<16x16x4xf32> to vector<256x4xf32>
    %c0_95 = arith.constant 0 : index
    %c2_96 = arith.constant 2 : index
    %c2_97 = arith.constant 2 : index
    %c0_98 = arith.constant 0 : index
    %c0_99 = arith.constant 0 : index
    %74 = vector.load %arg3[%c0_95, %c2_96, %c2_97, %c0_98, %c0_99] : memref<4x3x3x4x8xf32, #tpu.memory_space<vmem>>, vector<1x1x1x4x8xf32>
    %75 = vector.shape_cast %74 : vector<1x1x1x4x8xf32> to vector<4x8xf32>
    %cst_100 = arith.constant dense<0.000000e+00> : vector<256x8xf32>
    %76 = tpu.matmul %73, %75, %cst_100 {dimension_numbers = #tpu.dot_dimension_numbers<[1], [0], [0], [1], [0, 0, 1, 1], [], []>} : vector<256x4xf32>, vector<4x8xf32>, vector<256x8xf32> -> vector<256x8xf32>
    %77 = arith.addf %71, %76 : vector<256x8xf32>
    %c6 = arith.constant 6 : index
    %c6_101 = arith.constant 6 : index
    %c0_102 = arith.constant 0 : index
    %78 = vector.load %arg13[%c6, %c6_101, %c0_102] : memref<32x32x4xf32, #tpu.memory_space<vmem>>, vector<20x16x4xf32>
    %79 = vector.extract_strided_slice %78 {offsets = [0, 0, 0], sizes = [16, 16, 4], strides = [1, 1, 1]} : vector<20x16x4xf32> to vector<16x16x4xf32>
    %80 = vector.shape_cast %79 : vector<16x16x4xf32> to vector<256x4xf32>
    %c1_103 = arith.constant 1 : index
    %c0_104 = arith.constant 0 : index
    %c0_105 = arith.constant 0 : index
    %c0_106 = arith.constant 0 : index
    %c0_107 = arith.constant 0 : index
    %81 = vector.load %arg3[%c1_103, %c0_104, %c0_105, %c0_106, %c0_107] : memref<4x3x3x4x8xf32, #tpu.memory_space<vmem>>, vector<1x1x1x4x8xf32>
    %82 = vector.shape_cast %81 : vector<1x1x1x4x8xf32> to vector<4x8xf32>
    %cst_108 = arith.constant dense<0.000000e+00> : vector<256x8xf32>
    %83 = tpu.matmul %80, %82, %cst_108 {dimension_numbers = #tpu.dot_dimension_numbers<[1], [0], [0], [1], [0, 0, 1, 1], [], []>} : vector<256x4xf32>, vector<4x8xf32>, vector<256x8xf32> -> vector<256x8xf32>
    %84 = arith.addf %77, %83 : vector<256x8xf32>
    %85 = vector.extract_strided_slice %78 {offsets = [2, 0, 0], sizes = [16, 16, 4], strides = [1, 1, 1]} : vector<20x16x4xf32> to vector<16x16x4xf32>
    %86 = vector.shape_cast %85 : vector<16x16x4xf32> to vector<256x4xf32>
    %c1_109 = arith.constant 1 : index
    %c1_110 = arith.constant 1 : index
    %c0_111 = arith.constant 0 : index
    %c0_112 = arith.constant 0 : index
    %c0_113 = arith.constant 0 : index
    %87 = vector.load %arg3[%c1_109, %c1_110, %c0_111, %c0_112, %c0_113] : memref<4x3x3x4x8xf32, #tpu.memory_space<vmem>>, vector<1x1x1x4x8xf32>
    %88 = vector.shape_cast %87 : vector<1x1x1x4x8xf32> to vector<4x8xf32>
    %cst_114 = arith.constant dense<0.000000e+00> : vector<256x8xf32>
    %89 = tpu.matmul %86, %88, %cst_114 {dimension_numbers = #tpu.dot_dimension_numbers<[1], [0], [0], [1], [0, 0, 1, 1], [], []>} : vector<256x4xf32>, vector<4x8xf32>, vector<256x8xf32> -> vector<256x8xf32>
    %90 = arith.addf %84, %89 : vector<256x8xf32>
    %91 = vector.extract_strided_slice %78 {offsets = [4, 0, 0], sizes = [16, 16, 4], strides = [1, 1, 1]} : vector<20x16x4xf32> to vector<16x16x4xf32>
    %92 = vector.shape_cast %91 : vector<16x16x4xf32> to vector<256x4xf32>
    %c1_115 = arith.constant 1 : index
    %c2_116 = arith.constant 2 : index
    %c0_117 = arith.constant 0 : index
    %c0_118 = arith.constant 0 : index
    %c0_119 = arith.constant 0 : index
    %93 = vector.load %arg3[%c1_115, %c2_116, %c0_117, %c0_118, %c0_119] : memref<4x3x3x4x8xf32, #tpu.memory_space<vmem>>, vector<1x1x1x4x8xf32>
    %94 = vector.shape_cast %93 : vector<1x1x1x4x8xf32> to vector<4x8xf32>
    %cst_120 = arith.constant dense<0.000000e+00> : vector<256x8xf32>
    %95 = tpu.matmul %92, %94, %cst_120 {dimension_numbers = #tpu.dot_dimension_numbers<[1], [0], [0], [1], [0, 0, 1, 1], [], []>} : vector<256x4xf32>, vector<4x8xf32>, vector<256x8xf32> -> vector<256x8xf32>
    %96 = arith.addf %90, %95 : vector<256x8xf32>
    %c6_121 = arith.constant 6 : index
    %c8_122 = arith.constant 8 : index
    %c0_123 = arith.constant 0 : index
    %97 = vector.load %arg13[%c6_121, %c8_122, %c0_123] : memref<32x32x4xf32, #tpu.memory_space<vmem>>, vector<16x16x4xf32>
    %98 = vector.shape_cast %97 : vector<16x16x4xf32> to vector<256x4xf32>
    %c1_124 = arith.constant 1 : index
    %c0_125 = arith.constant 0 : index
    %c1_126 = arith.constant 1 : index
    %c0_127 = arith.constant 0 : index
    %c0_128 = arith.constant 0 : index
    %99 = vector.load %arg3[%c1_124, %c0_125, %c1_126, %c0_127, %c0_128] : memref<4x3x3x4x8xf32, #tpu.memory_space<vmem>>, vector<1x1x1x4x8xf32>
    %100 = vector.shape_cast %99 : vector<1x1x1x4x8xf32> to vector<4x8xf32>
    %cst_129 = arith.constant dense<0.000000e+00> : vector<256x8xf32>
    %101 = tpu.matmul %98, %100, %cst_129 {dimension_numbers = #tpu.dot_dimension_numbers<[1], [0], [0], [1], [0, 0, 1, 1], [], []>} : vector<256x4xf32>, vector<4x8xf32>, vector<256x8xf32> -> vector<256x8xf32>
    %102 = arith.addf %96, %101 : vector<256x8xf32>
    %c8_130 = arith.constant 8 : index
    %c8_131 = arith.constant 8 : index
    %c0_132 = arith.constant 0 : index
    %103 = vector.load %arg13[%c8_130, %c8_131, %c0_132] : memref<32x32x4xf32, #tpu.memory_space<vmem>>, vector<16x16x4xf32>
    %104 = vector.shape_cast %103 : vector<16x16x4xf32> to vector<256x4xf32>
    %c1_133 = arith.constant 1 : index
    %c1_134 = arith.constant 1 : index
    %c1_135 = arith.constant 1 : index
    %c0_136 = arith.constant 0 : index
    %c0_137 = arith.constant 0 : index
    %105 = vector.load %arg3[%c1_133, %c1_134, %c1_135, %c0_136, %c0_137] : memref<4x3x3x4x8xf32, #tpu.memory_space<vmem>>, vector<1x1x1x4x8xf32>
    %106 = vector.shape_cast %105 : vector<1x1x1x4x8xf32> to vector<4x8xf32>
    %cst_138 = arith.constant dense<0.000000e+00> : vector<256x8xf32>
    %107 = tpu.matmul %104, %106, %cst_138 {dimension_numbers = #tpu.dot_dimension_numbers<[1], [0], [0], [1], [0, 0, 1, 1], [], []>} : vector<256x4xf32>, vector<4x8xf32>, vector<256x8xf32> -> vector<256x8xf32>
    %108 = arith.addf %102, %107 : vector<256x8xf32>
    %c10 = arith.constant 10 : index
    %c8_139 = arith.constant 8 : index
    %c0_140 = arith.constant 0 : index
    %109 = vector.load %arg13[%c10, %c8_139, %c0_140] : memref<32x32x4xf32, #tpu.memory_space<vmem>>, vector<16x16x4xf32>
    %110 = vector.shape_cast %109 : vector<16x16x4xf32> to vector<256x4xf32>
    %c1_141 = arith.constant 1 : index
    %c2_142 = arith.constant 2 : index
    %c1_143 = arith.constant 1 : index
    %c0_144 = arith.constant 0 : index
    %c0_145 = arith.constant 0 : index
    %111 = vector.load %arg3[%c1_141, %c2_142, %c1_143, %c0_144, %c0_145] : memref<4x3x3x4x8xf32, #tpu.memory_space<vmem>>, vector<1x1x1x4x8xf32>
    %112 = vector.shape_cast %111 : vector<1x1x1x4x8xf32> to vector<4x8xf32>
    %cst_146 = arith.constant dense<0.000000e+00> : vector<256x8xf32>
    %113 = tpu.matmul %110, %112, %cst_146 {dimension_numbers = #tpu.dot_dimension_numbers<[1], [0], [0], [1], [0, 0, 1, 1], [], []>} : vector<256x4xf32>, vector<4x8xf32>, vector<256x8xf32> -> vector<256x8xf32>
    %114 = arith.addf %108, %113 : vector<256x8xf32>
    %c6_147 = arith.constant 6 : index
    %c10_148 = arith.constant 10 : index
    %c0_149 = arith.constant 0 : index
    %115 = vector.load %arg13[%c6_147, %c10_148, %c0_149] : memref<32x32x4xf32, #tpu.memory_space<vmem>>, vector<20x16x4xf32>
    %116 = vector.extract_strided_slice %115 {offsets = [0, 0, 0], sizes = [16, 16, 4], strides = [1, 1, 1]} : vector<20x16x4xf32> to vector<16x16x4xf32>
    %117 = vector.shape_cast %116 : vector<16x16x4xf32> to vector<256x4xf32>
    %c1_150 = arith.constant 1 : index
    %c0_151 = arith.constant 0 : index
    %c2_152 = arith.constant 2 : index
    %c0_153 = arith.constant 0 : index
    %c0_154 = arith.constant 0 : index
    %118 = vector.load %arg3[%c1_150, %c0_151, %c2_152, %c0_153, %c0_154] : memref<4x3x3x4x8xf32, #tpu.memory_space<vmem>>, vector<1x1x1x4x8xf32>
    %119 = vector.shape_cast %118 : vector<1x1x1x4x8xf32> to vector<4x8xf32>
    %cst_155 = arith.constant dense<0.000000e+00> : vector<256x8xf32>
    %120 = tpu.matmul %117, %119, %cst_155 {dimension_numbers = #tpu.dot_dimension_numbers<[1], [0], [0], [1], [0, 0, 1, 1], [], []>} : vector<256x4xf32>, vector<4x8xf32>, vector<256x8xf32> -> vector<256x8xf32>
    %121 = arith.addf %114, %120 : vector<256x8xf32>
    %122 = vector.extract_strided_slice %115 {offsets = [2, 0, 0], sizes = [16, 16, 4], strides = [1, 1, 1]} : vector<20x16x4xf32> to vector<16x16x4xf32>
    %123 = vector.shape_cast %122 : vector<16x16x4xf32> to vector<256x4xf32>
    %c1_156 = arith.constant 1 : index
    %c1_157 = arith.constant 1 : index
    %c2_158 = arith.constant 2 : index
    %c0_159 = arith.constant 0 : index
    %c0_160 = arith.constant 0 : index
    %124 = vector.load %arg3[%c1_156, %c1_157, %c2_158, %c0_159, %c0_160] : memref<4x3x3x4x8xf32, #tpu.memory_space<vmem>>, vector<1x1x1x4x8xf32>
    %125 = vector.shape_cast %124 : vector<1x1x1x4x8xf32> to vector<4x8xf32>
    %cst_161 = arith.constant dense<0.000000e+00> : vector<256x8xf32>
    %126 = tpu.matmul %123, %125, %cst_161 {dimension_numbers = #tpu.dot_dimension_numbers<[1], [0], [0], [1], [0, 0, 1, 1], [], []>} : vector<256x4xf32>, vector<4x8xf32>, vector<256x8xf32> -> vector<256x8xf32>
    %127 = arith.addf %121, %126 : vector<256x8xf32>
    %128 = vector.extract_strided_slice %115 {offsets = [4, 0, 0], sizes = [16, 16, 4], strides = [1, 1, 1]} : vector<20x16x4xf32> to vector<16x16x4xf32>
    %129 = vector.shape_cast %128 : vector<16x16x4xf32> to vector<256x4xf32>
    %c1_162 = arith.constant 1 : index
    %c2_163 = arith.constant 2 : index
    %c2_164 = arith.constant 2 : index
    %c0_165 = arith.constant 0 : index
    %c0_166 = arith.constant 0 : index
    %130 = vector.load %arg3[%c1_162, %c2_163, %c2_164, %c0_165, %c0_166] : memref<4x3x3x4x8xf32, #tpu.memory_space<vmem>>, vector<1x1x1x4x8xf32>
    %131 = vector.shape_cast %130 : vector<1x1x1x4x8xf32> to vector<4x8xf32>
    %cst_167 = arith.constant dense<0.000000e+00> : vector<256x8xf32>
    %132 = tpu.matmul %129, %131, %cst_167 {dimension_numbers = #tpu.dot_dimension_numbers<[1], [0], [0], [1], [0, 0, 1, 1], [], []>} : vector<256x4xf32>, vector<4x8xf32>, vector<256x8xf32> -> vector<256x8xf32>
    %133 = arith.addf %127, %132 : vector<256x8xf32>
    %c4 = arith.constant 4 : index
    %c4_168 = arith.constant 4 : index
    %c0_169 = arith.constant 0 : index
    %134 = vector.load %arg13[%c4, %c4_168, %c0_169] : memref<32x32x4xf32, #tpu.memory_space<vmem>>, vector<24x16x4xf32>
    %135 = vector.extract_strided_slice %134 {offsets = [0, 0, 0], sizes = [16, 16, 4], strides = [1, 1, 1]} : vector<24x16x4xf32> to vector<16x16x4xf32>
    %136 = vector.shape_cast %135 : vector<16x16x4xf32> to vector<256x4xf32>
    %c2_170 = arith.constant 2 : index
    %c0_171 = arith.constant 0 : index
    %c0_172 = arith.constant 0 : index
    %c0_173 = arith.constant 0 : index
    %c0_174 = arith.constant 0 : index
    %137 = vector.load %arg3[%c2_170, %c0_171, %c0_172, %c0_173, %c0_174] : memref<4x3x3x4x8xf32, #tpu.memory_space<vmem>>, vector<1x1x1x4x8xf32>
    %138 = vector.shape_cast %137 : vector<1x1x1x4x8xf32> to vector<4x8xf32>
    %cst_175 = arith.constant dense<0.000000e+00> : vector<256x8xf32>
    %139 = tpu.matmul %136, %138, %cst_175 {dimension_numbers = #tpu.dot_dimension_numbers<[1], [0], [0], [1], [0, 0, 1, 1], [], []>} : vector<256x4xf32>, vector<4x8xf32>, vector<256x8xf32> -> vector<256x8xf32>
    %140 = arith.addf %133, %139 : vector<256x8xf32>
    %141 = vector.extract_strided_slice %134 {offsets = [4, 0, 0], sizes = [16, 16, 4], strides = [1, 1, 1]} : vector<24x16x4xf32> to vector<16x16x4xf32>
    %142 = vector.shape_cast %141 : vector<16x16x4xf32> to vector<256x4xf32>
    %c2_176 = arith.constant 2 : index
    %c1_177 = arith.constant 1 : index
    %c0_178 = arith.constant 0 : index
    %c0_179 = arith.constant 0 : index
    %c0_180 = arith.constant 0 : index
    %143 = vector.load %arg3[%c2_176, %c1_177, %c0_178, %c0_179, %c0_180] : memref<4x3x3x4x8xf32, #tpu.memory_space<vmem>>, vector<1x1x1x4x8xf32>
    %144 = vector.shape_cast %143 : vector<1x1x1x4x8xf32> to vector<4x8xf32>
    %cst_181 = arith.constant dense<0.000000e+00> : vector<256x8xf32>
    %145 = tpu.matmul %142, %144, %cst_181 {dimension_numbers = #tpu.dot_dimension_numbers<[1], [0], [0], [1], [0, 0, 1, 1], [], []>} : vector<256x4xf32>, vector<4x8xf32>, vector<256x8xf32> -> vector<256x8xf32>
    %146 = arith.addf %140, %145 : vector<256x8xf32>
    %147 = vector.extract_strided_slice %134 {offsets = [8, 0, 0], sizes = [16, 16, 4], strides = [1, 1, 1]} : vector<24x16x4xf32> to vector<16x16x4xf32>
    %148 = vector.shape_cast %147 : vector<16x16x4xf32> to vector<256x4xf32>
    %c2_182 = arith.constant 2 : index
    %c2_183 = arith.constant 2 : index
    %c0_184 = arith.constant 0 : index
    %c0_185 = arith.constant 0 : index
    %c0_186 = arith.constant 0 : index
    %149 = vector.load %arg3[%c2_182, %c2_183, %c0_184, %c0_185, %c0_186] : memref<4x3x3x4x8xf32, #tpu.memory_space<vmem>>, vector<1x1x1x4x8xf32>
    %150 = vector.shape_cast %149 : vector<1x1x1x4x8xf32> to vector<4x8xf32>
    %cst_187 = arith.constant dense<0.000000e+00> : vector<256x8xf32>
    %151 = tpu.matmul %148, %150, %cst_187 {dimension_numbers = #tpu.dot_dimension_numbers<[1], [0], [0], [1], [0, 0, 1, 1], [], []>} : vector<256x4xf32>, vector<4x8xf32>, vector<256x8xf32> -> vector<256x8xf32>
    %152 = arith.addf %146, %151 : vector<256x8xf32>
    %c4_188 = arith.constant 4 : index
    %c8_189 = arith.constant 8 : index
    %c0_190 = arith.constant 0 : index
    %153 = vector.load %arg13[%c4_188, %c8_189, %c0_190] : memref<32x32x4xf32, #tpu.memory_space<vmem>>, vector<16x16x4xf32>
    %154 = vector.shape_cast %153 : vector<16x16x4xf32> to vector<256x4xf32>
    %c2_191 = arith.constant 2 : index
    %c0_192 = arith.constant 0 : index
    %c1_193 = arith.constant 1 : index
    %c0_194 = arith.constant 0 : index
    %c0_195 = arith.constant 0 : index
    %155 = vector.load %arg3[%c2_191, %c0_192, %c1_193, %c0_194, %c0_195] : memref<4x3x3x4x8xf32, #tpu.memory_space<vmem>>, vector<1x1x1x4x8xf32>
    %156 = vector.shape_cast %155 : vector<1x1x1x4x8xf32> to vector<4x8xf32>
    %cst_196 = arith.constant dense<0.000000e+00> : vector<256x8xf32>
    %157 = tpu.matmul %154, %156, %cst_196 {dimension_numbers = #tpu.dot_dimension_numbers<[1], [0], [0], [1], [0, 0, 1, 1], [], []>} : vector<256x4xf32>, vector<4x8xf32>, vector<256x8xf32> -> vector<256x8xf32>
    %158 = arith.addf %152, %157 : vector<256x8xf32>
    %c8_197 = arith.constant 8 : index
    %c8_198 = arith.constant 8 : index
    %c0_199 = arith.constant 0 : index
    %159 = vector.load %arg13[%c8_197, %c8_198, %c0_199] : memref<32x32x4xf32, #tpu.memory_space<vmem>>, vector<16x16x4xf32>
    %160 = vector.shape_cast %159 : vector<16x16x4xf32> to vector<256x4xf32>
    %c2_200 = arith.constant 2 : index
    %c1_201 = arith.constant 1 : index
    %c1_202 = arith.constant 1 : index
    %c0_203 = arith.constant 0 : index
    %c0_204 = arith.constant 0 : index
    %161 = vector.load %arg3[%c2_200, %c1_201, %c1_202, %c0_203, %c0_204] : memref<4x3x3x4x8xf32, #tpu.memory_space<vmem>>, vector<1x1x1x4x8xf32>
    %162 = vector.shape_cast %161 : vector<1x1x1x4x8xf32> to vector<4x8xf32>
    %cst_205 = arith.constant dense<0.000000e+00> : vector<256x8xf32>
    %163 = tpu.matmul %160, %162, %cst_205 {dimension_numbers = #tpu.dot_dimension_numbers<[1], [0], [0], [1], [0, 0, 1, 1], [], []>} : vector<256x4xf32>, vector<4x8xf32>, vector<256x8xf32> -> vector<256x8xf32>
    %164 = arith.addf %158, %163 : vector<256x8xf32>
    %c12 = arith.constant 12 : index
    %c8_206 = arith.constant 8 : index
    %c0_207 = arith.constant 0 : index
    %165 = vector.load %arg13[%c12, %c8_206, %c0_207] : memref<32x32x4xf32, #tpu.memory_space<vmem>>, vector<16x16x4xf32>
    %166 = vector.shape_cast %165 : vector<16x16x4xf32> to vector<256x4xf32>
    %c2_208 = arith.constant 2 : index
    %c2_209 = arith.constant 2 : index
    %c1_210 = arith.constant 1 : index
    %c0_211 = arith.constant 0 : index
    %c0_212 = arith.constant 0 : index
    %167 = vector.load %arg3[%c2_208, %c2_209, %c1_210, %c0_211, %c0_212] : memref<4x3x3x4x8xf32, #tpu.memory_space<vmem>>, vector<1x1x1x4x8xf32>
    %168 = vector.shape_cast %167 : vector<1x1x1x4x8xf32> to vector<4x8xf32>
    %cst_213 = arith.constant dense<0.000000e+00> : vector<256x8xf32>
    %169 = tpu.matmul %166, %168, %cst_213 {dimension_numbers = #tpu.dot_dimension_numbers<[1], [0], [0], [1], [0, 0, 1, 1], [], []>} : vector<256x4xf32>, vector<4x8xf32>, vector<256x8xf32> -> vector<256x8xf32>
    %170 = arith.addf %164, %169 : vector<256x8xf32>
    %c4_214 = arith.constant 4 : index
    %c12_215 = arith.constant 12 : index
    %c0_216 = arith.constant 0 : index
    %171 = vector.load %arg13[%c4_214, %c12_215, %c0_216] : memref<32x32x4xf32, #tpu.memory_space<vmem>>, vector<24x16x4xf32>
    %172 = vector.extract_strided_slice %171 {offsets = [0, 0, 0], sizes = [16, 16, 4], strides = [1, 1, 1]} : vector<24x16x4xf32> to vector<16x16x4xf32>
    %173 = vector.shape_cast %172 : vector<16x16x4xf32> to vector<256x4xf32>
    %c2_217 = arith.constant 2 : index
    %c0_218 = arith.constant 0 : index
    %c2_219 = arith.constant 2 : index
    %c0_220 = arith.constant 0 : index
    %c0_221 = arith.constant 0 : index
    %174 = vector.load %arg3[%c2_217, %c0_218, %c2_219, %c0_220, %c0_221] : memref<4x3x3x4x8xf32, #tpu.memory_space<vmem>>, vector<1x1x1x4x8xf32>
    %175 = vector.shape_cast %174 : vector<1x1x1x4x8xf32> to vector<4x8xf32>
    %cst_222 = arith.constant dense<0.000000e+00> : vector<256x8xf32>
    %176 = tpu.matmul %173, %175, %cst_222 {dimension_numbers = #tpu.dot_dimension_numbers<[1], [0], [0], [1], [0, 0, 1, 1], [], []>} : vector<256x4xf32>, vector<4x8xf32>, vector<256x8xf32> -> vector<256x8xf32>
    %177 = arith.addf %170, %176 : vector<256x8xf32>
    %178 = vector.extract_strided_slice %171 {offsets = [4, 0, 0], sizes = [16, 16, 4], strides = [1, 1, 1]} : vector<24x16x4xf32> to vector<16x16x4xf32>
    %179 = vector.shape_cast %178 : vector<16x16x4xf32> to vector<256x4xf32>
    %c2_223 = arith.constant 2 : index
    %c1_224 = arith.constant 1 : index
    %c2_225 = arith.constant 2 : index
    %c0_226 = arith.constant 0 : index
    %c0_227 = arith.constant 0 : index
    %180 = vector.load %arg3[%c2_223, %c1_224, %c2_225, %c0_226, %c0_227] : memref<4x3x3x4x8xf32, #tpu.memory_space<vmem>>, vector<1x1x1x4x8xf32>
    %181 = vector.shape_cast %180 : vector<1x1x1x4x8xf32> to vector<4x8xf32>
    %cst_228 = arith.constant dense<0.000000e+00> : vector<256x8xf32>
    %182 = tpu.matmul %179, %181, %cst_228 {dimension_numbers = #tpu.dot_dimension_numbers<[1], [0], [0], [1], [0, 0, 1, 1], [], []>} : vector<256x4xf32>, vector<4x8xf32>, vector<256x8xf32> -> vector<256x8xf32>
    %183 = arith.addf %177, %182 : vector<256x8xf32>
    %184 = vector.extract_strided_slice %171 {offsets = [8, 0, 0], sizes = [16, 16, 4], strides = [1, 1, 1]} : vector<24x16x4xf32> to vector<16x16x4xf32>
    %185 = vector.shape_cast %184 : vector<16x16x4xf32> to vector<256x4xf32>
    %c2_229 = arith.constant 2 : index
    %c2_230 = arith.constant 2 : index
    %c2_231 = arith.constant 2 : index
    %c0_232 = arith.constant 0 : index
    %c0_233 = arith.constant 0 : index
    %186 = vector.load %arg3[%c2_229, %c2_230, %c2_231, %c0_232, %c0_233] : memref<4x3x3x4x8xf32, #tpu.memory_space<vmem>>, vector<1x1x1x4x8xf32>
    %187 = vector.shape_cast %186 : vector<1x1x1x4x8xf32> to vector<4x8xf32>
    %cst_234 = arith.constant dense<0.000000e+00> : vector<256x8xf32>
    %188 = tpu.matmul %185, %187, %cst_234 {dimension_numbers = #tpu.dot_dimension_numbers<[1], [0], [0], [1], [0, 0, 1, 1], [], []>} : vector<256x4xf32>, vector<4x8xf32>, vector<256x8xf32> -> vector<256x8xf32>
    %189 = arith.addf %183, %188 : vector<256x8xf32>
    %c0_235 = arith.constant 0 : index
    %c0_236 = arith.constant 0 : index
    %c0_237 = arith.constant 0 : index
    %190 = vector.load %arg13[%c0_235, %c0_236, %c0_237] : memref<32x32x4xf32, #tpu.memory_space<vmem>>, vector<16x16x4xf32>
    %191 = vector.shape_cast %190 : vector<16x16x4xf32> to vector<256x4xf32>
    %c3 = arith.constant 3 : index
    %c0_238 = arith.constant 0 : index
    %c0_239 = arith.constant 0 : index
    %c0_240 = arith.constant 0 : index
    %c0_241 = arith.constant 0 : index
    %192 = vector.load %arg3[%c3, %c0_238, %c0_239, %c0_240, %c0_241] : memref<4x3x3x4x8xf32, #tpu.memory_space<vmem>>, vector<1x1x1x4x8xf32>
    %193 = vector.shape_cast %192 : vector<1x1x1x4x8xf32> to vector<4x8xf32>
    %cst_242 = arith.constant dense<0.000000e+00> : vector<256x8xf32>
    %194 = tpu.matmul %191, %193, %cst_242 {dimension_numbers = #tpu.dot_dimension_numbers<[1], [0], [0], [1], [0, 0, 1, 1], [], []>} : vector<256x4xf32>, vector<4x8xf32>, vector<256x8xf32> -> vector<256x8xf32>
    %195 = arith.addf %189, %194 : vector<256x8xf32>
    %c8_243 = arith.constant 8 : index
    %c0_244 = arith.constant 0 : index
    %c0_245 = arith.constant 0 : index
    %196 = vector.load %arg13[%c8_243, %c0_244, %c0_245] : memref<32x32x4xf32, #tpu.memory_space<vmem>>, vector<16x16x4xf32>
    %197 = vector.shape_cast %196 : vector<16x16x4xf32> to vector<256x4xf32>
    %c3_246 = arith.constant 3 : index
    %c1_247 = arith.constant 1 : index
    %c0_248 = arith.constant 0 : index
    %c0_249 = arith.constant 0 : index
    %c0_250 = arith.constant 0 : index
    %198 = vector.load %arg3[%c3_246, %c1_247, %c0_248, %c0_249, %c0_250] : memref<4x3x3x4x8xf32, #tpu.memory_space<vmem>>, vector<1x1x1x4x8xf32>
    %199 = vector.shape_cast %198 : vector<1x1x1x4x8xf32> to vector<4x8xf32>
    %cst_251 = arith.constant dense<0.000000e+00> : vector<256x8xf32>
    %200 = tpu.matmul %197, %199, %cst_251 {dimension_numbers = #tpu.dot_dimension_numbers<[1], [0], [0], [1], [0, 0, 1, 1], [], []>} : vector<256x4xf32>, vector<4x8xf32>, vector<256x8xf32> -> vector<256x8xf32>
    %201 = arith.addf %195, %200 : vector<256x8xf32>
    %c16 = arith.constant 16 : index
    %c0_252 = arith.constant 0 : index
    %c0_253 = arith.constant 0 : index
    %202 = vector.load %arg13[%c16, %c0_252, %c0_253] : memref<32x32x4xf32, #tpu.memory_space<vmem>>, vector<16x16x4xf32>
    %203 = vector.shape_cast %202 : vector<16x16x4xf32> to vector<256x4xf32>
    %c3_254 = arith.constant 3 : index
    %c2_255 = arith.constant 2 : index
    %c0_256 = arith.constant 0 : index
    %c0_257 = arith.constant 0 : index
    %c0_258 = arith.constant 0 : index
    %204 = vector.load %arg3[%c3_254, %c2_255, %c0_256, %c0_257, %c0_258] : memref<4x3x3x4x8xf32, #tpu.memory_space<vmem>>, vector<1x1x1x4x8xf32>
    %205 = vector.shape_cast %204 : vector<1x1x1x4x8xf32> to vector<4x8xf32>
    %cst_259 = arith.constant dense<0.000000e+00> : vector<256x8xf32>
    %206 = tpu.matmul %203, %205, %cst_259 {dimension_numbers = #tpu.dot_dimension_numbers<[1], [0], [0], [1], [0, 0, 1, 1], [], []>} : vector<256x4xf32>, vector<4x8xf32>, vector<256x8xf32> -> vector<256x8xf32>
    %207 = arith.addf %201, %206 : vector<256x8xf32>
    %c0_260 = arith.constant 0 : index
    %c8_261 = arith.constant 8 : index
    %c0_262 = arith.constant 0 : index
    %208 = vector.load %arg13[%c0_260, %c8_261, %c0_262] : memref<32x32x4xf32, #tpu.memory_space<vmem>>, vector<16x16x4xf32>
    %209 = vector.shape_cast %208 : vector<16x16x4xf32> to vector<256x4xf32>
    %c3_263 = arith.constant 3 : index
    %c0_264 = arith.constant 0 : index
    %c1_265 = arith.constant 1 : index
    %c0_266 = arith.constant 0 : index
    %c0_267 = arith.constant 0 : index
    %210 = vector.load %arg3[%c3_263, %c0_264, %c1_265, %c0_266, %c0_267] : memref<4x3x3x4x8xf32, #tpu.memory_space<vmem>>, vector<1x1x1x4x8xf32>
    %211 = vector.shape_cast %210 : vector<1x1x1x4x8xf32> to vector<4x8xf32>
    %cst_268 = arith.constant dense<0.000000e+00> : vector<256x8xf32>
    %212 = tpu.matmul %209, %211, %cst_268 {dimension_numbers = #tpu.dot_dimension_numbers<[1], [0], [0], [1], [0, 0, 1, 1], [], []>} : vector<256x4xf32>, vector<4x8xf32>, vector<256x8xf32> -> vector<256x8xf32>
    %213 = arith.addf %207, %212 : vector<256x8xf32>
    %c8_269 = arith.constant 8 : index
    %c8_270 = arith.constant 8 : index
    %c0_271 = arith.constant 0 : index
    %214 = vector.load %arg13[%c8_269, %c8_270, %c0_271] : memref<32x32x4xf32, #tpu.memory_space<vmem>>, vector<16x16x4xf32>
    %215 = vector.shape_cast %214 : vector<16x16x4xf32> to vector<256x4xf32>
    %c3_272 = arith.constant 3 : index
    %c1_273 = arith.constant 1 : index
    %c1_274 = arith.constant 1 : index
    %c0_275 = arith.constant 0 : index
    %c0_276 = arith.constant 0 : index
    %216 = vector.load %arg3[%c3_272, %c1_273, %c1_274, %c0_275, %c0_276] : memref<4x3x3x4x8xf32, #tpu.memory_space<vmem>>, vector<1x1x1x4x8xf32>
    %217 = vector.shape_cast %216 : vector<1x1x1x4x8xf32> to vector<4x8xf32>
    %cst_277 = arith.constant dense<0.000000e+00> : vector<256x8xf32>
    %218 = tpu.matmul %215, %217, %cst_277 {dimension_numbers = #tpu.dot_dimension_numbers<[1], [0], [0], [1], [0, 0, 1, 1], [], []>} : vector<256x4xf32>, vector<4x8xf32>, vector<256x8xf32> -> vector<256x8xf32>
    %219 = arith.addf %213, %218 : vector<256x8xf32>
    %c16_278 = arith.constant 16 : index
    %c8_279 = arith.constant 8 : index
    %c0_280 = arith.constant 0 : index
    %220 = vector.load %arg13[%c16_278, %c8_279, %c0_280] : memref<32x32x4xf32, #tpu.memory_space<vmem>>, vector<16x16x4xf32>
    %221 = vector.shape_cast %220 : vector<16x16x4xf32> to vector<256x4xf32>
    %c3_281 = arith.constant 3 : index
    %c2_282 = arith.constant 2 : index
    %c1_283 = arith.constant 1 : index
    %c0_284 = arith.constant 0 : index
    %c0_285 = arith.constant 0 : index
    %222 = vector.load %arg3[%c3_281, %c2_282, %c1_283, %c0_284, %c0_285] : memref<4x3x3x4x8xf32, #tpu.memory_space<vmem>>, vector<1x1x1x4x8xf32>
    %223 = vector.shape_cast %222 : vector<1x1x1x4x8xf32> to vector<4x8xf32>
    %cst_286 = arith.constant dense<0.000000e+00> : vector<256x8xf32>
    %224 = tpu.matmul %221, %223, %cst_286 {dimension_numbers = #tpu.dot_dimension_numbers<[1], [0], [0], [1], [0, 0, 1, 1], [], []>} : vector<256x4xf32>, vector<4x8xf32>, vector<256x8xf32> -> vector<256x8xf32>
    %225 = arith.addf %219, %224 : vector<256x8xf32>
    %c0_287 = arith.constant 0 : index
    %c16_288 = arith.constant 16 : index
    %c0_289 = arith.constant 0 : index
    %226 = vector.load %arg13[%c0_287, %c16_288, %c0_289] : memref<32x32x4xf32, #tpu.memory_space<vmem>>, vector<16x16x4xf32>
    %227 = vector.shape_cast %226 : vector<16x16x4xf32> to vector<256x4xf32>
    %c3_290 = arith.constant 3 : index
    %c0_291 = arith.constant 0 : index
    %c2_292 = arith.constant 2 : index
    %c0_293 = arith.constant 0 : index
    %c0_294 = arith.constant 0 : index
    %228 = vector.load %arg3[%c3_290, %c0_291, %c2_292, %c0_293, %c0_294] : memref<4x3x3x4x8xf32, #tpu.memory_space<vmem>>, vector<1x1x1x4x8xf32>
    %229 = vector.shape_cast %228 : vector<1x1x1x4x8xf32> to vector<4x8xf32>
    %cst_295 = arith.constant dense<0.000000e+00> : vector<256x8xf32>
    %230 = tpu.matmul %227, %229, %cst_295 {dimension_numbers = #tpu.dot_dimension_numbers<[1], [0], [0], [1], [0, 0, 1, 1], [], []>} : vector<256x4xf32>, vector<4x8xf32>, vector<256x8xf32> -> vector<256x8xf32>
    %231 = arith.addf %225, %230 : vector<256x8xf32>
    %c8_296 = arith.constant 8 : index
    %c16_297 = arith.constant 16 : index
    %c0_298 = arith.constant 0 : index
    %232 = vector.load %arg13[%c8_296, %c16_297, %c0_298] : memref<32x32x4xf32, #tpu.memory_space<vmem>>, vector<16x16x4xf32>
    %233 = vector.shape_cast %232 : vector<16x16x4xf32> to vector<256x4xf32>
    %c3_299 = arith.constant 3 : index
    %c1_300 = arith.constant 1 : index
    %c2_301 = arith.constant 2 : index
    %c0_302 = arith.constant 0 : index
    %c0_303 = arith.constant 0 : index
    %234 = vector.load %arg3[%c3_299, %c1_300, %c2_301, %c0_302, %c0_303] : memref<4x3x3x4x8xf32, #tpu.memory_space<vmem>>, vector<1x1x1x4x8xf32>
    %235 = vector.shape_cast %234 : vector<1x1x1x4x8xf32> to vector<4x8xf32>
    %cst_304 = arith.constant dense<0.000000e+00> : vector<256x8xf32>
    %236 = tpu.matmul %233, %235, %cst_304 {dimension_numbers = #tpu.dot_dimension_numbers<[1], [0], [0], [1], [0, 0, 1, 1], [], []>} : vector<256x4xf32>, vector<4x8xf32>, vector<256x8xf32> -> vector<256x8xf32>
    %237 = arith.addf %231, %236 : vector<256x8xf32>
    %c16_305 = arith.constant 16 : index
    %c16_306 = arith.constant 16 : index
    %c0_307 = arith.constant 0 : index
    %238 = vector.load %arg13[%c16_305, %c16_306, %c0_307] : memref<32x32x4xf32, #tpu.memory_space<vmem>>, vector<16x16x4xf32>
    %239 = vector.shape_cast %238 : vector<16x16x4xf32> to vector<256x4xf32>
    %c3_308 = arith.constant 3 : index
    %c2_309 = arith.constant 2 : index
    %c2_310 = arith.constant 2 : index
    %c0_311 = arith.constant 0 : index
    %c0_312 = arith.constant 0 : index
    %240 = vector.load %arg3[%c3_308, %c2_309, %c2_310, %c0_311, %c0_312] : memref<4x3x3x4x8xf32, #tpu.memory_space<vmem>>, vector<1x1x1x4x8xf32>
    %241 = vector.shape_cast %240 : vector<1x1x1x4x8xf32> to vector<4x8xf32>
    %cst_313 = arith.constant dense<0.000000e+00> : vector<256x8xf32>
    %242 = tpu.matmul %239, %241, %cst_313 {dimension_numbers = #tpu.dot_dimension_numbers<[1], [0], [0], [1], [0, 0, 1, 1], [], []>} : vector<256x4xf32>, vector<4x8xf32>, vector<256x8xf32> -> vector<256x8xf32>
    %243 = arith.addf %237, %242 : vector<256x8xf32>
    %c0_314 = arith.constant 0 : index
    %c0_315 = arith.constant 0 : index
    %244 = vector.load %arg5[%c0_314, %c0_315] : memref<1x8xf32, #tpu.memory_space<vmem>>, vector<1x8xf32>
    %245 = vector.shape_cast %244 : vector<1x8xf32> to vector<1x8xf32>
    %246 = vector.broadcast %245 : vector<1x8xf32> to vector<256x8xf32>
    %cst_316 = arith.constant 0.000000e+00 : f32
    %247 = vector.broadcast %cst_316 : f32 to vector<256x8xf32>
    %248 = arith.cmpf ogt, %243, %247 : vector<256x8xf32>
    %249 = arith.mulf %246, %243 : vector<256x8xf32>
    %250 = arith.select %248, %243, %249 : vector<256x8xi1>, vector<256x8xf32>
    %251 = vector.shape_cast %250 : vector<256x8xf32> to vector<16x16x8xf32>
    %c1_317 = arith.constant 1 : index
    %c8_318 = arith.constant 8 : index
    %c0_319 = arith.constant 0 : index
    %252 = vector.load %arg14[%c1_317, %c8_318, %c0_319] : memref<18x32x8xf32, #tpu.memory_space<vmem>>, vector<16x16x8xf32>
    tpu.vector_store %arg14[%c1_317, %c8_318, %c0_319], %251 {strides = array<i32>} : memref<18x32x8xf32, #tpu.memory_space<vmem>>, vector<16x16x8xf32>,
    %c0_320 = arith.constant 0 : index
    %c0_321 = arith.constant 0 : index
    %253 = vector.load %arg7[%c0_320, %c0_321] : memref<1x8xf32, #tpu.memory_space<vmem>>, vector<1x8xf32>
    %254 = vector.shape_cast %253 : vector<1x8xf32> to vector<1x8xf32>
    %255 = vector.broadcast %254 : vector<1x8xf32> to vector<256x8xf32>
    %c0_322 = arith.constant 0 : index
    %c7_323 = arith.constant 7 : index
    %c0_324 = arith.constant 0 : index
    %256 = vector.load %arg14[%c0_322, %c7_323, %c0_324] : memref<18x32x8xf32, #tpu.memory_space<vmem>>, vector<18x16x8xf32>
    %257 = vector.extract_strided_slice %256 {offsets = [0, 0, 0], sizes = [16, 16, 8], strides = [1, 1, 1]} : vector<18x16x8xf32> to vector<16x16x8xf32>
    %258 = vector.shape_cast %257 : vector<16x16x8xf32> to vector<256x8xf32>
    %c0_325 = arith.constant 0 : index
    %c0_326 = arith.constant 0 : index
    %c0_327 = arith.constant 0 : index
    %c0_328 = arith.constant 0 : index
    %259 = vector.load %arg6[%c0_325, %c0_326, %c0_327, %c0_328] : memref<3x3x8x8xf32, #tpu.memory_space<vmem>>, vector<1x1x8x8xf32>
    %260 = vector.shape_cast %259 : vector<1x1x8x8xf32> to vector<8x8xf32>
    %cst_329 = arith.constant dense<0.000000e+00> : vector<256x8xf32>
    %261 = tpu.matmul %258, %260, %cst_329 {dimension_numbers = #tpu.dot_dimension_numbers<[1], [0], [0], [1], [0, 0, 1, 1], [], []>} : vector<256x8xf32>, vector<8x8xf32>, vector<256x8xf32> -> vector<256x8xf32>
    %262 = arith.addf %255, %261 : vector<256x8xf32>
    %263 = vector.extract_strided_slice %256 {offsets = [1, 0, 0], sizes = [16, 16, 8], strides = [1, 1, 1]} : vector<18x16x8xf32> to vector<16x16x8xf32>
    %264 = vector.shape_cast %263 : vector<16x16x8xf32> to vector<256x8xf32>
    %c1_330 = arith.constant 1 : index
    %c0_331 = arith.constant 0 : index
    %c0_332 = arith.constant 0 : index
    %c0_333 = arith.constant 0 : index
    %265 = vector.load %arg6[%c1_330, %c0_331, %c0_332, %c0_333] : memref<3x3x8x8xf32, #tpu.memory_space<vmem>>, vector<1x1x8x8xf32>
    %266 = vector.shape_cast %265 : vector<1x1x8x8xf32> to vector<8x8xf32>
    %cst_334 = arith.constant dense<0.000000e+00> : vector<256x8xf32>
    %267 = tpu.matmul %264, %266, %cst_334 {dimension_numbers = #tpu.dot_dimension_numbers<[1], [0], [0], [1], [0, 0, 1, 1], [], []>} : vector<256x8xf32>, vector<8x8xf32>, vector<256x8xf32> -> vector<256x8xf32>
    %268 = arith.addf %262, %267 : vector<256x8xf32>
    %269 = vector.extract_strided_slice %256 {offsets = [2, 0, 0], sizes = [16, 16, 8], strides = [1, 1, 1]} : vector<18x16x8xf32> to vector<16x16x8xf32>
    %270 = vector.shape_cast %269 : vector<16x16x8xf32> to vector<256x8xf32>
    %c2_335 = arith.constant 2 : index
    %c0_336 = arith.constant 0 : index
    %c0_337 = arith.constant 0 : index
    %c0_338 = arith.constant 0 : index
    %271 = vector.load %arg6[%c2_335, %c0_336, %c0_337, %c0_338] : memref<3x3x8x8xf32, #tpu.memory_space<vmem>>, vector<1x1x8x8xf32>
    %272 = vector.shape_cast %271 : vector<1x1x8x8xf32> to vector<8x8xf32>
    %cst_339 = arith.constant dense<0.000000e+00> : vector<256x8xf32>
    %273 = tpu.matmul %270, %272, %cst_339 {dimension_numbers = #tpu.dot_dimension_numbers<[1], [0], [0], [1], [0, 0, 1, 1], [], []>} : vector<256x8xf32>, vector<8x8xf32>, vector<256x8xf32> -> vector<256x8xf32>
    %274 = arith.addf %268, %273 : vector<256x8xf32>
    %c0_340 = arith.constant 0 : index
    %c8_341 = arith.constant 8 : index
    %c0_342 = arith.constant 0 : index
    %275 = vector.load %arg14[%c0_340, %c8_341, %c0_342] : memref<18x32x8xf32, #tpu.memory_space<vmem>>, vector<16x16x8xf32>
    %276 = vector.shape_cast %275 : vector<16x16x8xf32> to vector<256x8xf32>
    %c0_343 = arith.constant 0 : index
    %c1_344 = arith.constant 1 : index
    %c0_345 = arith.constant 0 : index
    %c0_346 = arith.constant 0 : index
    %277 = vector.load %arg6[%c0_343, %c1_344, %c0_345, %c0_346] : memref<3x3x8x8xf32, #tpu.memory_space<vmem>>, vector<1x1x8x8xf32>
    %278 = vector.shape_cast %277 : vector<1x1x8x8xf32> to vector<8x8xf32>
    %cst_347 = arith.constant dense<0.000000e+00> : vector<256x8xf32>
    %279 = tpu.matmul %276, %278, %cst_347 {dimension_numbers = #tpu.dot_dimension_numbers<[1], [0], [0], [1], [0, 0, 1, 1], [], []>} : vector<256x8xf32>, vector<8x8xf32>, vector<256x8xf32> -> vector<256x8xf32>
    %280 = arith.addf %274, %279 : vector<256x8xf32>
    %c1_348 = arith.constant 1 : index
    %c8_349 = arith.constant 8 : index
    %c0_350 = arith.constant 0 : index
    %281 = vector.load %arg14[%c1_348, %c8_349, %c0_350] : memref<18x32x8xf32, #tpu.memory_space<vmem>>, vector<16x16x8xf32>
    %282 = vector.shape_cast %281 : vector<16x16x8xf32> to vector<256x8xf32>
    %c1_351 = arith.constant 1 : index
    %c1_352 = arith.constant 1 : index
    %c0_353 = arith.constant 0 : index
    %c0_354 = arith.constant 0 : index
    %283 = vector.load %arg6[%c1_351, %c1_352, %c0_353, %c0_354] : memref<3x3x8x8xf32, #tpu.memory_space<vmem>>, vector<1x1x8x8xf32>
    %284 = vector.shape_cast %283 : vector<1x1x8x8xf32> to vector<8x8xf32>
    %cst_355 = arith.constant dense<0.000000e+00> : vector<256x8xf32>
    %285 = tpu.matmul %282, %284, %cst_355 {dimension_numbers = #tpu.dot_dimension_numbers<[1], [0], [0], [1], [0, 0, 1, 1], [], []>} : vector<256x8xf32>, vector<8x8xf32>, vector<256x8xf32> -> vector<256x8xf32>
    %286 = arith.addf %280, %285 : vector<256x8xf32>
    %c2_356 = arith.constant 2 : index
    %c8_357 = arith.constant 8 : index
    %c0_358 = arith.constant 0 : index
    %287 = vector.load %arg14[%c2_356, %c8_357, %c0_358] : memref<18x32x8xf32, #tpu.memory_space<vmem>>, vector<16x16x8xf32>
    %288 = vector.shape_cast %287 : vector<16x16x8xf32> to vector<256x8xf32>
    %c2_359 = arith.constant 2 : index
    %c1_360 = arith.constant 1 : index
    %c0_361 = arith.constant 0 : index
    %c0_362 = arith.constant 0 : index
    %289 = vector.load %arg6[%c2_359, %c1_360, %c0_361, %c0_362] : memref<3x3x8x8xf32, #tpu.memory_space<vmem>>, vector<1x1x8x8xf32>
    %290 = vector.shape_cast %289 : vector<1x1x8x8xf32> to vector<8x8xf32>
    %cst_363 = arith.constant dense<0.000000e+00> : vector<256x8xf32>
    %291 = tpu.matmul %288, %290, %cst_363 {dimension_numbers = #tpu.dot_dimension_numbers<[1], [0], [0], [1], [0, 0, 1, 1], [], []>} : vector<256x8xf32>, vector<8x8xf32>, vector<256x8xf32> -> vector<256x8xf32>
    %292 = arith.addf %286, %291 : vector<256x8xf32>
    %c0_364 = arith.constant 0 : index
    %c9_365 = arith.constant 9 : index
    %c0_366 = arith.constant 0 : index
    %293 = vector.load %arg14[%c0_364, %c9_365, %c0_366] : memref<18x32x8xf32, #tpu.memory_space<vmem>>, vector<18x16x8xf32>
    %294 = vector.extract_strided_slice %293 {offsets = [0, 0, 0], sizes = [16, 16, 8], strides = [1, 1, 1]} : vector<18x16x8xf32> to vector<16x16x8xf32>
    %295 = vector.shape_cast %294 : vector<16x16x8xf32> to vector<256x8xf32>
    %c0_367 = arith.constant 0 : index
    %c2_368 = arith.constant 2 : index
    %c0_369 = arith.constant 0 : index
    %c0_370 = arith.constant 0 : index
    %296 = vector.load %arg6[%c0_367, %c2_368, %c0_369, %c0_370] : memref<3x3x8x8xf32, #tpu.memory_space<vmem>>, vector<1x1x8x8xf32>
    %297 = vector.shape_cast %296 : vector<1x1x8x8xf32> to vector<8x8xf32>
    %cst_371 = arith.constant dense<0.000000e+00> : vector<256x8xf32>
    %298 = tpu.matmul %295, %297, %cst_371 {dimension_numbers = #tpu.dot_dimension_numbers<[1], [0], [0], [1], [0, 0, 1, 1], [], []>} : vector<256x8xf32>, vector<8x8xf32>, vector<256x8xf32> -> vector<256x8xf32>
    %299 = arith.addf %292, %298 : vector<256x8xf32>
    %300 = vector.extract_strided_slice %293 {offsets = [1, 0, 0], sizes = [16, 16, 8], strides = [1, 1, 1]} : vector<18x16x8xf32> to vector<16x16x8xf32>
    %301 = vector.shape_cast %300 : vector<16x16x8xf32> to vector<256x8xf32>
    %c1_372 = arith.constant 1 : index
    %c2_373 = arith.constant 2 : index
    %c0_374 = arith.constant 0 : index
    %c0_375 = arith.constant 0 : index
    %302 = vector.load %arg6[%c1_372, %c2_373, %c0_374, %c0_375] : memref<3x3x8x8xf32, #tpu.memory_space<vmem>>, vector<1x1x8x8xf32>
    %303 = vector.shape_cast %302 : vector<1x1x8x8xf32> to vector<8x8xf32>
    %cst_376 = arith.constant dense<0.000000e+00> : vector<256x8xf32>
    %304 = tpu.matmul %301, %303, %cst_376 {dimension_numbers = #tpu.dot_dimension_numbers<[1], [0], [0], [1], [0, 0, 1, 1], [], []>} : vector<256x8xf32>, vector<8x8xf32>, vector<256x8xf32> -> vector<256x8xf32>
    %305 = arith.addf %299, %304 : vector<256x8xf32>
    %306 = vector.extract_strided_slice %293 {offsets = [2, 0, 0], sizes = [16, 16, 8], strides = [1, 1, 1]} : vector<18x16x8xf32> to vector<16x16x8xf32>
    %307 = vector.shape_cast %306 : vector<16x16x8xf32> to vector<256x8xf32>
    %c2_377 = arith.constant 2 : index
    %c2_378 = arith.constant 2 : index
    %c0_379 = arith.constant 0 : index
    %c0_380 = arith.constant 0 : index
    %308 = vector.load %arg6[%c2_377, %c2_378, %c0_379, %c0_380] : memref<3x3x8x8xf32, #tpu.memory_space<vmem>>, vector<1x1x8x8xf32>
    %309 = vector.shape_cast %308 : vector<1x1x8x8xf32> to vector<8x8xf32>
    %cst_381 = arith.constant dense<0.000000e+00> : vector<256x8xf32>
    %310 = tpu.matmul %307, %309, %cst_381 {dimension_numbers = #tpu.dot_dimension_numbers<[1], [0], [0], [1], [0, 0, 1, 1], [], []>} : vector<256x8xf32>, vector<8x8xf32>, vector<256x8xf32> -> vector<256x8xf32>
    %311 = arith.addf %305, %310 : vector<256x8xf32>
    %c0_382 = arith.constant 0 : index
    %c0_383 = arith.constant 0 : index
    %c0_384 = arith.constant 0 : index
    %c0_385 = arith.constant 0 : index
    %312 = vector.load %arg1[%c0_382, %c0_383, %c0_384, %c0_385] : memref<1x16x16x4xf32, #tpu.memory_space<vmem>>, vector<1x16x16x4xf32>
    %313 = vector.shape_cast %312 : vector<1x16x16x4xf32> to vector<16x16x4xf32>
    %314 = vector.shape_cast %313 : vector<16x16x4xf32> to vector<256x4xf32>
    %c0_386 = arith.constant 0 : index
    %c0_387 = arith.constant 0 : index
    %c0_388 = arith.constant 0 : index
    %c0_389 = arith.constant 0 : index
    %315 = vector.load %arg2[%c0_386, %c0_387, %c0_388, %c0_389] : memref<1x16x16x4xf32, #tpu.memory_space<vmem>>, vector<1x16x16x4xf32>
    %316 = vector.shape_cast %315 : vector<1x16x16x4xf32> to vector<16x16x4xf32>
    %317 = vector.shape_cast %316 : vector<16x16x4xf32> to vector<256x4xf32>
    %c0_390 = arith.constant 0 : index
    %c0_391 = arith.constant 0 : index
    %318 = vector.load %arg11[%c0_390, %c0_391] : memref<1x128xf32, #tpu.memory_space<vmem>>, vector<1x128xf32>
    %319 = vector.shape_cast %318 : vector<1x128xf32> to vector<1x128xf32>
    %320 = vector.broadcast %319 : vector<1x128xf32> to vector<256x128xf32>
    %c0_392 = arith.constant 0 : index
    %c0_393 = arith.constant 0 : index
    %321 = vector.load %arg8[%c0_392, %c0_393] : memref<4x128xf32, #tpu.memory_space<vmem>>, vector<4x128xf32>
    %cst_394 = arith.constant dense<0.000000e+00> : vector<256x128xf32>
    %322 = tpu.matmul %314, %321, %cst_394 {dimension_numbers = #tpu.dot_dimension_numbers<[1], [0], [0], [1], [0, 0, 1, 1], [], []>} : vector<256x4xf32>, vector<4x128xf32>, vector<256x128xf32> -> vector<256x128xf32>
    %323 = arith.addf %320, %322 : vector<256x128xf32>
    %c0_395 = arith.constant 0 : index
    %c0_396 = arith.constant 0 : index
    %324 = vector.load %arg9[%c0_395, %c0_396] : memref<4x128xf32, #tpu.memory_space<vmem>>, vector<4x128xf32>
    %cst_397 = arith.constant dense<0.000000e+00> : vector<256x128xf32>
    %325 = tpu.matmul %317, %324, %cst_397 {dimension_numbers = #tpu.dot_dimension_numbers<[1], [0], [0], [1], [0, 0, 1, 1], [], []>} : vector<256x4xf32>, vector<4x128xf32>, vector<256x128xf32> -> vector<256x128xf32>
    %326 = arith.addf %323, %325 : vector<256x128xf32>
    %c0_398 = arith.constant 0 : index
    %c0_399 = arith.constant 0 : index
    %327 = vector.load %arg10[%c0_398, %c0_399] : memref<8x128xf32, #tpu.memory_space<vmem>>, vector<8x128xf32>
    %cst_400 = arith.constant dense<0.000000e+00> : vector<256x128xf32>
    %328 = tpu.matmul %311, %327, %cst_400 {dimension_numbers = #tpu.dot_dimension_numbers<[1], [0], [0], [1], [0, 0, 1, 1], [], []>} : vector<256x8xf32>, vector<8x128xf32>, vector<256x128xf32> -> vector<256x128xf32>
    %329 = arith.addf %326, %328 : vector<256x128xf32>
    %330 = tpu.transpose %329, [1, 0] : vector<256x128xf32> -> vector<128x256xf32>
    %331 = vector.extract_strided_slice %330 {offsets = [0, 0], sizes = [8, 256], strides = [1, 1]} : vector<128x256xf32> to vector<8x256xf32>
    %c0_401 = arith.constant 0 : index
    %c0_402 = arith.constant 0 : index
    %c0_403 = arith.constant 0 : index
    %332 = vector.load %arg12[%c0_401, %c0_402, %c0_403] : memref<1x8x256xf32, #tpu.memory_space<vmem>>, vector<1x8x256xf32>
    %333 = vector.shape_cast %332 : vector<1x8x256xf32> to vector<8x256xf32>
    %334 = vector.shape_cast %331 : vector<8x256xf32> to vector<1x8x256xf32>
    tpu.vector_store %arg12[%c0_401, %c0_402, %c0_403], %334 {strides = array<i32>} : memref<1x8x256xf32, #tpu.memory_space<vmem>>, vector<1x8x256xf32>,
    return
  }
  func.func @transform_0(%arg0: i32) -> (i32, i32, i32, i32) {
    %c0_i32 = arith.constant 0 : i32
    %c0_i32_0 = arith.constant 0 : i32
    %c0_i32_1 = arith.constant 0 : i32
    %c0_i32_2 = arith.constant 0 : i32
    return %arg0, %c0_i32, %c0_i32_0, %c0_i32_1 : i32, i32, i32, i32
  }
  func.func @transform_1(%arg0: i32) -> (i32, i32, i32, i32) {
    %c0_i32 = arith.constant 0 : i32
    %c0_i32_0 = arith.constant 0 : i32
    %c0_i32_1 = arith.constant 0 : i32
    %c0_i32_2 = arith.constant 0 : i32
    return %arg0, %c0_i32, %c0_i32_0, %c0_i32_1 : i32, i32, i32, i32
  }
  func.func @transform_2(%arg0: i32) -> (i32, i32, i32, i32, i32) {
    %c0_i32 = arith.constant 0 : i32
    %c0_i32_0 = arith.constant 0 : i32
    %c0_i32_1 = arith.constant 0 : i32
    %c0_i32_2 = arith.constant 0 : i32
    %c0_i32_3 = arith.constant 0 : i32
    %c0_i32_4 = arith.constant 0 : i32
    return %c0_i32, %c0_i32_0, %c0_i32_1, %c0_i32_2, %c0_i32_3 : i32, i32, i32, i32, i32
  }
  func.func @transform_3(%arg0: i32) -> (i32, i32) {
    %c0_i32 = arith.constant 0 : i32
    %c0_i32_0 = arith.constant 0 : i32
    %c0_i32_1 = arith.constant 0 : i32
    return %c0_i32, %c0_i32_0 : i32, i32
  }
  func.func @transform_4(%arg0: i32) -> (i32, i32) {
    %c0_i32 = arith.constant 0 : i32
    %c0_i32_0 = arith.constant 0 : i32
    %c0_i32_1 = arith.constant 0 : i32
    return %c0_i32, %c0_i32_0 : i32, i32
  }
  func.func @transform_5(%arg0: i32) -> (i32, i32, i32, i32) {
    %c0_i32 = arith.constant 0 : i32
    %c0_i32_0 = arith.constant 0 : i32
    %c0_i32_1 = arith.constant 0 : i32
    %c0_i32_2 = arith.constant 0 : i32
    %c0_i32_3 = arith.constant 0 : i32
    return %c0_i32, %c0_i32_0, %c0_i32_1, %c0_i32_2 : i32, i32, i32, i32
  }
  func.func @transform_6(%arg0: i32) -> (i32, i32) {
    %c0_i32 = arith.constant 0 : i32
    %c0_i32_0 = arith.constant 0 : i32
    %c0_i32_1 = arith.constant 0 : i32
    return %c0_i32, %c0_i32_0 : i32, i32
  }
  func.func @transform_7(%arg0: i32) -> (i32, i32) {
    %c0_i32 = arith.constant 0 : i32
    %c0_i32_0 = arith.constant 0 : i32
    %c0_i32_1 = arith.constant 0 : i32
    return %c0_i32, %c0_i32_0 : i32, i32
  }
  func.func @transform_8(%arg0: i32) -> (i32, i32) {
    %c0_i32 = arith.constant 0 : i32
    %c0_i32_0 = arith.constant 0 : i32
    %c0_i32_1 = arith.constant 0 : i32
    return %c0_i32, %c0_i32_0 : i32, i32
  }
  func.func @transform_9(%arg0: i32) -> (i32, i32) {
    %c0_i32 = arith.constant 0 : i32
    %c0_i32_0 = arith.constant 0 : i32
    %c0_i32_1 = arith.constant 0 : i32
    return %c0_i32, %c0_i32_0 : i32, i32
  }
  func.func @transform_10(%arg0: i32) -> (i32, i32) {
    %c0_i32 = arith.constant 0 : i32
    %c0_i32_0 = arith.constant 0 : i32
    %c0_i32_1 = arith.constant 0 : i32
    return %c0_i32, %c0_i32_0 : i32, i32
  }
  func.func @transform_11(%arg0: i32) -> (i32, i32, i32) {
    %c0_i32 = arith.constant 0 : i32
    %c0_i32_0 = arith.constant 0 : i32
    %c0_i32_1 = arith.constant 0 : i32
    return %arg0, %c0_i32, %c0_i32_0 : i32, i32, i32
  }
}

</mosaic_0001>

<bundles_post_ra>
// kernel: tpu_custom_call.1
= control target key start
LH: loop header
LB: loop body
LE: loop exit
PB: predicated region body
PF: predicated region fallthrough
CT: control target
= control target key end

     0   :  { %s29355_s0 = inlined_call_operand.vmem [shape: f32[2,16,16,4], index: 0, kind: input, shape index: {}]   ;;  %s29356_s1 = inlined_call_operand.vmem [shape: f32[2,16,16,4], index: 1, kind: input, shape index: {}]   ;;  %s29357_s2 = inlined_call_operand.vmem [shape: f32[4,3,3,4,8], index: 2, kind: input, shape index: {}]   ;;  %s29358_s3 = inlined_call_operand.vmem [shape: f32[1,8], index: 3, kind: input, shape index: {}]   ;;  %s29359_s4 = inlined_call_operand.vmem [shape: f32[1,8], index: 4, kind: input, shape index: {}]   ;;  %s29360_s5 = inlined_call_operand.vmem [shape: f32[3,3,8,8], index: 5, kind: input, shape index: {}]   ;;  %s29361_s6 = inlined_call_operand.vmem [shape: f32[1,8], index: 6, kind: input, shape index: {}]   ;;  %s29362_s7 = inlined_call_operand.vmem [shape: f32[4,128], index: 7, kind: input, shape index: {}]   ;;  %s29363_s8 = inlined_call_operand.vmem [shape: f32[4,128], index: 8, kind: input, shape index: {}]   ;;  %s29364_s9 = inlined_call_operand.vmem [shape: f32[8,128], index: 9, kind: input, shape index: {}]   ;;  %s29365_s10 = inlined_call_operand.vmem [shape: f32[1,128], index: 10, kind: input, shape index: {}]   ;;  %s29366_s11 = inlined_call_operand.hbm [shape: f32[2,8,256], index: 11, kind: output, shape index: {}]  }
   0x1   :  { %29387 = sst [smem:[#allocation21_spill]] %s29355_s0 }
   0x2   :  { %16 = vsyncpa [#allocation5], 0 }
   0x3   :  { %18 = vsyncpa [#allocation5 + $0x1], 0  ;;  %s24814_s17 = smov 0   ;;  %s24816_s18 = smov 0  }
   0x4   :  { %s24818_s19 = smov 0   ;;  %s24820_s20 = smov 0  }
   0x5 LB: > { %s24835_s21 = sadd.s32 4294967295, %s24750_s20   ;;  %s17405_s22 = sadd.s32 4294967294, %s24750_s20   ;;  %s24750_s20 = sphi %s24820_s20, %s29439_s20   ;;  %s24746_s19 = sphi %s24818_s19, %s29438_s19   ;;  %s24742_s18 = sphi %s24816_s18, %s29437_s18   ;;  %s24738_s17 = sphi %s24814_s17, %s29436_s17  }
   0x6   : > { %s24839_s23 = sadd.s32 1, %s24750_s20   ;;  %s272_s24 = sadd.s32 1, %s24746_s19 }
   0x7   : > { %s269_s25 = ssub.s32 %s24750_s20, %s24839_s23  ;;  %p282_p0 = scmp.ne.s32.totalorder %s24746_s19, %s24742_s18 }
   0x8   : > { %p270_p1 = scmp.eq.s32.totalorder %s269_s25, 0  ;;  %p283_p2 = scmp.eq.s32.totalorder %s24835_s21, 1 }
   0x9   : > { %p288_p3 = scmp.ne.s32.totalorder %s24742_s18, %s24738_s17  ;;  %p289_p4 = scmp.eq.s32.totalorder %s17405_s22, 1 }
   0xa   : > { %s24850_s26 = scalar_select %p270_p1, %s24746_s19, %s272_s24  }
   0xb   : > { %p24852_p5 = por %p283_p2, %p282_p0  ;;  %p24856_p6 = por %p289_p4, %p288_p3 }
   0xc   : > { %p17408_p7 = scmp.ge.s32.totalorder %s24750_s20, 1  ;;  %p350_p8 = scmp.lt.s32.totalorder %s24750_s20, 3 }
   0xe   : > { %p351_p9 = pnand %p17408_p7, %p350_p8 }
  0x10   : > { %354 = sbr.rel (%p351_p9) target bundleno = 2886 (0xb46), region = 64 }
  0x17   : > { %vm752_vm0 = vcmask 1043456   ;;  %v24865_v0 = vld [vmem:[%s29357_s2 + $0x28] sm:$0xf]  ;;  %vm405_vm1 = vcmask 31744   ;;  %p395_p10 = scmp.lt.s32.totalorder %s24835_s21, 1  ;;  %v29367_v1 = vmov 0.0  }
  0x18   : > { %21227 = vmatprep.subr.msk.mxu0 %vm752_vm0, %v24865_v0  ;;  %431 = vst.msk [vmem:[#allocation2 + $0xc8] sm:$0xff] %vm405_vm1, %v29367_v1  ;;  %406 = vst.msk [vmem:[#allocation2] sm:$0xff] %vm405_vm1, %v29367_v1  ;;  %v17856_v2 = vld [vmem:[%s29357_s2 + $0x34] sm:$0xf]  ;;  %v655_v3 = vld [vmem:[%s29357_s2] sm:$0xf] }
  0x19   : > { %407 = vst.msk [vmem:[#allocation2 + $0x8] sm:$0xff] %vm405_vm1, %v29367_v1  ;;  %408 = vst.msk [vmem:[#allocation2 + $0x10] sm:$0xff] %vm405_vm1, %v29367_v1  ;;  %21228 = vmatpush3.msk.msra.mxu0 %vm752_vm0, %v24865_v0  ;;  %s25073_s16 = scalar_select %p395_p10, %s24835_s21, 1  ;;  %20627 = vmatprep.subr.msk.mxu1 %vm752_vm0, %v655_v3  ;;  %v25079_v4 = vld [vmem:[%s29357_s2 + $0xc] sm:$0xf]  ;;  %vm504_vm2 = vcmask 64512  }
  0x1a   : > { %409 = vst.msk [vmem:[#allocation2 + $0x18] sm:$0xff] %vm405_vm1, %v29367_v1  ;;  %410 = vst.msk [vmem:[#allocation2 + $0x20] sm:$0xff] %vm405_vm1, %v29367_v1  ;;  %21277 = vmatprep.subr.msk.mxu0 %vm752_vm0, %v17856_v2  ;;  %20628 = vmatpush3.msk.msra.mxu1 %vm752_vm0, %v655_v3  ;;  %s29390_s0 = sld [smem:[#allocation21_spill]]  ;;  %v25105_v11 = vld [vmem:[%s29357_s2 + $0x40] sm:$0xf]  ;;  %s392_s29 = sand.u32 1, %s24742_s18  }
  0x1b   : > { %411 = vst.msk [vmem:[#allocation2 + $0x28] sm:$0xff] %vm405_vm1, %v29367_v1  ;;  %412 = vst.msk [vmem:[#allocation2 + $0x30] sm:$0xff] %vm405_vm1, %v29367_v1  ;;  %s19040_s25 = sshll.u32 %s25073_s16, 8  ;;  %20677 = vmatprep.subr.msk.mxu1 %vm752_vm0, %v25079_v4  ;;  %s17409_s30 = sshll.u32 %s392_s29, 4 }
  0x1c   : > { %413 = vst.msk [vmem:[#allocation2 + $0x38] sm:$0xff] %vm405_vm1, %v29367_v1  ;;  %414 = vst.msk [vmem:[#allocation2 + $0x40] sm:$0xff] %vm405_vm1, %v29367_v1  ;;  %s29131_s22 = scalar_lea.vmem %s29356_s1, %s19040_s25  ;;  %s394_s13 = scalar_lea.vmem [#allocation4], %s17409_s30 }
  0x1d   : > { %415 = vst.msk [vmem:[#allocation2 + $0x48] sm:$0xff] %vm405_vm1, %v29367_v1  ;;  %416 = vst.msk [vmem:[#allocation2 + $0x50] sm:$0xff] %vm405_vm1, %v29367_v1  ;;  %s17334_s14 = sshll.u32 %s394_s13, 4  ;;  %s19042_s15 = sshll.u32 %s24835_s21, 8  ;;  %s29310_s14 = int_to_ptr.vmem [resolvable:$true] %s17334_s14 }
  0x1e   : > { %417 = vst.msk [vmem:[#allocation2 + $0x58] sm:$0xff] %vm405_vm1, %v29367_v1  ;;  %418 = vst.msk [vmem:[#allocation2 + $0x60] sm:$0xff] %vm405_vm1, %v29367_v1  ;;  %s24688_s24 = scalar_lea.vmem %s29310_s14, 256  ;;  %s24753_s30 = smov [#allocation4]  }
  0x1f   : > { %419 = vst.msk [vmem:[#allocation2 + $0x68] sm:$0xff] %vm405_vm1, %v29367_v1  ;;  %420 = vst.msk [vmem:[#allocation2 + $0x70] sm:$0xff] %vm405_vm1, %v29367_v1  ;;  %v4597_v12 = vld [vmem:[#allocation2 + $0xc8] sm:$0xff]  ;;  %p24689_p11 = scmp.ne.s32.totalorder %s29310_s14, %s24688_s24  ;;  %s24692_s21 = sshll.u32 %s24753_s30, 4  ;;  %s24693_s21 = int_to_ptr.vmem [resolvable:$false] %s24692_s21 }
  0x20   : > { %421 = vst.msk [vmem:[#allocation2 + $0x78] sm:$0xff] %vm405_vm1, %v29367_v1  ;;  %422 = vst.msk [vmem:[#allocation2 + $0x80] sm:$0xff] %vm405_vm1, %v29367_v1  ;;  %s25091_s12 = scalar_lea.vmem %s29390_s0, %s19040_s25  ;;  %21229 = vmatprep.mubr.msk.f32.mxu0 %vm405_vm1, %v4597_v12  ;;  %s29315_s25 = scalar_lea.hbm %s29366_s11, %s19042_s15 }
  0x21   : > { %423 = vst.msk [vmem:[#allocation2 + $0x88] sm:$0xff] %vm405_vm1, %v29367_v1  ;;  %424 = vst.msk [vmem:[#allocation2 + $0x90] sm:$0xff] %vm405_vm1, %v29367_v1  ;;  %v547_v5 = vld [vmem:[%s25091_s12] sm:$0xff]  ;;  %v548_v6 = vld [vmem:[%s25091_s12 + $0x8] sm:$0xff]  ;;  %p24690_p12 = pnand %p24689_p11, %p24852_p5  ;;  %s24694_s0 = scalar_lea.vmem %s24693_s21, 512 }
  0x22   : > { %425 = vst.msk [vmem:[#allocation2 + $0x98] sm:$0xff] %vm405_vm1, %v29367_v1  ;;  %426 = vst.msk [vmem:[#allocation2 + $0xa0] sm:$0xff] %vm405_vm1, %v29367_v1  ;;  %v549_v7 = vld [vmem:[%s25091_s12 + $0x10] sm:$0xff]  ;;  %v550_v8 = vld [vmem:[%s25091_s12 + $0x18] sm:$0xff]  ;;  %p24695_p0 = scmp.lt.s32.totalorder %s29310_s14, %s24693_s21  ;;  %p24696_p1 = scmp.lt.s32.totalorder %s24694_s0, %s24688_s24 }
  0x23   : > { %427 = vst.msk [vmem:[#allocation2 + $0xa8] sm:$0xff] %vm405_vm1, %v29367_v1  ;;  %428 = vst.msk [vmem:[#allocation2 + $0xb0] sm:$0xff] %vm405_vm1, %v29367_v1  ;;  %v551_v9 = vld [vmem:[%s25091_s12 + $0x20] sm:$0xff]  ;;  %v552_v10 = vld [vmem:[%s25091_s12 + $0x28] sm:$0xff]  ;;  %p24691_p13 = pneg %p24690_p12 }
  0x24   : > { %429 = vst.msk [vmem:[#allocation2 + $0xb8] sm:$0xff] %vm405_vm1, %v29367_v1  ;;  %430 = vst.msk [vmem:[#allocation2 + $0xc0] sm:$0xff] %vm405_vm1, %v29367_v1  ;;  %v553_v16 = vld [vmem:[%s25091_s12 + $0x30] sm:$0xff]  ;;  %v554_v17 = vld [vmem:[%s25091_s12 + $0x38] sm:$0xff]  ;;  %p24697_p2 = por %p24696_p1, %p24695_p0 }
  0x25   : > { %432 = vst.msk [vmem:[#allocation2 + $0xd0] sm:$0xff] %vm405_vm1, %v29367_v1  ;;  %433 = vst.msk [vmem:[#allocation2 + $0xd8] sm:$0xff] %vm405_vm1, %v29367_v1  ;;  %v555_v18 = vld [vmem:[%s25091_s12 + $0x40] sm:$0xff]  ;;  %v556_v19 = vld [vmem:[%s25091_s12 + $0x48] sm:$0xff] }
  0x26   : > { %434 = vst.msk [vmem:[#allocation2 + $0xe0] sm:$0xff] %vm405_vm1, %v29367_v1  ;;  %435 = vst.msk [vmem:[#allocation2 + $0xe8] sm:$0xff] %vm405_vm1, %v29367_v1  ;;  %v557_v20 = vld [vmem:[%s25091_s12 + $0x50] sm:$0xff]  ;;  %v558_v21 = vld [vmem:[%s25091_s12 + $0x58] sm:$0xff]  ;;  %p24698_p3 = pnand %p24697_p2, %p24691_p13 }
  0x27   : > { %436 = vst.msk [vmem:[#allocation2 + $0xf0] sm:$0xff] %vm405_vm1, %v29367_v1  ;;  %437 = vst.msk [vmem:[#allocation2 + $0xf8] sm:$0xff] %vm405_vm1, %v29367_v1  ;;  %v559_v22 = vld [vmem:[%s25091_s12 + $0x60] sm:$0xff]  ;;  %v560_v23 = vld [vmem:[%s25091_s12 + $0x68] sm:$0xff] }
  0x28   : > { %439 = vst.msk [vmem:[#allocation2 + $0x300] sm:$0xff] %vm405_vm1, %v29367_v1  ;;  %440 = vst.msk [vmem:[#allocation2 + $0x308] sm:$0xff] %vm405_vm1, %v29367_v1  ;;  %v561_v24 = vld [vmem:[%s25091_s12 + $0x70] sm:$0xff]  ;;  %v562_v25 = vld [vmem:[%s25091_s12 + $0x78] sm:$0xff] }
  0x29   : > { %441 = vst.msk [vmem:[#allocation2 + $0x310] sm:$0xff] %vm405_vm1, %v29367_v1  ;;  %442 = vst.msk [vmem:[#allocation2 + $0x318] sm:$0xff] %vm405_vm1, %v29367_v1  ;;  %v563_v26 = vld [vmem:[%s25091_s12 + $0x80] sm:$0xff]  ;;  %v564_v27 = vld [vmem:[%s25091_s12 + $0x88] sm:$0xff] }
  0x2a   : > { %443 = vst.msk [vmem:[#allocation2 + $0x320] sm:$0xff] %vm405_vm1, %v29367_v1  ;;  %444 = vst.msk [vmem:[#allocation2 + $0x328] sm:$0xff] %vm405_vm1, %v29367_v1  ;;  %v565_v28 = vld [vmem:[%s25091_s12 + $0x90] sm:$0xff]  ;;  %v566_v29 = vld [vmem:[%s25091_s12 + $0x98] sm:$0xff] }
  0x2b   : > { %445 = vst.msk [vmem:[#allocation2 + $0x330] sm:$0xff] %vm405_vm1, %v29367_v1  ;;  %446 = vst.msk [vmem:[#allocation2 + $0x338] sm:$0xff] %vm405_vm1, %v29367_v1  ;;  %v567_v33 = vld [vmem:[%s25091_s12 + $0xa0] sm:$0xff]  ;;  %v568_v34 = vld [vmem:[%s25091_s12 + $0xa8] sm:$0xff] }
  0x2c   : > { %447 = vst.msk [vmem:[#allocation2 + $0x340] sm:$0xff] %vm405_vm1, %v29367_v1  ;;  %448 = vst.msk [vmem:[#allocation2 + $0x348] sm:$0xff] %vm405_vm1, %v29367_v1  ;;  %v4598_v13 = vld [vmem:[#allocation2 + $0xd0] sm:$0xff]  ;;  %v570_v36 = vld [vmem:[%s25091_s12 + $0xb8] sm:$0xff] }
  0x2d   : > { %449 = vst.msk [vmem:[#allocation2 + $0x350] sm:$0xff] %vm405_vm1, %v29367_v1  ;;  %450 = vst.msk [vmem:[#allocation2 + $0x358] sm:$0xff] %vm405_vm1, %v29367_v1  ;;  %v25107_v14 = vld [vmem:[#allocation2 + $0xe8] sm:$0xff]  ;;  %21230 = vmatmul.mubr.msk.f32.vlgmr.msra.gmra.mrb[0].mxu0 %vm405_vm1, %v4598_v13  ;;  %v569_v35 = vld [vmem:[%s25091_s12 + $0xb0] sm:$0xff] }
  0x2e   : > { %451 = vst.msk [vmem:[#allocation2 + $0x360] sm:$0xff] %vm405_vm1, %v29367_v1  ;;  %452 = vst.msk [vmem:[#allocation2 + $0x368] sm:$0xff] %vm405_vm1, %v29367_v1  ;;  %v25113_v15 = vld [vmem:[#allocation2 + $0xf0] sm:$0xff]  ;;  %21278 = vmatpush3.msk.msra.mxu0 %vm752_vm0, %v17856_v2  ;;  %21232 = vmatprep.mubr.msk.f32.mxu0 %vm405_vm1, %v25107_v14  ;;  %v571_v40 = vld [vmem:[%s25091_s12 + $0xc0] sm:$0xff] }
  0x2f   : > { %453 = vst.msk [vmem:[#allocation2 + $0x370] sm:$0xff] %vm405_vm1, %v29367_v1  ;;  %454 = vst.msk [vmem:[#allocation2 + $0x378] sm:$0xff] %vm405_vm1, %v29367_v1  ;;  %21327 = vmatprep.subr.msk.mxu0 %vm752_vm0, %v25105_v11  ;;  %v572_v41 = vld [vmem:[%s25091_s12 + $0xc8] sm:$0xff]  ;;  %v573_v42 = vld [vmem:[%s25091_s12 + $0xd0] sm:$0xff] }
  0x30   : > { %455 = vst.msk [vmem:[#allocation2 + $0x380] sm:$0xff] %vm405_vm1, %v29367_v1  ;;  %456 = vst.msk [vmem:[#allocation2 + $0x388] sm:$0xff] %vm405_vm1, %v29367_v1  ;;  %v619_v43 = vld [vmem:[#allocation2 + $0xe7] sm:$0xff]  ;;  %v574_v44 = vld [vmem:[%s25091_s12 + $0xd8] sm:$0xff] }
  0x31   : > { %457 = vst.msk [vmem:[#allocation2 + $0x390] sm:$0xff] %vm405_vm1, %v29367_v1  ;;  %458 = vst.msk [vmem:[#allocation2 + $0x398] sm:$0xff] %vm405_vm1, %v29367_v1  ;;  %21233 = vmatmul.mubr.msk.f32.gmra.mrb[2].mxu0 %vm405_vm1, %v25113_v15  ;;  %v620_v45 = vld [vmem:[#allocation2 + $0xef] sm:$0xff]  ;;  %20629 = vmatprep.mubr.msk.f32.mxu1 %vm405_vm1, %v619_v43  ;;  %v575_v60 = vld [vmem:[%s25091_s12 + $0xe0] sm:$0xff] }
  0x32   : > { %459 = vst.msk [vmem:[#allocation2 + $0x3a0] sm:$0xff] %vm405_vm1, %v29367_v1  ;;  %460 = vst.msk [vmem:[#allocation2 + $0x3a8] sm:$0xff] %vm405_vm1, %v29367_v1  ;;  %20630 = vmatmul.mubr.msk.f32.vlgmr.msra.gmra.mrb[0].mxu1 %vm405_vm1, %v620_v45  ;;  %v576_v61 = vld [vmem:[%s25091_s12 + $0xe8] sm:$0xff]  ;;  %v577_v62 = vld [vmem:[%s25091_s12 + $0xf0] sm:$0xff] }
  0x33   : > { %461 = vst.msk [vmem:[#allocation2 + $0x3b0] sm:$0xff] %vm405_vm1, %v29367_v1  ;;  %462 = vst.msk [vmem:[#allocation2 + $0x3b8] sm:$0xff] %vm405_vm1, %v29367_v1  ;;  %20678 = vmatpush3.msk.msra.mxu1 %vm752_vm0, %v25079_v4  ;;  %v578_v63 = vld [vmem:[%s25091_s12 + $0xf8] sm:$0xff] }
  0x34   : > { %463 = vst.msk [vmem:[#allocation2 + $0x3c0] sm:$0xff] %vm405_vm1, %v29367_v1  ;;  %464 = vst.msk [vmem:[#allocation2 + $0x3c8] sm:$0xff] %vm405_vm1, %v29367_v1 }
  0x35   : > { %465 = vst.msk [vmem:[#allocation2 + $0x3d0] sm:$0xff] %vm405_vm1, %v29367_v1  ;;  %466 = vst.msk [vmem:[#allocation2 + $0x3d8] sm:$0xff] %vm405_vm1, %v29367_v1 }
  0x36   : > { %467 = vst.msk [vmem:[#allocation2 + $0x3e0] sm:$0xff] %vm405_vm1, %v29367_v1  ;;  %468 = vst.msk [vmem:[#allocation2 + $0x3e8] sm:$0xff] %vm405_vm1, %v29367_v1 }
  0x37   : > { %469 = vst.msk [vmem:[#allocation2 + $0x3f0] sm:$0xff] %vm405_vm1, %v29367_v1  ;;  %470 = vst.msk [vmem:[#allocation2 + $0x3f8] sm:$0xff] %vm405_vm1, %v29367_v1 }
  0x38   : > { %472 = vst.msk [vmem:[#allocation2 + $0x100] sm:$0xff] %vm405_vm1, %v29367_v1  ;;  %473 = vst.msk [vmem:[#allocation2 + $0x120] sm:$0xff] %vm405_vm1, %v29367_v1 }
  0x39   : > { %474 = vst.msk [vmem:[#allocation2 + $0x140] sm:$0xff] %vm405_vm1, %v29367_v1  ;;  %475 = vst.msk [vmem:[#allocation2 + $0x160] sm:$0xff] %vm405_vm1, %v29367_v1 }
  0x3a   : > { %476 = vst.msk [vmem:[#allocation2 + $0x180] sm:$0xff] %vm405_vm1, %v29367_v1  ;;  %477 = vst.msk [vmem:[#allocation2 + $0x1a0] sm:$0xff] %vm405_vm1, %v29367_v1 }
  0x3b   : > { %478 = vst.msk [vmem:[#allocation2 + $0x1c0] sm:$0xff] %vm405_vm1, %v29367_v1  ;;  %479 = vst.msk [vmem:[#allocation2 + $0x1e0] sm:$0xff] %vm405_vm1, %v29367_v1 }
  0x3c   : > { %480 = vst.msk [vmem:[#allocation2 + $0x200] sm:$0xff] %vm405_vm1, %v29367_v1  ;;  %481 = vst.msk [vmem:[#allocation2 + $0x220] sm:$0xff] %vm405_vm1, %v29367_v1 }
  0x3d   : > { %482 = vst.msk [vmem:[#allocation2 + $0x240] sm:$0xff] %vm405_vm1, %v29367_v1  ;;  %483 = vst.msk [vmem:[#allocation2 + $0x260] sm:$0xff] %vm405_vm1, %v29367_v1 }
  0x3e   : > { %484 = vst.msk [vmem:[#allocation2 + $0x280] sm:$0xff] %vm405_vm1, %v29367_v1  ;;  %485 = vst.msk [vmem:[#allocation2 + $0x2a0] sm:$0xff] %vm405_vm1, %v29367_v1 }
  0x3f   : > { %486 = vst.msk [vmem:[#allocation2 + $0x2c0] sm:$0xff] %vm405_vm1, %v29367_v1  ;;  %487 = vst.msk [vmem:[#allocation2 + $0x2e0] sm:$0xff] %vm405_vm1, %v29367_v1 }
  0x40   : > { %488 = vst.msk [vmem:[#allocation2 + $0x118] sm:$0xff] %vm405_vm1, %v29367_v1  ;;  %489 = vst.msk [vmem:[#allocation2 + $0x138] sm:$0xff] %vm405_vm1, %v29367_v1 }
  0x41   : > { %490 = vst.msk [vmem:[#allocation2 + $0x158] sm:$0xff] %vm405_vm1, %v29367_v1  ;;  %491 = vst.msk [vmem:[#allocation2 + $0x178] sm:$0xff] %vm405_vm1, %v29367_v1 }
  0x42   : > { %492 = vst.msk [vmem:[#allocation2 + $0x198] sm:$0xff] %vm405_vm1, %v29367_v1  ;;  %493 = vst.msk [vmem:[#allocation2 + $0x1b8] sm:$0xff] %vm405_vm1, %v29367_v1 }
  0x43   : > { %494 = vst.msk [vmem:[#allocation2 + $0x1d8] sm:$0xff] %vm405_vm1, %v29367_v1  ;;  %495 = vst.msk [vmem:[#allocation2 + $0x1f8] sm:$0xff] %vm405_vm1, %v29367_v1 }
  0x44   : > { %496 = vst.msk [vmem:[#allocation2 + $0x218] sm:$0xff] %vm405_vm1, %v29367_v1  ;;  %497 = vst.msk [vmem:[#allocation2 + $0x238] sm:$0xff] %vm405_vm1, %v29367_v1 }
  0x45   : > { %498 = vst.msk [vmem:[#allocation2 + $0x258] sm:$0xff] %vm405_vm1, %v29367_v1  ;;  %499 = vst.msk [vmem:[#allocation2 + $0x278] sm:$0xff] %vm405_vm1, %v29367_v1 }
  0x46   : > { %500 = vst.msk [vmem:[#allocation2 + $0x298] sm:$0xff] %vm405_vm1, %v29367_v1  ;;  %501 = vst.msk [vmem:[#allocation2 + $0x2b8] sm:$0xff] %vm405_vm1, %v29367_v1 }
  0x47   : > { %502 = vst.msk [vmem:[#allocation2 + $0x2d8] sm:$0xff] %vm405_vm1, %v29367_v1  ;;  %503 = vst.msk [vmem:[#allocation2 + $0x2f8] sm:$0xff] %vm405_vm1, %v29367_v1 }
  0x48   : > { %579 = vst.msk [vmem:[#allocation2 + $0x108] sm:$0xff] %vm405_vm1, %v547_v5  ;;  %580 = vst.msk [vmem:[#allocation2 + $0x110] sm:$0xff] %vm405_vm1, %v548_v6 }
  0x49   : > { %581 = vst.msk [vmem:[#allocation2 + $0x128] sm:$0xff] %vm405_vm1, %v549_v7  ;;  %582 = vst.msk [vmem:[#allocation2 + $0x130] sm:$0xff] %vm405_vm1, %v550_v8 }
  0x4a   : > { %583 = vst.msk [vmem:[#allocation2 + $0x148] sm:$0xff] %vm405_vm1, %v551_v9  ;;  %584 = vst.msk [vmem:[#allocation2 + $0x150] sm:$0xff] %vm405_vm1, %v552_v10 }
  0x4b   : > { %585 = vst.msk [vmem:[#allocation2 + $0x168] sm:$0xff] %vm405_vm1, %v553_v16  ;;  %586 = vst.msk [vmem:[#allocation2 + $0x170] sm:$0xff] %vm405_vm1, %v554_v17 }
  0x4c   : > { %587 = vst.msk [vmem:[#allocation2 + $0x188] sm:$0xff] %vm405_vm1, %v555_v18  ;;  %588 = vst.msk [vmem:[#allocation2 + $0x190] sm:$0xff] %vm405_vm1, %v556_v19 }
  0x4d   : > { %589 = vst.msk [vmem:[#allocation2 + $0x1a8] sm:$0xff] %vm405_vm1, %v557_v20  ;;  %590 = vst.msk [vmem:[#allocation2 + $0x1b0] sm:$0xff] %vm405_vm1, %v558_v21 }
  0x4e   : > { %591 = vst.msk [vmem:[#allocation2 + $0x1c8] sm:$0xff] %vm405_vm1, %v559_v22  ;;  %592 = vst.msk [vmem:[#allocation2 + $0x1d0] sm:$0xff] %vm405_vm1, %v560_v23 }
  0x4f   : > { %593 = vst.msk [vmem:[#allocation2 + $0x1e8] sm:$0xff] %vm405_vm1, %v561_v24  ;;  %594 = vst.msk [vmem:[#allocation2 + $0x1f0] sm:$0xff] %vm405_vm1, %v562_v25  ;;  %v25148_v30 = vld [vmem:[#allocation2 + $0x108] sm:$0xff]  ;;  %v25155_v31 = vld [vmem:[#allocation2 + $0x110] sm:$0xff] }
  0x50   : > { %595 = vst.msk [vmem:[#allocation2 + $0x208] sm:$0xff] %vm405_vm1, %v563_v26  ;;  %596 = vst.msk [vmem:[#allocation2 + $0x210] sm:$0xff] %vm405_vm1, %v564_v27  ;;  %21235 = vmatprep.mubr.msk.f32.mxu0 %vm405_vm1, %v25148_v30  ;;  %v25157_v32 = vld [vmem:[#allocation2 + $0x128] sm:$0xff]  ;;  %v25171_v37 = vld [vmem:[#allocation2 + $0x130] sm:$0xff] }
  0x51   : > { %597 = vst.msk [vmem:[#allocation2 + $0x228] sm:$0xff] %vm405_vm1, %v565_v28  ;;  %598 = vst.msk [vmem:[#allocation2 + $0x230] sm:$0xff] %vm405_vm1, %v566_v29  ;;  %21236 = vmatmul.mubr.msk.f32.gmra.mrb[4].mxu0 %vm405_vm1, %v25155_v31  ;;  %v25173_v38 = vld [vmem:[#allocation2 + $0x148] sm:$0xff]  ;;  %v25175_v39 = vld [vmem:[#allocation2 + $0x150] sm:$0xff] }
  0x52   : > { %599 = vst.msk [vmem:[#allocation2 + $0x248] sm:$0xff] %vm405_vm1, %v567_v33  ;;  %600 = vst.msk [vmem:[#allocation2 + $0x250] sm:$0xff] %vm405_vm1, %v568_v34  ;;  %21238 = vmatprep.mubr.msk.f32.mxu0 %vm405_vm1, %v25157_v32  ;;  %v25188_v46 = vld [vmem:[#allocation2 + $0x168] sm:$0xff]  ;;  %v25203_v49 = vld [vmem:[#allocation2 + $0x170] sm:$0xff] }
  0x53   : > { %601 = vst.msk [vmem:[#allocation2 + $0x268] sm:$0xff] %vm405_vm1, %v569_v35  ;;  %602 = vst.msk [vmem:[#allocation2 + $0x270] sm:$0xff] %vm405_vm1, %v570_v36  ;;  %v25193_v47 = vld [vmem:[#allocation2 + $0x107] sm:$0xff]  ;;  %v25199_v48 = vld [vmem:[#allocation2 + $0x10f] sm:$0xff] }
  0x54   : > { %29391 = vst [vmem:[#allocation7_spill] sm:$0xff] %v25171_v37  ;;  %29392 = vst [vmem:[#allocation8_spill] sm:$0xff] %v25175_v39  ;;  %20632 = vmatprep.mubr.msk.f32.mxu1 %vm405_vm1, %v25193_v47  ;;  %v25205_v50 = vld [vmem:[#allocation2 + $0x127] sm:$0xff]  ;;  %v25217_v52 = vld [vmem:[#allocation2 + $0x12f] sm:$0xff] }
  0x55   : > { %21239 = vmatmul.mubr.msk.f32.gmra.mrb[6].mxu0 %vm405_vm1, %v25171_v37  ;;  %603 = vst.msk [vmem:[#allocation2 + $0x288] sm:$0xff] %vm405_vm1, %v571_v40  ;;  %604 = vst.msk [vmem:[#allocation2 + $0x290] sm:$0xff] %vm405_vm1, %v572_v41  ;;  %v25209_v51 = vld [vmem:[#allocation2 + $0x188] sm:$0xff]  ;;  %20633 = vmatmul.mubr.msk.f32.gmra.mrb[2].mxu1 %vm405_vm1, %v25199_v48  ;;  %v25221_v53 = vld [vmem:[#allocation2 + $0x190] sm:$0xff] }
  0x56   : > { %21241 = vmatprep.mubr.msk.f32.mxu0 %vm405_vm1, %v25173_v38  ;;  %605 = vst.msk [vmem:[#allocation2 + $0x2a8] sm:$0xff] %vm405_vm1, %v573_v42  ;;  %606 = vst.msk [vmem:[#allocation2 + $0x2b0] sm:$0xff] %vm405_vm1, %v574_v44  ;;  %20635 = vmatprep.mubr.msk.f32.mxu1 %vm405_vm1, %v25205_v50  ;;  %v25223_v54 = vld [vmem:[#allocation2 + $0x147] sm:$0xff]  ;;  %v25233_v56 = vld [vmem:[#allocation2 + $0x14f] sm:$0xff] }
  0x57   : > { %v25225_v55 = vld [vmem:[#allocation2 + $0x1a8] sm:$0xff]  ;;  %v25237_v57 = vld [vmem:[#allocation2 + $0x1b0] sm:$0xff]  ;;  %607 = vst.msk [vmem:[#allocation2 + $0x2c8] sm:$0xff] %vm405_vm1, %v575_v60  ;;  %608 = vst.msk [vmem:[#allocation2 + $0x2d0] sm:$0xff] %vm405_vm1, %v576_v61 }
  0x58   : > { %v25239_v58 = vld [vmem:[#allocation2 + $0x1c8] sm:$0xff]  ;;  %609 = vst.msk [vmem:[#allocation2 + $0x2e8] sm:$0xff] %vm405_vm1, %v577_v62  ;;  %610 = vst.msk [vmem:[#allocation2 + $0x2f0] sm:$0xff] %vm405_vm1, %v578_v63  ;;  %v25261_v2 = vld [vmem:[#allocation2 + $0x1d0] sm:$0xff] }
  0x59   : > { %21242 = vmatmul.mubr.msk.f32.gmra.mrb[8].mxu0 %vm405_vm1, %v25175_v39  ;;  %20636 = vmatmul.mubr.msk.f32.gmra.mrb[4].mxu1 %vm405_vm1, %v25217_v52  ;;  %v25241_v59 = vld [vmem:[#allocation2 + $0x167] sm:$0xff]  ;;  %v25256_v0 = vld [vmem:[#allocation2 + $0x16f] sm:$0xff]  ;;  %v17482_v36 = vld [vmem:[%s29357_s2 + $0x18] sm:$0xf] }
  0x5a   : > { %21244 = vmatprep.mubr.msk.f32.mxu0 %vm405_vm1, %v25188_v46  ;;  %20638 = vmatprep.mubr.msk.f32.mxu1 %vm405_vm1, %v25223_v54  ;;  %v25263_v3 = vld [vmem:[#allocation2 + $0x187] sm:$0xff]  ;;  %v25273_v5 = vld [vmem:[#allocation2 + $0x18f] sm:$0xff] }
  0x5b   : > { %v25265_v4 = vld [vmem:[#allocation2 + $0x1e8] sm:$0xff]  ;;  %v25277_v6 = vld [vmem:[#allocation2 + $0x1f0] sm:$0xff]  ;;  %20727 = vmatprep.subr.msk.mxu1 %vm752_vm0, %v17482_v36 }
  0x5c   : > { %v25279_v7 = vld [vmem:[#allocation2 + $0x1a7] sm:$0xff]  ;;  %v25289_v9 = vld [vmem:[#allocation2 + $0x1af] sm:$0xff] }
  0x5d   : > { %21245 = vmatmul.mubr.msk.f32.gmra.mrb[10].mxu0 %vm405_vm1, %v25203_v49  ;;  %20639 = vmatmul.mubr.msk.f32.gmra.mrb[6].mxu1 %vm405_vm1, %v25233_v56  ;;  %v25281_v8 = vld [vmem:[#allocation2 + $0x208] sm:$0xff]  ;;  %v25293_v10 = vld [vmem:[#allocation2 + $0x210] sm:$0xff] }
  0x5e   : > { %21247 = vmatprep.mubr.msk.f32.mxu0 %vm405_vm1, %v25209_v51  ;;  %20641 = vmatprep.mubr.msk.f32.mxu1 %vm405_vm1, %v25241_v59  ;;  %v25295_v12 = vld [vmem:[#allocation2 + $0x1c7] sm:$0xff]  ;;  %v25305_v16 = vld [vmem:[#allocation2 + $0x1cf] sm:$0xff] }
  0x5f   : > { %v25297_v13 = vld [vmem:[#allocation2 + $0x228] sm:$0xff]  ;;  %v25309_v17 = vld [vmem:[#allocation2 + $0x230] sm:$0xff] }
  0x60   : > { %v25311_v18 = vld [vmem:[#allocation2 + $0x1e7] sm:$0xff]  ;;  %v25321_v20 = vld [vmem:[#allocation2 + $0x1ef] sm:$0xff] }
  0x61   : > { %21248 = vmatmul.mubr.msk.f32.gmra.mrb[12].mxu0 %vm405_vm1, %v25221_v53  ;;  %20642 = vmatmul.mubr.msk.f32.gmra.mrb[8].mxu1 %vm405_vm1, %v25256_v0  ;;  %v25313_v19 = vld [vmem:[#allocation2 + $0x248] sm:$0xff]  ;;  %v25325_v21 = vld [vmem:[#allocation2 + $0x250] sm:$0xff] }
  0x62   : > { %21250 = vmatprep.mubr.msk.f32.mxu0 %vm405_vm1, %v25225_v55  ;;  %20644 = vmatprep.mubr.msk.f32.mxu1 %vm405_vm1, %v25263_v3  ;;  %v25327_v22 = vld [vmem:[#allocation2 + $0x207] sm:$0xff]  ;;  %v25337_v24 = vld [vmem:[#allocation2 + $0x20f] sm:$0xff] }
  0x63   : > { %v25329_v23 = vld [vmem:[#allocation2 + $0x268] sm:$0xff]  ;;  %v25341_v25 = vld [vmem:[#allocation2 + $0x270] sm:$0xff] }
  0x64   : > { %v25343_v26 = vld [vmem:[#allocation2 + $0x227] sm:$0xff]  ;;  %v25353_v28 = vld [vmem:[#allocation2 + $0x22f] sm:$0xff] }
  0x65   : > { %21251 = vmatmul.mubr.msk.f32.gmra.mrb[14].mxu0 %vm405_vm1, %v25237_v57  ;;  %20645 = vmatmul.mubr.msk.f32.gmra.mrb[10].mxu1 %vm405_vm1, %v25273_v5  ;;  %v25345_v27 = vld [vmem:[#allocation2 + $0x288] sm:$0xff]  ;;  %v25357_v29 = vld [vmem:[#allocation2 + $0x290] sm:$0xff] }
  0x66   : > { %21253 = vmatprep.mubr.msk.f32.mxu0 %vm405_vm1, %v25239_v58  ;;  %20647 = vmatprep.mubr.msk.f32.mxu1 %vm405_vm1, %v25279_v7  ;;  %v25359_v33 = vld [vmem:[#allocation2 + $0x247] sm:$0xff]  ;;  %v25369_v35 = vld [vmem:[#allocation2 + $0x24f] sm:$0xff] }
  0x67   : > { %v25361_v34 = vld [vmem:[#allocation2 + $0x2a8] sm:$0xff]  ;;  %v25376_v40 = vld [vmem:[#allocation2 + $0x2b0] sm:$0xff] }
  0x68   : > { %v25378_v41 = vld [vmem:[#allocation2 + $0x267] sm:$0xff]  ;;  %v25387_v42 = vld [vmem:[#allocation2 + $0x26f] sm:$0xff] }
  0x69   : > { %21254 = vmatmul.mubr.msk.f32.gmra.mrb[16].mxu0 %vm405_vm1, %v25261_v2  ;;  %20648 = vmatmul.mubr.msk.f32.gmra.mrb[12].mxu1 %vm405_vm1, %v25289_v9  ;;  %v25391_v43 = vld [vmem:[#allocation2 + $0x287] sm:$0xff]  ;;  %v25404_v45 = vld [vmem:[#allocation2 + $0x28f] sm:$0xff] }
  0x6a   : > { %21256 = vmatprep.mubr.msk.f32.mxu0 %vm405_vm1, %v25265_v4  ;;  %20650 = vmatprep.mubr.msk.f32.mxu1 %vm405_vm1, %v25295_v12  ;;  %v25398_v44 = vld [vmem:[%s29357_s2 + $0x2c] sm:$0xf]  ;;  %v25542_v1 = vld [vmem:[#allocation2 + $0x2f0] sm:$0xff] }
  0x6b   : > { %v25410_v60 = vld [vmem:[#allocation2 + $0x2a7] sm:$0xff]  ;;  %v25420_v61 = vld [vmem:[#allocation2 + $0x2af] sm:$0xff] }
  0x6c   : > { %v25432_v62 = vld [vmem:[#allocation2 + $0x2cf] sm:$0xff] }
  0x6d   : > { %21257 = vmatmul.mubr.msk.f32.gmra.mrb[18].mxu0 %vm405_vm1, %v25277_v6  ;;  %20651 = vmatmul.mubr.msk.f32.gmra.mrb[14].mxu1 %vm405_vm1, %v25305_v16  ;;  %v25529_v63 = vld [vmem:[#allocation2 + $0x2e8] sm:$0xff] }
  0x6e   : > { %21259 = vmatprep.mubr.msk.f32.mxu0 %vm405_vm1, %v25281_v8  ;;  %20653 = vmatprep.mubr.msk.f32.mxu1 %vm405_vm1, %v25311_v18 }
  0x71   : > { %21260 = vmatmul.mubr.msk.f32.gmra.mrb[20].mxu0 %vm405_vm1, %v25293_v10  ;;  %20654 = vmatmul.mubr.msk.f32.gmra.mrb[16].mxu1 %vm405_vm1, %v25321_v20 }
  0x72   : > { %21262 = vmatprep.mubr.msk.f32.mxu0 %vm405_vm1, %v25297_v13  ;;  %20656 = vmatprep.mubr.msk.f32.mxu1 %vm405_vm1, %v25327_v22 }
  0x75   : > { %21263 = vmatmul.mubr.msk.f32.gmra.mrb[22].mxu0 %vm405_vm1, %v25309_v17  ;;  %20657 = vmatmul.mubr.msk.f32.gmra.mrb[18].mxu1 %vm405_vm1, %v25337_v24 }
  0x76   : > { %21265 = vmatprep.mubr.msk.f32.mxu0 %vm405_vm1, %v25313_v19  ;;  %20659 = vmatprep.mubr.msk.f32.mxu1 %vm405_vm1, %v25343_v26 }
  0x79   : > { %21266 = vmatmul.mubr.msk.f32.gmra.mrb[24].mxu0 %vm405_vm1, %v25325_v21  ;;  %20660 = vmatmul.mubr.msk.f32.gmra.mrb[20].mxu1 %vm405_vm1, %v25353_v28 }
  0x7a   : > { %21268 = vmatprep.mubr.msk.f32.mxu0 %vm405_vm1, %v25329_v23  ;;  %20662 = vmatprep.mubr.msk.f32.mxu1 %vm405_vm1, %v25359_v33 }
  0x7d   : > { %21269 = vmatmul.mubr.msk.f32.gmra.mrb[26].mxu0 %vm405_vm1, %v25341_v25  ;;  %20663 = vmatmul.mubr.msk.f32.gmra.mrb[22].mxu1 %vm405_vm1, %v25369_v35 }
  0x7e   : > { %21271 = vmatprep.mubr.msk.f32.mxu0 %vm405_vm1, %v25345_v27  ;;  %20665 = vmatprep.mubr.msk.f32.mxu1 %vm405_vm1, %v25378_v41 }
  0x81   : > { %21272 = vmatmul.mubr.msk.f32.gmra.mrb[28].mxu0 %vm405_vm1, %v25357_v29  ;;  %20666 = vmatmul.mubr.msk.f32.gmra.mrb[24].mxu1 %vm405_vm1, %v25387_v42 }
  0x82   : > { %21274 = vmatprep.mubr.msk.f32.mxu0 %vm405_vm1, %v25361_v34  ;;  %20668 = vmatprep.mubr.msk.f32.mxu1 %vm405_vm1, %v25391_v43 }
  0x85   : > { %21275 = vmatmul.mubr.msk.f32.gmra.mrb[30].mxu0 %vm405_vm1, %v25376_v40  ;;  %20669 = vmatmul.mubr.msk.f32.gmra.mrb[26].mxu1 %vm405_vm1, %v25404_v45 }
  0x86   : > { %21279 = vmatprep.mubr.msk.f32.mxu0 %vm405_vm1, %v25148_v30  ;;  %20671 = vmatprep.mubr.msk.f32.mxu1 %vm405_vm1, %v25410_v60 }
  0x89   : > { %21280 = vmatmul.mubr.msk.f32.vlgmr.msra.gmra.mrb[0].mxu0 %vm405_vm1, %v25155_v31  ;;  %20672 = vmatmul.mubr.msk.f32.gmra.mrb[28].mxu1 %vm405_vm1, %v25420_v61 }
  0x8a   : > { %21328 = vmatpush3.msk.msra.mxu0 %vm752_vm0, %v25105_v11  ;;  %21282 = vmatprep.mubr.msk.f32.mxu0 %vm405_vm1, %v25157_v32  ;;  %v25424_v11 = vld [vmem:[#allocation2 + $0x2c7] sm:$0xff] }
  0x8b   : > { %21377 = vmatprep.subr.msk.mxu0 %vm752_vm0, %v25398_v44  ;;  %20674 = vmatprep.mubr.msk.f32.mxu1 %vm405_vm1, %v25424_v11 }
  0x8d   : > { %21283 = vmatmul.mubr.msk.f32.gmra.mrb[2].mxu0 %vm405_vm1, %v25171_v37  ;;  %20675 = vmatmul.mubr.msk.f32.gmra.mrb[30].mxu1 %vm405_vm1, %v25432_v62  ;;  %v25558_v37 = vld [vmem:[%s29357_s2 + $0x38] sm:$0xf] }
  0x8e   : > { %21285 = vmatprep.mubr.msk.f32.mxu0 %vm405_vm1, %v25173_v38  ;;  %20679 = vmatprep.mubr.msk.f32.mxu1 %vm405_vm1, %v25193_v47  ;;  %v25517_v47 = vld [vmem:[#allocation2 + $0x2c8] sm:$0xff] }
  0x91   : > { %21286 = vmatmul.mubr.msk.f32.gmra.mrb[4].mxu0 %vm405_vm1, %v25175_v39  ;;  %20680 = vmatmul.mubr.msk.f32.vlgmr.msra.gmra.mrb[0].mxu1 %vm405_vm1, %v25199_v48  ;;  %v25527_v48 = vld [vmem:[#allocation2 + $0x2d0] sm:$0xff] }
  0x92   : > { %21288 = vmatprep.mubr.msk.f32.mxu0 %vm405_vm1, %v25188_v46  ;;  %20682 = vmatprep.mubr.msk.f32.mxu1 %vm405_vm1, %v25205_v50 }
  0x93   : > { %20728 = vmatpush3.msk.msra.mxu1 %vm752_vm0, %v17482_v36  ;;  %v17516_v36 = vld [vmem:[%s29357_s2 + $0x4] sm:$0xf] }
  0x94   : > { %20777 = vmatprep.subr.msk.mxu1 %vm752_vm0, %v17516_v36 }
  0x95   : > { %21289 = vmatmul.mubr.msk.f32.gmra.mrb[6].mxu0 %vm405_vm1, %v25203_v49  ;;  %20683 = vmatmul.mubr.msk.f32.gmra.mrb[2].mxu1 %vm405_vm1, %v25217_v52 }
  0x96   : > { %21291 = vmatprep.mubr.msk.f32.mxu0 %vm405_vm1, %v25209_v51  ;;  %20685 = vmatprep.mubr.msk.f32.mxu1 %vm405_vm1, %v25223_v54 }
  0x99   : > { %21292 = vmatmul.mubr.msk.f32.gmra.mrb[8].mxu0 %vm405_vm1, %v25221_v53  ;;  %20686 = vmatmul.mubr.msk.f32.gmra.mrb[4].mxu1 %vm405_vm1, %v25233_v56 }
  0x9a   : > { %21294 = vmatprep.mubr.msk.f32.mxu0 %vm405_vm1, %v25225_v55  ;;  %20688 = vmatprep.mubr.msk.f32.mxu1 %vm405_vm1, %v25241_v59 }
  0x9d   : > { %21295 = vmatmul.mubr.msk.f32.gmra.mrb[10].mxu0 %vm405_vm1, %v25237_v57  ;;  %20689 = vmatmul.mubr.msk.f32.gmra.mrb[6].mxu1 %vm405_vm1, %v25256_v0 }
  0x9e   : > { %21297 = vmatprep.mubr.msk.f32.mxu0 %vm405_vm1, %v25239_v58  ;;  %20691 = vmatprep.mubr.msk.f32.mxu1 %vm405_vm1, %v25263_v3 }
  0xa1   : > { %21298 = vmatmul.mubr.msk.f32.gmra.mrb[12].mxu0 %vm405_vm1, %v25261_v2  ;;  %20692 = vmatmul.mubr.msk.f32.gmra.mrb[8].mxu1 %vm405_vm1, %v25273_v5 }
  0xa2   : > { %21300 = vmatprep.mubr.msk.f32.mxu0 %vm405_vm1, %v25265_v4  ;;  %20694 = vmatprep.mubr.msk.f32.mxu1 %vm405_vm1, %v25279_v7 }
  0xa5   : > { %21301 = vmatmul.mubr.msk.f32.gmra.mrb[14].mxu0 %vm405_vm1, %v25277_v6  ;;  %20695 = vmatmul.mubr.msk.f32.gmra.mrb[10].mxu1 %vm405_vm1, %v25289_v9 }
  0xa6   : > { %21303 = vmatprep.mubr.msk.f32.mxu0 %vm405_vm1, %v25281_v8  ;;  %20697 = vmatprep.mubr.msk.f32.mxu1 %vm405_vm1, %v25295_v12 }
  0xa9   : > { %21304 = vmatmul.mubr.msk.f32.gmra.mrb[16].mxu0 %vm405_vm1, %v25293_v10  ;;  %20698 = vmatmul.mubr.msk.f32.gmra.mrb[12].mxu1 %vm405_vm1, %v25305_v16 }
  0xaa   : > { %21306 = vmatprep.mubr.msk.f32.mxu0 %vm405_vm1, %v25297_v13  ;;  %20700 = vmatprep.mubr.msk.f32.mxu1 %vm405_vm1, %v25311_v18 }
  0xad   : > { %21307 = vmatmul.mubr.msk.f32.gmra.mrb[18].mxu0 %vm405_vm1, %v25309_v17  ;;  %20701 = vmatmul.mubr.msk.f32.gmra.mrb[14].mxu1 %vm405_vm1, %v25321_v20 }
  0xae   : > { %21309 = vmatprep.mubr.msk.f32.mxu0 %vm405_vm1, %v25313_v19  ;;  %20703 = vmatprep.mubr.msk.f32.mxu1 %vm405_vm1, %v25327_v22 }
  0xb1   : > { %21310 = vmatmul.mubr.msk.f32.gmra.mrb[20].mxu0 %vm405_vm1, %v25325_v21  ;;  %20704 = vmatmul.mubr.msk.f32.gmra.mrb[16].mxu1 %vm405_vm1, %v25337_v24 }
  0xb2   : > { %21312 = vmatprep.mubr.msk.f32.mxu0 %vm405_vm1, %v25329_v23  ;;  %20706 = vmatprep.mubr.msk.f32.mxu1 %vm405_vm1, %v25343_v26 }
  0xb5   : > { %21313 = vmatmul.mubr.msk.f32.gmra.mrb[22].mxu0 %vm405_vm1, %v25341_v25  ;;  %20707 = vmatmul.mubr.msk.f32.gmra.mrb[18].mxu1 %vm405_vm1, %v25353_v28 }
  0xb6   : > { %21315 = vmatprep.mubr.msk.f32.mxu0 %vm405_vm1, %v25345_v27  ;;  %20709 = vmatprep.mubr.msk.f32.mxu1 %vm405_vm1, %v25359_v33 }
  0xb9   : > { %21316 = vmatmul.mubr.msk.f32.gmra.mrb[24].mxu0 %vm405_vm1, %v25357_v29  ;;  %20710 = vmatmul.mubr.msk.f32.gmra.mrb[20].mxu1 %vm405_vm1, %v25369_v35 }
  0xba   : > { %21318 = vmatprep.mubr.msk.f32.mxu0 %vm405_vm1, %v25361_v34  ;;  %20712 = vmatprep.mubr.msk.f32.mxu1 %vm405_vm1, %v25378_v41 }
  0xbd   : > { %21319 = vmatmul.mubr.msk.f32.gmra.mrb[26].mxu0 %vm405_vm1, %v25376_v40  ;;  %20713 = vmatmul.mubr.msk.f32.gmra.mrb[22].mxu1 %vm405_vm1, %v25387_v42 }
  0xbe   : > { %21321 = vmatprep.mubr.msk.f32.mxu0 %vm405_vm1, %v25517_v47  ;;  %20715 = vmatprep.mubr.msk.f32.mxu1 %vm405_vm1, %v25391_v43 }
  0xc1   : > { %21322 = vmatmul.mubr.msk.f32.gmra.mrb[28].mxu0 %vm405_vm1, %v25527_v48  ;;  %20716 = vmatmul.mubr.msk.f32.gmra.mrb[24].mxu1 %vm405_vm1, %v25404_v45 }
  0xc2   : > { %21324 = vmatprep.mubr.msk.f32.mxu0 %vm405_vm1, %v25529_v63  ;;  %20718 = vmatprep.mubr.msk.f32.mxu1 %vm405_vm1, %v25410_v60 }
  0xc5   : > { %21325 = vmatmul.mubr.msk.f32.gmra.mrb[30].mxu0 %vm405_vm1, %v25542_v1  ;;  %20719 = vmatmul.mubr.msk.f32.gmra.mrb[26].mxu1 %vm405_vm1, %v25420_v61 }
  0xc6   : > { %21329 = vmatprep.mubr.msk.f32.mxu0 %vm405_vm1, %v25173_v38  ;;  %20721 = vmatprep.mubr.msk.f32.mxu1 %vm405_vm1, %v25424_v11 }
  0xc9   : > { %21330 = vmatmul.mubr.msk.f32.vlgmr.msra.gmra.mrb[0].mxu0 %vm405_vm1, %v25175_v39  ;;  %v25578_v39 = vld [vmem:[#allocation2 + $0x2e7] sm:$0xff]  ;;  %20722 = vmatmul.mubr.msk.f32.gmra.mrb[28].mxu1 %vm405_vm1, %v25432_v62 }
  0xca   : > { %21378 = vmatpush3.msk.msra.mxu0 %vm752_vm0, %v25398_v44  ;;  %21332 = vmatprep.mubr.msk.f32.mxu0 %vm405_vm1, %v25188_v46  ;;  %v25586_v44 = vld [vmem:[#allocation2 + $0x2ef] sm:$0xff] }
  0xcb   : > { %21427 = vmatprep.subr.msk.mxu0 %vm752_vm0, %v25558_v37  ;;  %20724 = vmatprep.mubr.msk.f32.mxu1 %vm405_vm1, %v25578_v39 }
  0xcd   : > { %21333 = vmatmul.mubr.msk.f32.gmra.mrb[2].mxu0 %vm405_vm1, %v25203_v49  ;;  %20725 = vmatmul.mubr.msk.f32.gmra.mrb[30].mxu1 %vm405_vm1, %v25586_v44 }
  0xce   : > { %21335 = vmatprep.mubr.msk.f32.mxu0 %vm405_vm1, %v25209_v51  ;;  %20729 = vmatprep.mubr.msk.f32.mxu1 %vm405_vm1, %v25205_v50  ;;  %v25671_v50 = vld [vmem:[#allocation2 + $0x308] sm:$0xff] }
  0xd1   : > { %21336 = vmatmul.mubr.msk.f32.gmra.mrb[4].mxu0 %vm405_vm1, %v25221_v53  ;;  %20730 = vmatmul.mubr.msk.f32.vlgmr.msra.gmra.mrb[0].mxu1 %vm405_vm1, %v25217_v52  ;;  %v25681_v52 = vld [vmem:[#allocation2 + $0x310] sm:$0xff] }
  0xd2   : > { %21338 = vmatprep.mubr.msk.f32.mxu0 %vm405_vm1, %v25225_v55  ;;  %20732 = vmatprep.mubr.msk.f32.mxu1 %vm405_vm1, %v25223_v54  ;;  %29393 = vst [vmem:[#allocation9_spill] sm:$0xff] %v25681_v52  ;;  %v5280_v54 = vld [vmem:[#allocation2 + $0x328] sm:$0xff] }
  0xd3   : > { %20778 = vmatpush3.msk.msra.mxu1 %vm752_vm0, %v17516_v36  ;;  %v25821_v36 = vld [vmem:[#allocation2 + $0x22a] sm:$0xff] }
  0xd5   : > { %21339 = vmatmul.mubr.msk.f32.gmra.mrb[6].mxu0 %vm405_vm1, %v25237_v57  ;;  %20733 = vmatmul.mubr.msk.f32.gmra.mrb[2].mxu1 %vm405_vm1, %v25233_v56  ;;  %v17550_v56 = vld [vmem:[%s29357_s2 + $0x10] sm:$0xf] }
  0xd6   : > { %21341 = vmatprep.mubr.msk.f32.mxu0 %vm405_vm1, %v25239_v58  ;;  %20735 = vmatprep.mubr.msk.f32.mxu1 %vm405_vm1, %v25241_v59  ;;  %v5281_v59 = vld [vmem:[#allocation2 + $0x330] sm:$0xff] }
  0xd7   : > { %20827 = vmatprep.subr.msk.mxu1 %vm752_vm0, %v17550_v56 }
  0xd9   : > { %21342 = vmatmul.mubr.msk.f32.gmra.mrb[8].mxu0 %vm405_vm1, %v25261_v2  ;;  %20736 = vmatmul.mubr.msk.f32.gmra.mrb[4].mxu1 %vm405_vm1, %v25256_v0  ;;  %v5640_v0 = vld [vmem:[#allocation2 + $0xca] sm:$0xff] }
  0xda   : > { %21344 = vmatprep.mubr.msk.f32.mxu0 %vm405_vm1, %v25265_v4  ;;  %20738 = vmatprep.mubr.msk.f32.mxu1 %vm405_vm1, %v25263_v3  ;;  %v5641_v3 = vld [vmem:[#allocation2 + $0xd2] sm:$0xff] }
  0xdd   : > { %21345 = vmatmul.mubr.msk.f32.gmra.mrb[10].mxu0 %vm405_vm1, %v25277_v6  ;;  %20739 = vmatmul.mubr.msk.f32.gmra.mrb[6].mxu1 %vm405_vm1, %v25273_v5  ;;  %v5642_v5 = vld [vmem:[#allocation2 + $0xea] sm:$0xff] }
  0xde   : > { %21347 = vmatprep.mubr.msk.f32.mxu0 %vm405_vm1, %v25281_v8  ;;  %20741 = vmatprep.mubr.msk.f32.mxu1 %vm405_vm1, %v25279_v7  ;;  %v25705_v7 = vld [vmem:[%s29357_s2 + $0x44] sm:$0xf] }
  0xe1   : > { %21348 = vmatmul.mubr.msk.f32.gmra.mrb[12].mxu0 %vm405_vm1, %v25293_v10  ;;  %20742 = vmatmul.mubr.msk.f32.gmra.mrb[8].mxu1 %vm405_vm1, %v25289_v9  ;;  %v5643_v9 = vld [vmem:[#allocation2 + $0xf2] sm:$0xff] }
  0xe2   : > { %21350 = vmatprep.mubr.msk.f32.mxu0 %vm405_vm1, %v25297_v13  ;;  %20744 = vmatprep.mubr.msk.f32.mxu1 %vm405_vm1, %v25295_v12  ;;  %v25713_v12 = vld [vmem:[#allocation2 + $0x10a] sm:$0xff] }
  0xe5   : > { %21351 = vmatmul.mubr.msk.f32.gmra.mrb[14].mxu0 %vm405_vm1, %v25309_v17  ;;  %20745 = vmatmul.mubr.msk.f32.gmra.mrb[10].mxu1 %vm405_vm1, %v25305_v16  ;;  %v653_v16 = vld [vmem:[#allocation2 + $0x307] sm:$0xff] }
  0xe6   : > { %21353 = vmatprep.mubr.msk.f32.mxu0 %vm405_vm1, %v25313_v19  ;;  %20747 = vmatprep.mubr.msk.f32.mxu1 %vm405_vm1, %v25311_v18  ;;  %v25726_v18 = vld [vmem:[#allocation2 + $0x12a] sm:$0xff] }
  0xe9   : > { %21354 = vmatmul.mubr.msk.f32.gmra.mrb[16].mxu0 %vm405_vm1, %v25325_v21  ;;  %20748 = vmatmul.mubr.msk.f32.gmra.mrb[12].mxu1 %vm405_vm1, %v25321_v20  ;;  %v654_v20 = vld [vmem:[#allocation2 + $0x30f] sm:$0xff] }
  0xea   : > { %21356 = vmatprep.mubr.msk.f32.mxu0 %vm405_vm1, %v25329_v23  ;;  %20750 = vmatprep.mubr.msk.f32.mxu1 %vm405_vm1, %v25327_v22  ;;  %v25737_v22 = vld [vmem:[#allocation2 + $0x14a] sm:$0xff] }
  0xed   : > { %21357 = vmatmul.mubr.msk.f32.gmra.mrb[18].mxu0 %vm405_vm1, %v25341_v25  ;;  %20751 = vmatmul.mubr.msk.f32.gmra.mrb[14].mxu1 %vm405_vm1, %v25337_v24  ;;  %v25746_v24 = vld [vmem:[#allocation2 + $0x152] sm:$0xff] }
  0xee   : > { %21359 = vmatprep.mubr.msk.f32.mxu0 %vm405_vm1, %v25345_v27  ;;  %20753 = vmatprep.mubr.msk.f32.mxu1 %vm405_vm1, %v25343_v26  ;;  %v25748_v26 = vld [vmem:[#allocation2 + $0x16a] sm:$0xff] }
  0xf1   : > { %21360 = vmatmul.mubr.msk.f32.gmra.mrb[20].mxu0 %vm405_vm1, %v25357_v29  ;;  %20754 = vmatmul.mubr.msk.f32.gmra.mrb[16].mxu1 %vm405_vm1, %v25353_v28  ;;  %v25761_v28 = vld [vmem:[#allocation2 + $0x18a] sm:$0xff] }
  0xf2   : > { %21362 = vmatprep.mubr.msk.f32.mxu0 %vm405_vm1, %v25361_v34  ;;  %20756 = vmatprep.mubr.msk.f32.mxu1 %vm405_vm1, %v25359_v33  ;;  %v25773_v33 = vld [vmem:[#allocation2 + $0x1aa] sm:$0xff] }
  0xf5   : > { %21363 = vmatmul.mubr.msk.f32.gmra.mrb[22].mxu0 %vm405_vm1, %v25376_v40  ;;  %20757 = vmatmul.mubr.msk.f32.gmra.mrb[18].mxu1 %vm405_vm1, %v25369_v35  ;;  %v29394_v35 = vld [vmem:[#allocation7_spill] sm:$0xff] }
  0xf6   : > { %21365 = vmatprep.mubr.msk.f32.mxu0 %vm405_vm1, %v25517_v47  ;;  %20759 = vmatprep.mubr.msk.f32.mxu1 %vm405_vm1, %v25378_v41  ;;  %v25783_v41 = vld [vmem:[#allocation2 + $0x1b2] sm:$0xff] }
  0xf9   : > { %21366 = vmatmul.mubr.msk.f32.gmra.mrb[24].mxu0 %vm405_vm1, %v25527_v48  ;;  %20760 = vmatmul.mubr.msk.f32.gmra.mrb[20].mxu1 %vm405_vm1, %v25387_v42  ;;  %v25785_v42 = vld [vmem:[#allocation2 + $0x1ca] sm:$0xff] }
  0xfa   : > { %21368 = vmatprep.mubr.msk.f32.mxu0 %vm405_vm1, %v25529_v63  ;;  %20762 = vmatprep.mubr.msk.f32.mxu1 %vm405_vm1, %v25391_v43  ;;  %v29395_v43 = vld [vmem:[#allocation8_spill] sm:$0xff] }
  0xfd   : > { %21369 = vmatmul.mubr.msk.f32.gmra.mrb[26].mxu0 %vm405_vm1, %v25542_v1  ;;  %20763 = vmatmul.mubr.msk.f32.gmra.mrb[22].mxu1 %vm405_vm1, %v25404_v45  ;;  %v25795_v45 = vld [vmem:[#allocation2 + $0x1d2] sm:$0xff] }
  0xfe   : > { %21371 = vmatprep.mubr.msk.f32.mxu0 %vm405_vm1, %v25671_v50  ;;  %20765 = vmatprep.mubr.msk.f32.mxu1 %vm405_vm1, %v25410_v60  ;;  %v25797_v60 = vld [vmem:[#allocation2 + $0x1ea] sm:$0xff] }
 0x101   : > { %21372 = vmatmul.mubr.msk.f32.gmra.mrb[28].mxu0 %vm405_vm1, %v25681_v52  ;;  %20766 = vmatmul.mubr.msk.f32.gmra.mrb[24].mxu1 %vm405_vm1, %v25420_v61  ;;  %v25807_v61 = vld [vmem:[#allocation2 + $0x1f2] sm:$0xff]  ;;  %v25898_v52 = vld [vmem:[%s29357_s2 + $0x48] sm:$0xf] }
 0x102   : > { %21374 = vmatprep.mubr.msk.f32.mxu0 %vm405_vm1, %v5280_v54  ;;  %20768 = vmatprep.mubr.msk.f32.mxu1 %vm405_vm1, %v25424_v11  ;;  %v25809_v11 = vld [vmem:[#allocation2 + $0x20a] sm:$0xff] }
 0x103   : > { %v25833_v54 = vld [vmem:[#allocation2 + $0x24a] sm:$0xff] }
 0x105   : > { %21375 = vmatmul.mubr.msk.f32.gmra.mrb[30].mxu0 %vm405_vm1, %v5281_v59  ;;  %20769 = vmatmul.mubr.msk.f32.gmra.mrb[26].mxu1 %vm405_vm1, %v25432_v62  ;;  %v25819_v62 = vld [vmem:[#allocation2 + $0x212] sm:$0xff]  ;;  %v25845_v59 = vld [vmem:[#allocation2 + $0x26a] sm:$0xff] }
 0x106   : > { %21379 = vmatprep.mubr.msk.f32.mxu0 %vm405_vm1, %v5640_v0  ;;  %20771 = vmatprep.mubr.msk.f32.mxu1 %vm405_vm1, %v25578_v39  ;;  %v25735_v39 = vld [vmem:[#allocation2 + $0x132] sm:$0xff] }
 0x107   : > { %v25855_v0 = vld [vmem:[#allocation2 + $0x272] sm:$0xff] }
 0x109   : > { %21380 = vmatmul.mubr.msk.f32.vlgmr.msra.gmra.mrb[0].mxu0 %vm405_vm1, %v5641_v3  ;;  %20772 = vmatmul.mubr.msk.f32.gmra.mrb[28].mxu1 %vm405_vm1, %v25586_v44  ;;  %v25831_v44 = vld [vmem:[#allocation2 + $0x232] sm:$0xff]  ;;  %v25857_v3 = vld [vmem:[#allocation2 + $0x28a] sm:$0xff] }
 0x10a   : > { %21428 = vmatpush3.msk.msra.mxu0 %vm752_vm0, %v25558_v37  ;;  %21382 = vmatprep.mubr.msk.f32.mxu0 %vm405_vm1, %v5642_v5  ;;  %v25724_v37 = vld [vmem:[#allocation2 + $0x112] sm:$0xff] }
 0x10b   : > { %21477 = vmatprep.subr.msk.mxu0 %vm752_vm0, %v25705_v7  ;;  %20774 = vmatprep.mubr.msk.f32.mxu1 %vm405_vm1, %v653_v16  ;;  %v25867_v5 = vld [vmem:[#allocation2 + $0x292] sm:$0xff]  ;;  %v17584_v16 = vld [vmem:[%s29357_s2 + $0x1c] sm:$0xf] }
 0x10d   : > { %21383 = vmatmul.mubr.msk.f32.gmra.mrb[2].mxu0 %vm405_vm1, %v5643_v9  ;;  %20775 = vmatmul.mubr.msk.f32.gmra.mrb[30].mxu1 %vm405_vm1, %v654_v20  ;;  %v25869_v9 = vld [vmem:[#allocation2 + $0x2aa] sm:$0xff]  ;;  %v25882_v20 = vld [vmem:[#allocation2 + $0x2b2] sm:$0xff] }
 0x10e   : > { %21385 = vmatprep.mubr.msk.f32.mxu0 %vm405_vm1, %v25713_v12  ;;  %20779 = vmatprep.mubr.msk.f32.mxu1 %vm405_vm1, %v25107_v14  ;;  %v25758_v14 = vld [vmem:[#allocation2 + $0x172] sm:$0xff] }
 0x111   : > { %21386 = vmatmul.mubr.msk.f32.gmra.mrb[4].mxu0 %vm405_vm1, %v25724_v37  ;;  %20780 = vmatmul.mubr.msk.f32.vlgmr.msra.gmra.mrb[0].mxu1 %vm405_vm1, %v25113_v15  ;;  %v25771_v15 = vld [vmem:[#allocation2 + $0x192] sm:$0xff] }
 0x112   : > { %21388 = vmatprep.mubr.msk.f32.mxu0 %vm405_vm1, %v25726_v18  ;;  %20782 = vmatprep.mubr.msk.f32.mxu1 %vm405_vm1, %v25148_v30 }
 0x113   : > { %20828 = vmatpush3.msk.msra.mxu1 %vm752_vm0, %v17550_v56  ;;  %v25843_v56 = vld [vmem:[#allocation2 + $0x252] sm:$0xff] }
 0x114   : > { %20877 = vmatprep.subr.msk.mxu1 %vm752_vm0, %v17584_v16 }
 0x115   : > { %21389 = vmatmul.mubr.msk.f32.gmra.mrb[6].mxu0 %vm405_vm1, %v25735_v39  ;;  %20783 = vmatmul.mubr.msk.f32.gmra.mrb[2].mxu1 %vm405_vm1, %v25155_v31 }
 0x116   : > { %21391 = vmatprep.mubr.msk.f32.mxu0 %vm405_vm1, %v25737_v22  ;;  %20785 = vmatprep.mubr.msk.f32.mxu1 %vm405_vm1, %v25157_v32 }
 0x119   : > { %21392 = vmatmul.mubr.msk.f32.gmra.mrb[8].mxu0 %vm405_vm1, %v25746_v24  ;;  %20786 = vmatmul.mubr.msk.f32.gmra.mrb[4].mxu1 %vm405_vm1, %v29394_v35 }
 0x11a   : > { %21394 = vmatprep.mubr.msk.f32.mxu0 %vm405_vm1, %v25748_v26  ;;  %20788 = vmatprep.mubr.msk.f32.mxu1 %vm405_vm1, %v25173_v38 }
 0x11d   : > { %21395 = vmatmul.mubr.msk.f32.gmra.mrb[10].mxu0 %vm405_vm1, %v25758_v14  ;;  %20789 = vmatmul.mubr.msk.f32.gmra.mrb[6].mxu1 %vm405_vm1, %v29395_v43 }
 0x11e   : > { %21397 = vmatprep.mubr.msk.f32.mxu0 %vm405_vm1, %v25761_v28  ;;  %20791 = vmatprep.mubr.msk.f32.mxu1 %vm405_vm1, %v25188_v46 }
 0x121   : > { %21398 = vmatmul.mubr.msk.f32.gmra.mrb[12].mxu0 %vm405_vm1, %v25771_v15  ;;  %20792 = vmatmul.mubr.msk.f32.gmra.mrb[8].mxu1 %vm405_vm1, %v25203_v49 }
 0x122   : > { %21400 = vmatprep.mubr.msk.f32.mxu0 %vm405_vm1, %v25773_v33  ;;  %20794 = vmatprep.mubr.msk.f32.mxu1 %vm405_vm1, %v25209_v51 }
 0x125   : > { %21401 = vmatmul.mubr.msk.f32.gmra.mrb[14].mxu0 %vm405_vm1, %v25783_v41  ;;  %20795 = vmatmul.mubr.msk.f32.gmra.mrb[10].mxu1 %vm405_vm1, %v25221_v53 }
 0x126   : > { %21403 = vmatprep.mubr.msk.f32.mxu0 %vm405_vm1, %v25785_v42  ;;  %20797 = vmatprep.mubr.msk.f32.mxu1 %vm405_vm1, %v25225_v55 }
 0x129   : > { %21404 = vmatmul.mubr.msk.f32.gmra.mrb[16].mxu0 %vm405_vm1, %v25795_v45  ;;  %20798 = vmatmul.mubr.msk.f32.gmra.mrb[12].mxu1 %vm405_vm1, %v25237_v57 }
 0x12a   : > { %21406 = vmatprep.mubr.msk.f32.mxu0 %vm405_vm1, %v25797_v60  ;;  %20800 = vmatprep.mubr.msk.f32.mxu1 %vm405_vm1, %v25239_v58 }
 0x12d   : > { %21407 = vmatmul.mubr.msk.f32.gmra.mrb[18].mxu0 %vm405_vm1, %v25807_v61  ;;  %20801 = vmatmul.mubr.msk.f32.gmra.mrb[14].mxu1 %vm405_vm1, %v25261_v2 }
 0x12e   : > { %21409 = vmatprep.mubr.msk.f32.mxu0 %vm405_vm1, %v25809_v11  ;;  %20803 = vmatprep.mubr.msk.f32.mxu1 %vm405_vm1, %v25265_v4 }
 0x131   : > { %21410 = vmatmul.mubr.msk.f32.gmra.mrb[20].mxu0 %vm405_vm1, %v25819_v62  ;;  %20804 = vmatmul.mubr.msk.f32.gmra.mrb[16].mxu1 %vm405_vm1, %v25277_v6 }
 0x132   : > { %21412 = vmatprep.mubr.msk.f32.mxu0 %vm405_vm1, %v25821_v36  ;;  %20806 = vmatprep.mubr.msk.f32.mxu1 %vm405_vm1, %v25281_v8 }
 0x135   : > { %21413 = vmatmul.mubr.msk.f32.gmra.mrb[22].mxu0 %vm405_vm1, %v25831_v44  ;;  %20807 = vmatmul.mubr.msk.f32.gmra.mrb[18].mxu1 %vm405_vm1, %v25293_v10 }
 0x136   : > { %21415 = vmatprep.mubr.msk.f32.mxu0 %vm405_vm1, %v25833_v54  ;;  %20809 = vmatprep.mubr.msk.f32.mxu1 %vm405_vm1, %v25297_v13 }
 0x139   : > { %21416 = vmatmul.mubr.msk.f32.gmra.mrb[24].mxu0 %vm405_vm1, %v25843_v56  ;;  %20810 = vmatmul.mubr.msk.f32.gmra.mrb[20].mxu1 %vm405_vm1, %v25309_v17 }
 0x13a   : > { %21418 = vmatprep.mubr.msk.f32.mxu0 %vm405_vm1, %v25845_v59  ;;  %20812 = vmatprep.mubr.msk.f32.mxu1 %vm405_vm1, %v25313_v19 }
 0x13d   : > { %21419 = vmatmul.mubr.msk.f32.gmra.mrb[26].mxu0 %vm405_vm1, %v25855_v0  ;;  %20813 = vmatmul.mubr.msk.f32.gmra.mrb[22].mxu1 %vm405_vm1, %v25325_v21 }
 0x13e   : > { %21421 = vmatprep.mubr.msk.f32.mxu0 %vm405_vm1, %v25857_v3  ;;  %20815 = vmatprep.mubr.msk.f32.mxu1 %vm405_vm1, %v25329_v23 }
 0x141   : > { %21422 = vmatmul.mubr.msk.f32.gmra.mrb[28].mxu0 %vm405_vm1, %v25867_v5  ;;  %20816 = vmatmul.mubr.msk.f32.gmra.mrb[24].mxu1 %vm405_vm1, %v25341_v25 }
 0x142   : > { %21424 = vmatprep.mubr.msk.f32.mxu0 %vm405_vm1, %v25869_v9  ;;  %20818 = vmatprep.mubr.msk.f32.mxu1 %vm405_vm1, %v25345_v27 }
 0x145   : > { %21425 = vmatmul.mubr.msk.f32.gmra.mrb[30].mxu0 %vm405_vm1, %v25882_v20  ;;  %20819 = vmatmul.mubr.msk.f32.gmra.mrb[26].mxu1 %vm405_vm1, %v25357_v29 }
 0x146   : > { %21429 = vmatprep.mubr.msk.f32.mxu0 %vm405_vm1, %v25713_v12  ;;  %20821 = vmatprep.mubr.msk.f32.mxu1 %vm405_vm1, %v25361_v34  ;;  %v5677_v12 = vld [vmem:[#allocation2 + $0x312] sm:$0xff] }
 0x149   : > { %21430 = vmatmul.mubr.msk.f32.vlgmr.msra.gmra.mrb[0].mxu0 %vm405_vm1, %v25724_v37  ;;  %20822 = vmatmul.mubr.msk.f32.gmra.mrb[28].mxu1 %vm405_vm1, %v25376_v40  ;;  %v2352_v37 = vld [vmem:[#allocation2 + $0x288] sm:$0xff] }
 0x14a   : > { %21478 = vmatpush3.msk.msra.mxu0 %vm752_vm0, %v25705_v7  ;;  %21432 = vmatprep.mubr.msk.f32.mxu0 %vm405_vm1, %v25726_v18  ;;  %v26205_v7 = vld [vmem:[#allocation2 + $0x270] sm:$0xff] }
 0x14b   : > { %21527 = vmatprep.subr.msk.mxu0 %vm752_vm0, %v25898_v52  ;;  %20824 = vmatprep.mubr.msk.f32.mxu1 %vm405_vm1, %v25517_v47  ;;  %29408 = vst [vmem:[#allocation20_spill] sm:$0xff] %v26205_v7  ;;  %v5678_v18 = vld [vmem:[#allocation2 + $0x32a] sm:$0xff] }
 0x14d   : > { %21433 = vmatmul.mubr.msk.f32.gmra.mrb[2].mxu0 %vm405_vm1, %v25735_v39  ;;  %20825 = vmatmul.mubr.msk.f32.gmra.mrb[30].mxu1 %vm405_vm1, %v25527_v48  ;;  %v2353_v39 = vld [vmem:[#allocation2 + $0x290] sm:$0xff] }
 0x14e   : > { %21435 = vmatprep.mubr.msk.f32.mxu0 %vm405_vm1, %v25737_v22  ;;  %20829 = vmatprep.mubr.msk.f32.mxu1 %vm405_vm1, %v25148_v30  ;;  %v26007_v30 = vld [vmem:[#allocation2 + $0x2ca] sm:$0xff] }
 0x151   : > { %21436 = vmatmul.mubr.msk.f32.gmra.mrb[4].mxu0 %vm405_vm1, %v25746_v24  ;;  %20830 = vmatmul.mubr.msk.f32.vlgmr.msra.gmra.mrb[0].mxu1 %vm405_vm1, %v25155_v31  ;;  %v26017_v31 = vld [vmem:[#allocation2 + $0x2d2] sm:$0xff] }
 0x152   : > { %21438 = vmatprep.mubr.msk.f32.mxu0 %vm405_vm1, %v25748_v26  ;;  %20832 = vmatprep.mubr.msk.f32.mxu1 %vm405_vm1, %v25157_v32  ;;  %v26019_v32 = vld [vmem:[#allocation2 + $0x2ea] sm:$0xff] }
 0x153   : > { %20878 = vmatpush3.msk.msra.mxu1 %vm752_vm0, %v17584_v16  ;;  %v26298_v16 = vld [vmem:[#allocation2 + $0x151] sm:$0xff] }
 0x155   : > { %21439 = vmatmul.mubr.msk.f32.gmra.mrb[6].mxu0 %vm405_vm1, %v25758_v14  ;;  %20833 = vmatmul.mubr.msk.f32.gmra.mrb[2].mxu1 %vm405_vm1, %v29394_v35  ;;  %v6589_v35 = vld [vmem:[#allocation2 + $0xa4] sm:$0xff] }
 0x156   : > { %21441 = vmatprep.mubr.msk.f32.mxu0 %vm405_vm1, %v25761_v28  ;;  %20835 = vmatprep.mubr.msk.f32.mxu1 %vm405_vm1, %v25173_v38  ;;  %v17618_v38 = vld [vmem:[%s29357_s2 + $0x8] sm:$0xf] }
 0x157   : > { %20927 = vmatprep.subr.msk.mxu1 %vm752_vm0, %v17618_v38 }
 0x159   : > { %21442 = vmatmul.mubr.msk.f32.gmra.mrb[8].mxu0 %vm405_vm1, %v25771_v15  ;;  %20836 = vmatmul.mubr.msk.f32.gmra.mrb[4].mxu1 %vm405_vm1, %v29395_v43  ;;  %v6591_v43 = vld [vmem:[#allocation2 + $0xc4] sm:$0xff] }
 0x15a   : > { %21444 = vmatprep.mubr.msk.f32.mxu0 %vm405_vm1, %v25773_v33  ;;  %20838 = vmatprep.mubr.msk.f32.mxu1 %vm405_vm1, %v25188_v46  ;;  %v26032_v46 = vld [vmem:[#allocation2 + $0x2f2] sm:$0xff] }
 0x15d   : > { %21445 = vmatmul.mubr.msk.f32.gmra.mrb[10].mxu0 %vm405_vm1, %v25783_v41  ;;  %20839 = vmatmul.mubr.msk.f32.gmra.mrb[6].mxu1 %vm405_vm1, %v25203_v49  ;;  %v26048_v49 = vld [vmem:[%s29357_s2 + $0x54] sm:$0xf] }
 0x15e   : > { %21447 = vmatprep.mubr.msk.f32.mxu0 %vm405_vm1, %v25785_v42  ;;  %20841 = vmatprep.mubr.msk.f32.mxu1 %vm405_vm1, %v25209_v51  ;;  %v26076_v51 = vld [vmem:[#allocation2 + $0x128] sm:$0xff] }
 0x161   : > { %21448 = vmatmul.mubr.msk.f32.gmra.mrb[12].mxu0 %vm405_vm1, %v25795_v45  ;;  %20842 = vmatmul.mubr.msk.f32.gmra.mrb[8].mxu1 %vm405_vm1, %v25221_v53  ;;  %v26084_v53 = vld [vmem:[#allocation2 + $0x130] sm:$0xff] }
 0x162   : > { %21450 = vmatprep.mubr.msk.f32.mxu0 %vm405_vm1, %v25797_v60  ;;  %20844 = vmatprep.mubr.msk.f32.mxu1 %vm405_vm1, %v25225_v55  ;;  %v26088_v55 = vld [vmem:[#allocation2 + $0x148] sm:$0xff] }
 0x165   : > { %21451 = vmatmul.mubr.msk.f32.gmra.mrb[14].mxu0 %vm405_vm1, %v25807_v61  ;;  %20845 = vmatmul.mubr.msk.f32.gmra.mrb[10].mxu1 %vm405_vm1, %v25237_v57  ;;  %v26096_v57 = vld [vmem:[#allocation2 + $0x150] sm:$0xff] }
 0x166   : > { %21453 = vmatprep.mubr.msk.f32.mxu0 %vm405_vm1, %v25809_v11  ;;  %20847 = vmatprep.mubr.msk.f32.mxu1 %vm405_vm1, %v25239_v58  ;;  %v26100_v58 = vld [vmem:[#allocation2 + $0x168] sm:$0xff] }
 0x169   : > { %21454 = vmatmul.mubr.msk.f32.gmra.mrb[16].mxu0 %vm405_vm1, %v25819_v62  ;;  %20848 = vmatmul.mubr.msk.f32.gmra.mrb[12].mxu1 %vm405_vm1, %v25261_v2  ;;  %v26109_v2 = vld [vmem:[#allocation2 + $0x170] sm:$0xff] }
 0x16a   : > { %21456 = vmatprep.mubr.msk.f32.mxu0 %vm405_vm1, %v25821_v36  ;;  %20850 = vmatprep.mubr.msk.f32.mxu1 %vm405_vm1, %v25265_v4  ;;  %v26113_v4 = vld [vmem:[#allocation2 + $0x188] sm:$0xff] }
 0x16d   : > { %21457 = vmatmul.mubr.msk.f32.gmra.mrb[18].mxu0 %vm405_vm1, %v25831_v44  ;;  %20851 = vmatmul.mubr.msk.f32.gmra.mrb[14].mxu1 %vm405_vm1, %v25277_v6  ;;  %v26121_v6 = vld [vmem:[#allocation2 + $0x190] sm:$0xff] }
 0x16e   : > { %21459 = vmatprep.mubr.msk.f32.mxu0 %vm405_vm1, %v25833_v54  ;;  %20853 = vmatprep.mubr.msk.f32.mxu1 %vm405_vm1, %v25281_v8  ;;  %v26125_v8 = vld [vmem:[#allocation2 + $0x1a8] sm:$0xff] }
 0x171   : > { %21460 = vmatmul.mubr.msk.f32.gmra.mrb[20].mxu0 %vm405_vm1, %v25843_v56  ;;  %20854 = vmatmul.mubr.msk.f32.gmra.mrb[16].mxu1 %vm405_vm1, %v25293_v10  ;;  %v26133_v10 = vld [vmem:[#allocation2 + $0x1b0] sm:$0xff] }
 0x172   : > { %21462 = vmatprep.mubr.msk.f32.mxu0 %vm405_vm1, %v25845_v59  ;;  %20856 = vmatprep.mubr.msk.f32.mxu1 %vm405_vm1, %v25297_v13  ;;  %29396 = vst [vmem:[#allocation7_spill] sm:$0xff] %v26133_v10  ;;  %v26137_v13 = vld [vmem:[#allocation2 + $0x1c8] sm:$0xff] }
 0x173   : > { %29397 = vst [vmem:[#allocation8_spill] sm:$0xff] %v26137_v13 }
 0x175   : > { %21463 = vmatmul.mubr.msk.f32.gmra.mrb[22].mxu0 %vm405_vm1, %v25855_v0  ;;  %20857 = vmatmul.mubr.msk.f32.gmra.mrb[18].mxu1 %vm405_vm1, %v25309_v17  ;;  %v26145_v17 = vld [vmem:[#allocation2 + $0x1d0] sm:$0xff] }
 0x176   : > { %21465 = vmatprep.mubr.msk.f32.mxu0 %vm405_vm1, %v25857_v3  ;;  %20859 = vmatprep.mubr.msk.f32.mxu1 %vm405_vm1, %v25313_v19  ;;  %29398 = vst [vmem:[#allocation10_spill] sm:$0xff] %v26145_v17  ;;  %v26149_v19 = vld [vmem:[#allocation2 + $0x1e8] sm:$0xff] }
 0x177   : > { %29399 = vst [vmem:[#allocation11_spill] sm:$0xff] %v26149_v19 }
 0x179   : > { %21466 = vmatmul.mubr.msk.f32.gmra.mrb[24].mxu0 %vm405_vm1, %v25867_v5  ;;  %20860 = vmatmul.mubr.msk.f32.gmra.mrb[20].mxu1 %vm405_vm1, %v25325_v21  ;;  %v26157_v21 = vld [vmem:[#allocation2 + $0x1f0] sm:$0xff] }
 0x17a   : > { %21468 = vmatprep.mubr.msk.f32.mxu0 %vm405_vm1, %v25869_v9  ;;  %20862 = vmatprep.mubr.msk.f32.mxu1 %vm405_vm1, %v25329_v23  ;;  %29400 = vst [vmem:[#allocation12_spill] sm:$0xff] %v26157_v21  ;;  %v26161_v23 = vld [vmem:[#allocation2 + $0x208] sm:$0xff] }
 0x17b   : > { %29401 = vst [vmem:[#allocation13_spill] sm:$0xff] %v26161_v23 }
 0x17d   : > { %21469 = vmatmul.mubr.msk.f32.gmra.mrb[26].mxu0 %vm405_vm1, %v25882_v20  ;;  %20863 = vmatmul.mubr.msk.f32.gmra.mrb[22].mxu1 %vm405_vm1, %v25341_v25  ;;  %v26169_v25 = vld [vmem:[#allocation2 + $0x210] sm:$0xff] }
 0x17e   : > { %21471 = vmatprep.mubr.msk.f32.mxu0 %vm405_vm1, %v26007_v30  ;;  %20865 = vmatprep.mubr.msk.f32.mxu1 %vm405_vm1, %v25345_v27  ;;  %29402 = vst [vmem:[#allocation14_spill] sm:$0xff] %v26169_v25  ;;  %v26173_v27 = vld [vmem:[#allocation2 + $0x228] sm:$0xff] }
 0x17f   : > { %29403 = vst [vmem:[#allocation15_spill] sm:$0xff] %v26173_v27 }
 0x181   : > { %21472 = vmatmul.mubr.msk.f32.gmra.mrb[28].mxu0 %vm405_vm1, %v26017_v31  ;;  %20866 = vmatmul.mubr.msk.f32.gmra.mrb[24].mxu1 %vm405_vm1, %v25357_v29  ;;  %v26181_v29 = vld [vmem:[#allocation2 + $0x230] sm:$0xff] }
 0x182   : > { %21474 = vmatprep.mubr.msk.f32.mxu0 %vm405_vm1, %v26019_v32  ;;  %20868 = vmatprep.mubr.msk.f32.mxu1 %vm405_vm1, %v25361_v34  ;;  %29404 = vst [vmem:[#allocation16_spill] sm:$0xff] %v26181_v29  ;;  %v26185_v34 = vld [vmem:[#allocation2 + $0x248] sm:$0xff] }
 0x183   : > { %29405 = vst [vmem:[#allocation17_spill] sm:$0xff] %v26185_v34 }
 0x185   : > { %21475 = vmatmul.mubr.msk.f32.gmra.mrb[30].mxu0 %vm405_vm1, %v26032_v46  ;;  %20869 = vmatmul.mubr.msk.f32.gmra.mrb[26].mxu1 %vm405_vm1, %v25376_v40  ;;  %v26193_v40 = vld [vmem:[#allocation2 + $0x250] sm:$0xff] }
 0x186   : > { %21479 = vmatprep.mubr.msk.f32.mxu0 %vm405_vm1, %v25737_v22  ;;  %20871 = vmatprep.mubr.msk.f32.mxu1 %vm405_vm1, %v25517_v47  ;;  %29406 = vst [vmem:[#allocation18_spill] sm:$0xff] %v26193_v40  ;;  %v26197_v47 = vld [vmem:[#allocation2 + $0x268] sm:$0xff]  ;;  %v17652_v22 = vld [vmem:[%s29357_s2 + $0x14] sm:$0xf] }
 0x187   : > { %29407 = vst [vmem:[#allocation19_spill] sm:$0xff] %v26197_v47 }
 0x189   : > { %21480 = vmatmul.mubr.msk.f32.vlgmr.msra.gmra.mrb[0].mxu0 %vm405_vm1, %v25746_v24  ;;  %20872 = vmatmul.mubr.msk.f32.gmra.mrb[28].mxu1 %vm405_vm1, %v25527_v48  ;;  %v5679_v24 = vld [vmem:[#allocation2 + $0x332] sm:$0xff] }
 0x18a   : > { %21528 = vmatpush3.msk.msra.mxu0 %vm752_vm0, %v25898_v52  ;;  %21482 = vmatprep.mubr.msk.f32.mxu0 %vm405_vm1, %v25748_v26  ;;  %v5676_v52 = vld [vmem:[#allocation2 + $0x30a] sm:$0xff] }
 0x18b   : > { %21577 = vmatprep.subr.msk.mxu0 %vm752_vm0, %v26048_v49  ;;  %20874 = vmatprep.mubr.msk.f32.mxu1 %vm405_vm1, %v25529_v63  ;;  %v2354_v26 = vld [vmem:[#allocation2 + $0x2a8] sm:$0xff] }
 0x18d   : > { %21483 = vmatmul.mubr.msk.f32.gmra.mrb[2].mxu0 %vm405_vm1, %v25758_v14  ;;  %20875 = vmatmul.mubr.msk.f32.gmra.mrb[30].mxu1 %vm405_vm1, %v25542_v1  ;;  %v6587_v14 = vld [vmem:[#allocation2 + $0x84] sm:$0xff] }
 0x18e   : > { %21485 = vmatprep.mubr.msk.f32.mxu0 %vm405_vm1, %v25761_v28  ;;  %20879 = vmatprep.mubr.msk.f32.mxu1 %vm405_vm1, %v26076_v51  ;;  %v2355_v28 = vld [vmem:[#allocation2 + $0x2b0] sm:$0xff] }
 0x191   : > { %21486 = vmatmul.mubr.msk.f32.gmra.mrb[4].mxu0 %vm405_vm1, %v25771_v15  ;;  %20880 = vmatmul.mubr.msk.f32.vlgmr.msra.gmra.mrb[0].mxu1 %vm405_vm1, %v26084_v53  ;;  %v6588_v15 = vld [vmem:[#allocation2 + $0x8c] sm:$0xff] }
 0x192   : > { %21488 = vmatprep.mubr.msk.f32.mxu0 %vm405_vm1, %v25773_v33  ;;  %20882 = vmatprep.mubr.msk.f32.mxu1 %vm405_vm1, %v26088_v55  ;;  %v2356_v33 = vld [vmem:[#allocation2 + $0x2c8] sm:$0xff] }
 0x193   : > { %20928 = vmatpush3.msk.msra.mxu1 %vm752_vm0, %v17618_v38  ;;  %v26318_v38 = vld [vmem:[#allocation2 + $0x18c] sm:$0xff] }
 0x194   : > { %20977 = vmatprep.subr.msk.mxu1 %vm752_vm0, %v17652_v22 }
 0x195   : > { %21489 = vmatmul.mubr.msk.f32.gmra.mrb[6].mxu0 %vm405_vm1, %v25783_v41  ;;  %20883 = vmatmul.mubr.msk.f32.gmra.mrb[2].mxu1 %vm405_vm1, %v26096_v57  ;;  %v26225_v41 = vld [vmem:[%s29357_s2 + $0x60] sm:$0xf] }
 0x196   : > { %21491 = vmatprep.mubr.msk.f32.mxu0 %vm405_vm1, %v25785_v42  ;;  %20885 = vmatprep.mubr.msk.f32.mxu1 %vm405_vm1, %v26100_v58  ;;  %v6590_v42 = vld [vmem:[#allocation2 + $0xac] sm:$0xff] }
 0x199   : > { %21492 = vmatmul.mubr.msk.f32.gmra.mrb[8].mxu0 %vm405_vm1, %v25795_v45  ;;  %20886 = vmatmul.mubr.msk.f32.gmra.mrb[4].mxu1 %vm405_vm1, %v26109_v2  ;;  %v6592_v45 = vld [vmem:[#allocation2 + $0xcc] sm:$0xff] }
 0x19a   : > { %21494 = vmatprep.mubr.msk.f32.mxu0 %vm405_vm1, %v25797_v60  ;;  %20888 = vmatprep.mubr.msk.f32.mxu1 %vm405_vm1, %v26113_v4  ;;  %v6593_v60 = vld [vmem:[#allocation2 + $0xe4] sm:$0xff] }
 0x19d   : > { %21495 = vmatmul.mubr.msk.f32.gmra.mrb[10].mxu0 %vm405_vm1, %v25807_v61  ;;  %20889 = vmatmul.mubr.msk.f32.gmra.mrb[6].mxu1 %vm405_vm1, %v26121_v6  ;;  %v2720_v61 = vld [vmem:[#allocation2 + $0xe9] sm:$0xff] }
 0x19e   : > { %21497 = vmatprep.mubr.msk.f32.mxu0 %vm405_vm1, %v25809_v11  ;;  %20891 = vmatprep.mubr.msk.f32.mxu1 %vm405_vm1, %v26125_v8  ;;  %v26246_v11 = vld [vmem:[#allocation2 + $0x104] sm:$0xff] }
 0x1a1   : > { %21498 = vmatmul.mubr.msk.f32.gmra.mrb[12].mxu0 %vm405_vm1, %v25819_v62  ;;  %20892 = vmatmul.mubr.msk.f32.gmra.mrb[8].mxu1 %vm405_vm1, %v26133_v10  ;;  %v29409_v62 = vld [vmem:[#allocation9_spill] sm:$0xff]  ;;  %v26611_v10 = vld [vmem:[%s29357_s2 + $0x58] sm:$0xf] }
 0x1a2   : > { %21500 = vmatprep.mubr.msk.f32.mxu0 %vm405_vm1, %v25821_v36  ;;  %20894 = vmatprep.mubr.msk.f32.mxu1 %vm405_vm1, %v26137_v13  ;;  %v26258_v36 = vld [vmem:[#allocation2 + $0x124] sm:$0xff]  ;;  %v6626_v13 = vld [vmem:[#allocation2 + $0x2ec] sm:$0xff] }
 0x1a5   : > { %21501 = vmatmul.mubr.msk.f32.gmra.mrb[14].mxu0 %vm405_vm1, %v25831_v44  ;;  %20895 = vmatmul.mubr.msk.f32.gmra.mrb[10].mxu1 %vm405_vm1, %v26145_v17  ;;  %v26265_v44 = vld [vmem:[#allocation2 + $0x111] sm:$0xff] }
 0x1a6   : > { %21503 = vmatprep.mubr.msk.f32.mxu0 %vm405_vm1, %v25833_v54  ;;  %20897 = vmatprep.mubr.msk.f32.mxu1 %vm405_vm1, %v26149_v19  ;;  %v26269_v54 = vld [vmem:[#allocation2 + $0x12c] sm:$0xff] }
 0x1a7   : > { %v26455_v19 = vld [vmem:[%s29357_s2 + $0x4c] sm:$0xf]  ;;  %v26461_v17 = vld [vmem:[#allocation2 + $0x291] sm:$0xff] }
 0x1a9   : > { %21504 = vmatmul.mubr.msk.f32.gmra.mrb[16].mxu0 %vm405_vm1, %v25843_v56  ;;  %20898 = vmatmul.mubr.msk.f32.gmra.mrb[12].mxu1 %vm405_vm1, %v26157_v21  ;;  %v26271_v56 = vld [vmem:[#allocation2 + $0x129] sm:$0xff] }
 0x1aa   : > { %21506 = vmatprep.mubr.msk.f32.mxu0 %vm405_vm1, %v25845_v59  ;;  %20900 = vmatprep.mubr.msk.f32.mxu1 %vm405_vm1, %v26161_v23  ;;  %v26274_v59 = vld [vmem:[#allocation2 + $0x144] sm:$0xff]  ;;  %v26444_v23 = vld [vmem:[#allocation2 + $0x271] sm:$0xff] }
 0x1ab   : > { %v26448_v21 = vld [vmem:[#allocation2 + $0x289] sm:$0xff] }
 0x1ad   : > { %21507 = vmatmul.mubr.msk.f32.gmra.mrb[18].mxu0 %vm405_vm1, %v25855_v0  ;;  %20901 = vmatmul.mubr.msk.f32.gmra.mrb[14].mxu1 %vm405_vm1, %v26169_v25  ;;  %v26282_v0 = vld [vmem:[#allocation2 + $0x131] sm:$0xff]  ;;  %v26435_v25 = vld [vmem:[#allocation2 + $0x269] sm:$0xff] }
 0x1ae   : > { %21509 = vmatprep.mubr.msk.f32.mxu0 %vm405_vm1, %v25857_v3  ;;  %20903 = vmatprep.mubr.msk.f32.mxu1 %vm405_vm1, %v26173_v27  ;;  %v26286_v3 = vld [vmem:[#allocation2 + $0x14c] sm:$0xff] }
 0x1af   : > { %v26433_v27 = vld [vmem:[#allocation2 + $0x26c] sm:$0xff] }
 0x1b1   : > { %21510 = vmatmul.mubr.msk.f32.gmra.mrb[20].mxu0 %vm405_vm1, %v25867_v5  ;;  %20904 = vmatmul.mubr.msk.f32.gmra.mrb[16].mxu1 %vm405_vm1, %v26181_v29  ;;  %v26288_v5 = vld [vmem:[#allocation2 + $0x149] sm:$0xff]  ;;  %v17686_v29 = vld [vmem:[%s29357_s2 + $0x20] sm:$0xf] }
 0x1b2   : > { %21512 = vmatprep.mubr.msk.f32.mxu0 %vm405_vm1, %v25869_v9  ;;  %20906 = vmatprep.mubr.msk.f32.mxu1 %vm405_vm1, %v26185_v34  ;;  %v26290_v9 = vld [vmem:[#allocation2 + $0x164] sm:$0xff]  ;;  %v26426_v34 = vld [vmem:[#allocation2 + $0x251] sm:$0xff] }
 0x1b5   : > { %21513 = vmatmul.mubr.msk.f32.gmra.mrb[22].mxu0 %vm405_vm1, %v25882_v20  ;;  %20907 = vmatmul.mubr.msk.f32.gmra.mrb[18].mxu1 %vm405_vm1, %v26193_v40  ;;  %v26302_v20 = vld [vmem:[#allocation2 + $0x16c] sm:$0xff]  ;;  %v26418_v40 = vld [vmem:[#allocation2 + $0x264] sm:$0xff] }
 0x1b6   : > { %21515 = vmatprep.mubr.msk.f32.mxu0 %vm405_vm1, %v26007_v30  ;;  %20909 = vmatprep.mubr.msk.f32.mxu1 %vm405_vm1, %v26197_v47  ;;  %v26304_v30 = vld [vmem:[#allocation2 + $0x169] sm:$0xff] }
 0x1b7   : > { %v26416_v47 = vld [vmem:[#allocation2 + $0x249] sm:$0xff] }
 0x1b9   : > { %21516 = vmatmul.mubr.msk.f32.gmra.mrb[24].mxu0 %vm405_vm1, %v26017_v31  ;;  %20910 = vmatmul.mubr.msk.f32.gmra.mrb[20].mxu1 %vm405_vm1, %v26205_v7  ;;  %v26306_v31 = vld [vmem:[#allocation2 + $0x184] sm:$0xff]  ;;  %v26414_v7 = vld [vmem:[#allocation2 + $0x24c] sm:$0xff] }
 0x1ba   : > { %21518 = vmatprep.mubr.msk.f32.mxu0 %vm405_vm1, %v26019_v32  ;;  %20912 = vmatprep.mubr.msk.f32.mxu1 %vm405_vm1, %v2352_v37  ;;  %v26314_v32 = vld [vmem:[#allocation2 + $0x171] sm:$0xff]  ;;  %v26336_v37 = vld [vmem:[#allocation2 + $0x1a9] sm:$0xff] }
 0x1bd   : > { %21519 = vmatmul.mubr.msk.f32.gmra.mrb[26].mxu0 %vm405_vm1, %v26032_v46  ;;  %20913 = vmatmul.mubr.msk.f32.gmra.mrb[22].mxu1 %vm405_vm1, %v2353_v39  ;;  %v26320_v46 = vld [vmem:[#allocation2 + $0x189] sm:$0xff]  ;;  %v26346_v39 = vld [vmem:[#allocation2 + $0x1b1] sm:$0xff] }
 0x1be   : > { %21521 = vmatprep.mubr.msk.f32.mxu0 %vm405_vm1, %v5676_v52  ;;  %20915 = vmatprep.mubr.msk.f32.mxu1 %vm405_vm1, %v2354_v26  ;;  %v26330_v52 = vld [vmem:[#allocation2 + $0x191] sm:$0xff]  ;;  %v26354_v26 = vld [vmem:[#allocation2 + $0x1e4] sm:$0xff] }
 0x1c1   : > { %21522 = vmatmul.mubr.msk.f32.gmra.mrb[28].mxu0 %vm405_vm1, %v5677_v12  ;;  %20916 = vmatmul.mubr.msk.f32.gmra.mrb[24].mxu1 %vm405_vm1, %v2355_v28  ;;  %v26334_v12 = vld [vmem:[#allocation2 + $0x1ac] sm:$0xff] }
 0x1c2   : > { %21524 = vmatprep.mubr.msk.f32.mxu0 %vm405_vm1, %v5678_v18  ;;  %20918 = vmatprep.mubr.msk.f32.mxu1 %vm405_vm1, %v2356_v33  ;;  %v26338_v18 = vld [vmem:[#allocation2 + $0x1c4] sm:$0xff]  ;;  %v26366_v28 = vld [vmem:[#allocation2 + $0x1ec] sm:$0xff] }
 0x1c3   : > { %v26370_v33 = vld [vmem:[#allocation2 + $0x204] sm:$0xff] }
 0x1c5   : > { %21525 = vmatmul.mubr.msk.f32.gmra.mrb[30].mxu0 %vm405_vm1, %v5679_v24  ;;  %20919 = vmatmul.mubr.msk.f32.gmra.mrb[26].mxu1 %vm405_vm1, %v25527_v48  ;;  %v6594_v48 = vld [vmem:[#allocation2 + $0xec] sm:$0xff] }
 0x1c6   : > { %21529 = vmatprep.mubr.msk.f32.mxu0 %vm405_vm1, %v6587_v14  ;;  %20921 = vmatprep.mubr.msk.f32.mxu1 %vm405_vm1, %v25529_v63  ;;  %v2721_v63 = vld [vmem:[#allocation2 + $0xf1] sm:$0xff]  ;;  %v26352_v24 = vld [vmem:[#allocation2 + $0x1c9] sm:$0xff] }
 0x1c7   : > { %v26362_v14 = vld [vmem:[#allocation2 + $0x1d1] sm:$0xff] }
 0x1c9   : > { %21530 = vmatmul.mubr.msk.f32.vlgmr.msra.gmra.mrb[0].mxu0 %vm405_vm1, %v6588_v15  ;;  %20922 = vmatmul.mubr.msk.f32.gmra.mrb[28].mxu1 %vm405_vm1, %v25542_v1  ;;  %v26254_v1 = vld [vmem:[#allocation2 + $0x10c] sm:$0xff] }
 0x1ca   : > { %21578 = vmatpush3.msk.msra.mxu0 %vm752_vm0, %v26048_v49  ;;  %21532 = vmatprep.mubr.msk.f32.mxu0 %vm405_vm1, %v6589_v35  ;;  %v26322_v49 = vld [vmem:[#allocation2 + $0x1a4] sm:$0xff]  ;;  %v26378_v35 = vld [vmem:[#allocation2 + $0x1f1] sm:$0xff] }
 0x1cb   : > { %21627 = vmatprep.subr.msk.mxu0 %vm752_vm0, %v26225_v41  ;;  %20924 = vmatprep.mubr.msk.f32.mxu1 %vm405_vm1, %v25671_v50  ;;  %v26256_v50 = vld [vmem:[#allocation2 + $0x109] sm:$0xff] }
 0x1cc   : > { %v26368_v15 = vld [vmem:[#allocation2 + $0x1e9] sm:$0xff] }
 0x1cd   : > { %21533 = vmatmul.mubr.msk.f32.gmra.mrb[2].mxu0 %vm405_vm1, %v6590_v42  ;;  %20925 = vmatmul.mubr.msk.f32.gmra.mrb[30].mxu1 %vm405_vm1, %v29409_v62  ;;  %v26382_v42 = vld [vmem:[#allocation2 + $0x20c] sm:$0xff]  ;;  %v26402_v62 = vld [vmem:[#allocation2 + $0x244] sm:$0xff] }
 0x1ce   : > { %21535 = vmatprep.mubr.msk.f32.mxu0 %vm405_vm1, %v6591_v43  ;;  %20929 = vmatprep.mubr.msk.f32.mxu1 %vm405_vm1, %v2720_v61  ;;  %v26384_v43 = vld [vmem:[#allocation2 + $0x209] sm:$0xff] }
 0x1cf   : > { %v26400_v61 = vld [vmem:[#allocation2 + $0x229] sm:$0xff] }
 0x1d1   : > { %21536 = vmatmul.mubr.msk.f32.gmra.mrb[4].mxu0 %vm405_vm1, %v6592_v45  ;;  %20930 = vmatmul.mubr.msk.f32.vlgmr.msra.gmra.mrb[0].mxu1 %vm405_vm1, %v2721_v63  ;;  %v26386_v45 = vld [vmem:[#allocation2 + $0x224] sm:$0xff]  ;;  %v26410_v63 = vld [vmem:[#allocation2 + $0x231] sm:$0xff] }
 0x1d2   : > { %21538 = vmatprep.mubr.msk.f32.mxu0 %vm405_vm1, %v6593_v60  ;;  %20932 = vmatprep.mubr.msk.f32.mxu1 %vm405_vm1, %v26256_v50  ;;  %v26394_v60 = vld [vmem:[#allocation2 + $0x211] sm:$0xff] }
 0x1d3   : > { %20978 = vmatpush3.msk.msra.mxu1 %vm752_vm0, %v17652_v22  ;;  %v26350_v22 = vld [vmem:[#allocation2 + $0x1cc] sm:$0xff] }
 0x1d4   : > { %21027 = vmatprep.subr.msk.mxu1 %vm752_vm0, %v17686_v29 }
 0x1d5   : > { %21539 = vmatmul.mubr.msk.f32.gmra.mrb[6].mxu0 %vm405_vm1, %v6594_v48  ;;  %20933 = vmatmul.mubr.msk.f32.gmra.mrb[2].mxu1 %vm405_vm1, %v26265_v44  ;;  %v26398_v48 = vld [vmem:[#allocation2 + $0x22c] sm:$0xff] }
 0x1d6   : > { %21541 = vmatprep.mubr.msk.f32.mxu0 %vm405_vm1, %v26246_v11  ;;  %20935 = vmatprep.mubr.msk.f32.mxu1 %vm405_vm1, %v26271_v56 }
 0x1d9   : > { %21542 = vmatmul.mubr.msk.f32.gmra.mrb[8].mxu0 %vm405_vm1, %v26254_v1  ;;  %20936 = vmatmul.mubr.msk.f32.gmra.mrb[4].mxu1 %vm405_vm1, %v26282_v0 }
 0x1da   : > { %21544 = vmatprep.mubr.msk.f32.mxu0 %vm405_vm1, %v26258_v36  ;;  %20938 = vmatprep.mubr.msk.f32.mxu1 %vm405_vm1, %v26288_v5 }
 0x1dd   : > { %21545 = vmatmul.mubr.msk.f32.gmra.mrb[10].mxu0 %vm405_vm1, %v26269_v54  ;;  %20939 = vmatmul.mubr.msk.f32.gmra.mrb[6].mxu1 %vm405_vm1, %v26298_v16 }
 0x1de   : > { %21547 = vmatprep.mubr.msk.f32.mxu0 %vm405_vm1, %v26274_v59  ;;  %20941 = vmatprep.mubr.msk.f32.mxu1 %vm405_vm1, %v26304_v30 }
 0x1e1   : > { %21548 = vmatmul.mubr.msk.f32.gmra.mrb[12].mxu0 %vm405_vm1, %v26286_v3  ;;  %20942 = vmatmul.mubr.msk.f32.gmra.mrb[8].mxu1 %vm405_vm1, %v26314_v32 }
 0x1e2   : > { %21550 = vmatprep.mubr.msk.f32.mxu0 %vm405_vm1, %v26290_v9  ;;  %20944 = vmatprep.mubr.msk.f32.mxu1 %vm405_vm1, %v26320_v46 }
 0x1e5   : > { %21551 = vmatmul.mubr.msk.f32.gmra.mrb[14].mxu0 %vm405_vm1, %v26302_v20  ;;  %20945 = vmatmul.mubr.msk.f32.gmra.mrb[10].mxu1 %vm405_vm1, %v26330_v52 }
 0x1e6   : > { %21553 = vmatprep.mubr.msk.f32.mxu0 %vm405_vm1, %v26306_v31  ;;  %20947 = vmatprep.mubr.msk.f32.mxu1 %vm405_vm1, %v26336_v37 }
 0x1e9   : > { %21554 = vmatmul.mubr.msk.f32.gmra.mrb[16].mxu0 %vm405_vm1, %v26318_v38  ;;  %20948 = vmatmul.mubr.msk.f32.gmra.mrb[12].mxu1 %vm405_vm1, %v26346_v39 }
 0x1ea   : > { %21556 = vmatprep.mubr.msk.f32.mxu0 %vm405_vm1, %v26322_v49  ;;  %20950 = vmatprep.mubr.msk.f32.mxu1 %vm405_vm1, %v26352_v24 }
 0x1ed   : > { %21557 = vmatmul.mubr.msk.f32.gmra.mrb[18].mxu0 %vm405_vm1, %v26334_v12  ;;  %20951 = vmatmul.mubr.msk.f32.gmra.mrb[14].mxu1 %vm405_vm1, %v26362_v14 }
 0x1ee   : > { %21559 = vmatprep.mubr.msk.f32.mxu0 %vm405_vm1, %v26338_v18  ;;  %20953 = vmatprep.mubr.msk.f32.mxu1 %vm405_vm1, %v26368_v15 }
 0x1f1   : > { %21560 = vmatmul.mubr.msk.f32.gmra.mrb[20].mxu0 %vm405_vm1, %v26350_v22  ;;  %20954 = vmatmul.mubr.msk.f32.gmra.mrb[16].mxu1 %vm405_vm1, %v26378_v35 }
 0x1f2   : > { %21562 = vmatprep.mubr.msk.f32.mxu0 %vm405_vm1, %v26354_v26  ;;  %20956 = vmatprep.mubr.msk.f32.mxu1 %vm405_vm1, %v26384_v43 }
 0x1f5   : > { %21563 = vmatmul.mubr.msk.f32.gmra.mrb[22].mxu0 %vm405_vm1, %v26366_v28  ;;  %20957 = vmatmul.mubr.msk.f32.gmra.mrb[18].mxu1 %vm405_vm1, %v26394_v60 }
 0x1f6   : > { %21565 = vmatprep.mubr.msk.f32.mxu0 %vm405_vm1, %v26370_v33  ;;  %20959 = vmatprep.mubr.msk.f32.mxu1 %vm405_vm1, %v26400_v61 }
 0x1f9   : > { %21566 = vmatmul.mubr.msk.f32.gmra.mrb[24].mxu0 %vm405_vm1, %v26382_v42  ;;  %20960 = vmatmul.mubr.msk.f32.gmra.mrb[20].mxu1 %vm405_vm1, %v26410_v63 }
 0x1fa   : > { %21568 = vmatprep.mubr.msk.f32.mxu0 %vm405_vm1, %v26386_v45  ;;  %20962 = vmatprep.mubr.msk.f32.mxu1 %vm405_vm1, %v26416_v47 }
 0x1fd   : > { %21569 = vmatmul.mubr.msk.f32.gmra.mrb[26].mxu0 %vm405_vm1, %v26398_v48  ;;  %20963 = vmatmul.mubr.msk.f32.gmra.mrb[22].mxu1 %vm405_vm1, %v26426_v34 }
 0x1fe   : > { %21571 = vmatprep.mubr.msk.f32.mxu0 %vm405_vm1, %v26402_v62  ;;  %20965 = vmatprep.mubr.msk.f32.mxu1 %vm405_vm1, %v26435_v25 }
 0x201   : > { %21572 = vmatmul.mubr.msk.f32.gmra.mrb[28].mxu0 %vm405_vm1, %v26414_v7  ;;  %20966 = vmatmul.mubr.msk.f32.gmra.mrb[24].mxu1 %vm405_vm1, %v26444_v23 }
 0x202   : > { %21574 = vmatprep.mubr.msk.f32.mxu0 %vm405_vm1, %v26418_v40  ;;  %20968 = vmatprep.mubr.msk.f32.mxu1 %vm405_vm1, %v26448_v21 }
 0x205   : > { %21575 = vmatmul.mubr.msk.f32.gmra.mrb[30].mxu0 %vm405_vm1, %v26433_v27  ;;  %20969 = vmatmul.mubr.msk.f32.gmra.mrb[26].mxu1 %vm405_vm1, %v26461_v17 }
 0x206   : > { %21579 = vmatprep.mubr.msk.f32.mxu0 %vm405_vm1, %v26246_v11  ;;  %v26467_v11 = vld [vmem:[#allocation2 + $0x2a9] sm:$0xff] }
 0x207   : > { %20971 = vmatprep.mubr.msk.f32.mxu1 %vm405_vm1, %v26467_v11 }
 0x209   : > { %21580 = vmatmul.mubr.msk.f32.vlgmr.msra.gmra.mrb[0].mxu0 %vm405_vm1, %v26254_v1  ;;  %v26477_v1 = vld [vmem:[#allocation2 + $0x2b1] sm:$0xff] }
 0x20a   : > { %21628 = vmatpush3.msk.msra.mxu0 %vm752_vm0, %v26225_v41  ;;  %21582 = vmatprep.mubr.msk.f32.mxu0 %vm405_vm1, %v26258_v36  ;;  %v26481_v41 = vld [vmem:[#allocation2 + $0x2c9] sm:$0xff]  ;;  %v26489_v36 = vld [vmem:[#allocation2 + $0x2d1] sm:$0xff] }
 0x20b   : > { %21677 = vmatprep.subr.msk.mxu0 %vm752_vm0, %v26455_v19  ;;  %20972 = vmatmul.mubr.msk.f32.gmra.mrb[28].mxu1 %vm405_vm1, %v26477_v1 }
 0x20c   : > { %20974 = vmatprep.mubr.msk.f32.mxu1 %vm405_vm1, %v26481_v41 }
 0x20d   : > { %21583 = vmatmul.mubr.msk.f32.gmra.mrb[2].mxu0 %vm405_vm1, %v26269_v54  ;;  %v6622_v54 = vld [vmem:[#allocation2 + $0x2ac] sm:$0xff] }
 0x20e   : > { %21585 = vmatprep.mubr.msk.f32.mxu0 %vm405_vm1, %v26274_v59  ;;  %v26580_v59 = vld [vmem:[#allocation2 + $0x2c4] sm:$0xff] }
 0x20f   : > { %20975 = vmatmul.mubr.msk.f32.gmra.mrb[30].mxu1 %vm405_vm1, %v26489_v36 }
 0x210   : > { %20979 = vmatprep.mubr.msk.f32.mxu1 %vm405_vm1, %v26256_v50  ;;  %v26568_v50 = vld [vmem:[#allocation2 + $0x28c] sm:$0xff] }
 0x211   : > { %21586 = vmatmul.mubr.msk.f32.gmra.mrb[4].mxu0 %vm405_vm1, %v26286_v3  ;;  %v6624_v3 = vld [vmem:[#allocation2 + $0x2cc] sm:$0xff] }
 0x212   : > { %21588 = vmatprep.mubr.msk.f32.mxu0 %vm405_vm1, %v26290_v9  ;;  %v6625_v9 = vld [vmem:[#allocation2 + $0x2e4] sm:$0xff] }
 0x213   : > { %20980 = vmatmul.mubr.msk.f32.vlgmr.msra.gmra.mrb[0].mxu1 %vm405_vm1, %v26265_v44  ;;  %v26570_v44 = vld [vmem:[#allocation2 + $0x2a4] sm:$0xff] }
 0x214   : > { %20982 = vmatprep.mubr.msk.f32.mxu1 %vm405_vm1, %v26271_v56  ;;  %21028 = vmatpush3.msk.msra.mxu1 %vm752_vm0, %v17686_v29  ;;  %v26558_v29 = vld [vmem:[#allocation2 + $0x284] sm:$0xff] }
 0x215   : > { %21589 = vmatmul.mubr.msk.f32.gmra.mrb[6].mxu0 %vm405_vm1, %v26302_v20  ;;  %v17720_v20 = vld [vmem:[%s29357_s2 + $0x24] sm:$0xf] }
 0x216   : > { %21591 = vmatprep.mubr.msk.f32.mxu0 %vm405_vm1, %v26306_v31  ;;  %21077 = vmatprep.subr.msk.mxu1 %vm752_vm0, %v17720_v20 }
 0x217   : > { %20983 = vmatmul.mubr.msk.f32.gmra.mrb[2].mxu1 %vm405_vm1, %v26282_v0 }
 0x218   : > { %20985 = vmatprep.mubr.msk.f32.mxu1 %vm405_vm1, %v26288_v5 }
 0x219   : > { %21592 = vmatmul.mubr.msk.f32.gmra.mrb[8].mxu0 %vm405_vm1, %v26318_v38 }
 0x21a   : > { %21594 = vmatprep.mubr.msk.f32.mxu0 %vm405_vm1, %v26322_v49 }
 0x21b   : > { %20986 = vmatmul.mubr.msk.f32.gmra.mrb[4].mxu1 %vm405_vm1, %v26298_v16 }
 0x21c   : > { %20988 = vmatprep.mubr.msk.f32.mxu1 %vm405_vm1, %v26304_v30 }
 0x21d   : > { %21595 = vmatmul.mubr.msk.f32.gmra.mrb[10].mxu0 %vm405_vm1, %v26334_v12 }
 0x21e   : > { %21597 = vmatprep.mubr.msk.f32.mxu0 %vm405_vm1, %v26338_v18 }
 0x21f   : > { %20989 = vmatmul.mubr.msk.f32.gmra.mrb[6].mxu1 %vm405_vm1, %v26314_v32 }
 0x220   : > { %20991 = vmatprep.mubr.msk.f32.mxu1 %vm405_vm1, %v26320_v46 }
 0x221   : > { %21598 = vmatmul.mubr.msk.f32.gmra.mrb[12].mxu0 %vm405_vm1, %v26350_v22 }
 0x222   : > { %21600 = vmatprep.mubr.msk.f32.mxu0 %vm405_vm1, %v26354_v26 }
 0x223   : > { %20992 = vmatmul.mubr.msk.f32.gmra.mrb[8].mxu1 %vm405_vm1, %v26330_v52 }
 0x224   : > { %20994 = vmatprep.mubr.msk.f32.mxu1 %vm405_vm1, %v26336_v37 }
 0x225   : > { %21601 = vmatmul.mubr.msk.f32.gmra.mrb[14].mxu0 %vm405_vm1, %v26366_v28 }
 0x226   : > { %21603 = vmatprep.mubr.msk.f32.mxu0 %vm405_vm1, %v26370_v33 }
 0x227   : > { %20995 = vmatmul.mubr.msk.f32.gmra.mrb[10].mxu1 %vm405_vm1, %v26346_v39 }
 0x228   : > { %20997 = vmatprep.mubr.msk.f32.mxu1 %vm405_vm1, %v26352_v24 }
 0x229   : > { %21604 = vmatmul.mubr.msk.f32.gmra.mrb[16].mxu0 %vm405_vm1, %v26382_v42 }
 0x22a   : > { %21606 = vmatprep.mubr.msk.f32.mxu0 %vm405_vm1, %v26386_v45 }
 0x22b   : > { %20998 = vmatmul.mubr.msk.f32.gmra.mrb[12].mxu1 %vm405_vm1, %v26362_v14 }
 0x22c   : > { %21000 = vmatprep.mubr.msk.f32.mxu1 %vm405_vm1, %v26368_v15 }
 0x22d   : > { %21607 = vmatmul.mubr.msk.f32.gmra.mrb[18].mxu0 %vm405_vm1, %v26398_v48 }
 0x22e   : > { %21609 = vmatprep.mubr.msk.f32.mxu0 %vm405_vm1, %v26402_v62 }
 0x22f   : > { %21001 = vmatmul.mubr.msk.f32.gmra.mrb[14].mxu1 %vm405_vm1, %v26378_v35 }
 0x230   : > { %21003 = vmatprep.mubr.msk.f32.mxu1 %vm405_vm1, %v26384_v43 }
 0x231   : > { %21610 = vmatmul.mubr.msk.f32.gmra.mrb[20].mxu0 %vm405_vm1, %v26414_v7 }
 0x232   : > { %21612 = vmatprep.mubr.msk.f32.mxu0 %vm405_vm1, %v26418_v40 }
 0x233   : > { %21004 = vmatmul.mubr.msk.f32.gmra.mrb[16].mxu1 %vm405_vm1, %v26394_v60 }
 0x234   : > { %21006 = vmatprep.mubr.msk.f32.mxu1 %vm405_vm1, %v26400_v61 }
 0x235   : > { %21613 = vmatmul.mubr.msk.f32.gmra.mrb[22].mxu0 %vm405_vm1, %v26433_v27 }
 0x236   : > { %21615 = vmatprep.mubr.msk.f32.mxu0 %vm405_vm1, %v26558_v29 }
 0x237   : > { %21007 = vmatmul.mubr.msk.f32.gmra.mrb[18].mxu1 %vm405_vm1, %v26410_v63 }
 0x238   : > { %21009 = vmatprep.mubr.msk.f32.mxu1 %vm405_vm1, %v26416_v47 }
 0x239   : > { %21616 = vmatmul.mubr.msk.f32.gmra.mrb[24].mxu0 %vm405_vm1, %v26568_v50 }
 0x23a   : > { %21618 = vmatprep.mubr.msk.f32.mxu0 %vm405_vm1, %v26570_v44 }
 0x23b   : > { %21010 = vmatmul.mubr.msk.f32.gmra.mrb[20].mxu1 %vm405_vm1, %v26426_v34 }
 0x23c   : > { %21012 = vmatprep.mubr.msk.f32.mxu1 %vm405_vm1, %v26435_v25 }
 0x23d   : > { %21619 = vmatmul.mubr.msk.f32.gmra.mrb[26].mxu0 %vm405_vm1, %v6622_v54 }
 0x23e   : > { %21621 = vmatprep.mubr.msk.f32.mxu0 %vm405_vm1, %v26580_v59 }
 0x23f   : > { %21013 = vmatmul.mubr.msk.f32.gmra.mrb[22].mxu1 %vm405_vm1, %v26444_v23 }
 0x240   : > { %21015 = vmatprep.mubr.msk.f32.mxu1 %vm405_vm1, %v26448_v21 }
 0x241   : > { %21622 = vmatmul.mubr.msk.f32.gmra.mrb[28].mxu0 %vm405_vm1, %v6624_v3 }
 0x242   : > { %21624 = vmatprep.mubr.msk.f32.mxu0 %vm405_vm1, %v6625_v9 }
 0x243   : > { %21016 = vmatmul.mubr.msk.f32.gmra.mrb[24].mxu1 %vm405_vm1, %v26461_v17 }
 0x244   : > { %21018 = vmatprep.mubr.msk.f32.mxu1 %vm405_vm1, %v26467_v11 }
 0x245   : > { %21625 = vmatmul.mubr.msk.f32.gmra.mrb[30].mxu0 %vm405_vm1, %v6626_v13 }
 0x246   : > { %21629 = vmatprep.mubr.msk.f32.mxu0 %vm405_vm1, %v26306_v31  ;;  %v26631_v31 = vld [vmem:[#allocation2 + $0x2e9] sm:$0xff] }
 0x247   : > { %21019 = vmatmul.mubr.msk.f32.gmra.mrb[26].mxu1 %vm405_vm1, %v26477_v1 }
 0x248   : > { %21021 = vmatprep.mubr.msk.f32.mxu1 %vm405_vm1, %v26481_v41 }
 0x249   : > { %21630 = vmatmul.mubr.msk.f32.vlgmr.msra.gmra.mrb[0].mxu0 %vm405_vm1, %v26318_v38  ;;  %v2754_v38 = vld [vmem:[#allocation2 + $0x309] sm:$0xff] }
 0x24a   : > { %21678 = vmatpush3.msk.msra.mxu0 %vm752_vm0, %v26455_v19  ;;  %21632 = vmatprep.mubr.msk.f32.mxu0 %vm405_vm1, %v26322_v49  ;;  %v26639_v19 = vld [vmem:[#allocation2 + $0x2f1] sm:$0xff] }
 0x24b   : > { %21727 = vmatprep.subr.msk.mxu0 %vm752_vm0, %v26611_v10  ;;  %21022 = vmatmul.mubr.msk.f32.gmra.mrb[28].mxu1 %vm405_vm1, %v26489_v36  ;;  %v7572_v49 = vld [vmem:[#allocation2 + $0xf0] sm:$0xff] }
 0x24c   : > { %21024 = vmatprep.mubr.msk.f32.mxu1 %vm405_vm1, %v26631_v31 }
 0x24d   : > { %21633 = vmatmul.mubr.msk.f32.gmra.mrb[2].mxu0 %vm405_vm1, %v26334_v12  ;;  %v7573_v12 = vld [vmem:[#allocation2 + $0x108] sm:$0xff] }
 0x24e   : > { %21635 = vmatprep.mubr.msk.f32.mxu0 %vm405_vm1, %v26338_v18  ;;  %v7574_v18 = vld [vmem:[#allocation2 + $0x110] sm:$0xff] }
 0x24f   : > { %21025 = vmatmul.mubr.msk.f32.gmra.mrb[30].mxu1 %vm405_vm1, %v26639_v19 }
 0x250   : > { %21029 = vmatprep.mubr.msk.f32.mxu1 %vm405_vm1, %v26271_v56  ;;  %v6631_v56 = vld [vmem:[#allocation2 + $0x344] sm:$0xff] }
 0x251   : > { %21636 = vmatmul.mubr.msk.f32.gmra.mrb[4].mxu0 %vm405_vm1, %v26350_v22  ;;  %v3654_v22 = vld [vmem:[#allocation2 + $0xee] sm:$0xff] }
 0x252   : > { %21638 = vmatprep.mubr.msk.f32.mxu0 %vm405_vm1, %v26354_v26  ;;  %v26794_v26 = vld [vmem:[#allocation2 + $0x10e] sm:$0xff] }
 0x253   : > { %21030 = vmatmul.mubr.msk.f32.vlgmr.msra.gmra.mrb[0].mxu1 %vm405_vm1, %v26282_v0  ;;  %v26729_v0 = vld [vmem:[#allocation2 + $0x34c] sm:$0xff] }
 0x254   : > { %21032 = vmatprep.mubr.msk.f32.mxu1 %vm405_vm1, %v26288_v5  ;;  %21078 = vmatpush3.msk.msra.mxu1 %vm752_vm0, %v17720_v20  ;;  %v6633_v5 = vld [vmem:[#allocation2 + $0x364] sm:$0xff]  ;;  %v26918_v20 = vld [vmem:[#allocation2 + $0x24e] sm:$0xff] }
 0x255   : > { %21639 = vmatmul.mubr.msk.f32.gmra.mrb[6].mxu0 %vm405_vm1, %v26366_v28  ;;  %v29411_v28 = vld [vmem:[#allocation8_spill] sm:$0xff] }
 0x256   : > { %21641 = vmatprep.mubr.msk.f32.mxu0 %vm405_vm1, %v26370_v33  ;;  %v26854_v33 = vld [vmem:[#allocation2 + $0x1ae] sm:$0xff] }
 0x257   : > { %21033 = vmatmul.mubr.msk.f32.gmra.mrb[2].mxu1 %vm405_vm1, %v26298_v16  ;;  %v26756_v16 = vld [vmem:[%s29357_s2 + $0x64] sm:$0xf] }
 0x258   : > { %21035 = vmatprep.mubr.msk.f32.mxu1 %vm405_vm1, %v26304_v30  ;;  %v7569_v30 = vld [vmem:[#allocation2 + $0xc8] sm:$0xff] }
 0x259   : > { %21642 = vmatmul.mubr.msk.f32.gmra.mrb[8].mxu0 %vm405_vm1, %v26382_v42  ;;  %v26858_v42 = vld [vmem:[#allocation2 + $0x1c6] sm:$0xff] }
 0x25a   : > { %21644 = vmatprep.mubr.msk.f32.mxu0 %vm405_vm1, %v26386_v45  ;;  %v26866_v45 = vld [vmem:[#allocation2 + $0x1ce] sm:$0xff] }
 0x25b   : > { %21036 = vmatmul.mubr.msk.f32.gmra.mrb[4].mxu1 %vm405_vm1, %v26314_v32  ;;  %v7570_v32 = vld [vmem:[#allocation2 + $0xd0] sm:$0xff] }
 0x25c   : > { %21038 = vmatprep.mubr.msk.f32.mxu1 %vm405_vm1, %v26320_v46  ;;  %v2755_v46 = vld [vmem:[#allocation2 + $0x311] sm:$0xff] }
 0x25d   : > { %21645 = vmatmul.mubr.msk.f32.gmra.mrb[10].mxu0 %vm405_vm1, %v26398_v48  ;;  %v26870_v48 = vld [vmem:[#allocation2 + $0x1e6] sm:$0xff] }
 0x25e   : > { %21647 = vmatprep.mubr.msk.f32.mxu0 %vm405_vm1, %v26402_v62  ;;  %v26878_v62 = vld [vmem:[#allocation2 + $0x1ee] sm:$0xff] }
 0x25f   : > { %21039 = vmatmul.mubr.msk.f32.gmra.mrb[6].mxu1 %vm405_vm1, %v26330_v52  ;;  %v3651_v52 = vld [vmem:[#allocation2 + $0xc6] sm:$0xff] }
 0x260   : > { %21041 = vmatprep.mubr.msk.f32.mxu1 %vm405_vm1, %v26336_v37  ;;  %v3652_v37 = vld [vmem:[#allocation2 + $0xce] sm:$0xff] }
 0x261   : > { %21648 = vmatmul.mubr.msk.f32.gmra.mrb[12].mxu0 %vm405_vm1, %v26414_v7  ;;  %v6629_v7 = vld [vmem:[#allocation2 + $0x324] sm:$0xff] }
 0x262   : > { %21650 = vmatprep.mubr.msk.f32.mxu0 %vm405_vm1, %v26418_v40  ;;  %v26711_v40 = vld [vmem:[#allocation2 + $0x30c] sm:$0xff] }
 0x263   : > { %21042 = vmatmul.mubr.msk.f32.gmra.mrb[8].mxu1 %vm405_vm1, %v26346_v39  ;;  %v3653_v39 = vld [vmem:[#allocation2 + $0xe6] sm:$0xff] }
 0x264   : > { %21044 = vmatprep.mubr.msk.f32.mxu1 %vm405_vm1, %v26352_v24  ;;  %v26786_v24 = vld [vmem:[#allocation2 + $0x106] sm:$0xff] }
 0x265   : > { %21651 = vmatmul.mubr.msk.f32.gmra.mrb[14].mxu0 %vm405_vm1, %v26433_v27  ;;  %v6627_v27 = vld [vmem:[#allocation2 + $0x304] sm:$0xff] }
 0x266   : > { %21653 = vmatprep.mubr.msk.f32.mxu0 %vm405_vm1, %v26558_v29  ;;  %v26894_v29 = vld [vmem:[#allocation2 + $0x226] sm:$0xff] }
 0x267   : > { %21045 = vmatmul.mubr.msk.f32.gmra.mrb[10].mxu1 %vm405_vm1, %v26362_v14  ;;  %v26798_v14 = vld [vmem:[#allocation2 + $0x126] sm:$0xff] }
 0x268   : > { %21047 = vmatprep.mubr.msk.f32.mxu1 %vm405_vm1, %v26368_v15  ;;  %v26846_v15 = vld [vmem:[#allocation2 + $0x1a6] sm:$0xff] }
 0x269   : > { %21654 = vmatmul.mubr.msk.f32.gmra.mrb[16].mxu0 %vm405_vm1, %v26568_v50  ;;  %v29420_v50 = vld [vmem:[#allocation18_spill] sm:$0xff] }
 0x26a   : > { %21656 = vmatprep.mubr.msk.f32.mxu0 %vm405_vm1, %v26570_v44  ;;  %v26902_v44 = vld [vmem:[#allocation2 + $0x22e] sm:$0xff] }
 0x26b   : > { %21048 = vmatmul.mubr.msk.f32.gmra.mrb[12].mxu1 %vm405_vm1, %v26378_v35  ;;  %v29413_v35 = vld [vmem:[#allocation11_spill] sm:$0xff] }
 0x26c   : > { %21050 = vmatprep.mubr.msk.f32.mxu1 %vm405_vm1, %v26384_v43  ;;  %v29414_v43 = vld [vmem:[#allocation12_spill] sm:$0xff] }
 0x26d   : > { %21657 = vmatmul.mubr.msk.f32.gmra.mrb[18].mxu0 %vm405_vm1, %v6622_v54  ;;  %v17788_v54 = vld [vmem:[%s29357_s2 + $0x3c] sm:$0xf] }
 0x26e   : > { %21659 = vmatprep.mubr.msk.f32.mxu0 %vm405_vm1, %v26580_v59  ;;  %v29421_v59 = vld [vmem:[#allocation19_spill] sm:$0xff] }
 0x26f   : > { %21051 = vmatmul.mubr.msk.f32.gmra.mrb[14].mxu1 %vm405_vm1, %v26394_v60  ;;  %v29415_v60 = vld [vmem:[#allocation13_spill] sm:$0xff] }
 0x270   : > { %21053 = vmatprep.mubr.msk.f32.mxu1 %vm405_vm1, %v26400_v61  ;;  %v29416_v61 = vld [vmem:[#allocation14_spill] sm:$0xff] }
 0x271   : > { %21660 = vmatmul.mubr.msk.f32.gmra.mrb[20].mxu0 %vm405_vm1, %v6624_v3  ;;  %v26909_v3 = vld [vmem:[#allocation2 + $0x246] sm:$0xff] }
 0x272   : > { %21662 = vmatprep.mubr.msk.f32.mxu0 %vm405_vm1, %v6625_v9  ;;  %v29422_v9 = vld [vmem:[#allocation20_spill] sm:$0xff] }
 0x273   : > { %21054 = vmatmul.mubr.msk.f32.gmra.mrb[16].mxu1 %vm405_vm1, %v26410_v63  ;;  %v29417_v63 = vld [vmem:[#allocation15_spill] sm:$0xff] }
 0x274   : > { %21056 = vmatprep.mubr.msk.f32.mxu1 %vm405_vm1, %v26416_v47  ;;  %v7565_v47 = vld [vmem:[#allocation2 + $0x88] sm:$0xff] }
 0x275   : > { %21663 = vmatmul.mubr.msk.f32.gmra.mrb[22].mxu0 %vm405_vm1, %v6626_v13  ;;  %v26720_v13 = vld [vmem:[#allocation2 + $0x32c] sm:$0xff] }
 0x276   : > { %21665 = vmatprep.mubr.msk.f32.mxu0 %vm405_vm1, %v6627_v27  ;;  %v26928_v27 = vld [vmem:[%s29357_s2 + $0x50] sm:$0xf] }
 0x277   : > { %21057 = vmatmul.mubr.msk.f32.gmra.mrb[18].mxu1 %vm405_vm1, %v26426_v34  ;;  %v17754_v34 = vld [vmem:[%s29357_s2 + $0x30] sm:$0xf] }
 0x278   : > { %21059 = vmatprep.mubr.msk.f32.mxu1 %vm405_vm1, %v26435_v25  ;;  %v26741_v25 = vld [vmem:[#allocation2 + $0x36c] sm:$0xff]  ;;  %21127 = vmatprep.subr.msk.mxu1 %vm752_vm0, %v17754_v34 }
 0x279   : > { %21666 = vmatmul.mubr.msk.f32.gmra.mrb[24].mxu0 %vm405_vm1, %v26711_v40 }
 0x27a   : > { %21668 = vmatprep.mubr.msk.f32.mxu0 %vm405_vm1, %v6629_v7  ;;  %v24604_v7 = vld [vmem:[#allocation2 + $0x110] sm:$0xff] }
 0x27b   : > { %21060 = vmatmul.mubr.msk.f32.gmra.mrb[20].mxu1 %vm405_vm1, %v26444_v23  ;;  %v7567_v23 = vld [vmem:[#allocation2 + $0xa8] sm:$0xff] }
 0x27c   : > { %21062 = vmatprep.mubr.msk.f32.mxu1 %vm405_vm1, %v26448_v21  ;;  %v7566_v21 = vld [vmem:[#allocation2 + $0x90] sm:$0xff] }
 0x27d   : > { %21669 = vmatmul.mubr.msk.f32.gmra.mrb[26].mxu0 %vm405_vm1, %v26720_v13 }
 0x27e   : > { %21671 = vmatprep.mubr.msk.f32.mxu0 %vm405_vm1, %v6631_v56  ;;  %v26933_v56 = vld [vmem:[#allocation2 + $0x26e] sm:$0xff] }
 0x27f   : > { %21063 = vmatmul.mubr.msk.f32.gmra.mrb[22].mxu1 %vm405_vm1, %v26461_v17  ;;  %v7568_v17 = vld [vmem:[#allocation2 + $0xb0] sm:$0xff] }
 0x280   : > { %21065 = vmatprep.mubr.msk.f32.mxu1 %vm405_vm1, %v26467_v11  ;;  %v26882_v11 = vld [vmem:[#allocation2 + $0x206] sm:$0xff] }
 0x281   : > { %21672 = vmatmul.mubr.msk.f32.gmra.mrb[28].mxu0 %vm405_vm1, %v26729_v0 }
 0x282   : > { %21674 = vmatprep.mubr.msk.f32.mxu0 %vm405_vm1, %v6633_v5  ;;  %v24605_v5 = vld [vmem:[#allocation2 + $0x128] sm:$0xff] }
 0x283   : > { %21066 = vmatmul.mubr.msk.f32.gmra.mrb[24].mxu1 %vm405_vm1, %v26477_v1  ;;  %v29418_v1 = vld [vmem:[#allocation16_spill] sm:$0xff] }
 0x284   : > { %21068 = vmatprep.mubr.msk.f32.mxu1 %vm405_vm1, %v26481_v41  ;;  %v26890_v41 = vld [vmem:[#allocation2 + $0x20e] sm:$0xff] }
 0x285   : > { %21675 = vmatmul.mubr.msk.f32.gmra.mrb[30].mxu0 %vm405_vm1, %v26741_v25 }
 0x286   : > { %21679 = vmatprep.mubr.msk.f32.mxu0 %vm405_vm1, %v7565_v47  ;;  %v24606_v47 = vld [vmem:[#allocation2 + $0x130] sm:$0xff] }
 0x287   : > { %21069 = vmatmul.mubr.msk.f32.gmra.mrb[26].mxu1 %vm405_vm1, %v26489_v36  ;;  %v29419_v36 = vld [vmem:[#allocation17_spill] sm:$0xff] }
 0x288   : > { %21071 = vmatprep.mubr.msk.f32.mxu1 %vm405_vm1, %v26631_v31  ;;  %v24603_v31 = vld [vmem:[#allocation2 + $0x108] sm:$0xff] }
 0x289   : > { %21680 = vmatmul.mubr.msk.f32.vlgmr.msra.gmra.mrb[0].mxu0 %vm405_vm1, %v7566_v21  ;;  %v26947_v21 = vld [vmem:[#allocation2 + $0x28e] sm:$0xff] }
 0x28a   : > { %21728 = vmatpush3.msk.msra.mxu0 %vm752_vm0, %v26611_v10  ;;  %21682 = vmatprep.mubr.msk.f32.mxu0 %vm405_vm1, %v7567_v23  ;;  %v7571_v10 = vld [vmem:[#allocation2 + $0xe8] sm:$0xff] }
 0x28b   : > { %21777 = vmatprep.subr.msk.mxu0 %vm752_vm0, %v26756_v16  ;;  %21072 = vmatmul.mubr.msk.f32.gmra.mrb[28].mxu1 %vm405_vm1, %v26639_v19  ;;  %v26921_v19 = vld [vmem:[#allocation2 + $0x266] sm:$0xff] }
 0x28c   : > { %21074 = vmatprep.mubr.msk.f32.mxu1 %vm405_vm1, %v2754_v38  ;;  %v24607_v23 = vld [vmem:[#allocation2 + $0x148] sm:$0xff]  ;;  %v24610_v38 = vld [vmem:[#allocation2 + $0x170] sm:$0xff] }
 0x28d   : > { %21683 = vmatmul.mubr.msk.f32.gmra.mrb[2].mxu0 %vm405_vm1, %v7568_v17  ;;  %v24608_v17 = vld [vmem:[#allocation2 + $0x150] sm:$0xff] }
 0x28e   : > { %21685 = vmatprep.mubr.msk.f32.mxu0 %vm405_vm1, %v7569_v30  ;;  %v26957_v30 = vld [vmem:[#allocation2 + $0x2ae] sm:$0xff] }
 0x28f   : > { %21075 = vmatmul.mubr.msk.f32.gmra.mrb[30].mxu1 %vm405_vm1, %v2755_v46  ;;  %v24612_v46 = vld [vmem:[#allocation2 + $0x190] sm:$0xff] }
 0x290   : > { %21079 = vmatprep.mubr.msk.f32.mxu1 %vm405_vm1, %v3651_v52  ;;  %v24614_v52 = vld [vmem:[#allocation2 + $0x1b0] sm:$0xff] }
 0x291   : > { %21686 = vmatmul.mubr.msk.f32.gmra.mrb[4].mxu0 %vm405_vm1, %v7570_v32  ;;  %v24609_v32 = vld [vmem:[#allocation2 + $0x168] sm:$0xff] }
 0x292   : > { %21688 = vmatprep.mubr.msk.f32.mxu0 %vm405_vm1, %v7571_v10  ;;  %v24611_v10 = vld [vmem:[#allocation2 + $0x188] sm:$0xff] }
 0x293   : > { %21080 = vmatmul.mubr.msk.f32.vlgmr.msra.gmra.mrb[0].mxu1 %vm405_vm1, %v3652_v37  ;;  %v24616_v37 = vld [vmem:[#allocation2 + $0x1d0] sm:$0xff] }
 0x294   : > { %21082 = vmatprep.mubr.msk.f32.mxu1 %vm405_vm1, %v3653_v39  ;;  %21128 = vmatpush3.msk.msra.mxu1 %vm752_vm0, %v17754_v34  ;;  %v26938_v34 = vld [vmem:[#allocation2 + $0x286] sm:$0xff]  ;;  %v24618_v39 = vld [vmem:[#allocation2 + $0x1f0] sm:$0xff] }
 0x295   : > { %21689 = vmatmul.mubr.msk.f32.gmra.mrb[6].mxu0 %vm405_vm1, %v7572_v49  ;;  %21177 = vmatprep.subr.msk.mxu1 %vm752_vm0, %v17788_v54  ;;  %v24613_v49 = vld [vmem:[#allocation2 + $0x1a8] sm:$0xff] }
 0x296   : > { %21691 = vmatprep.mubr.msk.f32.mxu0 %vm405_vm1, %v7573_v12  ;;  %v24615_v12 = vld [vmem:[#allocation2 + $0x1c8] sm:$0xff] }
 0x297   : > { %21083 = vmatmul.mubr.msk.f32.gmra.mrb[2].mxu1 %vm405_vm1, %v3654_v22  ;;  %v24619_v22 = vld [vmem:[#allocation2 + $0x208] sm:$0xff] }
 0x298   : > { %21085 = vmatprep.mubr.msk.f32.mxu1 %vm405_vm1, %v26786_v24 }
 0x299   : > { %21692 = vmatmul.mubr.msk.f32.gmra.mrb[8].mxu0 %vm405_vm1, %v7574_v18  ;;  %v24617_v18 = vld [vmem:[#allocation2 + $0x1e8] sm:$0xff] }
 0x29a   : > { %21694 = vmatprep.mubr.msk.f32.mxu0 %vm405_vm1, %v26076_v51  ;;  %v26806_v51 = vld [vmem:[#allocation2 + $0x12e] sm:$0xff] }
 0x29b   : > { %21086 = vmatmul.mubr.msk.f32.gmra.mrb[4].mxu1 %vm405_vm1, %v26794_v26 }
 0x29c   : > { %21088 = vmatprep.mubr.msk.f32.mxu1 %vm405_vm1, %v26798_v14 }
 0x29d   : > { %21695 = vmatmul.mubr.msk.f32.gmra.mrb[10].mxu0 %vm405_vm1, %v26084_v53  ;;  %v26810_v53 = vld [vmem:[#allocation2 + $0x146] sm:$0xff] }
 0x29e   : > { %21697 = vmatprep.mubr.msk.f32.mxu0 %vm405_vm1, %v26088_v55  ;;  %v26818_v55 = vld [vmem:[#allocation2 + $0x14e] sm:$0xff] }
 0x29f   : > { %21089 = vmatmul.mubr.msk.f32.gmra.mrb[6].mxu1 %vm405_vm1, %v26806_v51 }
 0x2a0   : > { %21091 = vmatprep.mubr.msk.f32.mxu1 %vm405_vm1, %v26810_v53 }
 0x2a1   : > { %21698 = vmatmul.mubr.msk.f32.gmra.mrb[12].mxu0 %vm405_vm1, %v26096_v57  ;;  %v26822_v57 = vld [vmem:[#allocation2 + $0x166] sm:$0xff] }
 0x2a2   : > { %21700 = vmatprep.mubr.msk.f32.mxu0 %vm405_vm1, %v26100_v58  ;;  %v26830_v58 = vld [vmem:[#allocation2 + $0x16e] sm:$0xff] }
 0x2a3   : > { %21092 = vmatmul.mubr.msk.f32.gmra.mrb[8].mxu1 %vm405_vm1, %v26818_v55 }
 0x2a4   : > { %21094 = vmatprep.mubr.msk.f32.mxu1 %vm405_vm1, %v26822_v57 }
 0x2a5   : > { %21701 = vmatmul.mubr.msk.f32.gmra.mrb[14].mxu0 %vm405_vm1, %v26109_v2  ;;  %v26834_v2 = vld [vmem:[#allocation2 + $0x186] sm:$0xff] }
 0x2a6   : > { %21703 = vmatprep.mubr.msk.f32.mxu0 %vm405_vm1, %v26113_v4  ;;  %v29410_v4 = vld [vmem:[#allocation7_spill] sm:$0xff] }
 0x2a7   : > { %21095 = vmatmul.mubr.msk.f32.gmra.mrb[10].mxu1 %vm405_vm1, %v26830_v58 }
 0x2a8   : > { %21097 = vmatprep.mubr.msk.f32.mxu1 %vm405_vm1, %v26834_v2 }
 0x2a9   : > { %21704 = vmatmul.mubr.msk.f32.gmra.mrb[16].mxu0 %vm405_vm1, %v26121_v6  ;;  %v26842_v6 = vld [vmem:[#allocation2 + $0x18e] sm:$0xff] }
 0x2aa   : > { %21706 = vmatprep.mubr.msk.f32.mxu0 %vm405_vm1, %v26125_v8  ;;  %v29412_v8 = vld [vmem:[#allocation10_spill] sm:$0xff] }
 0x2ab   : > { %21098 = vmatmul.mubr.msk.f32.gmra.mrb[12].mxu1 %vm405_vm1, %v26842_v6 }
 0x2ac   : > { %21100 = vmatprep.mubr.msk.f32.mxu1 %vm405_vm1, %v26846_v15 }
 0x2ad   : > { %21707 = vmatmul.mubr.msk.f32.gmra.mrb[18].mxu0 %vm405_vm1, %v29410_v4  ;;  %v24624_v4 = vld [vmem:[#allocation2 + $0x250] sm:$0xff] }
 0x2ae   : > { %21709 = vmatprep.mubr.msk.f32.mxu0 %vm405_vm1, %v29411_v28  ;;  %v24625_v28 = vld [vmem:[#allocation2 + $0x268] sm:$0xff] }
 0x2af   : > { %21101 = vmatmul.mubr.msk.f32.gmra.mrb[14].mxu1 %vm405_vm1, %v26854_v33 }
 0x2b0   : > { %21103 = vmatprep.mubr.msk.f32.mxu1 %vm405_vm1, %v26858_v42 }
 0x2b1   : > { %21710 = vmatmul.mubr.msk.f32.gmra.mrb[20].mxu0 %vm405_vm1, %v29412_v8  ;;  %v24626_v8 = vld [vmem:[#allocation2 + $0x270] sm:$0xff] }
 0x2b2   : > { %21712 = vmatprep.mubr.msk.f32.mxu0 %vm405_vm1, %v29413_v35  ;;  %v24627_v35 = vld [vmem:[#allocation2 + $0x288] sm:$0xff] }
 0x2b3   : > { %21104 = vmatmul.mubr.msk.f32.gmra.mrb[16].mxu1 %vm405_vm1, %v26866_v45 }
 0x2b4   : > { %21106 = vmatprep.mubr.msk.f32.mxu1 %vm405_vm1, %v26870_v48 }
 0x2b5   : > { %21713 = vmatmul.mubr.msk.f32.gmra.mrb[22].mxu0 %vm405_vm1, %v29414_v43  ;;  %v24628_v43 = vld [vmem:[#allocation2 + $0x290] sm:$0xff] }
 0x2b6   : > { %21715 = vmatprep.mubr.msk.f32.mxu0 %vm405_vm1, %v29415_v60  ;;  %v24629_v60 = vld [vmem:[#allocation2 + $0x2a8] sm:$0xff] }
 0x2b7   : > { %21107 = vmatmul.mubr.msk.f32.gmra.mrb[18].mxu1 %vm405_vm1, %v26878_v62 }
 0x2b8   : > { %21109 = vmatprep.mubr.msk.f32.mxu1 %vm405_vm1, %v26882_v11 }
 0x2b9   : > { %21716 = vmatmul.mubr.msk.f32.gmra.mrb[24].mxu0 %vm405_vm1, %v29416_v61  ;;  %v24630_v61 = vld [vmem:[#allocation2 + $0x2b0] sm:$0xff] }
 0x2ba   : > { %21718 = vmatprep.mubr.msk.f32.mxu0 %vm405_vm1, %v29417_v63  ;;  %v24631_v63 = vld [vmem:[#allocation2 + $0x2c8] sm:$0xff] }
 0x2bb   : > { %21110 = vmatmul.mubr.msk.f32.gmra.mrb[20].mxu1 %vm405_vm1, %v26890_v41 }
 0x2bc   : > { %21112 = vmatprep.mubr.msk.f32.mxu1 %vm405_vm1, %v26894_v29 }
 0x2bd   : > { %21719 = vmatmul.mubr.msk.f32.gmra.mrb[26].mxu0 %vm405_vm1, %v29418_v1  ;;  %v24632_v1 = vld [vmem:[#allocation2 + $0x2d0] sm:$0xff] }
 0x2be   : > { %21721 = vmatprep.mubr.msk.f32.mxu0 %vm405_vm1, %v29419_v36  ;;  %v24633_v36 = vld [vmem:[#allocation2 + $0x2e8] sm:$0xff] }
 0x2bf   : > { %21113 = vmatmul.mubr.msk.f32.gmra.mrb[22].mxu1 %vm405_vm1, %v26902_v44 }
 0x2c0   : > { %21115 = vmatprep.mubr.msk.f32.mxu1 %vm405_vm1, %v26909_v3 }
 0x2c1   : > { %21722 = vmatmul.mubr.msk.f32.gmra.mrb[28].mxu0 %vm405_vm1, %v29420_v50  ;;  %v24634_v50 = vld [vmem:[#allocation2 + $0x2f0] sm:$0xff] }
 0x2c2   : > { %21724 = vmatprep.mubr.msk.f32.mxu0 %vm405_vm1, %v29421_v59  ;;  %v27044_v59 = vld [vmem:[%s29357_s2 + $0x5c] sm:$0xf] }
 0x2c3   : > { %21116 = vmatmul.mubr.msk.f32.gmra.mrb[24].mxu1 %vm405_vm1, %v26918_v20 }
 0x2c4   : > { %21118 = vmatprep.mubr.msk.f32.mxu1 %vm405_vm1, %v26921_v19 }
 0x2c5   : > { %21725 = vmatmul.mubr.msk.f32.gmra.mrb[30].mxu0 %vm405_vm1, %v29422_v9  ;;  %v24636_v9 = vld [vmem:[#allocation2 + $0x190] sm:$0xff] }
 0x2c6   : > { %21729 = vmatprep.mubr.msk.f32.mxu0 %vm405_vm1, %v24603_v31  ;;  %v24637_v31 = vld [vmem:[#allocation2 + $0x1a8] sm:$0xff] }
 0x2c7   : > { %21119 = vmatmul.mubr.msk.f32.gmra.mrb[26].mxu1 %vm405_vm1, %v26933_v56 }
 0x2c8   : > { %21121 = vmatprep.mubr.msk.f32.mxu1 %vm405_vm1, %v26938_v34 }
 0x2c9   : > { %21730 = vmatmul.mubr.msk.f32.vlgmr.msra.gmra.mrb[0].mxu0 %vm405_vm1, %v24604_v7  ;;  %v27052_v7 = vld [vmem:[#allocation2 + $0x2c6] sm:$0xff] }
 0x2ca   : > { %21778 = vmatpush3.msk.msra.mxu0 %vm752_vm0, %v26756_v16  ;;  %21732 = vmatprep.mubr.msk.f32.mxu0 %vm405_vm1, %v24605_v5  ;;  %v26950_v16 = vld [vmem:[#allocation2 + $0x2a6] sm:$0xff]  ;;  %v24638_v5 = vld [vmem:[#allocation2 + $0x1b0] sm:$0xff] }
 0x2cb   : > { %21827 = vmatprep.subr.msk.mxu0 %vm752_vm0, %v26928_v27  ;;  %21122 = vmatmul.mubr.msk.f32.gmra.mrb[28].mxu1 %vm405_vm1, %v26947_v21 }
 0x2cc   : > { %21124 = vmatprep.mubr.msk.f32.mxu1 %vm405_vm1, %v26950_v16 }
 0x2cd   : > { %21733 = vmatmul.mubr.msk.f32.gmra.mrb[2].mxu0 %vm405_vm1, %v24606_v47  ;;  %v27061_v47 = vld [vmem:[#allocation2 + $0x2ce] sm:$0xff] }
 0x2ce   : > { %21735 = vmatprep.mubr.msk.f32.mxu0 %vm405_vm1, %v24607_v23  ;;  %v27064_v23 = vld [vmem:[#allocation2 + $0x2e6] sm:$0xff] }
 0x2cf   : > { %21125 = vmatmul.mubr.msk.f32.gmra.mrb[30].mxu1 %vm405_vm1, %v26957_v30 }
 0x2d0   : > { %21129 = vmatprep.mubr.msk.f32.mxu1 %vm405_vm1, %v26786_v24  ;;  %v24620_v24 = vld [vmem:[#allocation2 + $0x210] sm:$0xff] }
 0x2d1   : > { %21736 = vmatmul.mubr.msk.f32.gmra.mrb[4].mxu0 %vm405_vm1, %v24608_v17  ;;  %v24640_v17 = vld [vmem:[#allocation2 + $0x1d0] sm:$0xff] }
 0x2d2   : > { %21738 = vmatprep.mubr.msk.f32.mxu0 %vm405_vm1, %v24609_v32  ;;  %v27071_v32 = vld [vmem:[#allocation2 + $0x2ee] sm:$0xff] }
 0x2d3   : > { %21130 = vmatmul.mubr.msk.f32.vlgmr.msra.gmra.mrb[0].mxu1 %vm405_vm1, %v26794_v26  ;;  %v24621_v26 = vld [vmem:[#allocation2 + $0x228] sm:$0xff] }
 0x2d4   : > { %21132 = vmatprep.mubr.msk.f32.mxu1 %vm405_vm1, %v26798_v14  ;;  %21178 = vmatpush3.msk.msra.mxu1 %vm752_vm0, %v17788_v54  ;;  %v24622_v14 = vld [vmem:[#allocation2 + $0x230] sm:$0xff]  ;;  %v24635_v54 = vld [vmem:[#allocation2 + $0x188] sm:$0xff] }
 0x2d5   : > { %21739 = vmatmul.mubr.msk.f32.gmra.mrb[6].mxu0 %vm405_vm1, %v24610_v38  ;;  %v24641_v38 = vld [vmem:[#allocation2 + $0x1e8] sm:$0xff] }
 0x2d6   : > { %21741 = vmatprep.mubr.msk.f32.mxu0 %vm405_vm1, %v24611_v10  ;;  %v24642_v10 = vld [vmem:[#allocation2 + $0x1f0] sm:$0xff] }
 0x2d7   : > { %21133 = vmatmul.mubr.msk.f32.gmra.mrb[2].mxu1 %vm405_vm1, %v26806_v51  ;;  %v24623_v51 = vld [vmem:[#allocation2 + $0x248] sm:$0xff] }
 0x2d8   : > { %21135 = vmatprep.mubr.msk.f32.mxu1 %vm405_vm1, %v26810_v53 }
 0x2d9   : > { %21742 = vmatmul.mubr.msk.f32.gmra.mrb[8].mxu0 %vm405_vm1, %v24612_v46  ;;  %v24643_v46 = vld [vmem:[#allocation2 + $0x208] sm:$0xff] }
 0x2da   : > { %21744 = vmatprep.mubr.msk.f32.mxu0 %vm405_vm1, %v24613_v49  ;;  %v24644_v49 = vld [vmem:[#allocation2 + $0x210] sm:$0xff] }
 0x2db   : > { %21136 = vmatmul.mubr.msk.f32.gmra.mrb[4].mxu1 %vm405_vm1, %v26818_v55 }
 0x2dc   : > { %21138 = vmatprep.mubr.msk.f32.mxu1 %vm405_vm1, %v26822_v57 }
 0x2dd   : > { %21745 = vmatmul.mubr.msk.f32.gmra.mrb[10].mxu0 %vm405_vm1, %v24614_v52  ;;  %v24645_v52 = vld [vmem:[#allocation2 + $0x228] sm:$0xff] }
 0x2de   : > { %21747 = vmatprep.mubr.msk.f32.mxu0 %vm405_vm1, %v24615_v12  ;;  %v24646_v12 = vld [vmem:[#allocation2 + $0x230] sm:$0xff] }
 0x2df   : > { %21139 = vmatmul.mubr.msk.f32.gmra.mrb[6].mxu1 %vm405_vm1, %v26830_v58 }
 0x2e0   : > { %21141 = vmatprep.mubr.msk.f32.mxu1 %vm405_vm1, %v26834_v2 }
 0x2e1   : > { %21748 = vmatmul.mubr.msk.f32.gmra.mrb[12].mxu0 %vm405_vm1, %v24616_v37  ;;  %v27116_v37 = vld [vmem:[#allocation2 + $0x2e8] sm:$0xff] }
 0x2e2   : > { %21750 = vmatprep.mubr.msk.f32.mxu0 %vm405_vm1, %v24617_v18  ;;  %v3687_v18 = vld [vmem:[#allocation2 + $0x306] sm:$0xff] }
 0x2e3   : > { %21142 = vmatmul.mubr.msk.f32.gmra.mrb[8].mxu1 %vm405_vm1, %v26842_v6 }
 0x2e4   : > { %21144 = vmatprep.mubr.msk.f32.mxu1 %vm405_vm1, %v26846_v15 }
 0x2e5   : > { %21751 = vmatmul.mubr.msk.f32.gmra.mrb[14].mxu0 %vm405_vm1, %v24618_v39  ;;  %v8612_v39 = vld [vmem:[#allocation2 + $0xcc] sm:$0xff] }
 0x2e6   : > { %21753 = vmatprep.mubr.msk.f32.mxu0 %vm405_vm1, %v24619_v22  ;;  %v3688_v22 = vld [vmem:[#allocation2 + $0x30e] sm:$0xff] }
 0x2e7   : > { %21145 = vmatmul.mubr.msk.f32.gmra.mrb[10].mxu1 %vm405_vm1, %v26854_v33 }
 0x2e8   : > { %21147 = vmatprep.mubr.msk.f32.mxu1 %vm405_vm1, %v26858_v42 }
 0x2e9   : > { %21754 = vmatmul.mubr.msk.f32.gmra.mrb[16].mxu0 %vm405_vm1, %v24620_v24  ;;  %v8613_v24 = vld [vmem:[#allocation2 + $0xd4] sm:$0xff] }
 0x2ea   : > { %21756 = vmatprep.mubr.msk.f32.mxu0 %vm405_vm1, %v24621_v26  ;;  %v3689_v26 = vld [vmem:[#allocation2 + $0x326] sm:$0xff] }
 0x2eb   : > { %21148 = vmatmul.mubr.msk.f32.gmra.mrb[12].mxu1 %vm405_vm1, %v26866_v45 }
 0x2ec   : > { %21150 = vmatprep.mubr.msk.f32.mxu1 %vm405_vm1, %v26870_v48 }
 0x2ed   : > { %21757 = vmatmul.mubr.msk.f32.gmra.mrb[18].mxu0 %vm405_vm1, %v24622_v14  ;;  %v8614_v14 = vld [vmem:[#allocation2 + $0xec] sm:$0xff] }
 0x2ee   : > { %21759 = vmatprep.mubr.msk.f32.mxu0 %vm405_vm1, %v24623_v51  ;;  %v3690_v51 = vld [vmem:[#allocation2 + $0x32e] sm:$0xff] }
 0x2ef   : > { %21151 = vmatmul.mubr.msk.f32.gmra.mrb[14].mxu1 %vm405_vm1, %v26878_v62 }
 0x2f0   : > { %21153 = vmatprep.mubr.msk.f32.mxu1 %vm405_vm1, %v26882_v11 }
 0x2f1   : > { %21760 = vmatmul.mubr.msk.f32.gmra.mrb[20].mxu0 %vm405_vm1, %v24624_v4  ;;  %v8615_v4 = vld [vmem:[#allocation2 + $0xf4] sm:$0xff] }
 0x2f2   : > { %21762 = vmatprep.mubr.msk.f32.mxu0 %vm405_vm1, %v24625_v28  ;;  %v8616_v28 = vld [vmem:[#allocation2 + $0x10c] sm:$0xff] }
 0x2f3   : > { %21154 = vmatmul.mubr.msk.f32.gmra.mrb[16].mxu1 %vm405_vm1, %v26890_v41 }
 0x2f4   : > { %21156 = vmatprep.mubr.msk.f32.mxu1 %vm405_vm1, %v26894_v29 }
 0x2f5   : > { %21763 = vmatmul.mubr.msk.f32.gmra.mrb[22].mxu0 %vm405_vm1, %v24626_v8  ;;  %v8617_v8 = vld [vmem:[#allocation2 + $0x114] sm:$0xff] }
 0x2f6   : > { %21765 = vmatprep.mubr.msk.f32.mxu0 %vm405_vm1, %v24627_v35  ;;  %v8618_v35 = vld [vmem:[#allocation2 + $0x12c] sm:$0xff] }
 0x2f7   : > { %21157 = vmatmul.mubr.msk.f32.gmra.mrb[18].mxu1 %vm405_vm1, %v26902_v44 }
 0x2f8   : > { %21159 = vmatprep.mubr.msk.f32.mxu1 %vm405_vm1, %v26909_v3 }
 0x2f9   : > { %21766 = vmatmul.mubr.msk.f32.gmra.mrb[24].mxu0 %vm405_vm1, %v24628_v43  ;;  %v8619_v43 = vld [vmem:[#allocation2 + $0x134] sm:$0xff] }
 0x2fa   : > { %21768 = vmatprep.mubr.msk.f32.mxu0 %vm405_vm1, %v24629_v60  ;;  %v8620_v60 = vld [vmem:[#allocation2 + $0x14c] sm:$0xff] }
 0x2fb   : > { %21160 = vmatmul.mubr.msk.f32.gmra.mrb[20].mxu1 %vm405_vm1, %v26918_v20 }
 0x2fc   : > { %21162 = vmatprep.mubr.msk.f32.mxu1 %vm405_vm1, %v26921_v19 }
 0x2fd   : > { %21769 = vmatmul.mubr.msk.f32.gmra.mrb[26].mxu0 %vm405_vm1, %v24630_v61  ;;  %v8621_v61 = vld [vmem:[#allocation2 + $0x154] sm:$0xff] }
 0x2fe   : > { %21771 = vmatprep.mubr.msk.f32.mxu0 %vm405_vm1, %v24631_v63  ;;  %v8622_v63 = vld [vmem:[#allocation2 + $0x16c] sm:$0xff] }
 0x2ff   : > { %21163 = vmatmul.mubr.msk.f32.gmra.mrb[22].mxu1 %vm405_vm1, %v26933_v56 }
 0x300   : > { %21165 = vmatprep.mubr.msk.f32.mxu1 %vm405_vm1, %v26938_v34 }
 0x301   : > { %21772 = vmatmul.mubr.msk.f32.gmra.mrb[28].mxu0 %vm405_vm1, %v24632_v1  ;;  %v8623_v1 = vld [vmem:[#allocation2 + $0x174] sm:$0xff] }
 0x302   : > { %21774 = vmatprep.mubr.msk.f32.mxu0 %vm405_vm1, %v24633_v36  ;;  %v27200_v36 = vld [vmem:[#allocation2 + $0x18c] sm:$0xff] }
 0x303   : > { %21166 = vmatmul.mubr.msk.f32.gmra.mrb[24].mxu1 %vm405_vm1, %v26947_v21 }
 0x304   : > { %21168 = vmatprep.mubr.msk.f32.mxu1 %vm405_vm1, %v26950_v16 }
 0x305   : > { %21775 = vmatmul.mubr.msk.f32.gmra.mrb[30].mxu0 %vm405_vm1, %v24634_v50  ;;  %v27205_v50 = vld [vmem:[#allocation2 + $0x194] sm:$0xff] }
 0x306   : > { %21779 = vmatprep.mubr.msk.f32.mxu0 %vm405_vm1, %v24635_v54  ;;  %v27207_v54 = vld [vmem:[#allocation2 + $0x1ac] sm:$0xff] }
 0x307   : > { %21169 = vmatmul.mubr.msk.f32.gmra.mrb[26].mxu1 %vm405_vm1, %v26957_v30 }
 0x308   : > { %21171 = vmatprep.mubr.msk.f32.mxu1 %vm405_vm1, %v27052_v7 }
 0x309   : > { %21780 = vmatmul.mubr.msk.f32.vlgmr.msra.gmra.mrb[0].mxu0 %vm405_vm1, %v24636_v9  ;;  %v27215_v9 = vld [vmem:[#allocation2 + $0x1cc] sm:$0xff] }
 0x30a   : > { %21828 = vmatpush3.msk.msra.mxu0 %vm752_vm0, %v26928_v27  ;;  %21782 = vmatprep.mubr.msk.f32.mxu0 %vm405_vm1, %v24637_v31  ;;  %v24639_v27 = vld [vmem:[#allocation2 + $0x1c8] sm:$0xff]  ;;  %v27221_v31 = vld [vmem:[#allocation2 + $0x1d4] sm:$0xff] }
 0x30b   : > { %21877 = vmatprep.subr.msk.mxu0 %vm752_vm0, %v27044_v59  ;;  %21172 = vmatmul.mubr.msk.f32.gmra.mrb[28].mxu1 %vm405_vm1, %v27061_v47 }
 0x30c   : > { %21174 = vmatprep.mubr.msk.f32.mxu1 %vm405_vm1, %v27064_v23 }
 0x30d   : > { %21783 = vmatmul.mubr.msk.f32.gmra.mrb[2].mxu0 %vm405_vm1, %v24638_v5  ;;  %v27229_v5 = vld [vmem:[#allocation2 + $0x1f4] sm:$0xff] }
 0x30e   : > { %21785 = vmatprep.mubr.msk.f32.mxu0 %vm405_vm1, %v24639_v27  ;;  %v27237_v27 = vld [vmem:[#allocation2 + $0x214] sm:$0xff] }
 0x30f   : > { %21175 = vmatmul.mubr.msk.f32.gmra.mrb[30].mxu1 %vm405_vm1, %v27071_v32 }
 0x310   : > { %21179 = vmatprep.mubr.msk.f32.mxu1 %vm405_vm1, %v26810_v53  ;;  %v24647_v53 = vld [vmem:[#allocation2 + $0x248] sm:$0xff] }
 0x311   : > { %21786 = vmatmul.mubr.msk.f32.gmra.mrb[4].mxu0 %vm405_vm1, %v24640_v17  ;;  %v27245_v17 = vld [vmem:[#allocation2 + $0x234] sm:$0xff] }
 0x312   : > { %21788 = vmatprep.mubr.msk.f32.mxu0 %vm405_vm1, %v24641_v38  ;;  %v27253_v38 = vld [vmem:[#allocation2 + $0x254] sm:$0xff] }
 0x313   : > { %21180 = vmatmul.mubr.msk.f32.vlgmr.msra.gmra.mrb[0].mxu1 %vm405_vm1, %v26818_v55  ;;  %v24648_v55 = vld [vmem:[#allocation2 + $0x250] sm:$0xff] }
 0x314   : > { %21182 = vmatprep.mubr.msk.f32.mxu1 %vm405_vm1, %v26822_v57  ;;  %v24649_v57 = vld [vmem:[#allocation2 + $0x268] sm:$0xff] }
 0x315   : > { %21789 = vmatmul.mubr.msk.f32.gmra.mrb[6].mxu0 %vm405_vm1, %v24642_v10  ;;  %v27255_v10 = vld [vmem:[#allocation2 + $0x26c] sm:$0xff] }
 0x316   : > { %21791 = vmatprep.mubr.msk.f32.mxu0 %vm405_vm1, %v24643_v46  ;;  %v27261_v46 = vld [vmem:[#allocation2 + $0x274] sm:$0xff] }
 0x317   : > { %21183 = vmatmul.mubr.msk.f32.gmra.mrb[2].mxu1 %vm405_vm1, %v26830_v58  ;;  %v24650_v58 = vld [vmem:[#allocation2 + $0x270] sm:$0xff] }
 0x318   : > { %21185 = vmatprep.mubr.msk.f32.mxu1 %vm405_vm1, %v26834_v2  ;;  %v24651_v2 = vld [vmem:[#allocation2 + $0x288] sm:$0xff] }
 0x319   : > { %21792 = vmatmul.mubr.msk.f32.gmra.mrb[8].mxu0 %vm405_vm1, %v24644_v49  ;;  %v18332_v49 = vld [vmem:[%s29357_s2 + $0x6c] sm:$0xf] }
 0x31a   : > { %21794 = vmatprep.mubr.msk.f32.mxu0 %vm405_vm1, %v24645_v52  ;;  %v8640_v52 = vld [vmem:[#allocation2 + $0x28c] sm:$0xff] }
 0x31b   : > { %21186 = vmatmul.mubr.msk.f32.gmra.mrb[4].mxu1 %vm405_vm1, %v26842_v6  ;;  %v24652_v6 = vld [vmem:[#allocation2 + $0x290] sm:$0xff] }
 0x31c   : > { %21188 = vmatprep.mubr.msk.f32.mxu1 %vm405_vm1, %v26846_v15  ;;  %v24653_v15 = vld [vmem:[#allocation2 + $0x2a8] sm:$0xff] }
 0x31d   : > { %21795 = vmatmul.mubr.msk.f32.gmra.mrb[10].mxu0 %vm405_vm1, %v24646_v12  ;;  %v8641_v12 = vld [vmem:[#allocation2 + $0x294] sm:$0xff] }
 0x31e   : > { %21797 = vmatprep.mubr.msk.f32.mxu0 %vm405_vm1, %v24647_v53  ;;  %v8642_v53 = vld [vmem:[#allocation2 + $0x2ac] sm:$0xff] }
 0x31f   : > { %21189 = vmatmul.mubr.msk.f32.gmra.mrb[6].mxu1 %vm405_vm1, %v26854_v33  ;;  %v24654_v33 = vld [vmem:[#allocation2 + $0x2b0] sm:$0xff] }
 0x320   : > { %21191 = vmatprep.mubr.msk.f32.mxu1 %vm405_vm1, %v26858_v42  ;;  %v24655_v42 = vld [vmem:[#allocation2 + $0x2c8] sm:$0xff] }
 0x321   : > { %21798 = vmatmul.mubr.msk.f32.gmra.mrb[12].mxu0 %vm405_vm1, %v24648_v55  ;;  %v8643_v55 = vld [vmem:[#allocation2 + $0x2b4] sm:$0xff] }
 0x322   : > { %21800 = vmatprep.mubr.msk.f32.mxu0 %vm405_vm1, %v24649_v57  ;;  %v8644_v57 = vld [vmem:[#allocation2 + $0x2cc] sm:$0xff] }
 0x323   : > { %21192 = vmatmul.mubr.msk.f32.gmra.mrb[8].mxu1 %vm405_vm1, %v26866_v45  ;;  %v8239_v45 = vld [vmem:[#allocation2 + $0x2d0] sm:$0xff] }
 0x324   : > { %21194 = vmatprep.mubr.msk.f32.mxu1 %vm405_vm1, %v26870_v48  ;;  %v8241_v48 = vld [vmem:[#allocation2 + $0x2f0] sm:$0xff] }
 0x325   : > { %21801 = vmatmul.mubr.msk.f32.gmra.mrb[14].mxu0 %vm405_vm1, %v24650_v58  ;;  %v8645_v58 = vld [vmem:[#allocation2 + $0x2d4] sm:$0xff] }
 0x326   : > { %21803 = vmatprep.mubr.msk.f32.mxu0 %vm405_vm1, %v24651_v2  ;;  %v8646_v2 = vld [vmem:[#allocation2 + $0x2ec] sm:$0xff] }
 0x327   : > { %21195 = vmatmul.mubr.msk.f32.gmra.mrb[10].mxu1 %vm405_vm1, %v26878_v62  ;;  %v27125_v62 = vld [vmem:[#allocation2 + $0x308] sm:$0xff] }
 0x328   : > { %21197 = vmatprep.mubr.msk.f32.mxu1 %vm405_vm1, %v26882_v11  ;;  %v8243_v11 = vld [vmem:[#allocation2 + $0x310] sm:$0xff] }
 0x329   : > { %21804 = vmatmul.mubr.msk.f32.gmra.mrb[16].mxu0 %vm405_vm1, %v24652_v6  ;;  %v8647_v6 = vld [vmem:[#allocation2 + $0x2f4] sm:$0xff] }
 0x32a   : > { %21806 = vmatprep.mubr.msk.f32.mxu0 %vm405_vm1, %v24653_v15  ;;  %v18366_v15 = vld [vmem:[%s29357_s2 + $0x78] sm:$0xf] }
 0x32b   : > { %21198 = vmatmul.mubr.msk.f32.gmra.mrb[12].mxu1 %vm405_vm1, %v26890_v41  ;;  %v27134_v41 = vld [vmem:[#allocation2 + $0x328] sm:$0xff] }
 0x32c   : > { %21200 = vmatprep.mubr.msk.f32.mxu1 %vm405_vm1, %v26894_v29  ;;  %v8245_v29 = vld [vmem:[#allocation2 + $0x330] sm:$0xff] }
 0x32d   : > { %21807 = vmatmul.mubr.msk.f32.gmra.mrb[18].mxu0 %vm405_vm1, %v24654_v33 }
 0x32e   : > { %21809 = vmatprep.mubr.msk.f32.mxu0 %vm405_vm1, %v24655_v42 }
 0x32f   : > { %21201 = vmatmul.mubr.msk.f32.gmra.mrb[14].mxu1 %vm405_vm1, %v26902_v44  ;;  %v27143_v44 = vld [vmem:[#allocation2 + $0x348] sm:$0xff] }
 0x330   : > { %21203 = vmatprep.mubr.msk.f32.mxu1 %vm405_vm1, %v26909_v3  ;;  %v8247_v3 = vld [vmem:[#allocation2 + $0x350] sm:$0xff] }
 0x331   : > { %21810 = vmatmul.mubr.msk.f32.gmra.mrb[20].mxu0 %vm405_vm1, %v8239_v45 }
 0x332   : > { %21812 = vmatprep.mubr.msk.f32.mxu0 %vm405_vm1, %v27116_v37 }
 0x333   : > { %21204 = vmatmul.mubr.msk.f32.gmra.mrb[16].mxu1 %vm405_vm1, %v26918_v20  ;;  %v27152_v20 = vld [vmem:[#allocation2 + $0x368] sm:$0xff] }
 0x334   : > { %21206 = vmatprep.mubr.msk.f32.mxu1 %vm405_vm1, %v26921_v19  ;;  %v8249_v19 = vld [vmem:[#allocation2 + $0x370] sm:$0xff] }
 0x335   : > { %21813 = vmatmul.mubr.msk.f32.gmra.mrb[22].mxu0 %vm405_vm1, %v8241_v48 }
 0x336   : > { %21815 = vmatprep.mubr.msk.f32.mxu0 %vm405_vm1, %v27125_v62 }
 0x337   : > { %21207 = vmatmul.mubr.msk.f32.gmra.mrb[18].mxu1 %vm405_vm1, %v26933_v56  ;;  %v8608_v56 = vld [vmem:[#allocation2 + $0x8c] sm:$0xff] }
 0x338   : > { %21209 = vmatprep.mubr.msk.f32.mxu1 %vm405_vm1, %v26938_v34  ;;  %v8609_v34 = vld [vmem:[#allocation2 + $0x94] sm:$0xff] }
 0x339   : > { %21816 = vmatmul.mubr.msk.f32.gmra.mrb[24].mxu0 %vm405_vm1, %v8243_v11 }
 0x33a   : > { %21818 = vmatprep.mubr.msk.f32.mxu0 %vm405_vm1, %v27134_v41 }
 0x33b   : > { %21210 = vmatmul.mubr.msk.f32.gmra.mrb[20].mxu1 %vm405_vm1, %v26947_v21  ;;  %v8610_v21 = vld [vmem:[#allocation2 + $0xac] sm:$0xff] }
 0x33c   : > { %21212 = vmatprep.mubr.msk.f32.mxu1 %vm405_vm1, %v26950_v16  ;;  %v27172_v16 = vld [vmem:[%s29357_s2 + $0x68] sm:$0xf] }
 0x33d   : > { %21819 = vmatmul.mubr.msk.f32.gmra.mrb[26].mxu0 %vm405_vm1, %v8245_v29 }
 0x33e   : > { %21821 = vmatprep.mubr.msk.f32.mxu0 %vm405_vm1, %v27143_v44 }
 0x33f   : > { %21213 = vmatmul.mubr.msk.f32.gmra.mrb[22].mxu1 %vm405_vm1, %v26957_v30  ;;  %v8611_v30 = vld [vmem:[#allocation2 + $0xb4] sm:$0xff] }
 0x340   : > { %21215 = vmatprep.mubr.msk.f32.mxu1 %vm405_vm1, %v27052_v7  ;;  %v27223_v7 = vld [vmem:[#allocation2 + $0x1ec] sm:$0xff] }
 0x341   : > { %21822 = vmatmul.mubr.msk.f32.gmra.mrb[28].mxu0 %vm405_vm1, %v8247_v3  ;;  %v8649_v3 = vld [vmem:[#allocation2 + $0x314] sm:$0xff] }
 0x342   : > { %21824 = vmatprep.mubr.msk.f32.mxu0 %vm405_vm1, %v27152_v20 }
 0x343   : > { %21216 = vmatmul.mubr.msk.f32.gmra.mrb[24].mxu1 %vm405_vm1, %v27061_v47  ;;  %v27231_v47 = vld [vmem:[#allocation2 + $0x20c] sm:$0xff] }
 0x344   : > { %21218 = vmatprep.mubr.msk.f32.mxu1 %vm405_vm1, %v27064_v23  ;;  %v27239_v23 = vld [vmem:[#allocation2 + $0x22c] sm:$0xff] }
 0x345   : > { %21825 = vmatmul.mubr.msk.f32.gmra.mrb[30].mxu0 %vm405_vm1, %v8249_v19 }
 0x346   : > { %21829 = vmatprep.mubr.msk.f32.mxu0 %vm405_vm1, %v8608_v56 }
 0x347   : > { %21219 = vmatmul.mubr.msk.f32.gmra.mrb[26].mxu1 %vm405_vm1, %v27071_v32  ;;  %v27247_v32 = vld [vmem:[#allocation2 + $0x24c] sm:$0xff] }
 0x348   : > { %21221 = vmatprep.mubr.msk.f32.mxu1 %vm405_vm1, %v3687_v18 }
 0x349   : > { %21830 = vmatmul.mubr.msk.f32.vlgmr.msra.gmra.mrb[0].mxu0 %vm405_vm1, %v8609_v34  ;;  %v8651_v34 = vld [vmem:[#allocation2 + $0x334] sm:$0xff] }
 0x34a   : > { %21878 = vmatpush3.msk.msra.mxu0 %vm752_vm0, %v27044_v59  ;;  %21832 = vmatprep.mubr.msk.f32.mxu0 %vm405_vm1, %v8610_v21  ;;  %v27213_v59 = vld [vmem:[#allocation2 + $0x1b4] sm:$0xff] }
 0x34b   : > { %21927 = vmatprep.subr.msk.mxu0 %vm752_vm0, %v27172_v16  ;;  %21222 = vmatmul.mubr.msk.f32.gmra.mrb[28].mxu1 %vm405_vm1, %v3688_v22 }
 0x34c   : > { %21224 = vmatprep.mubr.msk.f32.mxu1 %vm405_vm1, %v3689_v26  ;;  %v9588_v26 = vld [vmem:[#allocation2 + $0x20] sm:$0xff] }
 0x34d   : > { %21833 = vmatmul.mubr.msk.f32.gmra.mrb[2].mxu0 %vm405_vm1, %v8611_v30 }
 0x34e   : > { %21835 = vmatprep.mubr.msk.f32.mxu0 %vm405_vm1, %v8612_v39  ;;  %v9586_v39 = vld [vmem:[#allocation2] sm:$0xff] }
 0x34f   : > { %21225 = vmatmul.mubr.msk.f32.gmra.mrb[30].mxu1 %vm405_vm1, %v3690_v51 }
 0x351   : > { %21836 = vmatmul.mubr.msk.f32.gmra.mrb[4].mxu0 %vm405_vm1, %v8613_v24 }
 0x352   : > { %21838 = vmatprep.mubr.msk.f32.mxu0 %vm405_vm1, %v8614_v14 }
 0x355   : > { %21839 = vmatmul.mubr.msk.f32.gmra.mrb[6].mxu0 %vm405_vm1, %v8615_v4  ;;  %v27420_v4 = vld [vmem:[#allocation2 + $0x28] sm:$0xff] }
 0x356   : > { %21841 = vmatprep.mubr.msk.f32.mxu0 %vm405_vm1, %v8616_v28 }
 0x359   : > { %21842 = vmatmul.mubr.msk.f32.gmra.mrb[8].mxu0 %vm405_vm1, %v8617_v8 }
 0x35a   : > { %21844 = vmatprep.mubr.msk.f32.mxu0 %vm405_vm1, %v8618_v35 }
 0x35d   : > { %21845 = vmatmul.mubr.msk.f32.gmra.mrb[10].mxu0 %vm405_vm1, %v8619_v43 }
 0x35e   : > { %21847 = vmatprep.mubr.msk.f32.mxu0 %vm405_vm1, %v8620_v60 }
 0x361   : > { %21848 = vmatmul.mubr.msk.f32.gmra.mrb[12].mxu0 %vm405_vm1, %v8621_v61 }
 0x362   : > { %21850 = vmatprep.mubr.msk.f32.mxu0 %vm405_vm1, %v8622_v63 }
 0x365   : > { %21851 = vmatmul.mubr.msk.f32.gmra.mrb[14].mxu0 %vm405_vm1, %v8623_v1 }
 0x366   : > { %21853 = vmatprep.mubr.msk.f32.mxu0 %vm405_vm1, %v27200_v36 }
 0x369   : > { %21854 = vmatmul.mubr.msk.f32.gmra.mrb[16].mxu0 %vm405_vm1, %v27205_v50 }
 0x36a   : > { %21856 = vmatprep.mubr.msk.f32.mxu0 %vm405_vm1, %v27207_v54 }
 0x36d   : > { %21857 = vmatmul.mubr.msk.f32.gmra.mrb[18].mxu0 %vm405_vm1, %v27213_v59 }
 0x36e   : > { %21859 = vmatprep.mubr.msk.f32.mxu0 %vm405_vm1, %v27215_v9 }
 0x371   : > { %21860 = vmatmul.mubr.msk.f32.gmra.mrb[20].mxu0 %vm405_vm1, %v27221_v31 }
 0x372   : > { %21862 = vmatprep.mubr.msk.f32.mxu0 %vm405_vm1, %v27223_v7 }
 0x375   : > { %21863 = vmatmul.mubr.msk.f32.gmra.mrb[22].mxu0 %vm405_vm1, %v27229_v5 }
 0x376   : > { %21865 = vmatprep.mubr.msk.f32.mxu0 %vm405_vm1, %v27231_v47 }
 0x379   : > { %21866 = vmatmul.mubr.msk.f32.gmra.mrb[24].mxu0 %vm405_vm1, %v27237_v27 }
 0x37a   : > { %21868 = vmatprep.mubr.msk.f32.mxu0 %vm405_vm1, %v27239_v23 }
 0x37d   : > { %21869 = vmatmul.mubr.msk.f32.gmra.mrb[26].mxu0 %vm405_vm1, %v27245_v17 }
 0x37e   : > { %21871 = vmatprep.mubr.msk.f32.mxu0 %vm405_vm1, %v27247_v32 }
 0x381   : > { %21872 = vmatmul.mubr.msk.f32.gmra.mrb[28].mxu0 %vm405_vm1, %v27253_v38 }
 0x382   : > { %21874 = vmatprep.mubr.msk.f32.mxu0 %vm405_vm1, %v27255_v10 }
 0x385   : > { %21875 = vmatmul.mubr.msk.f32.gmra.mrb[30].mxu0 %vm405_vm1, %v27261_v46 }
 0x386   : > { %21879 = vmatprep.mubr.msk.f32.mxu0 %vm405_vm1, %v8616_v28  ;;  %v9590_v28 = vld [vmem:[#allocation2 + $0x40] sm:$0xff] }
 0x389   : > { %21880 = vmatmul.mubr.msk.f32.vlgmr.msra.gmra.mrb[0].mxu0 %vm405_vm1, %v8617_v8 }
 0x38a   : > { %21928 = vmatpush3.msk.msra.mxu0 %vm752_vm0, %v27172_v16  ;;  %21882 = vmatprep.mubr.msk.f32.mxu0 %vm405_vm1, %v8618_v35 }
 0x38b   : > { %21977 = vmatprep.subr.msk.mxu0 %vm752_vm0, %v18332_v49 }
 0x38d   : > { %21883 = vmatmul.mubr.msk.f32.gmra.mrb[2].mxu0 %vm405_vm1, %v8619_v43  ;;  %v27431_v43 = vld [vmem:[#allocation2 + $0x48] sm:$0xff] }
 0x38e   : > { %21885 = vmatprep.mubr.msk.f32.mxu0 %vm405_vm1, %v8620_v60  ;;  %v9592_v60 = vld [vmem:[#allocation2 + $0x60] sm:$0xff] }
 0x391   : > { %21886 = vmatmul.mubr.msk.f32.gmra.mrb[4].mxu0 %vm405_vm1, %v8621_v61 }
 0x392   : > { %21888 = vmatprep.mubr.msk.f32.mxu0 %vm405_vm1, %v8622_v63 }
 0x395   : > { %21889 = vmatmul.mubr.msk.f32.gmra.mrb[6].mxu0 %vm405_vm1, %v8623_v1  ;;  %v27440_v1 = vld [vmem:[#allocation2 + $0x68] sm:$0xff] }
 0x396   : > { %21891 = vmatprep.mubr.msk.f32.mxu0 %vm405_vm1, %v27200_v36 }
 0x399   : > { %21892 = vmatmul.mubr.msk.f32.gmra.mrb[8].mxu0 %vm405_vm1, %v27205_v50 }
 0x39a   : > { %21894 = vmatprep.mubr.msk.f32.mxu0 %vm405_vm1, %v27207_v54 }
 0x39d   : > { %21895 = vmatmul.mubr.msk.f32.gmra.mrb[10].mxu0 %vm405_vm1, %v27213_v59 }
 0x39e   : > { %21897 = vmatprep.mubr.msk.f32.mxu0 %vm405_vm1, %v27215_v9 }
 0x3a1   : > { %21898 = vmatmul.mubr.msk.f32.gmra.mrb[12].mxu0 %vm405_vm1, %v27221_v31 }
 0x3a2   : > { %21900 = vmatprep.mubr.msk.f32.mxu0 %vm405_vm1, %v27223_v7 }
 0x3a5   : > { %21901 = vmatmul.mubr.msk.f32.gmra.mrb[14].mxu0 %vm405_vm1, %v27229_v5 }
 0x3a6   : > { %21903 = vmatprep.mubr.msk.f32.mxu0 %vm405_vm1, %v27231_v47 }
 0x3a9   : > { %21904 = vmatmul.mubr.msk.f32.gmra.mrb[16].mxu0 %vm405_vm1, %v27237_v27 }
 0x3aa   : > { %21906 = vmatprep.mubr.msk.f32.mxu0 %vm405_vm1, %v27239_v23 }
 0x3ad   : > { %21907 = vmatmul.mubr.msk.f32.gmra.mrb[18].mxu0 %vm405_vm1, %v27245_v17 }
 0x3ae   : > { %21909 = vmatprep.mubr.msk.f32.mxu0 %vm405_vm1, %v27247_v32 }
 0x3b1   : > { %21910 = vmatmul.mubr.msk.f32.gmra.mrb[20].mxu0 %vm405_vm1, %v27253_v38 }
 0x3b2   : > { %21912 = vmatprep.mubr.msk.f32.mxu0 %vm405_vm1, %v27255_v10 }
 0x3b5   : > { %21913 = vmatmul.mubr.msk.f32.gmra.mrb[22].mxu0 %vm405_vm1, %v27261_v46 }
 0x3b6   : > { %21915 = vmatprep.mubr.msk.f32.mxu0 %vm405_vm1, %v8640_v52 }
 0x3b9   : > { %21916 = vmatmul.mubr.msk.f32.gmra.mrb[24].mxu0 %vm405_vm1, %v8641_v12 }
 0x3ba   : > { %21918 = vmatprep.mubr.msk.f32.mxu0 %vm405_vm1, %v8642_v53 }
 0x3bd   : > { %21919 = vmatmul.mubr.msk.f32.gmra.mrb[26].mxu0 %vm405_vm1, %v8643_v55 }
 0x3be   : > { %21921 = vmatprep.mubr.msk.f32.mxu0 %vm405_vm1, %v8644_v57 }
 0x3c1   : > { %21922 = vmatmul.mubr.msk.f32.gmra.mrb[28].mxu0 %vm405_vm1, %v8645_v58 }
 0x3c2   : > { %21924 = vmatprep.mubr.msk.f32.mxu0 %vm405_vm1, %v8646_v2 }
 0x3c5   : > { %21925 = vmatmul.mubr.msk.f32.gmra.mrb[30].mxu0 %vm405_vm1, %v8647_v6 }
 0x3c6   : > { %21929 = vmatprep.mubr.msk.f32.mxu0 %vm405_vm1, %v27200_v36  ;;  %v9594_v36 = vld [vmem:[#allocation2 + $0x80] sm:$0xff] }
 0x3c9   : > { %21930 = vmatmul.mubr.msk.f32.vlgmr.msra.gmra.mrb[0].mxu0 %vm405_vm1, %v27205_v50 }
 0x3ca   : > { %21978 = vmatpush3.msk.msra.mxu0 %vm752_vm0, %v18332_v49  ;;  %21932 = vmatprep.mubr.msk.f32.mxu0 %vm405_vm1, %v27207_v54  ;;  %v9602_v49 = vld [vmem:[#allocation2 + $0x100] sm:$0xff] }
 0x3cb   : > { %22027 = vmatprep.subr.msk.mxu0 %vm752_vm0, %v18366_v15 }
 0x3cd   : > { %21933 = vmatmul.mubr.msk.f32.gmra.mrb[2].mxu0 %vm405_vm1, %v27213_v59  ;;  %v27449_v59 = vld [vmem:[#allocation2 + $0x88] sm:$0xff] }
 0x3ce   : > { %21935 = vmatprep.mubr.msk.f32.mxu0 %vm405_vm1, %v27215_v9  ;;  %v9596_v9 = vld [vmem:[#allocation2 + $0xa0] sm:$0xff] }
 0x3d1   : > { %21936 = vmatmul.mubr.msk.f32.gmra.mrb[4].mxu0 %vm405_vm1, %v27221_v31 }
 0x3d2   : > { %21938 = vmatprep.mubr.msk.f32.mxu0 %vm405_vm1, %v27223_v7 }
 0x3d5   : > { %21939 = vmatmul.mubr.msk.f32.gmra.mrb[6].mxu0 %vm405_vm1, %v27229_v5  ;;  %v27458_v5 = vld [vmem:[#allocation2 + $0xa8] sm:$0xff] }
 0x3d6   : > { %21941 = vmatprep.mubr.msk.f32.mxu0 %vm405_vm1, %v27231_v47  ;;  %v9598_v47 = vld [vmem:[#allocation2 + $0xc0] sm:$0xff] }
 0x3d9   : > { %21942 = vmatmul.mubr.msk.f32.gmra.mrb[8].mxu0 %vm405_vm1, %v27237_v27 }
 0x3da   : > { %21944 = vmatprep.mubr.msk.f32.mxu0 %vm405_vm1, %v27239_v23 }
 0x3dd   : > { %21945 = vmatmul.mubr.msk.f32.gmra.mrb[10].mxu0 %vm405_vm1, %v27245_v17  ;;  %v27467_v17 = vld [vmem:[#allocation2 + $0xc8] sm:$0xff] }
 0x3de   : > { %21947 = vmatprep.mubr.msk.f32.mxu0 %vm405_vm1, %v27247_v32  ;;  %v9600_v32 = vld [vmem:[#allocation2 + $0xe0] sm:$0xff] }
 0x3e1   : > { %21948 = vmatmul.mubr.msk.f32.gmra.mrb[12].mxu0 %vm405_vm1, %v27253_v38 }
 0x3e2   : > { %21950 = vmatprep.mubr.msk.f32.mxu0 %vm405_vm1, %v27255_v10 }
 0x3e5   : > { %21951 = vmatmul.mubr.msk.f32.gmra.mrb[14].mxu0 %vm405_vm1, %v27261_v46  ;;  %v27476_v46 = vld [vmem:[#allocation2 + $0xe8] sm:$0xff] }
 0x3e6   : > { %21953 = vmatprep.mubr.msk.f32.mxu0 %vm405_vm1, %v8640_v52  ;;  %v27359_v33 = vpop.f32.mrb[0].mxu1 }
 0x3e7   : > { %v27361_v42 = vpop.f32.mrb[1].mxu1 }
 0x3e9   : > { %21954 = vmatmul.mubr.msk.f32.gmra.mrb[16].mxu0 %vm405_vm1, %v8641_v12 }
 0x3ea   : > { %21956 = vmatprep.mubr.msk.f32.mxu0 %vm405_vm1, %v8642_v53  ;;  %v27365_v45 = vpop.f32.mrb[2].mxu1  ;;  %v27485_v53 = vld [vmem:[#allocation2 + $0x108] sm:$0xff] }
 0x3eb   : > { %v27367_v48 = vpop.f32.mrb[3].mxu1 }
 0x3ed   : > { %21957 = vmatmul.mubr.msk.f32.gmra.mrb[18].mxu0 %vm405_vm1, %v8643_v55  ;;  %v9604_v55 = vld [vmem:[#allocation2 + $0x120] sm:$0xff] }
 0x3ee   : > { %21959 = vmatprep.mubr.msk.f32.mxu0 %vm405_vm1, %v8644_v57  ;;  %v27371_v11 = vpop.f32.mrb[4].mxu1 }
 0x3ef   : > { %v27373_v29 = vpop.f32.mrb[5].mxu1 }
 0x3f1   : > { %21960 = vmatmul.mubr.msk.f32.gmra.mrb[20].mxu0 %vm405_vm1, %v8645_v58 }
 0x3f2   : > { %21962 = vmatprep.mubr.msk.f32.mxu0 %vm405_vm1, %v8646_v2  ;;  %v27378_v19 = vpop.f32.mrb[6].mxu1  ;;  %v27494_v2 = vld [vmem:[#allocation2 + $0x128] sm:$0xff] }
 0x3f3   : > { %v27380_v56 = vpop.f32.mrb[7].mxu1 }
 0x3f5   : > { %21963 = vmatmul.mubr.msk.f32.gmra.mrb[22].mxu0 %vm405_vm1, %v8647_v6  ;;  %v9606_v6 = vld [vmem:[#allocation2 + $0x140] sm:$0xff] }
 0x3f6   : > { %21965 = vmatprep.mubr.msk.f32.mxu0 %vm405_vm1, %v26711_v40  ;;  %v27385_v21 = vpop.f32.mrb[8].mxu1  ;;  %v8653_v40 = vld [vmem:[#allocation2 + $0x354] sm:$0xff] }
 0x3f7   : > { %v27387_v16 = vpop.f32.mrb[9].mxu1 }
 0x3f9   : > { %21966 = vmatmul.mubr.msk.f32.gmra.mrb[24].mxu0 %vm405_vm1, %v8649_v3  ;;  %v9608_v3 = vld [vmem:[#allocation2 + $0x160] sm:$0xff] }
 0x3fa   : > { %21968 = vmatprep.mubr.msk.f32.mxu0 %vm405_vm1, %v26720_v13  ;;  %v27392_v30 = vpop.f32.mrb[10].mxu1  ;;  %v8655_v13 = vld [vmem:[#allocation2 + $0x374] sm:$0xff] }
 0x3fb   : > { %v27394_v18 = vpop.f32.mrb[11].mxu1 }
 0x3fd   : > { %21969 = vmatmul.mubr.msk.f32.gmra.mrb[26].mxu0 %vm405_vm1, %v8651_v34  ;;  %v27504_v34 = vld [vmem:[#allocation2 + $0x168] sm:$0xff] }
 0x3fe   : > { %21971 = vmatprep.mubr.msk.f32.mxu0 %vm405_vm1, %v26729_v0  ;;  %v27399_v22 = vpop.f32.mrb[12].mxu1  ;;  %v27405_v0 = vld [vmem:[#allocation2 + $0x8] sm:$0xff] }
 0x3ff   : > { %v27401_v24 = vpop.f32.mrb[13].mxu1 }
 0x401   : > { %21972 = vmatmul.mubr.msk.f32.gmra.mrb[28].mxu0 %vm405_vm1, %v8653_v40  ;;  %v9610_v40 = vld [vmem:[#allocation2 + $0x180] sm:$0xff] }
 0x402   : > { %21974 = vmatprep.mubr.msk.f32.mxu0 %vm405_vm1, %v26741_v25  ;;  %v27407_v14 = vpop.f32.mrb[14].mxu1  ;;  %v27414_v25 = vld [vmem:[%s29357_s2 + $0x84] sm:$0xf] }
 0x403   : > { %v27409_v51 = vpop.f32.mrb[15].mxu1 }
 0x405   : > { %21975 = vmatmul.mubr.msk.f32.gmra.mrb[30].mxu0 %vm405_vm1, %v8655_v13  ;;  %v27509_v13 = vld [vmem:[#allocation2 + $0x188] sm:$0xff] }
 0x406   : > { %21979 = vmatprep.mubr.msk.f32.mxu0 %vm405_vm1, %v9586_v39  ;;  %v27422_v8 = vpop.f32.mrb[16].mxu1  ;;  %v9612_v39 = vld [vmem:[#allocation2 + $0x1a0] sm:$0xff] }
 0x407   : > { %v27426_v35 = vpop.f32.mrb[17].mxu1 }
 0x409   : > { %21980 = vmatmul.mubr.msk.f32.vlgmr.msra.gmra.mrb[0].mxu0 %vm405_vm1, %v27405_v0 }
 0x40a   : > { %22028 = vmatpush3.msk.msra.mxu0 %vm752_vm0, %v18366_v15  ;;  %21982 = vmatprep.mubr.msk.f32.mxu0 %vm405_vm1, %v9588_v26  ;;  %v27433_v61 = vpop.f32.mrb[18].mxu1  ;;  %v27499_v15 = vld [vmem:[#allocation2 + $0x148] sm:$0xff] }
 0x40b   : > { %22077 = vmatprep.subr.msk.mxu0 %vm752_vm0, %v27414_v25  ;;  %v27435_v63 = vpop.f32.mrb[19].mxu1  ;;  %v27514_v26 = vld [vmem:[#allocation2 + $0x1a8] sm:$0xff] }
 0x40d   : > { %21983 = vmatmul.mubr.msk.f32.gmra.mrb[2].mxu0 %vm405_vm1, %v27420_v4 }
 0x40e   : > { %21985 = vmatprep.mubr.msk.f32.mxu0 %vm405_vm1, %v9590_v28  ;;  %v27442_v50 = vpop.f32.mrb[20].mxu1  ;;  %v9614_v28 = vld [vmem:[#allocation2 + $0x1c0] sm:$0xff] }
 0x40f   : > { %v27444_v54 = vpop.f32.mrb[21].mxu1 }
 0x411   : > { %21986 = vmatmul.mubr.msk.f32.gmra.mrb[4].mxu0 %vm405_vm1, %v27431_v43 }
 0x412   : > { %21988 = vmatprep.mubr.msk.f32.mxu0 %vm405_vm1, %v9592_v60  ;;  %v27451_v31 = vpop.f32.mrb[22].mxu1  ;;  %v27519_v60 = vld [vmem:[#allocation2 + $0x1c8] sm:$0xff] }
 0x413   : > { %v27453_v7 = vpop.f32.mrb[23].mxu1 }
 0x415   : > { %21989 = vmatmul.mubr.msk.f32.gmra.mrb[6].mxu0 %vm405_vm1, %v27440_v1 }
 0x416   : > { %21991 = vmatprep.mubr.msk.f32.mxu0 %vm405_vm1, %v9594_v36  ;;  %v27460_v27 = vpop.f32.mrb[24].mxu1  ;;  %v9616_v36 = vld [vmem:[#allocation2 + $0x1e0] sm:$0xff] }
 0x417   : > { %v27462_v23 = vpop.f32.mrb[25].mxu1 }
 0x419   : > { %21992 = vmatmul.mubr.msk.f32.gmra.mrb[8].mxu0 %vm405_vm1, %v27449_v59 }
 0x41a   : > { %21994 = vmatprep.mubr.msk.f32.mxu0 %vm405_vm1, %v9596_v9  ;;  %v27469_v38 = vpop.f32.mrb[26].mxu1  ;;  %v27524_v9 = vld [vmem:[#allocation2 + $0x1e8] sm:$0xff] }
 0x41b   : > { %29423 = vst [vmem:[#allocation9_spill] sm:$0xff] %v27469_v38  ;;  %v27471_v10 = vpop.f32.mrb[27].mxu1  ;;  %v18468_v38 = vld [vmem:[%s29357_s2 + $0x7c] sm:$0xf] }
 0x41c   : > { %29424 = vst [vmem:[#allocation7_spill] sm:$0xff] %v27471_v10  ;;  %v10006_v10 = vld [vmem:[#allocation2 + $0x2e0] sm:$0xff] }
 0x41d   : > { %21995 = vmatmul.mubr.msk.f32.gmra.mrb[10].mxu0 %vm405_vm1, %v27458_v5 }
 0x41e   : > { %21997 = vmatprep.mubr.msk.f32.mxu0 %vm405_vm1, %v9598_v47  ;;  %v27478_v52 = vpop.f32.mrb[28].mxu1  ;;  %v18434_v47 = vld [vmem:[%s29357_s2 + $0x70] sm:$0xf] }
 0x41f   : > { %29425 = vst [vmem:[#allocation8_spill] sm:$0xff] %v27478_v52  ;;  %v27480_v12 = vpop.f32.mrb[29].mxu1  ;;  %v27589_v52 = vld [vmem:[#allocation2 + $0x2c8] sm:$0xff] }
 0x420   : > { %29426 = vst [vmem:[#allocation10_spill] sm:$0xff] %v27480_v12  ;;  %v10004_v12 = vld [vmem:[#allocation2 + $0x2c0] sm:$0xff] }
 0x421   : > { %21998 = vmatmul.mubr.msk.f32.gmra.mrb[12].mxu0 %vm405_vm1, %v27467_v17 }
 0x422   : > { %22000 = vmatprep.mubr.msk.f32.mxu0 %vm405_vm1, %v9600_v32  ;;  %v27487_v57 = vpop.f32.mrb[30].mxu1  ;;  %v27559_v32 = vld [vmem:[#allocation2 + $0x208] sm:$0xff] }
 0x423   : > { %29427 = vst [vmem:[#allocation11_spill] sm:$0xff] %v27487_v57  ;;  %v27489_v58 = vpop.f32.mrb[31].mxu1  ;;  %v27584_v57 = vld [vmem:[#allocation2 + $0x2a8] sm:$0xff] }
 0x424   : > { %29428 = vst [vmem:[#allocation12_spill] sm:$0xff] %v27489_v58  ;;  %v10002_v58 = vld [vmem:[#allocation2 + $0x2a0] sm:$0xff] }
 0x425   : > { %22001 = vmatmul.mubr.msk.f32.gmra.mrb[14].mxu0 %vm405_vm1, %v27476_v46 }
 0x426   : > { %22003 = vmatprep.mubr.msk.f32.mxu0 %vm405_vm1, %v9602_v49 }
 0x429   : > { %22004 = vmatmul.mubr.msk.f32.gmra.mrb[16].mxu0 %vm405_vm1, %v27485_v53 }
 0x42a   : > { %22006 = vmatprep.mubr.msk.f32.mxu0 %vm405_vm1, %v9604_v55 }
 0x42d   : > { %22007 = vmatmul.mubr.msk.f32.gmra.mrb[18].mxu0 %vm405_vm1, %v27494_v2 }
 0x42e   : > { %22009 = vmatprep.mubr.msk.f32.mxu0 %vm405_vm1, %v9606_v6 }
 0x431   : > { %22010 = vmatmul.mubr.msk.f32.gmra.mrb[20].mxu0 %vm405_vm1, %v27499_v15 }
 0x432   : > { %22012 = vmatprep.mubr.msk.f32.mxu0 %vm405_vm1, %v9608_v3 }
 0x435   : > { %22013 = vmatmul.mubr.msk.f32.gmra.mrb[22].mxu0 %vm405_vm1, %v27504_v34 }
 0x436   : > { %22015 = vmatprep.mubr.msk.f32.mxu0 %vm405_vm1, %v9610_v40 }
 0x439   : > { %22016 = vmatmul.mubr.msk.f32.gmra.mrb[24].mxu0 %vm405_vm1, %v27509_v13 }
 0x43a   : > { %22018 = vmatprep.mubr.msk.f32.mxu0 %vm405_vm1, %v9612_v39 }
 0x43d   : > { %22019 = vmatmul.mubr.msk.f32.gmra.mrb[26].mxu0 %vm405_vm1, %v27514_v26 }
 0x43e   : > { %22021 = vmatprep.mubr.msk.f32.mxu0 %vm405_vm1, %v9614_v28 }
 0x441   : > { %22022 = vmatmul.mubr.msk.f32.gmra.mrb[28].mxu0 %vm405_vm1, %v27519_v60 }
 0x442   : > { %22024 = vmatprep.mubr.msk.f32.mxu0 %vm405_vm1, %v9616_v36 }
 0x445   : > { %22025 = vmatmul.mubr.msk.f32.gmra.mrb[30].mxu0 %vm405_vm1, %v27524_v9 }
 0x446   : > { %22029 = vmatprep.mubr.msk.f32.mxu0 %vm405_vm1, %v9602_v49  ;;  %v9994_v49 = vld [vmem:[#allocation2 + $0x220] sm:$0xff] }
 0x449   : > { %22030 = vmatmul.mubr.msk.f32.vlgmr.msra.gmra.mrb[0].mxu0 %vm405_vm1, %v27485_v53 }
 0x44a   : > { %22078 = vmatpush3.msk.msra.mxu0 %vm752_vm0, %v27414_v25  ;;  %22032 = vmatprep.mubr.msk.f32.mxu0 %vm405_vm1, %v9604_v55  ;;  %v9992_v25 = vld [vmem:[#allocation2 + $0x200] sm:$0xff]  ;;  %v27564_v55 = vld [vmem:[#allocation2 + $0x228] sm:$0xff] }
 0x44b   : > { %22127 = vmatprep.subr.msk.mxu0 %vm752_vm0, %v18434_v47 }
 0x44d   : > { %22033 = vmatmul.mubr.msk.f32.gmra.mrb[2].mxu0 %vm405_vm1, %v27494_v2 }
 0x44e   : > { %22035 = vmatprep.mubr.msk.f32.mxu0 %vm405_vm1, %v9606_v6  ;;  %v9996_v6 = vld [vmem:[#allocation2 + $0x240] sm:$0xff] }
 0x451   : > { %22036 = vmatmul.mubr.msk.f32.gmra.mrb[4].mxu0 %vm405_vm1, %v27499_v15 }
 0x452   : > { %22038 = vmatprep.mubr.msk.f32.mxu0 %vm405_vm1, %v9608_v3  ;;  %v27569_v3 = vld [vmem:[#allocation2 + $0x248] sm:$0xff] }
 0x455   : > { %22039 = vmatmul.mubr.msk.f32.gmra.mrb[6].mxu0 %vm405_vm1, %v27504_v34 }
 0x456   : > { %22041 = vmatprep.mubr.msk.f32.mxu0 %vm405_vm1, %v9610_v40  ;;  %v9998_v40 = vld [vmem:[#allocation2 + $0x260] sm:$0xff] }
 0x459   : > { %22042 = vmatmul.mubr.msk.f32.gmra.mrb[8].mxu0 %vm405_vm1, %v27509_v13 }
 0x45a   : > { %22044 = vmatprep.mubr.msk.f32.mxu0 %vm405_vm1, %v9612_v39  ;;  %v27574_v39 = vld [vmem:[#allocation2 + $0x268] sm:$0xff] }
 0x45d   : > { %22045 = vmatmul.mubr.msk.f32.gmra.mrb[10].mxu0 %vm405_vm1, %v27514_v26 }
 0x45e   : > { %22047 = vmatprep.mubr.msk.f32.mxu0 %vm405_vm1, %v9614_v28  ;;  %v10000_v28 = vld [vmem:[#allocation2 + $0x280] sm:$0xff] }
 0x461   : > { %22048 = vmatmul.mubr.msk.f32.gmra.mrb[12].mxu0 %vm405_vm1, %v27519_v60 }
 0x462   : > { %22050 = vmatprep.mubr.msk.f32.mxu0 %vm405_vm1, %v9616_v36  ;;  %v27579_v36 = vld [vmem:[#allocation2 + $0x288] sm:$0xff] }
 0x465   : > { %22051 = vmatmul.mubr.msk.f32.gmra.mrb[14].mxu0 %vm405_vm1, %v27524_v9 }
 0x466   : > { %22053 = vmatprep.mubr.msk.f32.mxu0 %vm405_vm1, %v9992_v25 }
 0x469   : > { %22054 = vmatmul.mubr.msk.f32.gmra.mrb[16].mxu0 %vm405_vm1, %v27559_v32 }
 0x46a   : > { %22056 = vmatprep.mubr.msk.f32.mxu0 %vm405_vm1, %v9994_v49 }
 0x46d   : > { %22057 = vmatmul.mubr.msk.f32.gmra.mrb[18].mxu0 %vm405_vm1, %v27564_v55 }
 0x46e   : > { %22059 = vmatprep.mubr.msk.f32.mxu0 %vm405_vm1, %v9996_v6 }
 0x471   : > { %22060 = vmatmul.mubr.msk.f32.gmra.mrb[20].mxu0 %vm405_vm1, %v27569_v3 }
 0x472   : > { %22062 = vmatprep.mubr.msk.f32.mxu0 %vm405_vm1, %v9998_v40 }
 0x475   : > { %22063 = vmatmul.mubr.msk.f32.gmra.mrb[22].mxu0 %vm405_vm1, %v27574_v39 }
 0x476   : > { %22065 = vmatprep.mubr.msk.f32.mxu0 %vm405_vm1, %v10000_v28 }
 0x479   : > { %22066 = vmatmul.mubr.msk.f32.gmra.mrb[24].mxu0 %vm405_vm1, %v27579_v36 }
 0x47a   : > { %22068 = vmatprep.mubr.msk.f32.mxu0 %vm405_vm1, %v10002_v58 }
 0x47d   : > { %22069 = vmatmul.mubr.msk.f32.gmra.mrb[26].mxu0 %vm405_vm1, %v27584_v57 }
 0x47e   : > { %22071 = vmatprep.mubr.msk.f32.mxu0 %vm405_vm1, %v10004_v12 }
 0x481   : > { %22072 = vmatmul.mubr.msk.f32.gmra.mrb[28].mxu0 %vm405_vm1, %v27589_v52 }
 0x482   : > { %22074 = vmatprep.mubr.msk.f32.mxu0 %vm405_vm1, %v10006_v10 }
 0x485   : > { %22075 = vmatmul.mubr.msk.f32.gmra.mrb[30].mxu0 %vm405_vm1, %v27116_v37 }
 0x486   : > { %22079 = vmatprep.mubr.msk.f32.mxu0 %vm405_vm1, %v9992_v25  ;;  %v10385_v25 = vld [vmem:[#allocation2 + $0x320] sm:$0xff] }
 0x489   : > { %22080 = vmatmul.mubr.msk.f32.vlgmr.msra.gmra.mrb[0].mxu0 %vm405_vm1, %v27559_v32 }
 0x48a   : > { %22128 = vmatpush3.msk.msra.mxu0 %vm752_vm0, %v18434_v47  ;;  %22082 = vmatprep.mubr.msk.f32.mxu0 %vm405_vm1, %v9994_v49  ;;  %v10383_v47 = vld [vmem:[#allocation2 + $0x300] sm:$0xff] }
 0x48b   : > { %22177 = vmatprep.subr.msk.mxu0 %vm752_vm0, %v18468_v38  ;;  %v10395_v49 = vld [vmem:[#allocation2 + $0x3c0] sm:$0xff] }
 0x48d   : > { %22083 = vmatmul.mubr.msk.f32.gmra.mrb[2].mxu0 %vm405_vm1, %v27564_v55 }
 0x48e   : > { %22085 = vmatprep.mubr.msk.f32.mxu0 %vm405_vm1, %v9996_v6  ;;  %v27653_v6 = vld [vmem:[#allocation2 + $0x3e8] sm:$0xff] }
 0x491   : > { %22086 = vmatmul.mubr.msk.f32.gmra.mrb[4].mxu0 %vm405_vm1, %v27569_v3 }
 0x492   : > { %22088 = vmatprep.mubr.msk.f32.mxu0 %vm405_vm1, %v9998_v40  ;;  %v27659_v40 = vld [vmem:[#allocation2 + $0x10] sm:$0xff] }
 0x495   : > { %22089 = vmatmul.mubr.msk.f32.gmra.mrb[6].mxu0 %vm405_vm1, %v27574_v39 }
 0x496   : > { %22091 = vmatprep.mubr.msk.f32.mxu0 %vm405_vm1, %v10000_v28  ;;  %v18502_v28 = vld [vmem:[%s29357_s2 + $0x88] sm:$0xf] }
 0x499   : > { %22092 = vmatmul.mubr.msk.f32.gmra.mrb[8].mxu0 %vm405_vm1, %v27579_v36 }
 0x49a   : > { %22094 = vmatprep.mubr.msk.f32.mxu0 %vm405_vm1, %v10002_v58  ;;  %v10387_v58 = vld [vmem:[#allocation2 + $0x340] sm:$0xff] }
 0x49d   : > { %22095 = vmatmul.mubr.msk.f32.gmra.mrb[10].mxu0 %vm405_vm1, %v27584_v57 }
 0x49e   : > { %22097 = vmatprep.mubr.msk.f32.mxu0 %vm405_vm1, %v10004_v12  ;;  %v10389_v12 = vld [vmem:[#allocation2 + $0x360] sm:$0xff] }
 0x4a1   : > { %22098 = vmatmul.mubr.msk.f32.gmra.mrb[12].mxu0 %vm405_vm1, %v27589_v52 }
 0x4a2   : > { %22100 = vmatprep.mubr.msk.f32.mxu0 %vm405_vm1, %v10006_v10  ;;  %v10393_v10 = vld [vmem:[#allocation2 + $0x3a0] sm:$0xff] }
 0x4a5   : > { %22101 = vmatmul.mubr.msk.f32.gmra.mrb[14].mxu0 %vm405_vm1, %v27116_v37  ;;  %v10391_v37 = vld [vmem:[#allocation2 + $0x380] sm:$0xff] }
 0x4a6   : > { %22103 = vmatprep.mubr.msk.f32.mxu0 %vm405_vm1, %v10383_v47  ;;  %v27669_v47 = vld [vmem:[#allocation2 + $0x30] sm:$0xff] }
 0x4a9   : > { %22104 = vmatmul.mubr.msk.f32.gmra.mrb[16].mxu0 %vm405_vm1, %v27125_v62  ;;  %v27638_v62 = vld [vmem:[#allocation2 + $0x388] sm:$0xff] }
 0x4aa   : > { %22106 = vmatprep.mubr.msk.f32.mxu0 %vm405_vm1, %v10385_v25  ;;  %v24657_v25 = vld [vmem:[#allocation2 + $0x110] sm:$0xff] }
 0x4ad   : > { %22107 = vmatmul.mubr.msk.f32.gmra.mrb[18].mxu0 %vm405_vm1, %v27134_v41  ;;  %v27643_v41 = vld [vmem:[#allocation2 + $0x3a8] sm:$0xff] }
 0x4ae   : > { %22109 = vmatprep.mubr.msk.f32.mxu0 %vm405_vm1, %v10387_v58  ;;  %v24658_v58 = vld [vmem:[#allocation2 + $0x128] sm:$0xff] }
 0x4b1   : > { %22110 = vmatmul.mubr.msk.f32.gmra.mrb[20].mxu0 %vm405_vm1, %v27143_v44  ;;  %v27648_v44 = vld [vmem:[#allocation2 + $0x3c8] sm:$0xff] }
 0x4b2   : > { %22112 = vmatprep.mubr.msk.f32.mxu0 %vm405_vm1, %v10389_v12  ;;  %v24660_v12 = vld [vmem:[#allocation2 + $0x148] sm:$0xff] }
 0x4b5   : > { %22113 = vmatmul.mubr.msk.f32.gmra.mrb[22].mxu0 %vm405_vm1, %v27152_v20  ;;  %v10397_v20 = vld [vmem:[#allocation2 + $0x3e0] sm:$0xff] }
 0x4b6   : > { %22115 = vmatprep.mubr.msk.f32.mxu0 %vm405_vm1, %v10391_v37  ;;  %v24661_v37 = vld [vmem:[#allocation2 + $0x150] sm:$0xff] }
 0x4b9   : > { %22116 = vmatmul.mubr.msk.f32.gmra.mrb[24].mxu0 %vm405_vm1, %v27638_v62 }
 0x4ba   : > { %22118 = vmatprep.mubr.msk.f32.mxu0 %vm405_vm1, %v10393_v10  ;;  %v24662_v10 = vld [vmem:[#allocation2 + $0x168] sm:$0xff] }
 0x4bd   : > { %22119 = vmatmul.mubr.msk.f32.gmra.mrb[26].mxu0 %vm405_vm1, %v27643_v41 }
 0x4be   : > { %22121 = vmatprep.mubr.msk.f32.mxu0 %vm405_vm1, %v10395_v49  ;;  %v24663_v49 = vld [vmem:[#allocation2 + $0x170] sm:$0xff] }
 0x4c1   : > { %22122 = vmatmul.mubr.msk.f32.gmra.mrb[28].mxu0 %vm405_vm1, %v27648_v44 }
 0x4c2   : > { %22124 = vmatprep.mubr.msk.f32.mxu0 %vm405_vm1, %v10397_v20  ;;  %v24664_v20 = vld [vmem:[#allocation2 + $0x188] sm:$0xff] }
 0x4c5   : > { %22125 = vmatmul.mubr.msk.f32.gmra.mrb[30].mxu0 %vm405_vm1, %v27653_v6 }
 0x4c6   : > { %22129 = vmatprep.mubr.msk.f32.mxu0 %vm405_vm1, %v27405_v0  ;;  %v27676_v0 = vld [vmem:[#allocation2 + $0x50] sm:$0xff] }
 0x4c9   : > { %22130 = vmatmul.mubr.msk.f32.vlgmr.msra.gmra.mrb[0].mxu0 %vm405_vm1, %v27659_v40 }
 0x4ca   : > { %22178 = vmatpush3.msk.msra.mxu0 %vm752_vm0, %v18468_v38  ;;  %22132 = vmatprep.mubr.msk.f32.mxu0 %vm405_vm1, %v27420_v4  ;;  %v27682_v38 = vld [vmem:[#allocation2 + $0x70] sm:$0xff] }
 0x4cb   : > { %22227 = vmatprep.subr.msk.mxu0 %vm752_vm0, %v18502_v28  ;;  %v27688_v4 = vld [vmem:[#allocation2 + $0x90] sm:$0xff] }
 0x4cd   : > { %22133 = vmatmul.mubr.msk.f32.gmra.mrb[2].mxu0 %vm405_vm1, %v27669_v47 }
 0x4ce   : > { %22135 = vmatprep.mubr.msk.f32.mxu0 %vm405_vm1, %v27431_v43  ;;  %v27694_v43 = vld [vmem:[#allocation2 + $0xb0] sm:$0xff] }
 0x4d1   : > { %22136 = vmatmul.mubr.msk.f32.gmra.mrb[4].mxu0 %vm405_vm1, %v27676_v0 }
 0x4d2   : > { %22138 = vmatprep.mubr.msk.f32.mxu0 %vm405_vm1, %v27440_v1  ;;  %v27700_v1 = vld [vmem:[#allocation2 + $0xd0] sm:$0xff] }
 0x4d5   : > { %22139 = vmatmul.mubr.msk.f32.gmra.mrb[6].mxu0 %vm405_vm1, %v27682_v38 }
 0x4d6   : > { %22141 = vmatprep.mubr.msk.f32.mxu0 %vm405_vm1, %v27449_v59  ;;  %v27706_v59 = vld [vmem:[#allocation2 + $0xf0] sm:$0xff] }
 0x4d9   : > { %22142 = vmatmul.mubr.msk.f32.gmra.mrb[8].mxu0 %vm405_vm1, %v27688_v4 }
 0x4da   : > { %22144 = vmatprep.mubr.msk.f32.mxu0 %vm405_vm1, %v27458_v5  ;;  %v27712_v5 = vld [vmem:[#allocation2 + $0x110] sm:$0xff] }
 0x4dd   : > { %22145 = vmatmul.mubr.msk.f32.gmra.mrb[10].mxu0 %vm405_vm1, %v27694_v43 }
 0x4de   : > { %22147 = vmatprep.mubr.msk.f32.mxu0 %vm405_vm1, %v27467_v17  ;;  %v27718_v17 = vld [vmem:[#allocation2 + $0x130] sm:$0xff] }
 0x4e1   : > { %22148 = vmatmul.mubr.msk.f32.gmra.mrb[12].mxu0 %vm405_vm1, %v27700_v1 }
 0x4e2   : > { %22150 = vmatprep.mubr.msk.f32.mxu0 %vm405_vm1, %v27476_v46  ;;  %v27724_v46 = vld [vmem:[#allocation2 + $0x150] sm:$0xff] }
 0x4e5   : > { %22151 = vmatmul.mubr.msk.f32.gmra.mrb[14].mxu0 %vm405_vm1, %v27706_v59 }
 0x4e6   : > { %22153 = vmatprep.mubr.msk.f32.mxu0 %vm405_vm1, %v27485_v53  ;;  %v27730_v53 = vld [vmem:[#allocation2 + $0x170] sm:$0xff] }
 0x4e9   : > { %22154 = vmatmul.mubr.msk.f32.gmra.mrb[16].mxu0 %vm405_vm1, %v27712_v5 }
 0x4ea   : > { %22156 = vmatprep.mubr.msk.f32.mxu0 %vm405_vm1, %v27494_v2  ;;  %v27736_v2 = vld [vmem:[#allocation2 + $0x190] sm:$0xff] }
 0x4ed   : > { %22157 = vmatmul.mubr.msk.f32.gmra.mrb[18].mxu0 %vm405_vm1, %v27718_v17 }
 0x4ee   : > { %22159 = vmatprep.mubr.msk.f32.mxu0 %vm405_vm1, %v27499_v15  ;;  %v27742_v15 = vld [vmem:[#allocation2 + $0x1b0] sm:$0xff] }
 0x4f1   : > { %22160 = vmatmul.mubr.msk.f32.gmra.mrb[20].mxu0 %vm405_vm1, %v27724_v46 }
 0x4f2   : > { %22162 = vmatprep.mubr.msk.f32.mxu0 %vm405_vm1, %v27504_v34  ;;  %v27748_v34 = vld [vmem:[#allocation2 + $0x1d0] sm:$0xff] }
 0x4f5   : > { %22163 = vmatmul.mubr.msk.f32.gmra.mrb[22].mxu0 %vm405_vm1, %v27730_v53 }
 0x4f6   : > { %22165 = vmatprep.mubr.msk.f32.mxu0 %vm405_vm1, %v27509_v13  ;;  %v27754_v13 = vld [vmem:[#allocation2 + $0x1f0] sm:$0xff] }
 0x4f9   : > { %22166 = vmatmul.mubr.msk.f32.gmra.mrb[24].mxu0 %vm405_vm1, %v27736_v2 }
 0x4fa   : > { %22168 = vmatprep.mubr.msk.f32.mxu0 %vm405_vm1, %v27514_v26  ;;  %v24656_v26 = vld [vmem:[#allocation2 + $0x108] sm:$0xff] }
 0x4fd   : > { %22169 = vmatmul.mubr.msk.f32.gmra.mrb[26].mxu0 %vm405_vm1, %v27742_v15 }
 0x4fe   : > { %22171 = vmatprep.mubr.msk.f32.mxu0 %vm405_vm1, %v27519_v60  ;;  %v27762_v60 = vld [vmem:[%s29357_s2 + $0x74] sm:$0xf] }
 0x501   : > { %22172 = vmatmul.mubr.msk.f32.gmra.mrb[28].mxu0 %vm405_vm1, %v27748_v34 }
 0x502   : > { %22174 = vmatprep.mubr.msk.f32.mxu0 %vm405_vm1, %v27524_v9  ;;  %v24659_v9 = vld [vmem:[#allocation2 + $0x130] sm:$0xff] }
 0x505   : > { %22175 = vmatmul.mubr.msk.f32.gmra.mrb[30].mxu0 %vm405_vm1, %v27754_v13 }
 0x506   : > { %22179 = vmatprep.mubr.msk.f32.mxu0 %vm405_vm1, %v24656_v26  ;;  %v24666_v26 = vld [vmem:[#allocation2 + $0x1a8] sm:$0xff] }
 0x509   : > { %22180 = vmatmul.mubr.msk.f32.vlgmr.msra.gmra.mrb[0].mxu0 %vm405_vm1, %v24657_v25  ;;  %v24667_v25 = vld [vmem:[#allocation2 + $0x1b0] sm:$0xff] }
 0x50a   : > { %22228 = vmatpush3.msk.msra.mxu0 %vm752_vm0, %v18502_v28  ;;  %22182 = vmatprep.mubr.msk.f32.mxu0 %vm405_vm1, %v24658_v58  ;;  %v24665_v28 = vld [vmem:[#allocation2 + $0x190] sm:$0xff]  ;;  %v24668_v58 = vld [vmem:[#allocation2 + $0x1c8] sm:$0xff] }
 0x50b   : > { %22277 = vmatprep.subr.msk.mxu0 %vm752_vm0, %v27762_v60 }
 0x50d   : > { %22183 = vmatmul.mubr.msk.f32.gmra.mrb[2].mxu0 %vm405_vm1, %v24659_v9  ;;  %v24669_v9 = vld [vmem:[#allocation2 + $0x1d0] sm:$0xff] }
 0x50e   : > { %22185 = vmatprep.mubr.msk.f32.mxu0 %vm405_vm1, %v24660_v12  ;;  %v24670_v12 = vld [vmem:[#allocation2 + $0x1e8] sm:$0xff] }
 0x511   : > { %22186 = vmatmul.mubr.msk.f32.gmra.mrb[4].mxu0 %vm405_vm1, %v24661_v37  ;;  %v24671_v37 = vld [vmem:[#allocation2 + $0x1f0] sm:$0xff] }
 0x512   : > { %22188 = vmatprep.mubr.msk.f32.mxu0 %vm405_vm1, %v24662_v10  ;;  %v24672_v10 = vld [vmem:[#allocation2 + $0x208] sm:$0xff] }
 0x515   : > { %22189 = vmatmul.mubr.msk.f32.gmra.mrb[6].mxu0 %vm405_vm1, %v24663_v49  ;;  %v24673_v49 = vld [vmem:[#allocation2 + $0x210] sm:$0xff] }
 0x516   : > { %22191 = vmatprep.mubr.msk.f32.mxu0 %vm405_vm1, %v24664_v20  ;;  %v24674_v20 = vld [vmem:[#allocation2 + $0x228] sm:$0xff] }
 0x519   : > { %22192 = vmatmul.mubr.msk.f32.gmra.mrb[8].mxu0 %vm405_vm1, %v24665_v28  ;;  %v24675_v28 = vld [vmem:[#allocation2 + $0x230] sm:$0xff] }
 0x51a   : > { %22194 = vmatprep.mubr.msk.f32.mxu0 %vm405_vm1, %v24666_v26  ;;  %v24676_v26 = vld [vmem:[#allocation2 + $0x248] sm:$0xff] }
 0x51d   : > { %22195 = vmatmul.mubr.msk.f32.gmra.mrb[10].mxu0 %vm405_vm1, %v24667_v25  ;;  %v24677_v25 = vld [vmem:[#allocation2 + $0x250] sm:$0xff] }
 0x51e   : > { %22197 = vmatprep.mubr.msk.f32.mxu0 %vm405_vm1, %v24668_v58  ;;  %v24678_v58 = vld [vmem:[#allocation2 + $0x268] sm:$0xff] }
 0x521   : > { %22198 = vmatmul.mubr.msk.f32.gmra.mrb[12].mxu0 %vm405_vm1, %v24669_v9  ;;  %v24679_v9 = vld [vmem:[#allocation2 + $0x270] sm:$0xff] }
 0x522   : > { %22200 = vmatprep.mubr.msk.f32.mxu0 %vm405_vm1, %v24670_v12  ;;  %v24680_v12 = vld [vmem:[#allocation2 + $0x288] sm:$0xff] }
 0x525   : > { %22201 = vmatmul.mubr.msk.f32.gmra.mrb[14].mxu0 %vm405_vm1, %v24671_v37  ;;  %v24681_v37 = vld [vmem:[#allocation2 + $0x290] sm:$0xff] }
 0x526   : > { %22203 = vmatprep.mubr.msk.f32.mxu0 %vm405_vm1, %v24672_v10  ;;  %v24682_v10 = vld [vmem:[#allocation2 + $0x2a8] sm:$0xff] }
 0x529   : > { %22204 = vmatmul.mubr.msk.f32.gmra.mrb[16].mxu0 %vm405_vm1, %v24673_v49  ;;  %v24683_v49 = vld [vmem:[#allocation2 + $0x2b0] sm:$0xff] }
 0x52a   : > { %22206 = vmatprep.mubr.msk.f32.mxu0 %vm405_vm1, %v24674_v20  ;;  %v24684_v20 = vld [vmem:[#allocation2 + $0x2c8] sm:$0xff] }
 0x52d   : > { %22207 = vmatmul.mubr.msk.f32.gmra.mrb[18].mxu0 %vm405_vm1, %v24675_v28  ;;  %v24685_v28 = vld [vmem:[#allocation2 + $0x2d0] sm:$0xff] }
 0x52e   : > { %22209 = vmatprep.mubr.msk.f32.mxu0 %vm405_vm1, %v24676_v26  ;;  %v24686_v26 = vld [vmem:[#allocation2 + $0x2e8] sm:$0xff] }
 0x531   : > { %22210 = vmatmul.mubr.msk.f32.gmra.mrb[20].mxu0 %vm405_vm1, %v24677_v25  ;;  %v24687_v25 = vld [vmem:[#allocation2 + $0x2f0] sm:$0xff] }
 0x532   : > { %22212 = vmatprep.mubr.msk.f32.mxu0 %vm405_vm1, %v24678_v58  ;;  %v27800_v58 = vld [vmem:[#allocation2 + $0x210] sm:$0xff] }
 0x535   : > { %22213 = vmatmul.mubr.msk.f32.gmra.mrb[22].mxu0 %vm405_vm1, %v24679_v9  ;;  %v18570_v9 = vld [vmem:[%s29357_s2 + $0x80] sm:$0xf] }
 0x536   : > { %22215 = vmatprep.mubr.msk.f32.mxu0 %vm405_vm1, %v24680_v12  ;;  %v27811_v12 = vld [vmem:[#allocation2 + $0x230] sm:$0xff] }
 0x539   : > { %22216 = vmatmul.mubr.msk.f32.gmra.mrb[24].mxu0 %vm405_vm1, %v24681_v37  ;;  %v11423_v37 = vld [vmem:[#allocation2 + $0x2e8] sm:$0xff] }
 0x53a   : > { %22218 = vmatprep.mubr.msk.f32.mxu0 %vm405_vm1, %v24682_v10  ;;  %v11425_v10 = vld [vmem:[#allocation2 + $0x308] sm:$0xff] }
 0x53d   : > { %22219 = vmatmul.mubr.msk.f32.gmra.mrb[26].mxu0 %vm405_vm1, %v24683_v49  ;;  %v11427_v49 = vld [vmem:[#allocation2 + $0x328] sm:$0xff] }
 0x53e   : > { %22221 = vmatprep.mubr.msk.f32.mxu0 %vm405_vm1, %v24684_v20  ;;  %v11429_v20 = vld [vmem:[#allocation2 + $0x348] sm:$0xff] }
 0x541   : > { %22222 = vmatmul.mubr.msk.f32.gmra.mrb[28].mxu0 %vm405_vm1, %v24685_v28  ;;  %v27862_v28 = vld [vmem:[#allocation2 + $0x350] sm:$0xff] }
 0x542   : > { %22224 = vmatprep.mubr.msk.f32.mxu0 %vm405_vm1, %v24686_v26  ;;  %v11431_v26 = vld [vmem:[#allocation2 + $0x368] sm:$0xff] }
 0x545   : > { %22225 = vmatmul.mubr.msk.f32.gmra.mrb[30].mxu0 %vm405_vm1, %v24687_v25  ;;  %v27867_v25 = vld [vmem:[#allocation2 + $0x370] sm:$0xff] }
 0x546   : > { %22229 = vmatprep.mubr.msk.f32.mxu0 %vm405_vm1, %v27559_v32  ;;  %v27818_v32 = vld [vmem:[#allocation2 + $0x250] sm:$0xff] }
 0x549   : > { %22230 = vmatmul.mubr.msk.f32.vlgmr.msra.gmra.mrb[0].mxu0 %vm405_vm1, %v27800_v58 }
 0x54a   : > { %22278 = vmatpush3.msk.msra.mxu0 %vm752_vm0, %v27762_v60  ;;  %22232 = vmatprep.mubr.msk.f32.mxu0 %vm405_vm1, %v27564_v55  ;;  %v27824_v60 = vld [vmem:[#allocation2 + $0x270] sm:$0xff] }
 0x54b   : > { %22327 = vmatprep.subr.msk.mxu0 %vm752_vm0, %v18570_v9  ;;  %v27830_v55 = vld [vmem:[#allocation2 + $0x290] sm:$0xff] }
 0x54d   : > { %22233 = vmatmul.mubr.msk.f32.gmra.mrb[2].mxu0 %vm405_vm1, %v27811_v12 }
 0x54e   : > { %22235 = vmatprep.mubr.msk.f32.mxu0 %vm405_vm1, %v27569_v3  ;;  %v27836_v3 = vld [vmem:[#allocation2 + $0x2b0] sm:$0xff] }
 0x551   : > { %22236 = vmatmul.mubr.msk.f32.gmra.mrb[4].mxu0 %vm405_vm1, %v27818_v32 }
 0x552   : > { %22238 = vmatprep.mubr.msk.f32.mxu0 %vm405_vm1, %v27574_v39  ;;  %v27842_v39 = vld [vmem:[#allocation2 + $0x2d0] sm:$0xff] }
 0x555   : > { %22239 = vmatmul.mubr.msk.f32.gmra.mrb[6].mxu0 %vm405_vm1, %v27824_v60 }
 0x556   : > { %22241 = vmatprep.mubr.msk.f32.mxu0 %vm405_vm1, %v27579_v36  ;;  %v27847_v36 = vld [vmem:[#allocation2 + $0x2f0] sm:$0xff] }
 0x559   : > { %22242 = vmatmul.mubr.msk.f32.gmra.mrb[8].mxu0 %vm405_vm1, %v27830_v55 }
 0x55a   : > { %22244 = vmatprep.mubr.msk.f32.mxu0 %vm405_vm1, %v27584_v57  ;;  %v27852_v57 = vld [vmem:[#allocation2 + $0x310] sm:$0xff] }
 0x55d   : > { %22245 = vmatmul.mubr.msk.f32.gmra.mrb[10].mxu0 %vm405_vm1, %v27836_v3 }
 0x55e   : > { %22247 = vmatprep.mubr.msk.f32.mxu0 %vm405_vm1, %v27589_v52  ;;  %v27857_v52 = vld [vmem:[#allocation2 + $0x330] sm:$0xff] }
 0x561   : > { %22248 = vmatmul.mubr.msk.f32.gmra.mrb[12].mxu0 %vm405_vm1, %v27842_v39 }
 0x562   : > { %22250 = vmatprep.mubr.msk.f32.mxu0 %vm405_vm1, %v11423_v37  ;;  %v27873_v37 = vld [vmem:[#allocation2 + $0x390] sm:$0xff] }
 0x565   : > { %22251 = vmatmul.mubr.msk.f32.gmra.mrb[14].mxu0 %vm405_vm1, %v27847_v36 }
 0x566   : > { %22253 = vmatprep.mubr.msk.f32.mxu0 %vm405_vm1, %v11425_v10  ;;  %v27879_v10 = vld [vmem:[#allocation2 + $0x3b0] sm:$0xff] }
 0x569   : > { %22254 = vmatmul.mubr.msk.f32.gmra.mrb[16].mxu0 %vm405_vm1, %v27852_v57 }
 0x56a   : > { %22256 = vmatprep.mubr.msk.f32.mxu0 %vm405_vm1, %v11427_v49  ;;  %v27885_v49 = vld [vmem:[#allocation2 + $0x3d0] sm:$0xff] }
 0x56d   : > { %22257 = vmatmul.mubr.msk.f32.gmra.mrb[18].mxu0 %vm405_vm1, %v27857_v52 }
 0x56e   : > { %22259 = vmatprep.mubr.msk.f32.mxu0 %vm405_vm1, %v11429_v20  ;;  %v11806_v20 = vld [vmem:[#allocation2 + $0x78] sm:$0xff] }
 0x571   : > { %22260 = vmatmul.mubr.msk.f32.gmra.mrb[20].mxu0 %vm405_vm1, %v27862_v28 }
 0x572   : > { %22262 = vmatprep.mubr.msk.f32.mxu0 %vm405_vm1, %v11431_v26  ;;  %v27953_v26 = vld [vmem:[#allocation2 + $0x198] sm:$0xff] }
 0x575   : > { %22263 = vmatmul.mubr.msk.f32.gmra.mrb[22].mxu0 %vm405_vm1, %v27867_v25 }
 0x576   : > { %22265 = vmatprep.mubr.msk.f32.mxu0 %vm405_vm1, %v27638_v62  ;;  %v27891_v62 = vld [vmem:[#allocation2 + $0x3f0] sm:$0xff] }
 0x579   : > { %22266 = vmatmul.mubr.msk.f32.gmra.mrb[24].mxu0 %vm405_vm1, %v27873_v37 }
 0x57a   : > { %22268 = vmatprep.mubr.msk.f32.mxu0 %vm405_vm1, %v27643_v41  ;;  %v11800_v41 = vld [vmem:[#allocation2 + $0x18] sm:$0xff] }
 0x57d   : > { %22269 = vmatmul.mubr.msk.f32.gmra.mrb[26].mxu0 %vm405_vm1, %v27879_v10 }
 0x57e   : > { %22271 = vmatprep.mubr.msk.f32.mxu0 %vm405_vm1, %v27648_v44  ;;  %v27900_v44 = vld [vmem:[%s29357_s2 + $0x8c] sm:$0xf] }
 0x581   : > { %22272 = vmatmul.mubr.msk.f32.gmra.mrb[28].mxu0 %vm405_vm1, %v27885_v49 }
 0x582   : > { %22274 = vmatprep.mubr.msk.f32.mxu0 %vm405_vm1, %v27653_v6  ;;  %v11802_v6 = vld [vmem:[#allocation2 + $0x38] sm:$0xff] }
 0x585   : > { %22275 = vmatmul.mubr.msk.f32.gmra.mrb[30].mxu0 %vm405_vm1, %v27891_v62 }
 0x586   : > { %22279 = vmatprep.mubr.msk.f32.mxu0 %vm405_vm1, %v27659_v40  ;;  %v11804_v40 = vld [vmem:[#allocation2 + $0x58] sm:$0xff] }
 0x589   : > { %22280 = vmatmul.mubr.msk.f32.vlgmr.msra.gmra.mrb[0].mxu0 %vm405_vm1, %v11800_v41  ;;  %v27959_v41 = vld [vmem:[#allocation2 + $0x1b8] sm:$0xff] }
 0x58a   : > { %22328 = vmatpush3.msk.msra.mxu0 %vm752_vm0, %v18570_v9  ;;  %22282 = vmatprep.mubr.msk.f32.mxu0 %vm405_vm1, %v27669_v47  ;;  %v11808_v47 = vld [vmem:[#allocation2 + $0x98] sm:$0xff] }
 0x58b   : > { %22377 = vmatprep.subr.msk.mxu0 %vm752_vm0, %v27900_v44  ;;  %v11810_v9 = vld [vmem:[#allocation2 + $0xb8] sm:$0xff] }
 0x58d   : > { %22283 = vmatmul.mubr.msk.f32.gmra.mrb[2].mxu0 %vm405_vm1, %v11802_v6  ;;  %v27965_v6 = vld [vmem:[#allocation2 + $0x1d8] sm:$0xff] }
 0x58e   : > { %22285 = vmatprep.mubr.msk.f32.mxu0 %vm405_vm1, %v27676_v0  ;;  %v11812_v0 = vld [vmem:[#allocation2 + $0xd8] sm:$0xff] }
 0x591   : > { %22286 = vmatmul.mubr.msk.f32.gmra.mrb[4].mxu0 %vm405_vm1, %v11804_v40  ;;  %v11830_v40 = vld [vmem:[#allocation2 + $0x1f8] sm:$0xff] }
 0x592   : > { %22288 = vmatprep.mubr.msk.f32.mxu0 %vm405_vm1, %v27682_v38  ;;  %v11814_v38 = vld [vmem:[#allocation2 + $0xf8] sm:$0xff] }
 0x595   : > { %22289 = vmatmul.mubr.msk.f32.gmra.mrb[6].mxu0 %vm405_vm1, %v11806_v20  ;;  %v13147_v20 = vld [vmem:[%s29360_s5] sm:$0xff] }
 0x596   : > { %22291 = vmatprep.mubr.msk.f32.mxu0 %vm405_vm1, %v27688_v4  ;;  %v27929_v4 = vld [vmem:[#allocation2 + $0x118] sm:$0xff]  ;;  %22427 = vmatprep.subr.mxu1 %v13147_v20 }
 0x597   : > { %22428 = vmatpush3.msra.mxu1 %v13147_v20 }
 0x599   : > { %22292 = vmatmul.mubr.msk.f32.gmra.mrb[8].mxu0 %vm405_vm1, %v11808_v47  ;;  %v29429_v47 = vmov 0.0  }
 0x59a   : > { %22294 = vmatprep.mubr.msk.f32.mxu0 %vm405_vm1, %v27694_v43  ;;  %v27935_v43 = vld [vmem:[#allocation2 + $0x138] sm:$0xff]  ;;  %505 = vst.msk [vmem:[#allocation3] sm:$0xff] %vm504_vm2, %v29429_v47  ;;  %506 = vst.msk [vmem:[#allocation3 + $0x8] sm:$0xff] %vm504_vm2, %v29429_v47 }
 0x59b   : > { %507 = vst.msk [vmem:[#allocation3 + $0x10] sm:$0xff] %vm504_vm2, %v29429_v47  ;;  %508 = vst.msk [vmem:[#allocation3 + $0x18] sm:$0xff] %vm504_vm2, %v29429_v47 }
 0x59c   : > { %510 = vst.msk [vmem:[#allocation3 + $0x220] sm:$0xff] %vm504_vm2, %v29429_v47  ;;  %511 = vst.msk [vmem:[#allocation3 + $0x228] sm:$0xff] %vm504_vm2, %v29429_v47 }
 0x59d   : > { %22295 = vmatmul.mubr.msk.f32.gmra.mrb[10].mxu0 %vm405_vm1, %v11810_v9  ;;  %512 = vst.msk [vmem:[#allocation3 + $0x230] sm:$0xff] %vm504_vm2, %v29429_v47  ;;  %513 = vst.msk [vmem:[#allocation3 + $0x238] sm:$0xff] %vm504_vm2, %v29429_v47 }
 0x59e   : > { %22297 = vmatprep.mubr.msk.f32.mxu0 %vm405_vm1, %v27700_v1  ;;  %v27941_v1 = vld [vmem:[#allocation2 + $0x158] sm:$0xff]  ;;  %515 = vst.msk [vmem:[#allocation3 + $0x20] sm:$0xff] %vm504_vm2, %v29429_v47  ;;  %516 = vst.msk [vmem:[#allocation3 + $0x40] sm:$0xff] %vm504_vm2, %v29429_v47 }
 0x59f   : > { %517 = vst.msk [vmem:[#allocation3 + $0x60] sm:$0xff] %vm504_vm2, %v29429_v47  ;;  %518 = vst.msk [vmem:[#allocation3 + $0x80] sm:$0xff] %vm504_vm2, %v29429_v47 }
 0x5a0   : > { %519 = vst.msk [vmem:[#allocation3 + $0xa0] sm:$0xff] %vm504_vm2, %v29429_v47  ;;  %520 = vst.msk [vmem:[#allocation3 + $0xc0] sm:$0xff] %vm504_vm2, %v29429_v47 }
 0x5a1   : > { %22298 = vmatmul.mubr.msk.f32.gmra.mrb[12].mxu0 %vm405_vm1, %v11812_v0  ;;  %521 = vst.msk [vmem:[#allocation3 + $0xe0] sm:$0xff] %vm504_vm2, %v29429_v47  ;;  %522 = vst.msk [vmem:[#allocation3 + $0x100] sm:$0xff] %vm504_vm2, %v29429_v47 }
 0x5a2   : > { %22300 = vmatprep.mubr.msk.f32.mxu0 %vm405_vm1, %v27706_v59  ;;  %v27947_v59 = vld [vmem:[#allocation2 + $0x178] sm:$0xff]  ;;  %523 = vst.msk [vmem:[#allocation3 + $0x120] sm:$0xff] %vm504_vm2, %v29429_v47  ;;  %524 = vst.msk [vmem:[#allocation3 + $0x140] sm:$0xff] %vm504_vm2, %v29429_v47 }
 0x5a3   : > { %525 = vst.msk [vmem:[#allocation3 + $0x160] sm:$0xff] %vm504_vm2, %v29429_v47  ;;  %526 = vst.msk [vmem:[#allocation3 + $0x180] sm:$0xff] %vm504_vm2, %v29429_v47 }
 0x5a4   : > { %527 = vst.msk [vmem:[#allocation3 + $0x1a0] sm:$0xff] %vm504_vm2, %v29429_v47  ;;  %528 = vst.msk [vmem:[#allocation3 + $0x1c0] sm:$0xff] %vm504_vm2, %v29429_v47 }
 0x5a5   : > { %22301 = vmatmul.mubr.msk.f32.gmra.mrb[14].mxu0 %vm405_vm1, %v11814_v38  ;;  %529 = vst.msk [vmem:[#allocation3 + $0x1e0] sm:$0xff] %vm504_vm2, %v29429_v47  ;;  %530 = vst.msk [vmem:[#allocation3 + $0x200] sm:$0xff] %vm504_vm2, %v29429_v47 }
 0x5a6   : > { %22303 = vmatprep.mubr.msk.f32.mxu0 %vm405_vm1, %v27712_v5  ;;  %531 = vst.msk [vmem:[#allocation3 + $0x38] sm:$0xff] %vm504_vm2, %v29429_v47  ;;  %532 = vst.msk [vmem:[#allocation3 + $0x58] sm:$0xff] %vm504_vm2, %v29429_v47 }
 0x5a7   : > { %533 = vst.msk [vmem:[#allocation3 + $0x78] sm:$0xff] %vm504_vm2, %v29429_v47  ;;  %534 = vst.msk [vmem:[#allocation3 + $0x98] sm:$0xff] %vm504_vm2, %v29429_v47 }
 0x5a8   : > { %535 = vst.msk [vmem:[#allocation3 + $0xb8] sm:$0xff] %vm504_vm2, %v29429_v47  ;;  %536 = vst.msk [vmem:[#allocation3 + $0xd8] sm:$0xff] %vm504_vm2, %v29429_v47 }
 0x5a9   : > { %22304 = vmatmul.mubr.msk.f32.gmra.mrb[16].mxu0 %vm405_vm1, %v27929_v4  ;;  %537 = vst.msk [vmem:[#allocation3 + $0xf8] sm:$0xff] %vm504_vm2, %v29429_v47  ;;  %538 = vst.msk [vmem:[#allocation3 + $0x118] sm:$0xff] %vm504_vm2, %v29429_v47 }
 0x5aa   : > { %22306 = vmatprep.mubr.msk.f32.mxu0 %vm405_vm1, %v27718_v17  ;;  %539 = vst.msk [vmem:[#allocation3 + $0x138] sm:$0xff] %vm504_vm2, %v29429_v47  ;;  %540 = vst.msk [vmem:[#allocation3 + $0x158] sm:$0xff] %vm504_vm2, %v29429_v47 }
 0x5ab   : > { %541 = vst.msk [vmem:[#allocation3 + $0x178] sm:$0xff] %vm504_vm2, %v29429_v47  ;;  %542 = vst.msk [vmem:[#allocation3 + $0x198] sm:$0xff] %vm504_vm2, %v29429_v47 }
 0x5ac   : > { %543 = vst.msk [vmem:[#allocation3 + $0x1b8] sm:$0xff] %vm504_vm2, %v29429_v47  ;;  %544 = vst.msk [vmem:[#allocation3 + $0x1d8] sm:$0xff] %vm504_vm2, %v29429_v47 }
 0x5ad   : > { %22307 = vmatmul.mubr.msk.f32.gmra.mrb[18].mxu0 %vm405_vm1, %v27935_v43  ;;  %545 = vst.msk [vmem:[#allocation3 + $0x1f8] sm:$0xff] %vm504_vm2, %v29429_v47  ;;  %546 = vst.msk [vmem:[#allocation3 + $0x218] sm:$0xff] %vm504_vm2, %v29429_v47 }
 0x5ae   : > { %22309 = vmatprep.mubr.msk.f32.mxu0 %vm405_vm1, %v27724_v46 }
 0x5b1   : > { %22310 = vmatmul.mubr.msk.f32.gmra.mrb[20].mxu0 %vm405_vm1, %v27941_v1 }
 0x5b2   : > { %22312 = vmatprep.mubr.msk.f32.mxu0 %vm405_vm1, %v27730_v53 }
 0x5b5   : > { %22313 = vmatmul.mubr.msk.f32.gmra.mrb[22].mxu0 %vm405_vm1, %v27947_v59 }
 0x5b6   : > { %22315 = vmatprep.mubr.msk.f32.mxu0 %vm405_vm1, %v27736_v2 }
 0x5b9   : > { %22316 = vmatmul.mubr.msk.f32.gmra.mrb[24].mxu0 %vm405_vm1, %v27953_v26 }
 0x5ba   : > { %22318 = vmatprep.mubr.msk.f32.mxu0 %vm405_vm1, %v27742_v15 }
 0x5bd   : > { %22319 = vmatmul.mubr.msk.f32.gmra.mrb[26].mxu0 %vm405_vm1, %v27959_v41 }
 0x5be   : > { %22321 = vmatprep.mubr.msk.f32.mxu0 %vm405_vm1, %v27748_v34 }
 0x5c1   : > { %22322 = vmatmul.mubr.msk.f32.gmra.mrb[28].mxu0 %vm405_vm1, %v27965_v6 }
 0x5c2   : > { %22324 = vmatprep.mubr.msk.f32.mxu0 %vm405_vm1, %v27754_v13 }
 0x5c5   : > { %22325 = vmatmul.mubr.msk.f32.gmra.mrb[30].mxu0 %vm405_vm1, %v11830_v40 }
 0x5c6   : > { %22329 = vmatprep.mubr.msk.f32.mxu0 %vm405_vm1, %v27712_v5  ;;  %v12206_v5 = vld [vmem:[#allocation2 + $0x218] sm:$0xff] }
 0x5c9   : > { %22330 = vmatmul.mubr.msk.f32.vlgmr.msra.gmra.mrb[0].mxu0 %vm405_vm1, %v27929_v4 }
 0x5ca   : > { %22378 = vmatpush3.msk.msra.mxu0 %vm752_vm0, %v27900_v44  ;;  %22332 = vmatprep.mubr.msk.f32.mxu0 %vm405_vm1, %v27718_v17  ;;  %v12208_v17 = vld [vmem:[#allocation2 + $0x238] sm:$0xff]  ;;  %v28183_v44 = vld [vmem:[%s29359_s4] ss:$0 sm:$0xff] }
 0x5cd   : > { %22333 = vmatmul.mubr.msk.f32.gmra.mrb[2].mxu0 %vm405_vm1, %v27935_v43 }
 0x5ce   : > { %22335 = vmatprep.mubr.msk.f32.mxu0 %vm405_vm1, %v27724_v46  ;;  %v12210_v46 = vld [vmem:[#allocation2 + $0x258] sm:$0xff] }
 0x5d1   : > { %22336 = vmatmul.mubr.msk.f32.gmra.mrb[4].mxu0 %vm405_vm1, %v27941_v1 }
 0x5d2   : > { %22338 = vmatprep.mubr.msk.f32.mxu0 %vm405_vm1, %v27730_v53  ;;  %v12212_v53 = vld [vmem:[#allocation2 + $0x278] sm:$0xff] }
 0x5d5   : > { %22339 = vmatmul.mubr.msk.f32.gmra.mrb[6].mxu0 %vm405_vm1, %v27947_v59 }
 0x5d6   : > { %22341 = vmatprep.mubr.msk.f32.mxu0 %vm405_vm1, %v27736_v2  ;;  %v12214_v2 = vld [vmem:[#allocation2 + $0x298] sm:$0xff] }
 0x5d9   : > { %22342 = vmatmul.mubr.msk.f32.gmra.mrb[8].mxu0 %vm405_vm1, %v27953_v26 }
 0x5da   : > { %22344 = vmatprep.mubr.msk.f32.mxu0 %vm405_vm1, %v27742_v15  ;;  %v12216_v15 = vld [vmem:[#allocation2 + $0x2b8] sm:$0xff] }
 0x5dd   : > { %22345 = vmatmul.mubr.msk.f32.gmra.mrb[10].mxu0 %vm405_vm1, %v27959_v41 }
 0x5de   : > { %22347 = vmatprep.mubr.msk.f32.mxu0 %vm405_vm1, %v27748_v34  ;;  %v12218_v34 = vld [vmem:[#allocation2 + $0x2d8] sm:$0xff] }
 0x5e1   : > { %22348 = vmatmul.mubr.msk.f32.gmra.mrb[12].mxu0 %vm405_vm1, %v27965_v6 }
 0x5e2   : > { %22350 = vmatprep.mubr.msk.f32.mxu0 %vm405_vm1, %v27754_v13  ;;  %v12220_v13 = vld [vmem:[#allocation2 + $0x2f8] sm:$0xff] }
 0x5e5   : > { %22351 = vmatmul.mubr.msk.f32.gmra.mrb[14].mxu0 %vm405_vm1, %v11830_v40 }
 0x5e6   : > { %22353 = vmatprep.mubr.msk.f32.mxu0 %vm405_vm1, %v27800_v58 }
 0x5e9   : > { %22354 = vmatmul.mubr.msk.f32.gmra.mrb[16].mxu0 %vm405_vm1, %v12206_v5 }
 0x5ea   : > { %22356 = vmatprep.mubr.msk.f32.mxu0 %vm405_vm1, %v27811_v12 }
 0x5ed   : > { %22357 = vmatmul.mubr.msk.f32.gmra.mrb[18].mxu0 %vm405_vm1, %v12208_v17 }
 0x5ee   : > { %22359 = vmatprep.mubr.msk.f32.mxu0 %vm405_vm1, %v27818_v32 }
 0x5f1   : > { %22360 = vmatmul.mubr.msk.f32.gmra.mrb[20].mxu0 %vm405_vm1, %v12210_v46 }
 0x5f2   : > { %22362 = vmatprep.mubr.msk.f32.mxu0 %vm405_vm1, %v27824_v60 }
 0x5f5   : > { %22363 = vmatmul.mubr.msk.f32.gmra.mrb[22].mxu0 %vm405_vm1, %v12212_v53 }
 0x5f6   : > { %22365 = vmatprep.mubr.msk.f32.mxu0 %vm405_vm1, %v27830_v55 }
 0x5f9   : > { %22366 = vmatmul.mubr.msk.f32.gmra.mrb[24].mxu0 %vm405_vm1, %v12214_v2 }
 0x5fa   : > { %22368 = vmatprep.mubr.msk.f32.mxu0 %vm405_vm1, %v27836_v3 }
 0x5fd   : > { %22369 = vmatmul.mubr.msk.f32.gmra.mrb[26].mxu0 %vm405_vm1, %v12216_v15 }
 0x5fe   : > { %22371 = vmatprep.mubr.msk.f32.mxu0 %vm405_vm1, %v27842_v39 }
 0x601   : > { %22372 = vmatmul.mubr.msk.f32.gmra.mrb[28].mxu0 %vm405_vm1, %v12218_v34 }
 0x602   : > { %22374 = vmatprep.mubr.msk.f32.mxu0 %vm405_vm1, %v27847_v36 }
 0x605   : > { %22375 = vmatmul.mubr.msk.f32.gmra.mrb[30].mxu0 %vm405_vm1, %v12220_v13 }
 0x606   : > { %22379 = vmatprep.mubr.msk.f32.mxu0 %vm405_vm1, %v27800_v58  ;;  %v12596_v58 = vld [vmem:[#allocation2 + $0x318] sm:$0xff] }
 0x609   : > { %22380 = vmatmul.mubr.msk.f32.vlgmr.msra.gmra.mrb[0].mxu0 %vm405_vm1, %v12206_v5 }
 0x60a   : > { %22382 = vmatprep.mubr.msk.f32.mxu0 %vm405_vm1, %v27811_v12  ;;  %v12598_v12 = vld [vmem:[#allocation2 + $0x338] sm:$0xff] }
 0x60d   : > { %22383 = vmatmul.mubr.msk.f32.gmra.mrb[2].mxu0 %vm405_vm1, %v12208_v17 }
 0x60e   : > { %22385 = vmatprep.mubr.msk.f32.mxu0 %vm405_vm1, %v27818_v32  ;;  %v12600_v32 = vld [vmem:[#allocation2 + $0x358] sm:$0xff] }
 0x611   : > { %22386 = vmatmul.mubr.msk.f32.gmra.mrb[4].mxu0 %vm405_vm1, %v12210_v46 }
 0x612   : > { %22388 = vmatprep.mubr.msk.f32.mxu0 %vm405_vm1, %v27824_v60  ;;  %v12602_v60 = vld [vmem:[#allocation2 + $0x378] sm:$0xff] }
 0x615   : > { %22389 = vmatmul.mubr.msk.f32.gmra.mrb[6].mxu0 %vm405_vm1, %v12212_v53 }
 0x616   : > { %22391 = vmatprep.mubr.msk.f32.mxu0 %vm405_vm1, %v27830_v55  ;;  %v12604_v55 = vld [vmem:[#allocation2 + $0x398] sm:$0xff] }
 0x619   : > { %22392 = vmatmul.mubr.msk.f32.gmra.mrb[8].mxu0 %vm405_vm1, %v12214_v2 }
 0x61a   : > { %22394 = vmatprep.mubr.msk.f32.mxu0 %vm405_vm1, %v27836_v3  ;;  %v12606_v3 = vld [vmem:[#allocation2 + $0x3b8] sm:$0xff] }
 0x61d   : > { %22395 = vmatmul.mubr.msk.f32.gmra.mrb[10].mxu0 %vm405_vm1, %v12216_v15 }
 0x61e   : > { %22397 = vmatprep.mubr.msk.f32.mxu0 %vm405_vm1, %v27842_v39  ;;  %v12608_v39 = vld [vmem:[#allocation2 + $0x3d8] sm:$0xff] }
 0x621   : > { %22398 = vmatmul.mubr.msk.f32.gmra.mrb[12].mxu0 %vm405_vm1, %v12218_v34 }
 0x622   : > { %22400 = vmatprep.mubr.msk.f32.mxu0 %vm405_vm1, %v27847_v36  ;;  %v12610_v36 = vld [vmem:[#allocation2 + $0x3f8] sm:$0xff] }
 0x625   : > { %22401 = vmatmul.mubr.msk.f32.gmra.mrb[14].mxu0 %vm405_vm1, %v12220_v13 }
 0x626   : > { %22403 = vmatprep.mubr.msk.f32.mxu0 %vm405_vm1, %v27852_v57  ;;  %v13111_v57 = vld [vmem:[#allocation3 + $0x7] sm:$0xff] }
 0x627   : > { %22429 = vmatprep.mubr.msk.f32.mxu1 %vm504_vm2, %v13111_v57 }
 0x629   : > { %22404 = vmatmul.mubr.msk.f32.gmra.mrb[16].mxu0 %vm405_vm1, %v12596_v58 }
 0x62a   : > { %22406 = vmatprep.mubr.msk.f32.mxu0 %vm405_vm1, %v27857_v52  ;;  %v13112_v52 = vld [vmem:[#allocation3 + $0xf] sm:$0xff] }
 0x62b   : > { %22430 = vmatmul.mubr.msk.f32.vlgmr.msra.gmra.mrb[32].mxu1 %vm504_vm2, %v13112_v52 }
 0x62d   : > { %22407 = vmatmul.mubr.msk.f32.gmra.mrb[18].mxu0 %vm405_vm1, %v12598_v12 }
 0x62e   : > { %22409 = vmatprep.mubr.msk.f32.mxu0 %vm405_vm1, %v27862_v28  ;;  %v18672_v28 = vld [vmem:[%s29360_s5 + $0x18] sm:$0xff] }
 0x62f   : > { %22477 = vmatprep.subr.mxu1 %v18672_v28 }
 0x630   : > { %22478 = vmatpush3.msra.mxu1 %v18672_v28 }
 0x631   : > { %22410 = vmatmul.mubr.msk.f32.gmra.mrb[20].mxu0 %vm405_vm1, %v12600_v32 }
 0x632   : > { %22412 = vmatprep.mubr.msk.f32.mxu0 %vm405_vm1, %v27867_v25  ;;  %v28168_v25 = vld [vmem:[%s29360_s5 + $0x30] sm:$0xff] }
 0x633   : > { %22527 = vmatprep.subr.mxu1 %v28168_v25 }
 0x635   : > { %22413 = vmatmul.mubr.msk.f32.gmra.mrb[22].mxu0 %vm405_vm1, %v12602_v60 }
 0x636   : > { %22415 = vmatprep.mubr.msk.f32.mxu0 %vm405_vm1, %v27873_v37  ;;  %v28174_v37 = vld [vmem:[%s29358_s3] ss:$0 sm:$0xff] }
 0x637   : > { %v23031_v4 = vadd.f32 %v27365_v45, %v28174_v37  ;;  %v23035_v45 = vadd.f32 %v27371_v11, %v28174_v37  ;;  %v23039_v11 = vadd.f32 %v27378_v19, %v28174_v37  ;;  %v23045_v57 = vadd.f32 %v28174_v37, %v27387_v16 }
 0x638   : > { %v23047_v16 = vadd.f32 %v27392_v30, %v28174_v37 }
 0x639   : > { %22416 = vmatmul.mubr.msk.f32.gmra.mrb[24].mxu0 %vm405_vm1, %v12604_v55 }
 0x63a   : > { %22418 = vmatprep.mubr.msk.f32.mxu0 %vm405_vm1, %v27879_v10  ;;  %v23027_v10 = vadd.f32 %v27359_v33, %v28174_v37  ;;  %v23033_v33 = vadd.f32 %v28174_v37, %v27367_v48  ;;  %v23037_v48 = vadd.f32 %v28174_v37, %v27373_v29  ;;  %v23041_v29 = vadd.f32 %v28174_v37, %v27380_v56 }
 0x63d   : > { %22419 = vmatmul.mubr.msk.f32.gmra.mrb[26].mxu0 %vm405_vm1, %v12606_v3 }
 0x63e   : > { %22421 = vmatprep.mubr.msk.f32.mxu0 %vm405_vm1, %v27885_v49  ;;  %v23029_v49 = vadd.f32 %v28174_v37, %v27361_v42 }
 0x641   : > { %22422 = vmatmul.mubr.msk.f32.gmra.mrb[28].mxu0 %vm405_vm1, %v12608_v39 }
 0x642   : > { %22424 = vmatprep.mubr.msk.f32.mxu0 %vm405_vm1, %v27891_v62 }
 0x645   : > { %22425 = vmatmul.mubr.msk.f32.gmra.mrb[30].mxu0 %vm405_vm1, %v12610_v36  ;;  %v23043_v36 = vadd.f32 %v27385_v21, %v28174_v37 }
 0x6dc   : > { %v22381_v62 = vpop.f32.mrb[0].mxu0 }
 0x6dd   : > { %v23028_v9 = vadd.f32 %v23027_v10, %v22381_v62  ;;  %v12778_v0 = vpop.f32.mrb[1].mxu0 }
 0x6de   : > { %v23030_v38 = vadd.f32 %v23029_v49, %v12778_v0 }
 0x6df   : > { %vm12977_vm3 = vcmp.gt.f32.partialorder %v23028_v9, 0.0  ;;  %v13009_v43 = vmul.f32 %v23028_v9, %v28183_v44 }
 0x6e0   : > { %vm12976_vm4 = vcmp.gt.f32.partialorder %v23030_v38, 0.0  ;;  %v13008_v42 = vmul.f32 %v23030_v38, %v28183_v44  ;;  %v22384_v1 = vpop.f32.mrb[2].mxu0 }
 0x6e1   : > { %v13041_v59 = vsel %vm12977_vm3, %v23028_v9, %v13009_v43  ;;  %v23032_v26 = vadd.f32 %v23031_v4, %v22384_v1  ;;  %v12788_v41 = vpop.f32.mrb[3].mxu0  ;;  %v23049_v43 = vadd.f32 %v28174_v37, %v27394_v18  ;;  %v23051_v18 = vadd.f32 %v27399_v22, %v28174_v37 }
 0x6e2   : > { %13073 = vst.msk [vmem:[#allocation3 + $0x30] sm:$0xff] %vm504_vm2, %v13041_v59  ;;  %v13040_v6 = vsel %vm12976_vm4, %v23030_v38, %v13008_v42  ;;  %v23034_v40 = vadd.f32 %v23033_v33, %v12788_v41 }
 0x6e3   : > { %13072 = vst.msk [vmem:[#allocation3 + $0x28] sm:$0xff] %vm504_vm2, %v13040_v6  ;;  %vm12979_vm5 = vcmp.gt.f32.partialorder %v23032_v26, 0.0  ;;  %v13011_v20 = vmul.f32 %v23032_v26, %v28183_v44 }
 0x6e4   : > { %vm12978_vm6 = vcmp.gt.f32.partialorder %v23034_v40, 0.0  ;;  %v13010_v47 = vmul.f32 %v23034_v40, %v28183_v44  ;;  %v22387_v5 = vpop.f32.mrb[4].mxu0 }
 0x6e5   : > { %v13043_v17 = vsel %vm12979_vm5, %v23032_v26, %v13011_v20  ;;  %v23036_v46 = vadd.f32 %v23035_v45, %v22387_v5  ;;  %v12798_v53 = vpop.f32.mrb[5].mxu0  ;;  %v23053_v20 = vadd.f32 %v28174_v37, %v27401_v24  ;;  %v23055_v24 = vadd.f32 %v27407_v14, %v28174_v37 }
 0x6e6   : > { %13075 = vst.msk [vmem:[#allocation3 + $0x50] sm:$0xff] %vm504_vm2, %v13043_v17  ;;  %v13042_v2 = vsel %vm12978_vm6, %v23034_v40, %v13010_v47  ;;  %v23038_v15 = vadd.f32 %v23037_v48, %v12798_v53 }
 0x6e7   : > { %13074 = vst.msk [vmem:[#allocation3 + $0x48] sm:$0xff] %vm504_vm2, %v13042_v2  ;;  %vm12981_vm7 = vcmp.gt.f32.partialorder %v23036_v46, 0.0  ;;  %v13013_v34 = vmul.f32 %v23036_v46, %v28183_v44 }
 0x6e8   : > { %vm12980_vm8 = vcmp.gt.f32.partialorder %v23038_v15, 0.0  ;;  %v13012_v13 = vmul.f32 %v23038_v15, %v28183_v44  ;;  %v22390_v58 = vpop.f32.mrb[6].mxu0 }
 0x6e9   : > { %v13045_v12 = vsel %vm12981_vm7, %v23036_v46, %v13013_v34  ;;  %v23040_v32 = vadd.f32 %v23039_v11, %v22390_v58  ;;  %v12808_v60 = vpop.f32.mrb[7].mxu0  ;;  %v23057_v34 = vadd.f32 %v28174_v37, %v27409_v51  ;;  %v23059_v51 = vadd.f32 %v27422_v8, %v28174_v37 }
 0x6ea   : > { %13077 = vst.msk [vmem:[#allocation3 + $0x70] sm:$0xff] %vm504_vm2, %v13045_v12  ;;  %v13044_v55 = vsel %vm12980_vm8, %v23038_v15, %v13012_v13  ;;  %v23042_v3 = vadd.f32 %v23041_v29, %v12808_v60  ;;  %v28208_v19 = vld [vmem:[#allocation3 + $0x27] sm:$0xff]  ;;  %v28210_v39 = vld [vmem:[#allocation3 + $0x2f] sm:$0xff] }
 0x6eb   : > { %13076 = vst.msk [vmem:[#allocation3 + $0x68] sm:$0xff] %vm504_vm2, %v13044_v55  ;;  %vm12983_vm9 = vcmp.gt.f32.partialorder %v23040_v32, 0.0  ;;  %v13015_v56 = vmul.f32 %v23040_v32, %v28183_v44  ;;  %22432 = vmatprep.mubr.msk.f32.mxu1 %vm504_vm2, %v28208_v19 }
 0x6ec   : > { %vm12982_vm10 = vcmp.gt.f32.partialorder %v23042_v3, 0.0  ;;  %v13014_v52 = vmul.f32 %v23042_v3, %v28183_v44  ;;  %v22393_v28 = vpop.f32.mrb[8].mxu0  ;;  %22433 = vmatmul.mubr.msk.f32.gmra.mrb[34].mxu1 %vm504_vm2, %v28210_v39 }
 0x6ed   : > { %v13047_v10 = vsel %vm12983_vm9, %v23040_v32, %v13015_v56  ;;  %v23044_v21 = vadd.f32 %v23043_v36, %v22393_v28  ;;  %v12818_v49 = vpop.f32.mrb[9].mxu0  ;;  %v23061_v56 = vadd.f32 %v28174_v37, %v27426_v35  ;;  %v23063_v35 = vadd.f32 %v27433_v61, %v28174_v37 }
 0x6ee   : > { %13079 = vst.msk [vmem:[#allocation3 + $0x90] sm:$0xff] %vm504_vm2, %v13047_v10  ;;  %v13046_v62 = vsel %vm12982_vm10, %v23042_v3, %v13014_v52  ;;  %v23046_v9 = vadd.f32 %v23045_v57, %v12818_v49  ;;  %v28224_v0 = vld [vmem:[#allocation3 + $0x47] sm:$0xff]  ;;  %v28226_v38 = vld [vmem:[#allocation3 + $0x4f] sm:$0xff] }
 0x6ef   : > { %13078 = vst.msk [vmem:[#allocation3 + $0x88] sm:$0xff] %vm504_vm2, %v13046_v62  ;;  %vm12985_vm11 = vcmp.gt.f32.partialorder %v23044_v21, 0.0  ;;  %v13017_v4 = vmul.f32 %v23044_v21, %v28183_v44  ;;  %22435 = vmatprep.mubr.msk.f32.mxu1 %vm504_vm2, %v28224_v0 }
 0x6f0   : > { %vm12984_vm12 = vcmp.gt.f32.partialorder %v23046_v9, 0.0  ;;  %v13016_v33 = vmul.f32 %v23046_v9, %v28183_v44  ;;  %v22396_v42 = vpop.f32.mrb[10].mxu0  ;;  %22436 = vmatmul.mubr.msk.f32.gmra.mrb[36].mxu1 %vm504_vm2, %v28226_v38 }
 0x6f1   : > { %v13049_v1 = vsel %vm12985_vm11, %v23044_v21, %v13017_v4  ;;  %v23048_v30 = vadd.f32 %v23047_v16, %v22396_v42  ;;  %v12828_v59 = vpop.f32.mrb[11].mxu0  ;;  %v23065_v4 = vadd.f32 %v28174_v37, %v27435_v63  ;;  %v23067_v63 = vadd.f32 %v27442_v50, %v28174_v37 }
 0x6f2   : > { %13081 = vst.msk [vmem:[#allocation3 + $0xb0] sm:$0xff] %vm504_vm2, %v13049_v1  ;;  %v13048_v26 = vsel %vm12984_vm12, %v23046_v9, %v13016_v33  ;;  %v23050_v41 = vadd.f32 %v23049_v43, %v12828_v59  ;;  %v28240_v6 = vld [vmem:[#allocation3 + $0x67] sm:$0xff]  ;;  %v28242_v40 = vld [vmem:[#allocation3 + $0x6f] sm:$0xff] }
 0x6f3   : > { %13080 = vst.msk [vmem:[#allocation3 + $0xa8] sm:$0xff] %vm504_vm2, %v13048_v26  ;;  %vm12987_vm13 = vcmp.gt.f32.partialorder %v23048_v30, 0.0  ;;  %v13019_v45 = vmul.f32 %v23048_v30, %v28183_v44  ;;  %22438 = vmatprep.mubr.msk.f32.mxu1 %vm504_vm2, %v28240_v6 }
 0x6f4   : > { %vm12986_vm14 = vcmp.gt.f32.partialorder %v23050_v41, 0.0  ;;  %v13018_v48 = vmul.f32 %v23050_v41, %v28183_v44  ;;  %v22399_v47 = vpop.f32.mrb[12].mxu0  ;;  %22439 = vmatmul.mubr.msk.f32.gmra.mrb[38].mxu1 %vm504_vm2, %v28242_v40 }
 0x6f5   : > { %v13051_v5 = vsel %vm12987_vm13, %v23048_v30, %v13019_v45  ;;  %v23052_v22 = vadd.f32 %v23051_v18, %v22399_v47  ;;  %v12838_v17 = vpop.f32.mrb[13].mxu0  ;;  %v23069_v45 = vadd.f32 %v28174_v37, %v27444_v54  ;;  %v23071_v54 = vadd.f32 %v27451_v31, %v28174_v37 }
 0x6f6   : > { %13083 = vst.msk [vmem:[#allocation3 + $0xd0] sm:$0xff] %vm504_vm2, %v13051_v5  ;;  %v13050_v46 = vsel %vm12986_vm14, %v23050_v41, %v13018_v48  ;;  %v23054_v53 = vadd.f32 %v23053_v20, %v12838_v17  ;;  %v28256_v2 = vld [vmem:[#allocation3 + $0x87] sm:$0xff]  ;;  %v28258_v15 = vld [vmem:[#allocation3 + $0x8f] sm:$0xff] }
 0x6f7   : > { %13082 = vst.msk [vmem:[#allocation3 + $0xc8] sm:$0xff] %vm504_vm2, %v13050_v46  ;;  %vm12989_vm15 = vcmp.gt.f32.partialorder %v23052_v22, 0.0  ;;  %v13021_v11 = vmul.f32 %v23052_v22, %v28183_v44  ;;  %22441 = vmatprep.mubr.msk.f32.mxu1 %vm504_vm2, %v28256_v2 }
 0x6f8   : > { %vm12988_vm3 = vcmp.gt.f32.partialorder %v23054_v53, 0.0  ;;  %v13020_v29 = vmul.f32 %v23054_v53, %v28183_v44  ;;  %v22402_v13 = vpop.f32.mrb[14].mxu0  ;;  %22442 = vmatmul.mubr.msk.f32.gmra.mrb[40].mxu1 %vm504_vm2, %v28258_v15 }
 0x6f9   : > { %v13053_v58 = vsel %vm12989_vm15, %v23052_v22, %v13021_v11  ;;  %v23056_v14 = vadd.f32 %v23055_v24, %v22402_v13  ;;  %v12848_v12 = vpop.f32.mrb[15].mxu0  ;;  %v23073_v11 = vadd.f32 %v28174_v37, %v27453_v7  ;;  %v23075_v7 = vadd.f32 %v27460_v27, %v28174_v37 }
 0x6fa   : > { %13085 = vst.msk [vmem:[#allocation3 + $0xf0] sm:$0xff] %vm504_vm2, %v13053_v58  ;;  %v13052_v32 = vsel %vm12988_vm3, %v23054_v53, %v13020_v29  ;;  %v23058_v60 = vadd.f32 %v23057_v34, %v12848_v12  ;;  %v28272_v55 = vld [vmem:[#allocation3 + $0xa7] sm:$0xff]  ;;  %v28274_v3 = vld [vmem:[#allocation3 + $0xaf] sm:$0xff] }
 0x6fb   : > { %13084 = vst.msk [vmem:[#allocation3 + $0xe8] sm:$0xff] %vm504_vm2, %v13052_v32  ;;  %vm12991_vm4 = vcmp.gt.f32.partialorder %v23056_v14, 0.0  ;;  %v13023_v36 = vmul.f32 %v23056_v14, %v28183_v44  ;;  %22444 = vmatprep.mubr.msk.f32.mxu1 %vm504_vm2, %v28272_v55 }
 0x6fc   : > { %vm12990_vm5 = vcmp.gt.f32.partialorder %v23058_v60, 0.0  ;;  %v13022_v57 = vmul.f32 %v23058_v60, %v28183_v44  ;;  %v22405_v52 = vpop.f32.mrb[16].mxu0  ;;  %22445 = vmatmul.mubr.msk.f32.gmra.mrb[42].mxu1 %vm504_vm2, %v28274_v3 }
 0x6fd   : > { %v13055_v28 = vsel %vm12991_vm4, %v23056_v14, %v13023_v36  ;;  %v23060_v8 = vadd.f32 %v23059_v51, %v22405_v52  ;;  %v12858_v10 = vpop.f32.mrb[17].mxu0  ;;  %v23077_v36 = vadd.f32 %v28174_v37, %v27462_v23  ;;  %v29430_v23 = vld [vmem:[#allocation9_spill] sm:$0xff] }
 0x6fe   : > { %13087 = vst.msk [vmem:[#allocation3 + $0x110] sm:$0xff] %vm504_vm2, %v13055_v28  ;;  %v13054_v21 = vsel %vm12990_vm5, %v23058_v60, %v13022_v57  ;;  %v23062_v49 = vadd.f32 %v23061_v56, %v12858_v10  ;;  %v28288_v62 = vld [vmem:[#allocation3 + $0xc7] sm:$0xff]  ;;  %v28290_v9 = vld [vmem:[#allocation3 + $0xcf] sm:$0xff] }
 0x6ff   : > { %13086 = vst.msk [vmem:[#allocation3 + $0x108] sm:$0xff] %vm504_vm2, %v13054_v21  ;;  %vm12993_vm6 = vcmp.gt.f32.partialorder %v23060_v8, 0.0  ;;  %v13025_v16 = vmul.f32 %v23060_v8, %v28183_v44  ;;  %22447 = vmatprep.mubr.msk.f32.mxu1 %vm504_vm2, %v28288_v62 }
 0x700   : > { %vm12992_vm7 = vcmp.gt.f32.partialorder %v23062_v49, 0.0  ;;  %v13024_v43 = vmul.f32 %v23062_v49, %v28183_v44  ;;  %v22408_v33 = vpop.f32.mrb[18].mxu0  ;;  %22448 = vmatmul.mubr.msk.f32.gmra.mrb[44].mxu1 %vm504_vm2, %v28290_v9 }
 0x701   : > { %v13057_v42 = vsel %vm12993_vm6, %v23060_v8, %v13025_v16  ;;  %v23064_v61 = vadd.f32 %v23063_v35, %v22408_v33  ;;  %v12868_v1 = vpop.f32.mrb[19].mxu0  ;;  %v23079_v35 = vadd.f32 %v29430_v23, %v28174_v37 }
 0x702   : > { %13089 = vst.msk [vmem:[#allocation3 + $0x130] sm:$0xff] %vm504_vm2, %v13057_v42  ;;  %v13056_v30 = vsel %vm12992_vm7, %v23062_v49, %v13024_v43  ;;  %v23066_v59 = vadd.f32 %v23065_v4, %v12868_v1  ;;  %v28304_v26 = vld [vmem:[#allocation3 + $0xe7] sm:$0xff]  ;;  %v28306_v41 = vld [vmem:[#allocation3 + $0xef] sm:$0xff] }
 0x703   : > { %13088 = vst.msk [vmem:[#allocation3 + $0x128] sm:$0xff] %vm504_vm2, %v13056_v30  ;;  %vm12995_vm8 = vcmp.gt.f32.partialorder %v23064_v61, 0.0  ;;  %v13027_v18 = vmul.f32 %v23064_v61, %v28183_v44  ;;  %22450 = vmatprep.mubr.msk.f32.mxu1 %vm504_vm2, %v28304_v26  ;;  %v29431_v4 = vld [vmem:[#allocation7_spill] sm:$0xff] }
 0x704   : > { %vm12994_vm9 = vcmp.gt.f32.partialorder %v23066_v59, 0.0  ;;  %v13026_v20 = vmul.f32 %v23066_v59, %v28183_v44  ;;  %v22411_v48 = vpop.f32.mrb[20].mxu0  ;;  %22451 = vmatmul.mubr.msk.f32.gmra.mrb[46].mxu1 %vm504_vm2, %v28306_v41  ;;  %v23081_v43 = vadd.f32 %v28174_v37, %v29431_v4 }
 0x705   : > { %v13059_v47 = vsel %vm12995_vm8, %v23064_v61, %v13027_v18  ;;  %v23068_v50 = vadd.f32 %v23067_v63, %v22411_v48  ;;  %v12878_v5 = vpop.f32.mrb[21].mxu0 }
 0x706   : > { %13091 = vst.msk [vmem:[#allocation3 + $0x150] sm:$0xff] %vm504_vm2, %v13059_v47  ;;  %v13058_v22 = vsel %vm12994_vm9, %v23066_v59, %v13026_v20  ;;  %v23070_v17 = vadd.f32 %v23069_v45, %v12878_v5  ;;  %v28320_v46 = vld [vmem:[#allocation3 + $0x107] sm:$0xff]  ;;  %v28322_v53 = vld [vmem:[#allocation3 + $0x10f] sm:$0xff] }
 0x707   : > { %13090 = vst.msk [vmem:[#allocation3 + $0x148] sm:$0xff] %vm504_vm2, %v13058_v22  ;;  %vm12997_vm10 = vcmp.gt.f32.partialorder %v23068_v50, 0.0  ;;  %v13029_v24 = vmul.f32 %v23068_v50, %v28183_v44  ;;  %22453 = vmatprep.mubr.msk.f32.mxu1 %vm504_vm2, %v28320_v46  ;;  %v29432_v20 = vld [vmem:[#allocation8_spill] sm:$0xff] }
 0x708   : > { %vm12996_vm11 = vcmp.gt.f32.partialorder %v23070_v17, 0.0  ;;  %v13028_v34 = vmul.f32 %v23070_v17, %v28183_v44  ;;  %v22414_v29 = vpop.f32.mrb[22].mxu0  ;;  %22454 = vmatmul.mubr.msk.f32.gmra.mrb[48].mxu1 %vm504_vm2, %v28322_v53  ;;  %v23083_v48 = vadd.f32 %v29432_v20, %v28174_v37 }
 0x709   : > { %v13061_v13 = vsel %vm12997_vm10, %v23068_v50, %v13029_v24  ;;  %v23072_v31 = vadd.f32 %v23071_v54, %v22414_v29  ;;  %v12888_v58 = vpop.f32.mrb[23].mxu0  ;;  %v29433_v50 = vld [vmem:[#allocation10_spill] sm:$0xff] }
 0x70a   : > { %13093 = vst.msk [vmem:[#allocation3 + $0x170] sm:$0xff] %vm504_vm2, %v13061_v13  ;;  %v13060_v14 = vsel %vm12996_vm11, %v23070_v17, %v13028_v34  ;;  %v23074_v12 = vadd.f32 %v23073_v11, %v12888_v58  ;;  %v28336_v32 = vld [vmem:[#allocation3 + $0x127] sm:$0xff]  ;;  %v28338_v60 = vld [vmem:[#allocation3 + $0x12f] sm:$0xff]  ;;  %v23085_v5 = vadd.f32 %v28174_v37, %v29433_v50 }
 0x70b   : > { %13092 = vst.msk [vmem:[#allocation3 + $0x168] sm:$0xff] %vm504_vm2, %v13060_v14  ;;  %vm12999_vm12 = vcmp.gt.f32.partialorder %v23072_v31, 0.0  ;;  %v13031_v51 = vmul.f32 %v23072_v31, %v28183_v44  ;;  %22456 = vmatprep.mubr.msk.f32.mxu1 %vm504_vm2, %v28336_v32  ;;  %v29434_v58 = vld [vmem:[#allocation11_spill] sm:$0xff] }
 0x70c   : > { %vm12998_vm13 = vcmp.gt.f32.partialorder %v23074_v12, 0.0  ;;  %v13030_v56 = vmul.f32 %v23074_v12, %v28183_v44  ;;  %v22417_v57 = vpop.f32.mrb[24].mxu0  ;;  %22457 = vmatmul.mubr.msk.f32.gmra.mrb[50].mxu1 %vm504_vm2, %v28338_v60  ;;  %v23087_v14 = vadd.f32 %v29434_v58, %v28174_v37  ;;  %v18870_v58 = vld [vmem:[%s29360_s5 + $0x28] sm:$0xff] }
 0x70d   : > { %v13063_v52 = vsel %vm12999_vm12, %v23072_v31, %v13031_v51  ;;  %v23076_v27 = vadd.f32 %v23075_v7, %v22417_v57  ;;  %v12898_v28 = vpop.f32.mrb[25].mxu0  ;;  %v29435_v7 = vld [vmem:[#allocation12_spill] sm:$0xff]  ;;  %v28636_v20 = vld [vmem:[#allocation3 + $0x150] sm:$0xff] }
 0x70e   : > { %13095 = vst.msk [vmem:[#allocation3 + $0x190] sm:$0xff] %vm504_vm2, %v13063_v52  ;;  %v13062_v8 = vsel %vm12998_vm13, %v23074_v12, %v13030_v56  ;;  %v23078_v10 = vadd.f32 %v23077_v36, %v12898_v28  ;;  %v28352_v21 = vld [vmem:[#allocation3 + $0x147] sm:$0xff]  ;;  %v28354_v49 = vld [vmem:[#allocation3 + $0x14f] sm:$0xff]  ;;  %v23089_v51 = vadd.f32 %v28174_v37, %v29435_v7 }
 0x70f   : > { %13094 = vst.msk [vmem:[#allocation3 + $0x188] sm:$0xff] %vm504_vm2, %v13062_v8  ;;  %vm13001_vm14 = vcmp.gt.f32.partialorder %v23076_v27, 0.0  ;;  %v13033_v16 = vmul.f32 %v23076_v27, %v28183_v44  ;;  %22459 = vmatprep.mubr.msk.f32.mxu1 %vm504_vm2, %v28352_v21  ;;  %v15193_v7 = vld [vmem:[#allocation3 + $0x9] sm:$0xff] }
 0x710   : > { %vm13000_vm15 = vcmp.gt.f32.partialorder %v23078_v10, 0.0  ;;  %v13032_v33 = vmul.f32 %v23078_v10, %v28183_v44  ;;  %v22420_v42 = vpop.f32.mrb[26].mxu0  ;;  %22460 = vmatmul.mubr.msk.f32.gmra.mrb[52].mxu1 %vm504_vm2, %v28354_v49 }
 0x711   : > { %v13065_v61 = vsel %vm13001_vm14, %v23076_v27, %v13033_v16  ;;  %v23080_v1 = vadd.f32 %v23079_v35, %v22420_v42  ;;  %v12908_v30 = vpop.f32.mrb[27].mxu0 }
 0x712   : > { %13097 = vst.msk [vmem:[#allocation3 + $0x1b0] sm:$0xff] %vm504_vm2, %v13065_v61  ;;  %v13064_v59 = vsel %vm13000_vm15, %v23078_v10, %v13032_v33  ;;  %v23082_v63 = vadd.f32 %v23081_v43, %v12908_v30  ;;  %v28368_v18 = vld [vmem:[#allocation3 + $0x167] sm:$0xff]  ;;  %v28370_v45 = vld [vmem:[#allocation3 + $0x16f] sm:$0xff] }
 0x713   : > { %13096 = vst.msk [vmem:[#allocation3 + $0x1a8] sm:$0xff] %vm504_vm2, %v13064_v59  ;;  %vm13003_vm3 = vcmp.gt.f32.partialorder %v23080_v1, 0.0  ;;  %v13035_v47 = vmul.f32 %v23080_v1, %v28183_v44  ;;  %22462 = vmatprep.mubr.msk.f32.mxu1 %vm504_vm2, %v28368_v18  ;;  %v18738_v61 = vld [vmem:[%s29360_s5 + $0x8] sm:$0xff]  ;;  %v28620_v59 = vld [vmem:[#allocation3 + $0x110] sm:$0xff] }
 0x714   : > { %vm13002_vm4 = vcmp.gt.f32.partialorder %v23082_v63, 0.0  ;;  %v13034_v22 = vmul.f32 %v23082_v63, %v28183_v44  ;;  %v22423_v17 = vpop.f32.mrb[28].mxu0  ;;  %22463 = vmatmul.mubr.msk.f32.gmra.mrb[54].mxu1 %vm504_vm2, %v28370_v45  ;;  %v28616_v30 = vld [vmem:[#allocation3 + $0x108] sm:$0xff] }
 0x715   : > { %v13067_v54 = vsel %vm13003_vm3, %v23080_v1, %v13035_v47  ;;  %v23084_v24 = vadd.f32 %v23083_v48, %v22423_v17  ;;  %v12918_v11 = vpop.f32.mrb[29].mxu0  ;;  %v28612_v1 = vld [vmem:[#allocation3 + $0xf0] sm:$0xff]  ;;  %v28640_v48 = vld [vmem:[#allocation3 + $0x168] sm:$0xff] }
 0x716   : > { %13099 = vst.msk [vmem:[#allocation3 + $0x1d0] sm:$0xff] %vm504_vm2, %v13067_v54  ;;  %v13066_v34 = vsel %vm13002_vm4, %v23082_v63, %v13034_v22  ;;  %v23086_v29 = vadd.f32 %v23085_v5, %v12918_v11  ;;  %v28384_v13 = vld [vmem:[#allocation3 + $0x187] sm:$0xff]  ;;  %v28386_v31 = vld [vmem:[#allocation3 + $0x18f] sm:$0xff] }
 0x717   : > { %13098 = vst.msk [vmem:[#allocation3 + $0x1c8] sm:$0xff] %vm504_vm2, %v13066_v34  ;;  %vm13005_vm5 = vcmp.gt.f32.partialorder %v23084_v24, 0.0  ;;  %v13037_v12 = vmul.f32 %v23084_v24, %v28183_v44  ;;  %22465 = vmatprep.mubr.msk.f32.mxu1 %vm504_vm2, %v28384_v13  ;;  %v28624_v63 = vld [vmem:[#allocation3 + $0x128] sm:$0xff]  ;;  %v28644_v47 = vld [vmem:[#allocation3 + $0x170] sm:$0xff] }
 0x718   : > { %vm13004_vm6 = vcmp.gt.f32.partialorder %v23086_v29, 0.0  ;;  %v13036_v36 = vmul.f32 %v23086_v29, %v28183_v44  ;;  %v22426_v56 = vpop.f32.mrb[30].mxu0  ;;  %22466 = vmatmul.mubr.msk.f32.gmra.mrb[56].mxu1 %vm504_vm2, %v28386_v31  ;;  %v28648_v50 = vld [vmem:[#allocation3 + $0x188] sm:$0xff]  ;;  %v28652_v5 = vld [vmem:[#allocation3 + $0x190] sm:$0xff] }
 0x719   : > { %v13069_v57 = vsel %vm13005_vm5, %v23084_v24, %v13037_v12  ;;  %v23088_v52 = vadd.f32 %v23087_v14, %v22426_v56  ;;  %v12928_v27 = vpop.f32.mrb[31].mxu0  ;;  %v28660_v17 = vld [vmem:[#allocation3 + $0x1b0] sm:$0xff]  ;;  %v14836_v14 = vld [vmem:[#allocation3 + $0x228] sm:$0xff] }
 0x71a   : > { %13101 = vst.msk [vmem:[#allocation3 + $0x1f0] sm:$0xff] %vm504_vm2, %v13069_v57  ;;  %v13068_v28 = vsel %vm13004_vm6, %v23086_v29, %v13036_v36  ;;  %v23090_v8 = vadd.f32 %v23089_v51, %v12928_v27  ;;  %v28400_v10 = vld [vmem:[#allocation3 + $0x1a7] sm:$0xff]  ;;  %v28402_v23 = vld [vmem:[#allocation3 + $0x1af] sm:$0xff] }
 0x71b   : > { %13100 = vst.msk [vmem:[#allocation3 + $0x1e8] sm:$0xff] %vm504_vm2, %v13068_v28  ;;  %vm13007_vm7 = vcmp.gt.f32.partialorder %v23088_v52, 0.0  ;;  %v13039_v37 = vmul.f32 %v23088_v52, %v28183_v44  ;;  %22468 = vmatprep.mubr.msk.f32.mxu1 %vm504_vm2, %v28400_v10  ;;  %v28656_v22 = vld [vmem:[#allocation3 + $0x1a8] sm:$0xff]  ;;  %v18837_v29 = vld [vmem:[%s29360_s5 + $0x10] sm:$0xff]  ;;  %v28811_v36 = vld [vmem:[%s29360_s5 + $0x40] sm:$0xff] }
 0x71c   : > { %vm13006_vm8 = vcmp.gt.f32.partialorder %v23090_v8, 0.0  ;;  %v13038_v35 = vmul.f32 %v23090_v8, %v28183_v44  ;;  %22469 = vmatmul.mubr.msk.f32.gmra.mrb[58].mxu1 %vm504_vm2, %v28402_v23  ;;  %v14837_v12 = vld [vmem:[#allocation3 + $0x230] sm:$0xff] }
 0x71d   : > { %v13071_v16 = vsel %vm13007_vm7, %v23088_v52, %v13039_v37  ;;  %v28668_v24 = vld [vmem:[#allocation3 + $0x1d0] sm:$0xff] }
 0x71e   : > { %13103 = vst.msk [vmem:[#allocation3 + $0x210] sm:$0xff] %vm504_vm2, %v13071_v16  ;;  %v13070_v4 = vsel %vm13006_vm8, %v23090_v8, %v13038_v35  ;;  %v28412_v43 = vld [vmem:[#allocation3 + $0x1c7] sm:$0xff]  ;;  %v28414_v33 = vld [vmem:[#allocation3 + $0x1cf] sm:$0xff] }
 0x71f   : > { %13102 = vst.msk [vmem:[#allocation3 + $0x208] sm:$0xff] %vm504_vm2, %v13070_v4  ;;  %22471 = vmatprep.mubr.msk.f32.mxu1 %vm504_vm2, %v28412_v43  ;;  %v28664_v54 = vld [vmem:[#allocation3 + $0x1c8] sm:$0xff]  ;;  %v15194_v51 = vld [vmem:[#allocation3 + $0x11] sm:$0xff] }
 0x720   : > { %22472 = vmatmul.mubr.msk.f32.gmra.mrb[60].mxu1 %vm504_vm2, %v28414_v33  ;;  %v15195_v56 = vld [vmem:[#allocation3 + $0x29] sm:$0xff]  ;;  %v15196_v57 = vld [vmem:[#allocation3 + $0x31] sm:$0xff] }
 0x721   : > { %v28676_v34 = vld [vmem:[#allocation3 + $0x1f0] sm:$0xff] }
 0x722   : > { %v28421_v44 = vld [vmem:[#allocation3 + $0x1e7] sm:$0xff]  ;;  %v28423_v42 = vld [vmem:[#allocation3 + $0x1ef] sm:$0xff] }
 0x723   : > { %22474 = vmatprep.mubr.msk.f32.mxu1 %vm504_vm2, %v28421_v44  ;;  %v28672_v11 = vld [vmem:[#allocation3 + $0x1e8] sm:$0xff]  ;;  %v28821_v27 = vld [vmem:[#allocation3 + $0x51] sm:$0xff] }
 0x724   : > { %22475 = vmatmul.mubr.msk.f32.gmra.mrb[62].mxu1 %vm504_vm2, %v28423_v42  ;;  %v28817_v52 = vld [vmem:[#allocation3 + $0x49] sm:$0xff]  ;;  %v28829_v8 = vld [vmem:[#allocation3 + $0x71] sm:$0xff] }
 0x725   : > { %22479 = vmatprep.mubr.msk.f32.mxu1 %vm504_vm2, %v28208_v19  ;;  %v28825_v28 = vld [vmem:[#allocation3 + $0x69] sm:$0xff]  ;;  %v28845_v35 = vld [vmem:[#allocation3 + $0xb1] sm:$0xff] }
 0x726   : > { %v13144_v19 = vld [vmem:[#allocation3 + $0x20f] sm:$0xff] }
 0x727   : > { %v28841_v37 = vld [vmem:[#allocation3 + $0xa9] sm:$0xff]  ;;  %v28853_v4 = vld [vmem:[#allocation3 + $0xd1] sm:$0xff] }
 0x728   : > { %22480 = vmatmul.mubr.msk.f32.vlgmr.msra.gmra.mrb[32].mxu1 %vm504_vm2, %v28210_v39  ;;  %v18771_v39 = vld [vmem:[%s29360_s5 + $0x20] sm:$0xff]  ;;  %v28849_v16 = vld [vmem:[#allocation3 + $0xc9] sm:$0xff] }
 0x729   : > { %22528 = vmatpush3.msra.mxu1 %v28168_v25  ;;  %22482 = vmatprep.mubr.msk.f32.mxu1 %vm504_vm2, %v28224_v0  ;;  %v13143_v25 = vld [vmem:[#allocation3 + $0x207] sm:$0xff] }
 0x72a   : > { %22577 = vmatprep.subr.mxu1 %v18738_v61 }
 0x72c   : > { %22483 = vmatmul.mubr.msk.f32.gmra.mrb[34].mxu1 %vm504_vm2, %v28226_v38 }
 0x72d   : > { %22485 = vmatprep.mubr.msk.f32.mxu1 %vm504_vm2, %v28240_v6 }
 0x730   : > { %22486 = vmatmul.mubr.msk.f32.gmra.mrb[36].mxu1 %vm504_vm2, %v28242_v40 }
 0x731   : > { %22488 = vmatprep.mubr.msk.f32.mxu1 %vm504_vm2, %v28256_v2 }
 0x734   : > { %22489 = vmatmul.mubr.msk.f32.gmra.mrb[38].mxu1 %vm504_vm2, %v28258_v15 }
 0x735   : > { %22491 = vmatprep.mubr.msk.f32.mxu1 %vm504_vm2, %v28272_v55 }
 0x738   : > { %22492 = vmatmul.mubr.msk.f32.gmra.mrb[40].mxu1 %vm504_vm2, %v28274_v3 }
 0x739   : > { %22494 = vmatprep.mubr.msk.f32.mxu1 %vm504_vm2, %v28288_v62 }
 0x73c   : > { %22495 = vmatmul.mubr.msk.f32.gmra.mrb[42].mxu1 %vm504_vm2, %v28290_v9 }
 0x73d   : > { %22497 = vmatprep.mubr.msk.f32.mxu1 %vm504_vm2, %v28304_v26 }
 0x740   : > { %22498 = vmatmul.mubr.msk.f32.gmra.mrb[44].mxu1 %vm504_vm2, %v28306_v41 }
 0x741   : > { %22500 = vmatprep.mubr.msk.f32.mxu1 %vm504_vm2, %v28320_v46 }
 0x744   : > { %22501 = vmatmul.mubr.msk.f32.gmra.mrb[46].mxu1 %vm504_vm2, %v28322_v53 }
 0x745   : > { %22503 = vmatprep.mubr.msk.f32.mxu1 %vm504_vm2, %v28336_v32 }
 0x748   : > { %22504 = vmatmul.mubr.msk.f32.gmra.mrb[48].mxu1 %vm504_vm2, %v28338_v60 }
 0x749   : > { %22506 = vmatprep.mubr.msk.f32.mxu1 %vm504_vm2, %v28352_v21 }
 0x74c   : > { %22507 = vmatmul.mubr.msk.f32.gmra.mrb[50].mxu1 %vm504_vm2, %v28354_v49 }
 0x74d   : > { %22509 = vmatprep.mubr.msk.f32.mxu1 %vm504_vm2, %v28368_v18 }
 0x750   : > { %22510 = vmatmul.mubr.msk.f32.gmra.mrb[52].mxu1 %vm504_vm2, %v28370_v45 }
 0x751   : > { %22512 = vmatprep.mubr.msk.f32.mxu1 %vm504_vm2, %v28384_v13 }
 0x754   : > { %22513 = vmatmul.mubr.msk.f32.gmra.mrb[54].mxu1 %vm504_vm2, %v28386_v31 }
 0x755   : > { %22515 = vmatprep.mubr.msk.f32.mxu1 %vm504_vm2, %v28400_v10 }
 0x758   : > { %22516 = vmatmul.mubr.msk.f32.gmra.mrb[56].mxu1 %vm504_vm2, %v28402_v23 }
 0x759   : > { %22518 = vmatprep.mubr.msk.f32.mxu1 %vm504_vm2, %v28412_v43 }
 0x75c   : > { %22519 = vmatmul.mubr.msk.f32.gmra.mrb[58].mxu1 %vm504_vm2, %v28414_v33 }
 0x75d   : > { %22521 = vmatprep.mubr.msk.f32.mxu1 %vm504_vm2, %v28421_v44 }
 0x760   : > { %22522 = vmatmul.mubr.msk.f32.gmra.mrb[60].mxu1 %vm504_vm2, %v28423_v42 }
 0x761   : > { %22524 = vmatprep.mubr.msk.f32.mxu1 %vm504_vm2, %v13143_v25 }
 0x764   : > { %22525 = vmatmul.mubr.msk.f32.gmra.mrb[62].mxu1 %vm504_vm2, %v13144_v19 }
 0x765   : > { %22529 = vmatprep.mubr.msk.f32.mxu1 %vm504_vm2, %v28224_v0  ;;  %v13145_v0 = vld [vmem:[#allocation3 + $0x227] sm:$0xff] }
 0x768   : > { %22530 = vmatmul.mubr.msk.f32.vlgmr.msra.gmra.mrb[32].mxu1 %vm504_vm2, %v28226_v38  ;;  %v13146_v38 = vld [vmem:[#allocation3 + $0x22f] sm:$0xff] }
 0x769   : > { %22578 = vmatpush3.msra.mxu1 %v18738_v61  ;;  %22532 = vmatprep.mubr.msk.f32.mxu1 %vm504_vm2, %v28240_v6  ;;  %v14031_v6 = vld [vmem:[#allocation3 + $0x8] sm:$0xff] }
 0x76a   : > { %22627 = vmatprep.subr.mxu1 %v18771_v39  ;;  %v28873_v61 = vld [vmem:[#allocation3 + $0x129] sm:$0xff] }
 0x76c   : > { %22533 = vmatmul.mubr.msk.f32.gmra.mrb[34].mxu1 %vm504_vm2, %v28242_v40  ;;  %v14032_v40 = vld [vmem:[#allocation3 + $0x10] sm:$0xff] }
 0x76d   : > { %22535 = vmatprep.mubr.msk.f32.mxu1 %vm504_vm2, %v28256_v2  ;;  %v28562_v2 = vld [vmem:[%s29360_s5 + $0x38] sm:$0xff] }
 0x770   : > { %22536 = vmatmul.mubr.msk.f32.gmra.mrb[36].mxu1 %vm504_vm2, %v28258_v15  ;;  %v14033_v15 = vld [vmem:[#allocation3 + $0x28] sm:$0xff] }
 0x771   : > { %22538 = vmatprep.mubr.msk.f32.mxu1 %vm504_vm2, %v28272_v55  ;;  %v14034_v55 = vld [vmem:[#allocation3 + $0x30] sm:$0xff] }
 0x774   : > { %22539 = vmatmul.mubr.msk.f32.gmra.mrb[38].mxu1 %vm504_vm2, %v28274_v3  ;;  %v28568_v3 = vld [vmem:[#allocation3 + $0x48] sm:$0xff] }
 0x775   : > { %22541 = vmatprep.mubr.msk.f32.mxu1 %vm504_vm2, %v28288_v62  ;;  %v28572_v62 = vld [vmem:[#allocation3 + $0x50] sm:$0xff] }
 0x778   : > { %22542 = vmatmul.mubr.msk.f32.gmra.mrb[40].mxu1 %vm504_vm2, %v28290_v9  ;;  %v28576_v9 = vld [vmem:[#allocation3 + $0x68] sm:$0xff] }
 0x779   : > { %22544 = vmatprep.mubr.msk.f32.mxu1 %vm504_vm2, %v28304_v26  ;;  %v28580_v26 = vld [vmem:[#allocation3 + $0x70] sm:$0xff] }
 0x77c   : > { %22545 = vmatmul.mubr.msk.f32.gmra.mrb[42].mxu1 %vm504_vm2, %v28306_v41  ;;  %v28584_v41 = vld [vmem:[#allocation3 + $0x88] sm:$0xff] }
 0x77d   : > { %22547 = vmatprep.mubr.msk.f32.mxu1 %vm504_vm2, %v28320_v46  ;;  %v28588_v46 = vld [vmem:[#allocation3 + $0x90] sm:$0xff] }
 0x780   : > { %22548 = vmatmul.mubr.msk.f32.gmra.mrb[44].mxu1 %vm504_vm2, %v28322_v53  ;;  %v28592_v53 = vld [vmem:[#allocation3 + $0xa8] sm:$0xff] }
 0x781   : > { %22550 = vmatprep.mubr.msk.f32.mxu1 %vm504_vm2, %v28336_v32  ;;  %v28596_v32 = vld [vmem:[#allocation3 + $0xb0] sm:$0xff] }
 0x784   : > { %22551 = vmatmul.mubr.msk.f32.gmra.mrb[46].mxu1 %vm504_vm2, %v28338_v60  ;;  %v28600_v60 = vld [vmem:[#allocation3 + $0xc8] sm:$0xff] }
 0x785   : > { %22553 = vmatprep.mubr.msk.f32.mxu1 %vm504_vm2, %v28352_v21  ;;  %v28604_v21 = vld [vmem:[#allocation3 + $0xd0] sm:$0xff] }
 0x788   : > { %22554 = vmatmul.mubr.msk.f32.gmra.mrb[48].mxu1 %vm504_vm2, %v28354_v49  ;;  %v28608_v49 = vld [vmem:[#allocation3 + $0xe8] sm:$0xff] }
 0x789   : > { %22556 = vmatprep.mubr.msk.f32.mxu1 %vm504_vm2, %v28368_v18  ;;  %v28628_v18 = vld [vmem:[#allocation3 + $0x130] sm:$0xff] }
 0x78c   : > { %22557 = vmatmul.mubr.msk.f32.gmra.mrb[50].mxu1 %vm504_vm2, %v28370_v45  ;;  %v28632_v45 = vld [vmem:[#allocation3 + $0x148] sm:$0xff] }
 0x78d   : > { %22559 = vmatprep.mubr.msk.f32.mxu1 %vm504_vm2, %v28384_v13  ;;  %v14448_v13 = vld [vmem:[#allocation3 + $0x208] sm:$0xff] }
 0x790   : > { %22560 = vmatmul.mubr.msk.f32.gmra.mrb[52].mxu1 %vm504_vm2, %v28386_v31  ;;  %v14449_v31 = vld [vmem:[#allocation3 + $0x210] sm:$0xff] }
 0x791   : > { %22562 = vmatprep.mubr.msk.f32.mxu1 %vm504_vm2, %v28400_v10  ;;  %v28833_v10 = vld [vmem:[#allocation3 + $0x89] sm:$0xff] }
 0x794   : > { %22563 = vmatmul.mubr.msk.f32.gmra.mrb[54].mxu1 %vm504_vm2, %v28402_v23  ;;  %v28837_v23 = vld [vmem:[#allocation3 + $0x91] sm:$0xff] }
 0x795   : > { %22565 = vmatprep.mubr.msk.f32.mxu1 %vm504_vm2, %v28412_v43  ;;  %v28857_v43 = vld [vmem:[#allocation3 + $0xe9] sm:$0xff] }
 0x798   : > { %22566 = vmatmul.mubr.msk.f32.gmra.mrb[56].mxu1 %vm504_vm2, %v28414_v33  ;;  %v28861_v33 = vld [vmem:[#allocation3 + $0xf1] sm:$0xff] }
 0x799   : > { %22568 = vmatprep.mubr.msk.f32.mxu1 %vm504_vm2, %v28421_v44  ;;  %v28865_v44 = vld [vmem:[#allocation3 + $0x109] sm:$0xff] }
 0x79c   : > { %22569 = vmatmul.mubr.msk.f32.gmra.mrb[58].mxu1 %vm504_vm2, %v28423_v42  ;;  %v28869_v42 = vld [vmem:[#allocation3 + $0x111] sm:$0xff] }
 0x79d   : > { %22571 = vmatprep.mubr.msk.f32.mxu1 %vm504_vm2, %v13143_v25  ;;  %v28877_v25 = vld [vmem:[#allocation3 + $0x131] sm:$0xff] }
 0x7a0   : > { %22572 = vmatmul.mubr.msk.f32.gmra.mrb[60].mxu1 %vm504_vm2, %v13144_v19  ;;  %v28881_v19 = vld [vmem:[#allocation3 + $0x149] sm:$0xff] }
 0x7a1   : > { %22574 = vmatprep.mubr.msk.f32.mxu1 %vm504_vm2, %v13145_v0  ;;  %v28889_v0 = vld [vmem:[#allocation3 + $0x169] sm:$0xff] }
 0x7a4   : > { %22575 = vmatmul.mubr.msk.f32.gmra.mrb[62].mxu1 %vm504_vm2, %v13146_v38  ;;  %v28893_v38 = vld [vmem:[#allocation3 + $0x171] sm:$0xff] }
 0x7a5   : > { %22579 = vmatprep.mubr.msk.f32.mxu1 %vm504_vm2, %v14031_v6  ;;  %v28897_v6 = vld [vmem:[#allocation3 + $0x189] sm:$0xff] }
 0x7a8   : > { %22580 = vmatmul.mubr.msk.f32.vlgmr.msra.gmra.mrb[32].mxu1 %vm504_vm2, %v14032_v40  ;;  %v28901_v40 = vld [vmem:[#allocation3 + $0x191] sm:$0xff] }
 0x7a9   : > { %22628 = vmatpush3.msra.mxu1 %v18771_v39  ;;  %22582 = vmatprep.mubr.msk.f32.mxu1 %vm504_vm2, %v14033_v15  ;;  %v28885_v39 = vld [vmem:[#allocation3 + $0x151] sm:$0xff] }
 0x7aa   : > { %22677 = vmatprep.subr.mxu1 %v28562_v2 }
 0x7ac   : > { %22583 = vmatmul.mubr.msk.f32.gmra.mrb[34].mxu1 %vm504_vm2, %v14034_v55 }
 0x7ad   : > { %22585 = vmatprep.mubr.msk.f32.mxu1 %vm504_vm2, %v28568_v3 }
 0x7b0   : > { %22586 = vmatmul.mubr.msk.f32.gmra.mrb[36].mxu1 %vm504_vm2, %v28572_v62 }
 0x7b1   : > { %22588 = vmatprep.mubr.msk.f32.mxu1 %vm504_vm2, %v28576_v9 }
 0x7b4   : > { %22589 = vmatmul.mubr.msk.f32.gmra.mrb[38].mxu1 %vm504_vm2, %v28580_v26 }
 0x7b5   : > { %22591 = vmatprep.mubr.msk.f32.mxu1 %vm504_vm2, %v28584_v41 }
 0x7b8   : > { %22592 = vmatmul.mubr.msk.f32.gmra.mrb[40].mxu1 %vm504_vm2, %v28588_v46 }
 0x7b9   : > { %22594 = vmatprep.mubr.msk.f32.mxu1 %vm504_vm2, %v28592_v53 }
 0x7bc   : > { %22595 = vmatmul.mubr.msk.f32.gmra.mrb[42].mxu1 %vm504_vm2, %v28596_v32 }
 0x7bd   : > { %22597 = vmatprep.mubr.msk.f32.mxu1 %vm504_vm2, %v28600_v60 }
 0x7c0   : > { %22598 = vmatmul.mubr.msk.f32.gmra.mrb[44].mxu1 %vm504_vm2, %v28604_v21 }
 0x7c1   : > { %22600 = vmatprep.mubr.msk.f32.mxu1 %vm504_vm2, %v28608_v49 }
 0x7c4   : > { %22601 = vmatmul.mubr.msk.f32.gmra.mrb[46].mxu1 %vm504_vm2, %v28612_v1 }
 0x7c5   : > { %22603 = vmatprep.mubr.msk.f32.mxu1 %vm504_vm2, %v28616_v30 }
 0x7c8   : > { %22604 = vmatmul.mubr.msk.f32.gmra.mrb[48].mxu1 %vm504_vm2, %v28620_v59 }
 0x7c9   : > { %22606 = vmatprep.mubr.msk.f32.mxu1 %vm504_vm2, %v28624_v63 }
 0x7cc   : > { %22607 = vmatmul.mubr.msk.f32.gmra.mrb[50].mxu1 %vm504_vm2, %v28628_v18 }
 0x7cd   : > { %22609 = vmatprep.mubr.msk.f32.mxu1 %vm504_vm2, %v28632_v45 }
 0x7d0   : > { %22610 = vmatmul.mubr.msk.f32.gmra.mrb[52].mxu1 %vm504_vm2, %v28636_v20 }
 0x7d1   : > { %22612 = vmatprep.mubr.msk.f32.mxu1 %vm504_vm2, %v28640_v48 }
 0x7d4   : > { %22613 = vmatmul.mubr.msk.f32.gmra.mrb[54].mxu1 %vm504_vm2, %v28644_v47 }
 0x7d5   : > { %22615 = vmatprep.mubr.msk.f32.mxu1 %vm504_vm2, %v28648_v50 }
 0x7d8   : > { %22616 = vmatmul.mubr.msk.f32.gmra.mrb[56].mxu1 %vm504_vm2, %v28652_v5 }
 0x7d9   : > { %22618 = vmatprep.mubr.msk.f32.mxu1 %vm504_vm2, %v28656_v22 }
 0x7dc   : > { %22619 = vmatmul.mubr.msk.f32.gmra.mrb[58].mxu1 %vm504_vm2, %v28660_v17 }
 0x7dd   : > { %22621 = vmatprep.mubr.msk.f32.mxu1 %vm504_vm2, %v28664_v54 }
 0x7e0   : > { %22622 = vmatmul.mubr.msk.f32.gmra.mrb[60].mxu1 %vm504_vm2, %v28668_v24 }
 0x7e1   : > { %22624 = vmatprep.mubr.msk.f32.mxu1 %vm504_vm2, %v28672_v11 }
 0x7e4   : > { %22625 = vmatmul.mubr.msk.f32.gmra.mrb[62].mxu1 %vm504_vm2, %v28676_v34 }
 0x7e5   : > { %22629 = vmatprep.mubr.msk.f32.mxu1 %vm504_vm2, %v14033_v15  ;;  %v28909_v15 = vld [vmem:[#allocation3 + $0x1b1] sm:$0xff] }
 0x7e8   : > { %22630 = vmatmul.mubr.msk.f32.vlgmr.msra.gmra.mrb[32].mxu1 %vm504_vm2, %v14034_v55  ;;  %v28913_v55 = vld [vmem:[#allocation3 + $0x1c9] sm:$0xff] }
 0x7e9   : > { %22678 = vmatpush3.msra.mxu1 %v28562_v2  ;;  %22632 = vmatprep.mubr.msk.f32.mxu1 %vm504_vm2, %v28568_v3  ;;  %v28905_v2 = vld [vmem:[#allocation3 + $0x1a9] sm:$0xff] }
 0x7ea   : > { %22727 = vmatprep.subr.mxu1 %v18837_v29 }
 0x7ec   : > { %22633 = vmatmul.mubr.msk.f32.gmra.mrb[34].mxu1 %vm504_vm2, %v28572_v62 }
 0x7ed   : > { %22635 = vmatprep.mubr.msk.f32.mxu1 %vm504_vm2, %v28576_v9 }
 0x7f0   : > { %22636 = vmatmul.mubr.msk.f32.gmra.mrb[36].mxu1 %vm504_vm2, %v28580_v26 }
 0x7f1   : > { %22638 = vmatprep.mubr.msk.f32.mxu1 %vm504_vm2, %v28584_v41 }
 0x7f4   : > { %22639 = vmatmul.mubr.msk.f32.gmra.mrb[38].mxu1 %vm504_vm2, %v28588_v46 }
 0x7f5   : > { %22641 = vmatprep.mubr.msk.f32.mxu1 %vm504_vm2, %v28592_v53 }
 0x7f8   : > { %22642 = vmatmul.mubr.msk.f32.gmra.mrb[40].mxu1 %vm504_vm2, %v28596_v32 }
 0x7f9   : > { %22644 = vmatprep.mubr.msk.f32.mxu1 %vm504_vm2, %v28600_v60 }
 0x7fc   : > { %22645 = vmatmul.mubr.msk.f32.gmra.mrb[42].mxu1 %vm504_vm2, %v28604_v21 }
 0x7fd   : > { %22647 = vmatprep.mubr.msk.f32.mxu1 %vm504_vm2, %v28608_v49 }
 0x800   : > { %22648 = vmatmul.mubr.msk.f32.gmra.mrb[44].mxu1 %vm504_vm2, %v28612_v1 }
 0x801   : > { %22650 = vmatprep.mubr.msk.f32.mxu1 %vm504_vm2, %v28616_v30 }
 0x804   : > { %22651 = vmatmul.mubr.msk.f32.gmra.mrb[46].mxu1 %vm504_vm2, %v28620_v59 }
 0x805   : > { %22653 = vmatprep.mubr.msk.f32.mxu1 %vm504_vm2, %v28624_v63 }
 0x808   : > { %22654 = vmatmul.mubr.msk.f32.gmra.mrb[48].mxu1 %vm504_vm2, %v28628_v18 }
 0x809   : > { %22656 = vmatprep.mubr.msk.f32.mxu1 %vm504_vm2, %v28632_v45 }
 0x80c   : > { %22657 = vmatmul.mubr.msk.f32.gmra.mrb[50].mxu1 %vm504_vm2, %v28636_v20 }
 0x80d   : > { %22659 = vmatprep.mubr.msk.f32.mxu1 %vm504_vm2, %v28640_v48 }
 0x810   : > { %22660 = vmatmul.mubr.msk.f32.gmra.mrb[52].mxu1 %vm504_vm2, %v28644_v47 }
 0x811   : > { %22662 = vmatprep.mubr.msk.f32.mxu1 %vm504_vm2, %v28648_v50 }
 0x814   : > { %22663 = vmatmul.mubr.msk.f32.gmra.mrb[54].mxu1 %vm504_vm2, %v28652_v5 }
 0x815   : > { %22665 = vmatprep.mubr.msk.f32.mxu1 %vm504_vm2, %v28656_v22 }
 0x818   : > { %22666 = vmatmul.mubr.msk.f32.gmra.mrb[56].mxu1 %vm504_vm2, %v28660_v17 }
 0x819   : > { %22668 = vmatprep.mubr.msk.f32.mxu1 %vm504_vm2, %v28664_v54 }
 0x81c   : > { %22669 = vmatmul.mubr.msk.f32.gmra.mrb[58].mxu1 %vm504_vm2, %v28668_v24 }
 0x81d   : > { %22671 = vmatprep.mubr.msk.f32.mxu1 %vm504_vm2, %v28672_v11 }
 0x820   : > { %22672 = vmatmul.mubr.msk.f32.gmra.mrb[60].mxu1 %vm504_vm2, %v28676_v34 }
 0x821   : > { %22674 = vmatprep.mubr.msk.f32.mxu1 %vm504_vm2, %v14448_v13 }
 0x824   : > { %22675 = vmatmul.mubr.msk.f32.gmra.mrb[62].mxu1 %vm504_vm2, %v14449_v31 }
 0x825   : > { %22679 = vmatprep.mubr.msk.f32.mxu1 %vm504_vm2, %v28568_v3  ;;  %v28917_v3 = vld [vmem:[#allocation3 + $0x1d1] sm:$0xff] }
 0x828   : > { %22680 = vmatmul.mubr.msk.f32.vlgmr.msra.gmra.mrb[32].mxu1 %vm504_vm2, %v28572_v62  ;;  %v28921_v62 = vld [vmem:[#allocation3 + $0x1e9] sm:$0xff] }
 0x829   : > { %22728 = vmatpush3.msra.mxu1 %v18837_v29  ;;  %22682 = vmatprep.mubr.msk.f32.mxu1 %vm504_vm2, %v28576_v9  ;;  %v28925_v9 = vld [vmem:[#allocation3 + $0x1f1] sm:$0xff] }
 0x82a   : > { %22777 = vmatprep.subr.mxu1 %v18870_v58  ;;  %v16132_v29 = vld [vmem:[%s25091_s12 + $0x90] sm:$0xff] }
 0x82c   : > { %22683 = vmatmul.mubr.msk.f32.gmra.mrb[34].mxu1 %vm504_vm2, %v28580_v26  ;;  %v16185_v26 = vld [vmem:[%s29362_s7] sm:$0xf] }
 0x82d   : > { %22685 = vmatprep.mubr.msk.f32.mxu1 %vm504_vm2, %v28584_v41  ;;  %v15225_v41 = vld [vmem:[#allocation3 + $0x209] sm:$0xff] }
 0x830   : > { %22686 = vmatmul.mubr.msk.f32.gmra.mrb[36].mxu1 %vm504_vm2, %v28588_v46  ;;  %v15226_v46 = vld [vmem:[#allocation3 + $0x211] sm:$0xff] }
 0x831   : > { %22688 = vmatprep.mubr.msk.f32.mxu1 %vm504_vm2, %v28592_v53  ;;  %v16542_v53 = vld [vmem:[%s29363_s8] sm:$0xf] }
 0x834   : > { %22689 = vmatmul.mubr.msk.f32.gmra.mrb[38].mxu1 %vm504_vm2, %v28596_v32  ;;  %v15227_v32 = vld [vmem:[#allocation3 + $0x229] sm:$0xff] }
 0x835   : > { %22691 = vmatprep.mubr.msk.f32.mxu1 %vm504_vm2, %v28600_v60  ;;  %v15228_v60 = vld [vmem:[#allocation3 + $0x231] sm:$0xff] }
 0x838   : > { %22692 = vmatmul.mubr.msk.f32.gmra.mrb[40].mxu1 %vm504_vm2, %v28604_v21  ;;  %v16114_v21 = vld [vmem:[%s25091_s12] sm:$0xff] }
 0x839   : > { %22694 = vmatprep.mubr.msk.f32.mxu1 %vm504_vm2, %v28608_v49  ;;  %v16115_v49 = vld [vmem:[%s25091_s12 + $0x8] sm:$0xff] }
 0x83c   : > { %22695 = vmatmul.mubr.msk.f32.gmra.mrb[42].mxu1 %vm504_vm2, %v28612_v1  ;;  %v16116_v1 = vld [vmem:[%s25091_s12 + $0x10] sm:$0xff] }
 0x83d   : > { %22697 = vmatprep.mubr.msk.f32.mxu1 %vm504_vm2, %v28616_v30  ;;  %v29066_v30 = vld [vmem:[%s29364_s9] sm:$0xff] }
 0x840   : > { %22698 = vmatmul.mubr.msk.f32.gmra.mrb[44].mxu1 %vm504_vm2, %v28620_v59  ;;  %v16117_v59 = vld [vmem:[%s25091_s12 + $0x18] sm:$0xff] }
 0x841   : > { %22700 = vmatprep.mubr.msk.f32.mxu1 %vm504_vm2, %v28624_v63  ;;  %v16118_v63 = vld [vmem:[%s25091_s12 + $0x20] sm:$0xff] }
 0x844   : > { %22701 = vmatmul.mubr.msk.f32.gmra.mrb[46].mxu1 %vm504_vm2, %v28628_v18  ;;  %v16119_v18 = vld [vmem:[%s25091_s12 + $0x28] sm:$0xff] }
 0x845   : > { %22703 = vmatprep.mubr.msk.f32.mxu1 %vm504_vm2, %v28632_v45  ;;  %v16120_v45 = vld [vmem:[%s25091_s12 + $0x30] sm:$0xff] }
 0x848   : > { %22704 = vmatmul.mubr.msk.f32.gmra.mrb[48].mxu1 %vm504_vm2, %v28636_v20  ;;  %v16121_v20 = vld [vmem:[%s25091_s12 + $0x38] sm:$0xff] }
 0x849   : > { %22706 = vmatprep.mubr.msk.f32.mxu1 %vm504_vm2, %v28640_v48  ;;  %v16122_v48 = vld [vmem:[%s25091_s12 + $0x40] sm:$0xff] }
 0x84c   : > { %22707 = vmatmul.mubr.msk.f32.gmra.mrb[50].mxu1 %vm504_vm2, %v28644_v47  ;;  %v16123_v47 = vld [vmem:[%s25091_s12 + $0x48] sm:$0xff] }
 0x84d   : > { %22709 = vmatprep.mubr.msk.f32.mxu1 %vm504_vm2, %v28648_v50  ;;  %v16124_v50 = vld [vmem:[%s25091_s12 + $0x50] sm:$0xff] }
 0x850   : > { %22710 = vmatmul.mubr.msk.f32.gmra.mrb[52].mxu1 %vm504_vm2, %v28652_v5  ;;  %v16125_v5 = vld [vmem:[%s25091_s12 + $0x58] sm:$0xff] }
 0x851   : > { %22712 = vmatprep.mubr.msk.f32.mxu1 %vm504_vm2, %v28656_v22  ;;  %v16126_v22 = vld [vmem:[%s25091_s12 + $0x60] sm:$0xff] }
 0x854   : > { %22713 = vmatmul.mubr.msk.f32.gmra.mrb[54].mxu1 %vm504_vm2, %v28660_v17  ;;  %v16127_v17 = vld [vmem:[%s25091_s12 + $0x68] sm:$0xff] }
 0x855   : > { %22715 = vmatprep.mubr.msk.f32.mxu1 %vm504_vm2, %v28664_v54  ;;  %v16128_v54 = vld [vmem:[%s25091_s12 + $0x70] sm:$0xff] }
 0x858   : > { %22716 = vmatmul.mubr.msk.f32.gmra.mrb[56].mxu1 %vm504_vm2, %v28668_v24  ;;  %v16129_v24 = vld [vmem:[%s25091_s12 + $0x78] sm:$0xff] }
 0x859   : > { %22718 = vmatprep.mubr.msk.f32.mxu1 %vm504_vm2, %v28672_v11  ;;  %v16130_v11 = vld [vmem:[%s25091_s12 + $0x80] sm:$0xff] }
 0x85c   : > { %22719 = vmatmul.mubr.msk.f32.gmra.mrb[58].mxu1 %vm504_vm2, %v28676_v34  ;;  %v16131_v34 = vld [vmem:[%s25091_s12 + $0x88] sm:$0xff] }
 0x85d   : > { %22721 = vmatprep.mubr.msk.f32.mxu1 %vm504_vm2, %v14448_v13  ;;  %v16133_v13 = vld [vmem:[%s25091_s12 + $0x98] sm:$0xff] }
 0x860   : > { %22722 = vmatmul.mubr.msk.f32.gmra.mrb[60].mxu1 %vm504_vm2, %v14449_v31  ;;  %v16134_v31 = vld [vmem:[%s25091_s12 + $0xa0] sm:$0xff] }
 0x861   : > { %22724 = vmatprep.mubr.msk.f32.mxu1 %vm504_vm2, %v14836_v14  ;;  %v16136_v14 = vld [vmem:[%s25091_s12 + $0xb0] sm:$0xff] }
 0x864   : > { %22725 = vmatmul.mubr.msk.f32.gmra.mrb[62].mxu1 %vm504_vm2, %v14837_v12  ;;  %v16137_v12 = vld [vmem:[%s25091_s12 + $0xb8] sm:$0xff] }
 0x865   : > { %22729 = vmatprep.mubr.msk.f32.mxu1 %vm504_vm2, %v15193_v7  ;;  %v16138_v7 = vld [vmem:[%s25091_s12 + $0xc0] sm:$0xff] }
 0x868   : > { %22730 = vmatmul.mubr.msk.f32.vlgmr.msra.gmra.mrb[32].mxu1 %vm504_vm2, %v15194_v51  ;;  %v16139_v51 = vld [vmem:[%s25091_s12 + $0xc8] sm:$0xff] }
 0x869   : > { %22778 = vmatpush3.msra.mxu1 %v18870_v58  ;;  %22732 = vmatprep.mubr.msk.f32.mxu1 %vm504_vm2, %v15195_v56  ;;  %v16135_v58 = vld [vmem:[%s25091_s12 + $0xa8] sm:$0xff] }
 0x86a   : > { %22827 = vmatprep.subr.mxu1 %v28811_v36 }
 0x86c   : > { %22733 = vmatmul.mubr.msk.f32.gmra.mrb[34].mxu1 %vm504_vm2, %v15196_v57 }
 0x86d   : > { %22735 = vmatprep.mubr.msk.f32.mxu1 %vm504_vm2, %v28817_v52 }
 0x870   : > { %22736 = vmatmul.mubr.msk.f32.gmra.mrb[36].mxu1 %vm504_vm2, %v28821_v27 }
 0x871   : > { %22738 = vmatprep.mubr.msk.f32.mxu1 %vm504_vm2, %v28825_v28 }
 0x874   : > { %22739 = vmatmul.mubr.msk.f32.gmra.mrb[38].mxu1 %vm504_vm2, %v28829_v8 }
 0x875   : > { %22741 = vmatprep.mubr.msk.f32.mxu1 %vm504_vm2, %v28833_v10 }
 0x878   : > { %22742 = vmatmul.mubr.msk.f32.gmra.mrb[40].mxu1 %vm504_vm2, %v28837_v23 }
 0x879   : > { %22744 = vmatprep.mubr.msk.f32.mxu1 %vm504_vm2, %v28841_v37 }
 0x87c   : > { %22745 = vmatmul.mubr.msk.f32.gmra.mrb[42].mxu1 %vm504_vm2, %v28845_v35 }
 0x87d   : > { %22747 = vmatprep.mubr.msk.f32.mxu1 %vm504_vm2, %v28849_v16 }
 0x880   : > { %22748 = vmatmul.mubr.msk.f32.gmra.mrb[44].mxu1 %vm504_vm2, %v28853_v4 }
 0x881   : > { %22750 = vmatprep.mubr.msk.f32.mxu1 %vm504_vm2, %v28857_v43 }
 0x884   : > { %22751 = vmatmul.mubr.msk.f32.gmra.mrb[46].mxu1 %vm504_vm2, %v28861_v33 }
 0x885   : > { %22753 = vmatprep.mubr.msk.f32.mxu1 %vm504_vm2, %v28865_v44 }
 0x888   : > { %22754 = vmatmul.mubr.msk.f32.gmra.mrb[48].mxu1 %vm504_vm2, %v28869_v42 }
 0x889   : > { %22756 = vmatprep.mubr.msk.f32.mxu1 %vm504_vm2, %v28873_v61 }
 0x88c   : > { %22757 = vmatmul.mubr.msk.f32.gmra.mrb[50].mxu1 %vm504_vm2, %v28877_v25 }
 0x88d   : > { %22759 = vmatprep.mubr.msk.f32.mxu1 %vm504_vm2, %v28881_v19 }
 0x890   : > { %22760 = vmatmul.mubr.msk.f32.gmra.mrb[52].mxu1 %vm504_vm2, %v28885_v39 }
 0x891   : > { %22762 = vmatprep.mubr.msk.f32.mxu1 %vm504_vm2, %v28889_v0 }
 0x894   : > { %22763 = vmatmul.mubr.msk.f32.gmra.mrb[54].mxu1 %vm504_vm2, %v28893_v38 }
 0x895   : > { %22765 = vmatprep.mubr.msk.f32.mxu1 %vm504_vm2, %v28897_v6 }
 0x898   : > { %22766 = vmatmul.mubr.msk.f32.gmra.mrb[56].mxu1 %vm504_vm2, %v28901_v40 }
 0x899   : > { %22768 = vmatprep.mubr.msk.f32.mxu1 %vm504_vm2, %v28905_v2 }
 0x89c   : > { %22769 = vmatmul.mubr.msk.f32.gmra.mrb[58].mxu1 %vm504_vm2, %v28909_v15 }
 0x89d   : > { %22771 = vmatprep.mubr.msk.f32.mxu1 %vm504_vm2, %v28913_v55 }
 0x8a0   : > { %22772 = vmatmul.mubr.msk.f32.gmra.mrb[60].mxu1 %vm504_vm2, %v28917_v3 }
 0x8a1   : > { %22774 = vmatprep.mubr.msk.f32.mxu1 %vm504_vm2, %v28921_v62 }
 0x8a4   : > { %22775 = vmatmul.mubr.msk.f32.gmra.mrb[62].mxu1 %vm504_vm2, %v28925_v9 }
 0x8a5   : > { %22779 = vmatprep.mubr.msk.f32.mxu1 %vm504_vm2, %v15195_v56  ;;  %v16141_v56 = vld [vmem:[%s25091_s12 + $0xd8] sm:$0xff] }
 0x8a8   : > { %22780 = vmatmul.mubr.msk.f32.vlgmr.msra.gmra.mrb[32].mxu1 %vm504_vm2, %v15196_v57  ;;  %v16142_v57 = vld [vmem:[%s25091_s12 + $0xe0] sm:$0xff] }
 0x8a9   : > { %22828 = vmatpush3.msra.mxu1 %v28811_v36  ;;  %22782 = vmatprep.mubr.msk.f32.mxu1 %vm504_vm2, %v28817_v52  ;;  %v16140_v36 = vld [vmem:[%s25091_s12 + $0xd0] sm:$0xff] }
 0x8aa   : > { %22877 = vmatprep.subr.msk.mxu1 %vm752_vm0, %v16185_v26 }
 0x8ac   : > { %22783 = vmatmul.mubr.msk.f32.gmra.mrb[34].mxu1 %vm504_vm2, %v28821_v27 }
 0x8ad   : > { %22785 = vmatprep.mubr.msk.f32.mxu1 %vm504_vm2, %v28825_v28 }
 0x8b0   : > { %22786 = vmatmul.mubr.msk.f32.gmra.mrb[36].mxu1 %vm504_vm2, %v28829_v8 }
 0x8b1   : > { %22788 = vmatprep.mubr.msk.f32.mxu1 %vm504_vm2, %v28833_v10 }
 0x8b4   : > { %22789 = vmatmul.mubr.msk.f32.gmra.mrb[38].mxu1 %vm504_vm2, %v28837_v23 }
 0x8b5   : > { %22791 = vmatprep.mubr.msk.f32.mxu1 %vm504_vm2, %v28841_v37 }
 0x8b8   : > { %22792 = vmatmul.mubr.msk.f32.gmra.mrb[40].mxu1 %vm504_vm2, %v28845_v35 }
 0x8b9   : > { %22794 = vmatprep.mubr.msk.f32.mxu1 %vm504_vm2, %v28849_v16 }
 0x8bc   : > { %22795 = vmatmul.mubr.msk.f32.gmra.mrb[42].mxu1 %vm504_vm2, %v28853_v4 }
 0x8bd   : > { %22797 = vmatprep.mubr.msk.f32.mxu1 %vm504_vm2, %v28857_v43 }
 0x8c0   : > { %22798 = vmatmul.mubr.msk.f32.gmra.mrb[44].mxu1 %vm504_vm2, %v28861_v33 }
 0x8c1   : > { %22800 = vmatprep.mubr.msk.f32.mxu1 %vm504_vm2, %v28865_v44 }
 0x8c4   : > { %22801 = vmatmul.mubr.msk.f32.gmra.mrb[46].mxu1 %vm504_vm2, %v28869_v42 }
 0x8c5   : > { %22803 = vmatprep.mubr.msk.f32.mxu1 %vm504_vm2, %v28873_v61 }
 0x8c8   : > { %22804 = vmatmul.mubr.msk.f32.gmra.mrb[48].mxu1 %vm504_vm2, %v28877_v25 }
 0x8c9   : > { %22806 = vmatprep.mubr.msk.f32.mxu1 %vm504_vm2, %v28881_v19 }
 0x8cc   : > { %22807 = vmatmul.mubr.msk.f32.gmra.mrb[50].mxu1 %vm504_vm2, %v28885_v39 }
 0x8cd   : > { %22809 = vmatprep.mubr.msk.f32.mxu1 %vm504_vm2, %v28889_v0 }
 0x8d0   : > { %22810 = vmatmul.mubr.msk.f32.gmra.mrb[52].mxu1 %vm504_vm2, %v28893_v38 }
 0x8d1   : > { %22812 = vmatprep.mubr.msk.f32.mxu1 %vm504_vm2, %v28897_v6 }
 0x8d4   : > { %22813 = vmatmul.mubr.msk.f32.gmra.mrb[54].mxu1 %vm504_vm2, %v28901_v40 }
 0x8d5   : > { %22815 = vmatprep.mubr.msk.f32.mxu1 %vm504_vm2, %v28905_v2 }
 0x8d8   : > { %22816 = vmatmul.mubr.msk.f32.gmra.mrb[56].mxu1 %vm504_vm2, %v28909_v15 }
 0x8d9   : > { %22818 = vmatprep.mubr.msk.f32.mxu1 %vm504_vm2, %v28913_v55 }
 0x8dc   : > { %22819 = vmatmul.mubr.msk.f32.gmra.mrb[58].mxu1 %vm504_vm2, %v28917_v3 }
 0x8dd   : > { %22821 = vmatprep.mubr.msk.f32.mxu1 %vm504_vm2, %v28921_v62 }
 0x8e0   : > { %22822 = vmatmul.mubr.msk.f32.gmra.mrb[60].mxu1 %vm504_vm2, %v28925_v9 }
 0x8e1   : > { %22824 = vmatprep.mubr.msk.f32.mxu1 %vm504_vm2, %v15225_v41 }
 0x8e4   : > { %22825 = vmatmul.mubr.msk.f32.gmra.mrb[62].mxu1 %vm504_vm2, %v15226_v46 }
 0x8e5   : > { %22829 = vmatprep.mubr.msk.f32.mxu1 %vm504_vm2, %v28817_v52  ;;  %v16143_v52 = vld [vmem:[%s25091_s12 + $0xe8] sm:$0xff] }
 0x8e8   : > { %22830 = vmatmul.mubr.msk.f32.vlgmr.msra.gmra.mrb[32].mxu1 %vm504_vm2, %v28821_v27  ;;  %v16144_v27 = vld [vmem:[%s25091_s12 + $0xf0] sm:$0xff] }
 0x8e9   : > { %22832 = vmatprep.mubr.msk.f32.mxu1 %vm504_vm2, %v28825_v28  ;;  %22878 = vmatpush3.msk.msra.mxu1 %vm752_vm0, %v16185_v26  ;;  %v16145_v28 = vld [vmem:[%s25091_s12 + $0xf8] sm:$0xff]  ;;  %v16171_v26 = vld [vmem:[%s29131_s22 + $0xc8] sm:$0xff]  ;;  %s17320_s12 = scalar_lea.sflag [#allocation5], %s392_s29 }
 0x8ea   : > { %22927 = vmatprep.subr.msk.mxu1 %vm752_vm0, %v16542_v53 }
 0x8ec   : > { %22833 = vmatmul.mubr.msk.f32.gmra.mrb[34].mxu1 %vm504_vm2, %v28829_v8  ;;  %v16146_v8 = vld [vmem:[%s29131_s22] sm:$0xff] }
 0x8ed   : > { %22835 = vmatprep.mubr.msk.f32.mxu1 %vm504_vm2, %v28833_v10  ;;  %v16147_v10 = vld [vmem:[%s29131_s22 + $0x8] sm:$0xff] }
 0x8f0   : > { %22836 = vmatmul.mubr.msk.f32.gmra.mrb[36].mxu1 %vm504_vm2, %v28837_v23  ;;  %v16148_v23 = vld [vmem:[%s29131_s22 + $0x10] sm:$0xff] }
 0x8f1   : > { %22838 = vmatprep.mubr.msk.f32.mxu1 %vm504_vm2, %v28841_v37  ;;  %v16149_v37 = vld [vmem:[%s29131_s22 + $0x18] sm:$0xff] }
 0x8f4   : > { %22839 = vmatmul.mubr.msk.f32.gmra.mrb[38].mxu1 %vm504_vm2, %v28845_v35  ;;  %v16150_v35 = vld [vmem:[%s29131_s22 + $0x20] sm:$0xff] }
 0x8f5   : > { %22841 = vmatprep.mubr.msk.f32.mxu1 %vm504_vm2, %v28849_v16  ;;  %v16151_v16 = vld [vmem:[%s29131_s22 + $0x28] sm:$0xff] }
 0x8f8   : > { %22842 = vmatmul.mubr.msk.f32.gmra.mrb[40].mxu1 %vm504_vm2, %v28853_v4  ;;  %v16152_v4 = vld [vmem:[%s29131_s22 + $0x30] sm:$0xff] }
 0x8f9   : > { %22844 = vmatprep.mubr.msk.f32.mxu1 %vm504_vm2, %v28857_v43  ;;  %v16153_v43 = vld [vmem:[%s29131_s22 + $0x38] sm:$0xff] }
 0x8fc   : > { %22845 = vmatmul.mubr.msk.f32.gmra.mrb[42].mxu1 %vm504_vm2, %v28861_v33  ;;  %v16154_v33 = vld [vmem:[%s29131_s22 + $0x40] sm:$0xff] }
 0x8fd   : > { %22847 = vmatprep.mubr.msk.f32.mxu1 %vm504_vm2, %v28865_v44  ;;  %v16155_v44 = vld [vmem:[%s29131_s22 + $0x48] sm:$0xff] }
 0x900   : > { %22848 = vmatmul.mubr.msk.f32.gmra.mrb[44].mxu1 %vm504_vm2, %v28869_v42  ;;  %v16156_v42 = vld [vmem:[%s29131_s22 + $0x50] sm:$0xff] }
 0x901   : > { %22850 = vmatprep.mubr.msk.f32.mxu1 %vm504_vm2, %v28873_v61  ;;  %v16157_v61 = vld [vmem:[%s29131_s22 + $0x58] sm:$0xff] }
 0x904   : > { %22851 = vmatmul.mubr.msk.f32.gmra.mrb[46].mxu1 %vm504_vm2, %v28877_v25  ;;  %v16158_v25 = vld [vmem:[%s29131_s22 + $0x60] sm:$0xff] }
 0x905   : > { %22853 = vmatprep.mubr.msk.f32.mxu1 %vm504_vm2, %v28881_v19  ;;  %v16159_v19 = vld [vmem:[%s29131_s22 + $0x68] sm:$0xff] }
 0x908   : > { %22854 = vmatmul.mubr.msk.f32.gmra.mrb[48].mxu1 %vm504_vm2, %v28885_v39  ;;  %v16160_v39 = vld [vmem:[%s29131_s22 + $0x70] sm:$0xff] }
 0x909   : > { %22856 = vmatprep.mubr.msk.f32.mxu1 %vm504_vm2, %v28889_v0  ;;  %v16161_v0 = vld [vmem:[%s29131_s22 + $0x78] sm:$0xff] }
 0x90c   : > { %22857 = vmatmul.mubr.msk.f32.gmra.mrb[50].mxu1 %vm504_vm2, %v28893_v38  ;;  %v16162_v38 = vld [vmem:[%s29131_s22 + $0x80] sm:$0xff] }
 0x90d   : > { %22859 = vmatprep.mubr.msk.f32.mxu1 %vm504_vm2, %v28897_v6  ;;  %v16163_v6 = vld [vmem:[%s29131_s22 + $0x88] sm:$0xff] }
 0x910   : > { %22860 = vmatmul.mubr.msk.f32.gmra.mrb[52].mxu1 %vm504_vm2, %v28901_v40  ;;  %v16164_v40 = vld [vmem:[%s29131_s22 + $0x90] sm:$0xff] }
 0x911   : > { %22862 = vmatprep.mubr.msk.f32.mxu1 %vm504_vm2, %v28905_v2  ;;  %v16165_v2 = vld [vmem:[%s29131_s22 + $0x98] sm:$0xff] }
 0x914   : > { %22863 = vmatmul.mubr.msk.f32.gmra.mrb[54].mxu1 %vm504_vm2, %v28909_v15  ;;  %v16166_v15 = vld [vmem:[%s29131_s22 + $0xa0] sm:$0xff] }
 0x915   : > { %22865 = vmatprep.mubr.msk.f32.mxu1 %vm504_vm2, %v28913_v55  ;;  %v16167_v55 = vld [vmem:[%s29131_s22 + $0xa8] sm:$0xff] }
 0x918   : > { %22866 = vmatmul.mubr.msk.f32.gmra.mrb[56].mxu1 %vm504_vm2, %v28917_v3  ;;  %v16168_v3 = vld [vmem:[%s29131_s22 + $0xb0] sm:$0xff] }
 0x919   : > { %22868 = vmatprep.mubr.msk.f32.mxu1 %vm504_vm2, %v28921_v62  ;;  %v16169_v62 = vld [vmem:[%s29131_s22 + $0xb8] sm:$0xff] }
 0x91c   : > { %22869 = vmatmul.mubr.msk.f32.gmra.mrb[58].mxu1 %vm504_vm2, %v28925_v9  ;;  %v16170_v9 = vld [vmem:[%s29131_s22 + $0xc0] sm:$0xff] }
 0x91d   : > { %22871 = vmatprep.mubr.msk.f32.mxu1 %vm504_vm2, %v15225_v41  ;;  %v16172_v41 = vld [vmem:[%s29131_s22 + $0xd0] sm:$0xff] }
 0x920   : > { %22872 = vmatmul.mubr.msk.f32.gmra.mrb[60].mxu1 %vm504_vm2, %v15226_v46  ;;  %v16173_v46 = vld [vmem:[%s29131_s22 + $0xd8] sm:$0xff] }
 0x921   : > { %22874 = vmatprep.mubr.msk.f32.mxu1 %vm504_vm2, %v15227_v32  ;;  %v16175_v32 = vld [vmem:[%s29131_s22 + $0xe8] sm:$0xff] }
 0x924   : > { %22875 = vmatmul.mubr.msk.f32.gmra.mrb[62].mxu1 %vm504_vm2, %v15228_v60  ;;  %v16176_v60 = vld [vmem:[%s29131_s22 + $0xf0] sm:$0xff] }
 0x925   : > { %22879 = vmatprep.mubr.msk.f32.mxu1 %vm405_vm1, %v16114_v21  ;;  %v16177_v21 = vld [vmem:[%s29131_s22 + $0xf8] sm:$0xff] }
 0x928   : > { %22880 = vmatmul.mubr.msk.f32.vlgmr.msra.gmra.mrb[64].mxu1 %vm405_vm1, %v16115_v49  ;;  %v29205_v49 = vld [vmem:[%s29361_s6] ss:$0 sm:$0xff] }
 0x929   : > { %22928 = vmatpush3.msk.msra.mxu1 %vm752_vm0, %v16542_v53  ;;  %22882 = vmatprep.mubr.msk.f32.mxu1 %vm405_vm1, %v16116_v1  ;;  %v16174_v53 = vld [vmem:[%s29131_s22 + $0xe0] sm:$0xff] }
 0x92a   : > { %22977 = vmatprep.subr.mxu1 %v29066_v30 }
 0x92c   : > { %22883 = vmatmul.mubr.msk.f32.gmra.mrb[66].mxu1 %vm405_vm1, %v16117_v59 }
 0x92d   : > { %22885 = vmatprep.mubr.msk.f32.mxu1 %vm405_vm1, %v16118_v63 }
 0x930   : > { %22886 = vmatmul.mubr.msk.f32.gmra.mrb[68].mxu1 %vm405_vm1, %v16119_v18 }
 0x931   : > { %22888 = vmatprep.mubr.msk.f32.mxu1 %vm405_vm1, %v16120_v45 }
 0x934   : > { %22889 = vmatmul.mubr.msk.f32.gmra.mrb[70].mxu1 %vm405_vm1, %v16121_v20 }
 0x935   : > { %22891 = vmatprep.mubr.msk.f32.mxu1 %vm405_vm1, %v16122_v48 }
 0x938   : > { %22892 = vmatmul.mubr.msk.f32.gmra.mrb[72].mxu1 %vm405_vm1, %v16123_v47 }
 0x939   : > { %22894 = vmatprep.mubr.msk.f32.mxu1 %vm405_vm1, %v16124_v50 }
 0x93c   : > { %22895 = vmatmul.mubr.msk.f32.gmra.mrb[74].mxu1 %vm405_vm1, %v16125_v5 }
 0x93d   : > { %22897 = vmatprep.mubr.msk.f32.mxu1 %vm405_vm1, %v16126_v22 }
 0x940   : > { %22898 = vmatmul.mubr.msk.f32.gmra.mrb[76].mxu1 %vm405_vm1, %v16127_v17 }
 0x941   : > { %22900 = vmatprep.mubr.msk.f32.mxu1 %vm405_vm1, %v16128_v54 }
 0x944   : > { %22901 = vmatmul.mubr.msk.f32.gmra.mrb[78].mxu1 %vm405_vm1, %v16129_v24 }
 0x945   : > { %22903 = vmatprep.mubr.msk.f32.mxu1 %vm405_vm1, %v16130_v11 }
 0x948   : > { %22904 = vmatmul.mubr.msk.f32.gmra.mrb[80].mxu1 %vm405_vm1, %v16131_v34 }
 0x949   : > { %22906 = vmatprep.mubr.msk.f32.mxu1 %vm405_vm1, %v16132_v29 }
 0x94c   : > { %22907 = vmatmul.mubr.msk.f32.gmra.mrb[82].mxu1 %vm405_vm1, %v16133_v13 }
 0x94d   : > { %22909 = vmatprep.mubr.msk.f32.mxu1 %vm405_vm1, %v16134_v31 }
 0x950   : > { %22910 = vmatmul.mubr.msk.f32.gmra.mrb[84].mxu1 %vm405_vm1, %v16135_v58 }
 0x951   : > { %22912 = vmatprep.mubr.msk.f32.mxu1 %vm405_vm1, %v16136_v14 }
 0x954   : > { %22913 = vmatmul.mubr.msk.f32.gmra.mrb[86].mxu1 %vm405_vm1, %v16137_v12 }
 0x955   : > { %22915 = vmatprep.mubr.msk.f32.mxu1 %vm405_vm1, %v16138_v7 }
 0x958   : > { %22916 = vmatmul.mubr.msk.f32.gmra.mrb[88].mxu1 %vm405_vm1, %v16139_v51 }
 0x959   : > { %22918 = vmatprep.mubr.msk.f32.mxu1 %vm405_vm1, %v16140_v36 }
 0x95c   : > { %22919 = vmatmul.mubr.msk.f32.gmra.mrb[90].mxu1 %vm405_vm1, %v16141_v56 }
 0x95d   : > { %22921 = vmatprep.mubr.msk.f32.mxu1 %vm405_vm1, %v16142_v57 }
 0x960   : > { %22922 = vmatmul.mubr.msk.f32.gmra.mrb[92].mxu1 %vm405_vm1, %v16143_v52 }
 0x961   : > { %22924 = vmatprep.mubr.msk.f32.mxu1 %vm405_vm1, %v16144_v27 }
 0x964   : > { %22925 = vmatmul.mubr.msk.f32.gmra.mrb[94].mxu1 %vm405_vm1, %v16145_v28 }
 0x965   : > { %22929 = vmatprep.mubr.msk.f32.mxu1 %vm405_vm1, %v16146_v8 }
 0x968   : > { %22930 = vmatmul.mubr.msk.f32.vlgmr.msra.gmra.mrb[64].mxu1 %vm405_vm1, %v16147_v10 }
 0x969   : > { %22978 = vmatpush3.msra.mxu1 %v29066_v30  ;;  %22932 = vmatprep.mubr.msk.f32.mxu1 %vm405_vm1, %v16148_v23 }
 0x96c   : > { %22933 = vmatmul.mubr.msk.f32.gmra.mrb[66].mxu1 %vm405_vm1, %v16149_v37 }
 0x96d   : > { %22935 = vmatprep.mubr.msk.f32.mxu1 %vm405_vm1, %v16150_v35 }
 0x970   : > { %22936 = vmatmul.mubr.msk.f32.gmra.mrb[68].mxu1 %vm405_vm1, %v16151_v16 }
 0x971   : > { %22938 = vmatprep.mubr.msk.f32.mxu1 %vm405_vm1, %v16152_v4 }
 0x974   : > { %22939 = vmatmul.mubr.msk.f32.gmra.mrb[70].mxu1 %vm405_vm1, %v16153_v43 }
 0x975   : > { %22941 = vmatprep.mubr.msk.f32.mxu1 %vm405_vm1, %v16154_v33 }
 0x978   : > { %22942 = vmatmul.mubr.msk.f32.gmra.mrb[72].mxu1 %vm405_vm1, %v16155_v44 }
 0x979   : > { %22944 = vmatprep.mubr.msk.f32.mxu1 %vm405_vm1, %v16156_v42 }
 0x97c   : > { %22945 = vmatmul.mubr.msk.f32.gmra.mrb[74].mxu1 %vm405_vm1, %v16157_v61 }
 0x97d   : > { %22947 = vmatprep.mubr.msk.f32.mxu1 %vm405_vm1, %v16158_v25 }
 0x980   : > { %22948 = vmatmul.mubr.msk.f32.gmra.mrb[76].mxu1 %vm405_vm1, %v16159_v19 }
 0x981   : > { %22950 = vmatprep.mubr.msk.f32.mxu1 %vm405_vm1, %v16160_v39 }
 0x984   : > { %22951 = vmatmul.mubr.msk.f32.gmra.mrb[78].mxu1 %vm405_vm1, %v16161_v0 }
 0x985   : > { %22953 = vmatprep.mubr.msk.f32.mxu1 %vm405_vm1, %v16162_v38 }
 0x988   : > { %22954 = vmatmul.mubr.msk.f32.gmra.mrb[80].mxu1 %vm405_vm1, %v16163_v6 }
 0x989   : > { %22956 = vmatprep.mubr.msk.f32.mxu1 %vm405_vm1, %v16164_v40 }
 0x98c   : > { %22957 = vmatmul.mubr.msk.f32.gmra.mrb[82].mxu1 %vm405_vm1, %v16165_v2 }
 0x98d   : > { %22959 = vmatprep.mubr.msk.f32.mxu1 %vm405_vm1, %v16166_v15 }
 0x990   : > { %22960 = vmatmul.mubr.msk.f32.gmra.mrb[84].mxu1 %vm405_vm1, %v16167_v55 }
 0x991   : > { %22962 = vmatprep.mubr.msk.f32.mxu1 %vm405_vm1, %v16168_v3 }
 0x994   : > { %22963 = vmatmul.mubr.msk.f32.gmra.mrb[86].mxu1 %vm405_vm1, %v16169_v62 }
 0x995   : > { %22965 = vmatprep.mubr.msk.f32.mxu1 %vm405_vm1, %v16170_v9 }
 0x998   : > { %22966 = vmatmul.mubr.msk.f32.gmra.mrb[88].mxu1 %vm405_vm1, %v16171_v26 }
 0x999   : > { %22968 = vmatprep.mubr.msk.f32.mxu1 %vm405_vm1, %v16172_v41 }
 0x99c   : > { %22969 = vmatmul.mubr.msk.f32.gmra.mrb[90].mxu1 %vm405_vm1, %v16173_v46 }
 0x99d   : > { %22971 = vmatprep.mubr.msk.f32.mxu1 %vm405_vm1, %v16174_v53 }
 0x9a0   : > { %22972 = vmatmul.mubr.msk.f32.gmra.mrb[92].mxu1 %vm405_vm1, %v16175_v32 }
 0x9a1   : > { %22974 = vmatprep.mubr.msk.f32.mxu1 %vm405_vm1, %v16176_v60 }
 0x9a4   : > { %22975 = vmatmul.mubr.msk.f32.gmra.mrb[94].mxu1 %vm405_vm1, %v16177_v21 }
 0x9bb   : > { %v22831_v1 = vpop.f32.mrb[32].mxu1 }
 0x9bc   : > { %v15923_v30 = vpop.f32.mrb[33].mxu1  ;;  %v23091_v63 = vadd.f32 %v22831_v1, %v29205_v49 }
 0x9bd   : > { %v23092_v59 = vadd.f32 %v29205_v49, %v15923_v30  ;;  %v29274_v30 = vld [vmem:[%s29365_s10] ss:$0 sm:$0xff] }
 0x9bf   : > { %v22834_v18 = vpop.f32.mrb[34].mxu1  ;;  %22979 = vmatprep.mubr.msk.f32.mxu1 %vm504_vm2, %v23092_v59 }
 0x9c0   : > { %v15933_v45 = vpop.f32.mrb[35].mxu1  ;;  %22980 = vmatmul.mubr.msk.f32.vlgmr.msra.gmra.mrb[64].mxu1 %vm504_vm2, %v23091_v63  ;;  %v23093_v48 = vadd.f32 %v22834_v18, %v29205_v49 }
 0x9c1   : > { %v23094_v20 = vadd.f32 %v29205_v49, %v15933_v45 }
 0x9c3   : > { %v22837_v47 = vpop.f32.mrb[36].mxu1  ;;  %22982 = vmatprep.mubr.msk.f32.mxu1 %vm504_vm2, %v23094_v20 }
 0x9c4   : > { %v15943_v50 = vpop.f32.mrb[37].mxu1  ;;  %22983 = vmatmul.mubr.msk.f32.gmra.mrb[66].mxu1 %vm504_vm2, %v23093_v48  ;;  %v23095_v22 = vadd.f32 %v22837_v47, %v29205_v49 }
 0x9c5   : > { %v23096_v5 = vadd.f32 %v29205_v49, %v15943_v50 }
 0x9c7   : > { %v22840_v17 = vpop.f32.mrb[38].mxu1  ;;  %22985 = vmatprep.mubr.msk.f32.mxu1 %vm504_vm2, %v23096_v5 }
 0x9c8   : > { %v15953_v54 = vpop.f32.mrb[39].mxu1  ;;  %22986 = vmatmul.mubr.msk.f32.gmra.mrb[68].mxu1 %vm504_vm2, %v23095_v22  ;;  %v23097_v11 = vadd.f32 %v22840_v17, %v29205_v49 }
 0x9c9   : > { %v23098_v24 = vadd.f32 %v29205_v49, %v15953_v54 }
 0x9cb   : > { %v22843_v34 = vpop.f32.mrb[40].mxu1  ;;  %22988 = vmatprep.mubr.msk.f32.mxu1 %vm504_vm2, %v23098_v24 }
 0x9cc   : > { %v15963_v29 = vpop.f32.mrb[41].mxu1  ;;  %22989 = vmatmul.mubr.msk.f32.gmra.mrb[70].mxu1 %vm504_vm2, %v23097_v11  ;;  %v23099_v31 = vadd.f32 %v22843_v34, %v29205_v49 }
 0x9cd   : > { %v23100_v13 = vadd.f32 %v29205_v49, %v15963_v29 }
 0x9cf   : > { %v22846_v58 = vpop.f32.mrb[42].mxu1  ;;  %22991 = vmatprep.mubr.msk.f32.mxu1 %vm504_vm2, %v23100_v13 }
 0x9d0   : > { %v15973_v14 = vpop.f32.mrb[43].mxu1  ;;  %22992 = vmatmul.mubr.msk.f32.gmra.mrb[72].mxu1 %vm504_vm2, %v23099_v31  ;;  %v23101_v7 = vadd.f32 %v22846_v58, %v29205_v49 }
 0x9d1   : > { %v23102_v12 = vadd.f32 %v29205_v49, %v15973_v14 }
 0x9d3   : > { %v22849_v51 = vpop.f32.mrb[44].mxu1  ;;  %22994 = vmatprep.mubr.msk.f32.mxu1 %vm504_vm2, %v23102_v12 }
 0x9d4   : > { %v15983_v36 = vpop.f32.mrb[45].mxu1  ;;  %22995 = vmatmul.mubr.msk.f32.gmra.mrb[74].mxu1 %vm504_vm2, %v23101_v7  ;;  %v23103_v57 = vadd.f32 %v22849_v51, %v29205_v49 }
 0x9d5   : > { %v23104_v56 = vadd.f32 %v29205_v49, %v15983_v36 }
 0x9d7   : > { %v22852_v52 = vpop.f32.mrb[46].mxu1  ;;  %22997 = vmatprep.mubr.msk.f32.mxu1 %vm504_vm2, %v23104_v56 }
 0x9d8   : > { %v15993_v27 = vpop.f32.mrb[47].mxu1  ;;  %22998 = vmatmul.mubr.msk.f32.gmra.mrb[76].mxu1 %vm504_vm2, %v23103_v57  ;;  %v23105_v8 = vadd.f32 %v22852_v52, %v29205_v49 }
 0x9d9   : > { %v23106_v28 = vadd.f32 %v29205_v49, %v15993_v27 }
 0x9db   : > { %v22855_v10 = vpop.f32.mrb[48].mxu1  ;;  %23000 = vmatprep.mubr.msk.f32.mxu1 %vm504_vm2, %v23106_v28 }
 0x9dc   : > { %v16003_v23 = vpop.f32.mrb[49].mxu1  ;;  %23001 = vmatmul.mubr.msk.f32.gmra.mrb[78].mxu1 %vm504_vm2, %v23105_v8  ;;  %v23107_v35 = vadd.f32 %v22855_v10, %v29205_v49 }
 0x9dd   : > { %v23108_v37 = vadd.f32 %v29205_v49, %v16003_v23 }
 0x9df   : > { %v22858_v16 = vpop.f32.mrb[50].mxu1  ;;  %23003 = vmatprep.mubr.msk.f32.mxu1 %vm504_vm2, %v23108_v37 }
 0x9e0   : > { %v16013_v4 = vpop.f32.mrb[51].mxu1  ;;  %23004 = vmatmul.mubr.msk.f32.gmra.mrb[80].mxu1 %vm504_vm2, %v23107_v35  ;;  %v23109_v33 = vadd.f32 %v22858_v16, %v29205_v49 }
 0x9e1   : > { %v23110_v43 = vadd.f32 %v29205_v49, %v16013_v4 }
 0x9e3   : > { %v22861_v44 = vpop.f32.mrb[52].mxu1  ;;  %23006 = vmatprep.mubr.msk.f32.mxu1 %vm504_vm2, %v23110_v43 }
 0x9e4   : > { %v16023_v42 = vpop.f32.mrb[53].mxu1  ;;  %23007 = vmatmul.mubr.msk.f32.gmra.mrb[82].mxu1 %vm504_vm2, %v23109_v33  ;;  %v23111_v25 = vadd.f32 %v22861_v44, %v29205_v49 }
 0x9e5   : > { %v23112_v61 = vadd.f32 %v29205_v49, %v16023_v42 }
 0x9e7   : > { %v22864_v19 = vpop.f32.mrb[54].mxu1  ;;  %23009 = vmatprep.mubr.msk.f32.mxu1 %vm504_vm2, %v23112_v61 }
 0x9e8   : > { %v16033_v39 = vpop.f32.mrb[55].mxu1  ;;  %23010 = vmatmul.mubr.msk.f32.gmra.mrb[84].mxu1 %vm504_vm2, %v23111_v25  ;;  %v23113_v38 = vadd.f32 %v22864_v19, %v29205_v49 }
 0x9e9   : > { %v23114_v0 = vadd.f32 %v29205_v49, %v16033_v39 }
 0x9eb   : > { %v22867_v6 = vpop.f32.mrb[56].mxu1  ;;  %23012 = vmatprep.mubr.msk.f32.mxu1 %vm504_vm2, %v23114_v0 }
 0x9ec   : > { %v16043_v40 = vpop.f32.mrb[57].mxu1  ;;  %23013 = vmatmul.mubr.msk.f32.gmra.mrb[86].mxu1 %vm504_vm2, %v23113_v38  ;;  %v23115_v15 = vadd.f32 %v22867_v6, %v29205_v49 }
 0x9ed   : > { %v23116_v2 = vadd.f32 %v29205_v49, %v16043_v40 }
 0x9ef   : > { %v22870_v55 = vpop.f32.mrb[58].mxu1  ;;  %23015 = vmatprep.mubr.msk.f32.mxu1 %vm504_vm2, %v23116_v2 }
 0x9f0   : > { %v16053_v3 = vpop.f32.mrb[59].mxu1  ;;  %23016 = vmatmul.mubr.msk.f32.gmra.mrb[88].mxu1 %vm504_vm2, %v23115_v15  ;;  %v23117_v9 = vadd.f32 %v22870_v55, %v29205_v49 }
 0x9f1   : > { %v23118_v62 = vadd.f32 %v29205_v49, %v16053_v3 }
 0x9f3   : > { %v22873_v26 = vpop.f32.mrb[60].mxu1  ;;  %23018 = vmatprep.mubr.msk.f32.mxu1 %vm504_vm2, %v23118_v62 }
 0x9f4   : > { %v16063_v41 = vpop.f32.mrb[61].mxu1  ;;  %23019 = vmatmul.mubr.msk.f32.gmra.mrb[90].mxu1 %vm504_vm2, %v23117_v9  ;;  %v23119_v53 = vadd.f32 %v22873_v26, %v29205_v49 }
 0x9f5   : > { %v23120_v46 = vadd.f32 %v29205_v49, %v16063_v41 }
 0x9f7   : > { %v22876_v32 = vpop.f32.mrb[62].mxu1  ;;  %23021 = vmatprep.mubr.msk.f32.mxu1 %vm504_vm2, %v23120_v46 }
 0x9f8   : > { %v16073_v60 = vpop.f32.mrb[63].mxu1  ;;  %23022 = vmatmul.mubr.msk.f32.gmra.mrb[92].mxu1 %vm504_vm2, %v23119_v53  ;;  %v23121_v1 = vadd.f32 %v22876_v32, %v29205_v49 }
 0x9f9   : > { %v23122_v21 = vadd.f32 %v29205_v49, %v16073_v60 }
 0x9fb   : > { %23024 = vmatprep.mubr.msk.f32.mxu1 %vm504_vm2, %v23122_v21 }
 0x9fc   : > { %23025 = vmatmul.mubr.msk.f32.gmra.mrb[94].mxu1 %vm504_vm2, %v23121_v1 }
 0xa93   : > { %v22981_v59 = vpop.f32.mrb[64].mxu1 }
 0xa94   : > { %v17062_v63 = vpop.f32.mrb[65].mxu1  ;;  %v23123_v48 = vadd.f32 %v22981_v59, %v29274_v30 }
 0xa95   : > { %v23124_v18 = vadd.f32 %v29274_v30, %v17062_v63 }
 0xa97   : > { %17253 = vxpose.xlu0.b32.start [1/16] (narrow) %v23124_v18, 8  ;;  %v22984_v45 = vpop.f32.mrb[66].mxu1 }
 0xa98   : > { %v17072_v20 = vpop.f32.mrb[67].mxu1  ;;  %v23125_v17 = vadd.f32 %v22984_v45, %v29274_v30 }
 0xa99   : > { %v23126_v50 = vadd.f32 %v29274_v30, %v17072_v20 }
 0xa9b   : > { %17254 = vxpose.xlu0.b32.cont [2/16] (narrow) %v23123_v48, 8  ;;  %v22987_v49 = vpop.f32.mrb[68].mxu1 }
 0xa9c   : > { %v17082_v47 = vpop.f32.mrb[69].mxu1  ;;  %v23127_v13 = vadd.f32 %v22987_v49, %v29274_v30 }
 0xa9d   : > { %v23128_v11 = vadd.f32 %v29274_v30, %v17082_v47 }
 0xa9f   : > { %17255 = vxpose.xlu0.b32.cont [3/16] (narrow) %v23126_v50, 8  ;;  %v22990_v5 = vpop.f32.mrb[70].mxu1 }
 0xaa0   : > { %v17092_v22 = vpop.f32.mrb[71].mxu1  ;;  %v23129_v51 = vadd.f32 %v22990_v5, %v29274_v30 }
 0xaa1   : > { %v23130_v14 = vadd.f32 %v29274_v30, %v17092_v22 }
 0xaa3   : > { %17256 = vxpose.xlu0.b32.cont [4/16] (narrow) %v23125_v17, 8  ;;  %v22993_v54 = vpop.f32.mrb[72].mxu1 }
 0xaa4   : > { %v17102_v24 = vpop.f32.mrb[73].mxu1  ;;  %v23131_v8 = vadd.f32 %v22993_v54, %v29274_v30 }
 0xaa5   : > { %v23132_v57 = vadd.f32 %v29274_v30, %v17102_v24 }
 0xaa7   : > { %17257 = vxpose.xlu0.b32.cont [5/16] (narrow) %v23128_v11, 8  ;;  %v22996_v34 = vpop.f32.mrb[74].mxu1 }
 0xaa8   : > { %v17112_v29 = vpop.f32.mrb[75].mxu1  ;;  %v23133_v33 = vadd.f32 %v22996_v34, %v29274_v30 }
 0xaa9   : > { %v23134_v35 = vadd.f32 %v29274_v30, %v17112_v29 }
 0xaab   : > { %17258 = vxpose.xlu0.b32.cont [6/16] (narrow) %v23127_v13, 8  ;;  %v22999_v31 = vpop.f32.mrb[76].mxu1 }
 0xaac   : > { %v17122_v58 = vpop.f32.mrb[77].mxu1  ;;  %v23135_v2 = vadd.f32 %v22999_v31, %v29274_v30 }
 0xaad   : > { %v23136_v19 = vadd.f32 %v29274_v30, %v17122_v58 }
 0xaaf   : > { %17259 = vxpose.xlu0.b32.cont [7/16] (narrow) %v23130_v14, 8  ;;  %v23002_v12 = vpop.f32.mrb[78].mxu1 }
 0xab0   : > { %v17132_v7 = vpop.f32.mrb[79].mxu1  ;;  %v23137_v21 = vadd.f32 %v23002_v12, %v29274_v30 }
 0xab1   : > { %v23138_v26 = vadd.f32 %v29274_v30, %v17132_v7 }
 0xab3   : > { %17260 = vxpose.xlu0.b32.cont [8/16] (narrow) %v23129_v51, 8  ;;  %v23005_v36 = vpop.f32.mrb[80].mxu1 }
 0xab4   : > { %v17142_v56 = vpop.f32.mrb[81].mxu1  ;;  %v23139_v10 = vadd.f32 %v23005_v36, %v29274_v30 }
 0xab5   : > { %v23140_v52 = vadd.f32 %v29274_v30, %v17142_v56 }
 0xab7   : > { %17261 = vxpose.xlu0.b32.cont [9/16] (narrow) %v23132_v57, 8  ;;  %17285 = vxpose.xlu1.b32.start [1/16] (narrow) %v23140_v52, 8  ;;  %v23008_v27 = vpop.f32.mrb[82].mxu1 }
 0xab8   : > { %v17152_v28 = vpop.f32.mrb[83].mxu1  ;;  %v23141_v44 = vadd.f32 %v23008_v27, %v29274_v30 }
 0xab9   : > { %v23142_v16 = vadd.f32 %v29274_v30, %v17152_v28 }
 0xabb   : > { %17262 = vxpose.xlu0.b32.cont [10/16] (narrow) %v23131_v8, 8  ;;  %17286 = vxpose.xlu1.b32.cont [2/16] (narrow) %v23139_v10, 8  ;;  %v23011_v23 = vpop.f32.mrb[84].mxu1 }
 0xabc   : > { %v17162_v37 = vpop.f32.mrb[85].mxu1  ;;  %v23143_v15 = vadd.f32 %v23011_v23, %v29274_v30 }
 0xabd   : > { %v23144_v39 = vadd.f32 %v29274_v30, %v17162_v37 }
 0xabf   : > { %17263 = vxpose.xlu0.b32.cont [11/16] (narrow) %v23134_v35, 8  ;;  %17287 = vxpose.xlu1.b32.cont [3/16] (narrow) %v23142_v16, 8  ;;  %v23014_v4 = vpop.f32.mrb[86].mxu1 }
 0xac0   : > { %v17172_v43 = vpop.f32.mrb[87].mxu1  ;;  %v23145_v1 = vadd.f32 %v23014_v4, %v29274_v30 }
 0xac1   : > { %v23146_v41 = vadd.f32 %v29274_v30, %v17172_v43 }
 0xac3   : > { %17264 = vxpose.xlu0.b32.cont [12/16] (narrow) %v23133_v33, 8  ;;  %17288 = vxpose.xlu1.b32.cont [4/16] (narrow) %v23141_v44, 8  ;;  %v23017_v42 = vpop.f32.mrb[88].mxu1 }
 0xac4   : > { %v23147_v61 = vadd.f32 %v23017_v42, %v29274_v30  ;;  %v17182_v25 = vpop.f32.mrb[89].mxu1 }
 0xac5   : > { %v23148_v0 = vadd.f32 %v29274_v30, %v17182_v25 }
 0xac7   : > { %17265 = vxpose.xlu0.b32.cont [13/16] (narrow) %v23136_v19, 8  ;;  %17289 = vxpose.xlu1.b32.cont [5/16] (narrow) %v23144_v39, 8  ;;  %v23020_v38 = vpop.f32.mrb[90].mxu1 }
 0xac8   : > { %v23149_v6 = vadd.f32 %v23020_v38, %v29274_v30  ;;  %v17192_v40 = vpop.f32.mrb[91].mxu1 }
 0xac9   : > { %v23150_v55 = vadd.f32 %v29274_v30, %v17192_v40 }
 0xacb   : > { %17266 = vxpose.xlu0.b32.cont [14/16] (narrow) %v23135_v2, 8  ;;  %17290 = vxpose.xlu1.b32.cont [6/16] (narrow) %v23143_v15, 8  ;;  %v23023_v3 = vpop.f32.mrb[92].mxu1 }
 0xacc   : > { %v23151_v62 = vadd.f32 %v23023_v3, %v29274_v30  ;;  %v17202_v9 = vpop.f32.mrb[93].mxu1 }
 0xacd   : > { %v23152_v46 = vadd.f32 %v29274_v30, %v17202_v9 }
 0xacf   : > { %17267 = vxpose.xlu0.b32.cont [15/16] (narrow) %v23138_v26, 8  ;;  %17291 = vxpose.xlu1.b32.cont [7/16] (narrow) %v23146_v41, 8  ;;  %v23026_v53 = vpop.f32.mrb[94].mxu1 }
 0xad0   : > { %v23153_v32 = vadd.f32 %v23026_v53, %v29274_v30  ;;  %v17212_v60 = vpop.f32.mrb[95].mxu1 }
 0xad1   : > { %v23154_v59 = vadd.f32 %v29274_v30, %v17212_v60 }
 0xad3   : > { %17268 = vxpose.xlu0.b32.end [16/16] (narrow) %v23137_v21, 8  ;;  %17292 = vxpose.xlu1.b32.cont [8/16] (narrow) %v23145_v1, 8 }
 0xad7   : > { %17293 = vxpose.xlu1.b32.cont [9/16] (narrow) %v23148_v0, 8 }
 0xadb   : > { %17294 = vxpose.xlu1.b32.cont [10/16] (narrow) %v23147_v61, 8 }
 0xadf   : > { %17295 = vxpose.xlu1.b32.cont [11/16] (narrow) %v23150_v55, 8 }
 0xae3   : > { %17296 = vxpose.xlu1.b32.cont [12/16] (narrow) %v23149_v6, 8 }
 0xae7   : > { %17297 = vxpose.xlu1.b32.cont [13/16] (narrow) %v23152_v46, 8 }
 0xaeb   : > { %17298 = vxpose.xlu1.b32.cont [14/16] (narrow) %v23151_v62, 8 }
 0xaef   : > { %17299 = vxpose.xlu1.b32.cont [15/16] (narrow) %v23154_v59, 8 }
 0xaf3   : > { %17300 = vxpose.xlu1.b32.end [16/16] (narrow) %v23153_v32, 8 }
 0xb17   : > { %v17269_v63 = vpop.trf.xlu0 }
 0xb18   : > { %17317 = vst [vmem:[%s394_s13] sm:$0xff] %v17269_v63 }
 0xb37   : > { %v17301_v30 = vpop.trf.xlu1 }
 0xb38   : > { %17318 = vst [vmem:[%s394_s13 + $0x8] sm:$0xff] %v17301_v30 }
 0xb39   : > { %24701 = shalt.err (!%p24698_p3)
}
 0xb3a   : > { %s24702_s29 = scalar_lea.hbm %s29315_s25, 256  ;;  %s24706_s22 = scalar_lea.hbm %s29366_s11, 512 }
 0xb3b   : > { %p24703_p4 = scmp.ne.s32.totalorder %s29315_s25, %s24702_s29  ;;  %p24707_p9 = scmp.lt.u32.totalorder %s29315_s25, %s29366_s11 }
 0xb3c   : > { %p24708_p10 = scmp.lt.u32.totalorder %s24706_s22, %s24702_s29  ;;  %p24710_p12 = scmp.lt.u32.totalorder %s24702_s29, %s29315_s25 }
 0xb3d   : > { %p24704_p7 = pnand %p24703_p4, %p24852_p5 }
 0xb3e   : > { %p24709_p11 = por %p24708_p10, %p24707_p9 }
 0xb3f   : > { %p24705_p8 = pneg %p24704_p7 }
 0xb40   : > { %p24711_p13 = por %p24710_p12, %p24709_p11 }
 0xb42   : > { %p24712_p0 = pnand %p24711_p13, %p24705_p8 }
 0xb44   : > { %24715 = shalt.err (!%p24712_p0)
}
 0xb45   : > { %24563 = dma.vmem_to_hbm [thread:$0]  (%p24852_p5), %s29310_s14, 256, %s29315_s25, %s17320_s12  }
 0xb46 PF: > { %p24569_p1 = scmp.ge.s32.totalorder %s24750_s20, 2  ;;  %s17346_s0 = sand.u32 1, %s24738_s17  }
 0xb47   : > { %s17347_s24 = scalar_lea.sflag [#allocation5], %s17346_s0 }
 0xb48   : > { %p24566_p2 = pnand %p24569_p1, %p24856_p6 }
 0xb4a   : > { %24733 = dma.done.wait (!%p24566_p2), %s17347_s24, 256  }
 0xb4b   : > { %24735 = vsyncadd (!%p24566_p2), %s17347_s24, 4294967040  ;;  %p21_p3 = scmp.ge.s32.totalorder %s24839_s23, 4   ;;  %s29436_s17 = smov %s24742_s18 }
 0xb4c   : > { %s29437_s18 = smov %s24746_s19  ;;  %s29438_s19 = smov %s24850_s26 }
 0xb4d   : > { %s29439_s20 = smov %s24839_s23  ;;  %23 = sbr.rel (!%p21_p3) target bundleno = 5 (0x5), region = 157 }
 0xb54   :  { %17352 = vsyncpa [#allocation5], 1 }
 0xb55   :  { %17354 = vsyncpa [#allocation5 + $0x1], 1 }

</bundles_post_ra>
